<compile_context>
chip_gen: v6e
topology: v6e:2x2x1
jax: 0.10.0
libtpu: 0.0.40
codegen_flags: <defaults>
</compile_context>

<pallas_src>
import numpy as np
import jax
import jax.numpy as jnp
from jax import lax
from jax.experimental import pallas as pl
from jax.experimental.pallas import tpu as pltpu

# ---------------- geometry constants (small, self-consistent) ----------------
STANDARD_VOLUME_SIZE = 16      # volume is 16 x 16 x 16 voxels
STANDARD_DETECTOR_U = 8        # detector columns
STANDARD_DETECTOR_V = 8        # detector rows
STANDARD_ANGLE_NUM = 8         # projection angles over [0, 360)
STANDARD_SID = 500.0           # source-to-isocenter distance
STANDARD_SDD = 1000.0          # source-to-detector distance
LAMB = 1.0                     # StandardGeometry.self.lamb
PROJ_BLOCK = 256               # rows of A streamed per grid step (MXU-wide)
NUM_CORES = 2                  # leading "parallel" grid axis (v7x dual-TC)


# -------------- deterministic cone-beam system matrix (plain numpy) ----------
def build_system_matrix(n_vol, n_det_u, n_det_v, n_angles, sid, sdd,
                        n_samples=48):
    nx = ny = nz = n_vol
    thetas = np.linspace(0.0, 2.0 * np.pi, n_angles, endpoint=False)
    u = np.arange(n_det_u) - (n_det_u - 1) / 2.0
    v = np.arange(n_det_v) - (n_det_v - 1) / 2.0
    det_pixel = 2.0            # detector pixel pitch (magnified geometry)
    vox = 1.0                  # voxel pitch
    diag = np.sqrt(3.0) * n_vol * vox
    n_rays = n_det_v * n_det_u
    n_proj = n_angles * n_rays
    n_voxels = nx * ny * nz
    A = np.zeros((n_proj, n_voxels), dtype=np.float64)

    for ia, th in enumerate(thetas):
        src = np.array([sid * np.cos(th), sid * np.sin(th), 0.0])
        det_c = np.array([-(sdd - sid) * np.cos(th),
                          -(sdd - sid) * np.sin(th), 0.0])
        eu = np.array([-np.sin(th), np.cos(th), 0.0])
        ev = np.array([0.0, 0.0, 1.0])

        det = (det_c[None, None, :]
               + v[:, None, None] * det_pixel * ev[None, None, :]
               + u[None, :, None] * det_pixel * eu[None, None, :])  # (V,U,3)
        rays = det.reshape(-1, 3) - src[None, :]                    # (R,3)
        rays = rays / np.linalg.norm(rays, axis=1, keepdims=True)

        t = np.linspace(sid - diag / 2.0, sid + diag / 2.0, n_samples)
        step = t[1] - t[0]
        pts = src[None, None, :] + rays[:, None, :] * t[None, :, None]  # (R,S,3)

        gx = pts[..., 0] / vox + (nx - 1) / 2.0
        gy = pts[..., 1] / vox + (ny - 1) / 2.0
        gz = pts[..., 2] / vox + (nz - 1) / 2.0
        ix0 = np.floor(gx).astype(np.int64); fx = gx - ix0
        iy0 = np.floor(gy).astype(np.int64); fy = gy - iy0
        iz0 = np.floor(gz).astype(np.int64); fz = gz - iz0

        rows = ia * n_rays + np.repeat(np.arange(n_rays), n_samples)

        for dx in (0, 1):
            for dy in (0, 1):
                for dz in (0, 1):
                    ix = ix0 + dx; iy = iy0 + dy; iz = iz0 + dz
                    w = (np.where(dx, fx, 1.0 - fx)
                         * np.where(dy, fy, 1.0 - fy)
                         * np.where(dz, fz, 1.0 - fz)) * step
                    valid = ((ix >= 0) & (ix < nx) & (iy >= 0) & (iy < ny)
                             & (iz >= 0) & (iz < nz))
                    flat = (iz * ny + iy) * nx + ix
                    flat = np.where(valid, flat, 0)
                    w = np.where(valid, w, 0.0)
                    np.add.at(A, (rows, flat.reshape(-1)), w.reshape(-1))
    return A.astype(np.float32)


# ------------------------------- Pallas kernel --------------------------------
def standard_geometry_kernel(xt_ref, pt_ref, a_ref, out_ref):
    """Grid = (core c: parallel, block k: arbitrary reduction over A rows).

    xt_ref : (Nvox, B)          bf16  volume, transposed (forward-proj RHS)
    pt_ref : (PROJ_BLOCK, B)    f32   measured sinogram block, transposed
    a_ref  : (PROJ_BLOCK, Nvox) bf16  system-matrix row block
    out_ref: (B, Nvox)          f32   per-core partial A^T(Ax - p) accumulator
    """
    k = pl.program_id(1)

    @pl.when(k == 0)
    def _init():
        out_ref[...] = jnp.zeros_like(out_ref)

    a_bf = a_ref[...]                                          # (TP, Nvox) bf16
    # Forward projection of this block of rays: A_blk @ x^T -> (TP, B).
    # Both operands bf16, f32 accumulation on the MXU.
    sino_t = jnp.dot(a_bf, xt_ref[...],
                     preferred_element_type=jnp.float32)       # (TP, B) f32
    # Only the tiny (TP, B) residual is re-quantized to bf16; the 2 MiB A
    # block is never cast.
    resid_t = (sino_t - pt_ref[...]).astype(jnp.bfloat16)      # (TP, B) bf16
    # Back-projection: contract the ray axis (dim 0) of the residual against
    # dim 0 of A (transposed-LHS MXU feed; no XLU transpose, bf16 x bf16).
    back = lax.dot_general(
        resid_t, a_bf,
        dimension_numbers=(((0,), (0,)), ((), ())),
        preferred_element_type=jnp.float32)                    # (B, Nvox) f32
    out_ref[...] += back


@jax.jit
def standard_geometry(x, p, a_bf16):
    """x: (B,1,Z,Y,X) volume, p: (B,Angles,V,U) sinogram -> updated volume."""
    B = x.shape[0]
    n_vox = int(np.prod(x.shape[1:]))
    n_proj = int(np.prod(p.shape[1:]))
    assert a_bf16.shape == (n_proj, n_vox)
    assert n_proj % (NUM_CORES * PROJ_BLOCK) == 0
    k_per_core = n_proj // (NUM_CORES * PROJ_BLOCK)

    x_flat = x.reshape(B, n_vox).astype(jnp.float32)                 # (B, Nvox)
    x_t = jnp.transpose(x_flat.astype(jnp.bfloat16))                 # (Nvox, B)
    p_t = jnp.transpose(p.reshape(B, n_proj).astype(jnp.float32))    # (Nproj, B)

    bytes_accessed = (n_proj * n_vox * 2                 # A (bf16)
                      + NUM_CORES * n_vox * B * 2        # x^T per core
                      + n_proj * B * 4                   # p^T
                      + NUM_CORES * B * n_vox * 4)       # partial outputs

    partial = pl.pallas_call(
        standard_geometry_kernel,
        out_shape=jax.ShapeDtypeStruct((NUM_CORES, B, n_vox), jnp.float32),
        grid=(NUM_CORES, k_per_core),
        in_specs=[
            pl.BlockSpec((n_vox, B), lambda c, k: (0, 0)),               # x^T
            pl.BlockSpec((PROJ_BLOCK, B),
                         lambda c, k: (c * k_per_core + k, 0)),          # p^T
            pl.BlockSpec((PROJ_BLOCK, n_vox),
                         lambda c, k: (c * k_per_core + k, 0)),          # A
        ],
        out_specs=pl.BlockSpec((None, B, n_vox), lambda c, k: (c, 0, 0)),
        compiler_params=pltpu.CompilerParams(
            dimension_semantics=("parallel", "arbitrary"),
            vmem_limit_bytes=8 << 20),
        cost_estimate=pl.CostEstimate(
            flops=4 * B * n_proj * n_vox,
            transcendentals=0,
            bytes_accessed=bytes_accessed),
    )(x_t, p_t, a_bf16)

    back_total = partial.sum(axis=0)                    # (B, Nvox) f32
    out_flat = x_flat - LAMB * back_total
    return out_flat.reshape(x.shape)


# ----------------------------------- main --------------------------------------
if __name__ == "__main__":
    B = 8
    nv = STANDARD_VOLUME_SIZE
    nu, ndv, na = STANDARD_DETECTOR_U, STANDARD_DETECTOR_V, STANDARD_ANGLE_NUM

    A_np = build_system_matrix(nv, nu, ndv, na, STANDARD_SID, STANDARD_SDD)
    A_bf = jnp.asarray(A_np).astype(jnp.bfloat16)            # (Nproj, Nvox) bf16

    key = jax.random.PRNGKey(0)
    kx, kp = jax.random.split(key)
    x = jax.random.normal(kx, (B, 1, nv, nv, nv), dtype=jnp.float32)
    p = jax.random.normal(kp, (B, na, ndv, nu), dtype=jnp.float32)

    out = standard_geometry(x, p, A_bf)
    out = jax.block_until_ready(out)
    assert out.shape == x.shape and out.dtype == jnp.float32
    out_np = np.asarray(out, dtype=np.float64)

    def bf16_round(a32):
        return np.asarray(
            jnp.asarray(np.asarray(a32, dtype=np.float32)).astype(
                jnp.bfloat16).astype(jnp.float32), dtype=np.float64)

    # Matched reference: same bf16 quantization of A, x AND the residual as
    # the kernel, f64 accumulation (validates the Pallas implementation).
    x32 = np.asarray(x, dtype=np.float32).reshape(B, -1)
    p64 = np.asarray(p, dtype=np.float64).reshape(B, -1)
    x64 = x32.astype(np.float64)
    x_q = bf16_round(x32)
    A_q = np.asarray(A_bf.astype(jnp.float32), dtype=np.float64)
    resid_q = bf16_round(x_q @ A_q.T - p64)
    ref_matched = (x64 - LAMB * (resid_q @ A_q)).reshape(x.shape)
    np.testing.assert_allclose(out_np, ref_matched, rtol=1e-2, atol=1e-2)

    # Loose sanity check vs the unquantized operator (bf16 quantization bound).
    A64 = A_np.astype(np.float64)
    ref_exact = (x64 - LAMB * ((x64 @ A64.T - p64) @ A64)).reshape(x.shape)
    rel = np.linalg.norm(out_np - ref_exact) / np.linalg.norm(ref_exact)
    assert rel < 0.1, rel

    print("KERNEL_OK")
</pallas_src>

<mosaic_0001>
module attributes {stable_mosaic.version = 11 : i64} {
  func.func @standard_geometry_kernel(%arg0: i32, %arg1: i32, %arg2: memref<4096x8xbf16, #tpu.memory_space<vmem>>, %arg3: memref<256x8xf32, #tpu.memory_space<vmem>>, %arg4: memref<256x4096xbf16, #tpu.memory_space<vmem>>, %arg5: memref<1x8x4096xf32, #tpu.memory_space<vmem>>) attributes {dimension_semantics = [#tpu.dimension_semantics<parallel>, #tpu.dimension_semantics<arbitrary>], iteration_bounds = array<i64: 2, 1>, scalar_prefetch = 0 : i64, scratch_operands = 0 : i64, tpu.core_type = #tpu.core_type<tc>, window_params = [{pipeline_mode = #tpu.pipeline_mode<synchronous>, transform_indices = @transform_0, window_bounds = array<i64: 4096, 8>}, {transform_indices = @transform_1, window_bounds = array<i64: 256, 8>}, {transform_indices = @transform_2, window_bounds = array<i64: 256, 4096>}, {transform_indices = @transform_3, window_bounds = array<i64: 1, 8, 4096>}]} {
    %c0_i32 = arith.constant 0 : i32
    %0 = arith.cmpi eq, %arg1, %c0_i32 : i32
    %1 = arith.extui %0 : i1 to i32
    %c0_i32_0 = arith.constant 0 : i32
    %2 = arith.cmpi ne, %1, %c0_i32_0 : i32
    scf.if %2 {
      %cst_13 = arith.constant 0.000000e+00 : f32
      %16 = vector.broadcast %cst_13 : f32 to vector<8x4096xf32>
      %c0_14 = arith.constant 0 : index
      %c0_15 = arith.constant 0 : index
      %c0_16 = arith.constant 0 : index
      %17 = vector.load %arg5[%c0_14, %c0_15, %c0_16] : memref<1x8x4096xf32, #tpu.memory_space<vmem>>, vector<1x8x4096xf32>
      %18 = vector.shape_cast %17 : vector<1x8x4096xf32> to vector<8x4096xf32>
      %19 = vector.shape_cast %16 : vector<8x4096xf32> to vector<1x8x4096xf32>
      tpu.vector_store %arg5[%c0_14, %c0_15, %c0_16], %19 {strides = array<i32>} : memref<1x8x4096xf32, #tpu.memory_space<vmem>>, vector<1x8x4096xf32>,
    } else {
    }
    %c0 = arith.constant 0 : index
    %c0_1 = arith.constant 0 : index
    %3 = vector.load %arg4[%c0, %c0_1] : memref<256x4096xbf16, #tpu.memory_space<vmem>>, vector<256x4096xbf16>
    %c0_2 = arith.constant 0 : index
    %c0_3 = arith.constant 0 : index
    %4 = vector.load %arg2[%c0_2, %c0_3] : memref<4096x8xbf16, #tpu.memory_space<vmem>>, vector<4096x8xbf16>
    %cst = arith.constant dense<0.000000e+00> : vector<256x8xf32>
    %5 = tpu.matmul %3, %4, %cst {dimension_numbers = #tpu.dot_dimension_numbers<[1], [0], [0], [1], [0, 0, 1, 1], [], []>} : vector<256x4096xbf16>, vector<4096x8xbf16>, vector<256x8xf32> -> vector<256x8xf32>
    %c0_4 = arith.constant 0 : index
    %c0_5 = arith.constant 0 : index
    %6 = vector.load %arg3[%c0_4, %c0_5] : memref<256x8xf32, #tpu.memory_space<vmem>>, vector<256x8xf32>
    %7 = arith.subf %5, %6 : vector<256x8xf32>
    %8 = arith.truncf %7 : vector<256x8xf32> to vector<256x8xbf16>
    %cst_6 = arith.constant dense<0.000000e+00> : vector<8x4096xf32>
    %9 = tpu.matmul %8, %3, %cst_6 {dimension_numbers = #tpu.dot_dimension_numbers<[0], [0], [1], [1], [0, 1, 1, 1], [], []>} : vector<256x8xbf16>, vector<256x4096xbf16>, vector<8x4096xf32> -> vector<8x4096xf32>
    %c0_7 = arith.constant 0 : index
    %c0_8 = arith.constant 0 : index
    %c0_9 = arith.constant 0 : index
    %10 = vector.load %arg5[%c0_7, %c0_8, %c0_9] : memref<1x8x4096xf32, #tpu.memory_space<vmem>>, vector<1x8x4096xf32>
    %11 = vector.shape_cast %10 : vector<1x8x4096xf32> to vector<8x4096xf32>
    %12 = arith.addf %11, %9 : vector<8x4096xf32>
    %c0_10 = arith.constant 0 : index
    %c0_11 = arith.constant 0 : index
    %c0_12 = arith.constant 0 : index
    %13 = vector.load %arg5[%c0_10, %c0_11, %c0_12] : memref<1x8x4096xf32, #tpu.memory_space<vmem>>, vector<1x8x4096xf32>
    %14 = vector.shape_cast %13 : vector<1x8x4096xf32> to vector<8x4096xf32>
    %15 = vector.shape_cast %12 : vector<8x4096xf32> to vector<1x8x4096xf32>
    tpu.vector_store %arg5[%c0_10, %c0_11, %c0_12], %15 {strides = array<i32>} : memref<1x8x4096xf32, #tpu.memory_space<vmem>>, vector<1x8x4096xf32>,
    return
  }
  func.func @transform_0(%arg0: i32, %arg1: i32) -> (i32, i32) {
    %c0_i32 = arith.constant 0 : i32
    %c0_i32_0 = arith.constant 0 : i32
    %c0_i32_1 = arith.constant 0 : i32
    return %c0_i32, %c0_i32_0 : i32, i32
  }
  func.func @transform_1(%arg0: i32, %arg1: i32) -> (i32, i32) {
    %c1_i32 = arith.constant 1 : i32
    %0 = arith.muli %arg0, %c1_i32 : i32
    %1 = arith.addi %0, %arg1 : i32
    %c0_i32 = arith.constant 0 : i32
    %c0_i32_0 = arith.constant 0 : i32
    return %1, %c0_i32 : i32, i32
  }
  func.func @transform_2(%arg0: i32, %arg1: i32) -> (i32, i32) {
    %c1_i32 = arith.constant 1 : i32
    %0 = arith.muli %arg0, %c1_i32 : i32
    %1 = arith.addi %0, %arg1 : i32
    %c0_i32 = arith.constant 0 : i32
    %c0_i32_0 = arith.constant 0 : i32
    return %1, %c0_i32 : i32, i32
  }
  func.func @transform_3(%arg0: i32, %arg1: i32) -> (i32, i32, i32) {
    %c0_i32 = arith.constant 0 : i32
    %c0_i32_0 = arith.constant 0 : i32
    %c0_i32_1 = arith.constant 0 : i32
    return %arg0, %c0_i32, %c0_i32_0 : i32, i32, i32
  }
}

</mosaic_0001>

<bundles_post_ra>
// kernel: sub.0
= control target key start
LH: loop header
LB: loop body
LE: loop exit
PB: predicated region body
PF: predicated region fallthrough
CT: control target
= control target key end

     0   :  { %3 = vsyncpa [#allocation1], 0  ;;  %s3108_s7 = smov [#allocation0]   ;;  %s4665_s0 = inlined_call_operand.vmem [shape: f32[8,1,16,16,16], index: 0, kind: input, shape index: {}]   ;;  %s4666_s1 = inlined_call_operand.vmem [shape: f32[8,1,16,16,16], index: 1, kind: input, shape index: {}]   ;;  %s4667_s2 = inlined_call_operand.hbm [shape: f32[8,1,16,16,16], index: 2, kind: output, shape index: {}]  }
   0x1   :  { %v4_v0 = vld [vmem:[%s4665_s0] sm:$0xff]  ;;  %v2587_v23 = vld [vmem:[%s4665_s0 + $0x10] sm:$0xff]  ;;  %s2564_s8 = sshll.u32 %s3108_s7, 4  ;;  %s2565_s8 = int_to_ptr.vmem [resolvable:$true] %s2564_s8 }
   0x2   :  { %v5_v1 = vld [vmem:[%s4666_s1] sm:$0xff]  ;;  %v2588_v25 = vld [vmem:[%s4666_s1 + $0x10] sm:$0xff]  ;;  %p3091_p1 = scmp.lt.s32.totalorder %s2565_s8, %s2565_s8 }
   0x3   :  { %v8_v2 = vsub.f32 %v4_v0, %v5_v1  ;;  %v2573_v3 = vld [vmem:[%s4665_s0 + $0x100] sm:$0xff]  ;;  %v2589_v26 = vld [vmem:[%s4665_s0 + $0x110] sm:$0xff]  ;;  %v87_v28 = vsub.f32 %v2587_v23, %v2588_v25 }
   0x4   :  { %v2574_v4 = vld [vmem:[%s4666_s1 + $0x100] sm:$0xff]  ;;  %v2590_v27 = vld [vmem:[%s4666_s1 + $0x110] sm:$0xff] }
   0x5   :  { %v2575_v5 = vld [vmem:[%s4665_s0 + $0x200] sm:$0xff]  ;;  %v17_v6 = vsub.f32 %v2573_v3, %v2574_v4  ;;  %10 = vst [vmem:[#allocation0] sm:$0xff] %v8_v2  ;;  %v97_v29 = vsub.f32 %v2589_v26, %v2590_v27  ;;  %v2591_v30 = vld [vmem:[%s4665_s0 + $0x210] sm:$0xff]  ;;  %90 = vst [vmem:[#allocation0 + $0x10] sm:$0xff] %v87_v28 }
   0x6   :  { %v2576_v7 = vld [vmem:[%s4666_s1 + $0x200] sm:$0xff]  ;;  %v2592_v31 = vld [vmem:[%s4666_s1 + $0x210] sm:$0xff] }
   0x7   :  { %v2577_v8 = vld [vmem:[%s4665_s0 + $0x300] sm:$0xff]  ;;  %v27_v10 = vsub.f32 %v2575_v5, %v2576_v7  ;;  %20 = vst [vmem:[#allocation0 + $0x100] sm:$0xff] %v17_v6  ;;  %v2593_v32 = vld [vmem:[%s4665_s0 + $0x310] sm:$0xff]  ;;  %v107_v33 = vsub.f32 %v2591_v30, %v2592_v31  ;;  %100 = vst [vmem:[#allocation0 + $0x110] sm:$0xff] %v97_v29 }
   0x8   :  { %v2578_v9 = vld [vmem:[%s4666_s1 + $0x300] sm:$0xff]  ;;  %v2594_v34 = vld [vmem:[%s4666_s1 + $0x310] sm:$0xff] }
   0x9   :  { %v37_v11 = vsub.f32 %v2577_v8, %v2578_v9  ;;  %v2579_v12 = vld [vmem:[%s4665_s0 + $0x400] sm:$0xff]  ;;  %30 = vst [vmem:[#allocation0 + $0x200] sm:$0xff] %v27_v10  ;;  %v2595_v35 = vld [vmem:[%s4665_s0 + $0x410] sm:$0xff]  ;;  %v117_v37 = vsub.f32 %v2593_v32, %v2594_v34  ;;  %110 = vst [vmem:[#allocation0 + $0x210] sm:$0xff] %v107_v33 }
   0xa   :  { %v2580_v13 = vld [vmem:[%s4666_s1 + $0x400] sm:$0xff]  ;;  %v2596_v36 = vld [vmem:[%s4666_s1 + $0x410] sm:$0xff] }
   0xb   :  { %v2581_v14 = vld [vmem:[%s4665_s0 + $0x500] sm:$0xff]  ;;  %v47_v15 = vsub.f32 %v2579_v12, %v2580_v13  ;;  %40 = vst [vmem:[#allocation0 + $0x300] sm:$0xff] %v37_v11  ;;  %v127_v38 = vsub.f32 %v2595_v35, %v2596_v36  ;;  %v2597_v39 = vld [vmem:[%s4665_s0 + $0x510] sm:$0xff]  ;;  %120 = vst [vmem:[#allocation0 + $0x310] sm:$0xff] %v117_v37 }
   0xc   :  { %v2582_v16 = vld [vmem:[%s4666_s1 + $0x500] sm:$0xff]  ;;  %v2598_v40 = vld [vmem:[%s4666_s1 + $0x510] sm:$0xff] }
   0xd   :  { %v2583_v17 = vld [vmem:[%s4665_s0 + $0x600] sm:$0xff]  ;;  %v57_v19 = vsub.f32 %v2581_v14, %v2582_v16  ;;  %50 = vst [vmem:[#allocation0 + $0x400] sm:$0xff] %v47_v15  ;;  %v2599_v41 = vld [vmem:[%s4665_s0 + $0x610] sm:$0xff]  ;;  %v137_v42 = vsub.f32 %v2597_v39, %v2598_v40  ;;  %130 = vst [vmem:[#allocation0 + $0x410] sm:$0xff] %v127_v38 }
   0xe   :  { %v2584_v18 = vld [vmem:[%s4666_s1 + $0x600] sm:$0xff]  ;;  %v2600_v43 = vld [vmem:[%s4666_s1 + $0x610] sm:$0xff] }
   0xf   :  { %v67_v20 = vsub.f32 %v2583_v17, %v2584_v18  ;;  %v2585_v21 = vld [vmem:[%s4665_s0 + $0x700] sm:$0xff]  ;;  %60 = vst [vmem:[#allocation0 + $0x500] sm:$0xff] %v57_v19  ;;  %v2601_v44 = vld [vmem:[%s4665_s0 + $0x710] sm:$0xff]  ;;  %v147_v46 = vsub.f32 %v2599_v41, %v2600_v43  ;;  %140 = vst [vmem:[#allocation0 + $0x510] sm:$0xff] %v137_v42 }
  0x10   :  { %v2586_v22 = vld [vmem:[%s4666_s1 + $0x700] sm:$0xff]  ;;  %v2602_v45 = vld [vmem:[%s4666_s1 + $0x710] sm:$0xff] }
  0x11   :  { %v77_v24 = vsub.f32 %v2585_v21, %v2586_v22  ;;  %70 = vst [vmem:[#allocation0 + $0x600] sm:$0xff] %v67_v20  ;;  %v157_v47 = vsub.f32 %v2601_v44, %v2602_v45  ;;  %v2603_v48 = vld [vmem:[%s4665_s0 + $0x20] sm:$0xff]  ;;  %150 = vst [vmem:[#allocation0 + $0x610] sm:$0xff] %v147_v46  ;;  %v2619_v7 = vld [vmem:[%s4665_s0 + $0x30] sm:$0xff] }
  0x12   :  { %v2604_v49 = vld [vmem:[%s4666_s1 + $0x20] sm:$0xff]  ;;  %v2620_v8 = vld [vmem:[%s4666_s1 + $0x30] sm:$0xff] }
  0x13   :  { %80 = vst [vmem:[#allocation0 + $0x700] sm:$0xff] %v77_v24  ;;  %v2605_v50 = vld [vmem:[%s4665_s0 + $0x120] sm:$0xff]  ;;  %v167_v51 = vsub.f32 %v2603_v48, %v2604_v49  ;;  %160 = vst [vmem:[#allocation0 + $0x710] sm:$0xff] %v157_v47  ;;  %v247_v10 = vsub.f32 %v2619_v7, %v2620_v8  ;;  %v2621_v11 = vld [vmem:[%s4665_s0 + $0x130] sm:$0xff] }
  0x14   :  { %v2606_v52 = vld [vmem:[%s4666_s1 + $0x120] sm:$0xff]  ;;  %v2622_v12 = vld [vmem:[%s4666_s1 + $0x130] sm:$0xff] }
  0x15   :  { %v2607_v53 = vld [vmem:[%s4665_s0 + $0x220] sm:$0xff]  ;;  %v177_v55 = vsub.f32 %v2605_v50, %v2606_v52  ;;  %170 = vst [vmem:[#allocation0 + $0x20] sm:$0xff] %v167_v51  ;;  %v2623_v13 = vld [vmem:[%s4665_s0 + $0x230] sm:$0xff]  ;;  %v257_v14 = vsub.f32 %v2621_v11, %v2622_v12  ;;  %250 = vst [vmem:[#allocation0 + $0x30] sm:$0xff] %v247_v10 }
  0x16   :  { %v2608_v54 = vld [vmem:[%s4666_s1 + $0x220] sm:$0xff]  ;;  %v2624_v15 = vld [vmem:[%s4666_s1 + $0x230] sm:$0xff] }
  0x17   :  { %v187_v56 = vsub.f32 %v2607_v53, %v2608_v54  ;;  %v2609_v57 = vld [vmem:[%s4665_s0 + $0x320] sm:$0xff]  ;;  %180 = vst [vmem:[#allocation0 + $0x120] sm:$0xff] %v177_v55  ;;  %v2625_v16 = vld [vmem:[%s4665_s0 + $0x330] sm:$0xff]  ;;  %v267_v18 = vsub.f32 %v2623_v13, %v2624_v15  ;;  %260 = vst [vmem:[#allocation0 + $0x130] sm:$0xff] %v257_v14 }
  0x18   :  { %v2610_v58 = vld [vmem:[%s4666_s1 + $0x320] sm:$0xff]  ;;  %v2626_v17 = vld [vmem:[%s4666_s1 + $0x330] sm:$0xff] }
  0x19   :  { %v2611_v59 = vld [vmem:[%s4665_s0 + $0x420] sm:$0xff]  ;;  %v197_v60 = vsub.f32 %v2609_v57, %v2610_v58  ;;  %190 = vst [vmem:[#allocation0 + $0x220] sm:$0xff] %v187_v56  ;;  %v277_v19 = vsub.f32 %v2625_v16, %v2626_v17  ;;  %v2627_v20 = vld [vmem:[%s4665_s0 + $0x430] sm:$0xff]  ;;  %270 = vst [vmem:[#allocation0 + $0x230] sm:$0xff] %v267_v18 }
  0x1a   :  { %v2612_v61 = vld [vmem:[%s4666_s1 + $0x420] sm:$0xff]  ;;  %v2628_v21 = vld [vmem:[%s4666_s1 + $0x430] sm:$0xff] }
  0x1b   :  { %v2613_v62 = vld [vmem:[%s4665_s0 + $0x520] sm:$0xff]  ;;  %v207_v0 = vsub.f32 %v2611_v59, %v2612_v61  ;;  %200 = vst [vmem:[#allocation0 + $0x320] sm:$0xff] %v197_v60  ;;  %v2629_v22 = vld [vmem:[%s4665_s0 + $0x530] sm:$0xff]  ;;  %v287_v23 = vsub.f32 %v2627_v20, %v2628_v21  ;;  %280 = vst [vmem:[#allocation0 + $0x330] sm:$0xff] %v277_v19 }
  0x1c   :  { %v2614_v63 = vld [vmem:[%s4666_s1 + $0x520] sm:$0xff]  ;;  %v2630_v24 = vld [vmem:[%s4666_s1 + $0x530] sm:$0xff] }
  0x1d   :  { %v217_v1 = vsub.f32 %v2613_v62, %v2614_v63  ;;  %v2615_v2 = vld [vmem:[%s4665_s0 + $0x620] sm:$0xff]  ;;  %210 = vst [vmem:[#allocation0 + $0x420] sm:$0xff] %v207_v0  ;;  %v2631_v25 = vld [vmem:[%s4665_s0 + $0x630] sm:$0xff]  ;;  %v297_v27 = vsub.f32 %v2629_v22, %v2630_v24  ;;  %290 = vst [vmem:[#allocation0 + $0x430] sm:$0xff] %v287_v23 }
  0x1e   :  { %v2616_v3 = vld [vmem:[%s4666_s1 + $0x620] sm:$0xff]  ;;  %v2632_v26 = vld [vmem:[%s4666_s1 + $0x630] sm:$0xff] }
  0x1f   :  { %v2617_v4 = vld [vmem:[%s4665_s0 + $0x720] sm:$0xff]  ;;  %v227_v5 = vsub.f32 %v2615_v2, %v2616_v3  ;;  %220 = vst [vmem:[#allocation0 + $0x520] sm:$0xff] %v217_v1  ;;  %v307_v28 = vsub.f32 %v2631_v25, %v2632_v26  ;;  %v2633_v29 = vld [vmem:[%s4665_s0 + $0x730] sm:$0xff]  ;;  %300 = vst [vmem:[#allocation0 + $0x530] sm:$0xff] %v297_v27 }
  0x20   :  { %v2618_v6 = vld [vmem:[%s4666_s1 + $0x720] sm:$0xff]  ;;  %v2634_v30 = vld [vmem:[%s4666_s1 + $0x730] sm:$0xff] }
  0x21   :  { %v237_v9 = vsub.f32 %v2617_v4, %v2618_v6  ;;  %230 = vst [vmem:[#allocation0 + $0x620] sm:$0xff] %v227_v5  ;;  %v2635_v31 = vld [vmem:[%s4665_s0 + $0x40] sm:$0xff]  ;;  %v317_v32 = vsub.f32 %v2633_v29, %v2634_v30  ;;  %310 = vst [vmem:[#allocation0 + $0x630] sm:$0xff] %v307_v28  ;;  %v2651_v56 = vld [vmem:[%s4665_s0 + $0x50] sm:$0xff] }
  0x22   :  { %v2636_v33 = vld [vmem:[%s4666_s1 + $0x40] sm:$0xff]  ;;  %v2652_v57 = vld [vmem:[%s4666_s1 + $0x50] sm:$0xff] }
  0x23   :  { %240 = vst [vmem:[#allocation0 + $0x720] sm:$0xff] %v237_v9  ;;  %v2637_v34 = vld [vmem:[%s4665_s0 + $0x140] sm:$0xff]  ;;  %v327_v36 = vsub.f32 %v2635_v31, %v2636_v33  ;;  %320 = vst [vmem:[#allocation0 + $0x730] sm:$0xff] %v317_v32  ;;  %v2653_v58 = vld [vmem:[%s4665_s0 + $0x150] sm:$0xff]  ;;  %v407_v59 = vsub.f32 %v2651_v56, %v2652_v57 }
  0x24   :  { %v2638_v35 = vld [vmem:[%s4666_s1 + $0x140] sm:$0xff]  ;;  %v2654_v60 = vld [vmem:[%s4666_s1 + $0x150] sm:$0xff] }
  0x25   :  { %v337_v37 = vsub.f32 %v2637_v34, %v2638_v35  ;;  %v2639_v38 = vld [vmem:[%s4665_s0 + $0x240] sm:$0xff]  ;;  %330 = vst [vmem:[#allocation0 + $0x40] sm:$0xff] %v327_v36  ;;  %v2655_v61 = vld [vmem:[%s4665_s0 + $0x250] sm:$0xff]  ;;  %v417_v63 = vsub.f32 %v2653_v58, %v2654_v60  ;;  %410 = vst [vmem:[#allocation0 + $0x50] sm:$0xff] %v407_v59 }
  0x26   :  { %v2640_v39 = vld [vmem:[%s4666_s1 + $0x240] sm:$0xff]  ;;  %v2656_v62 = vld [vmem:[%s4666_s1 + $0x250] sm:$0xff] }
  0x27   :  { %v2641_v40 = vld [vmem:[%s4665_s0 + $0x340] sm:$0xff]  ;;  %v347_v41 = vsub.f32 %v2639_v38, %v2640_v39  ;;  %340 = vst [vmem:[#allocation0 + $0x140] sm:$0xff] %v337_v37  ;;  %v427_v0 = vsub.f32 %v2655_v61, %v2656_v62  ;;  %v2657_v1 = vld [vmem:[%s4665_s0 + $0x350] sm:$0xff]  ;;  %420 = vst [vmem:[#allocation0 + $0x150] sm:$0xff] %v417_v63 }
  0x28   :  { %v2642_v42 = vld [vmem:[%s4666_s1 + $0x340] sm:$0xff]  ;;  %v2658_v2 = vld [vmem:[%s4666_s1 + $0x350] sm:$0xff] }
  0x29   :  { %v2643_v43 = vld [vmem:[%s4665_s0 + $0x440] sm:$0xff]  ;;  %v357_v45 = vsub.f32 %v2641_v40, %v2642_v42  ;;  %350 = vst [vmem:[#allocation0 + $0x240] sm:$0xff] %v347_v41  ;;  %v2659_v3 = vld [vmem:[%s4665_s0 + $0x450] sm:$0xff]  ;;  %v437_v4 = vsub.f32 %v2657_v1, %v2658_v2  ;;  %430 = vst [vmem:[#allocation0 + $0x250] sm:$0xff] %v427_v0 }
  0x2a   :  { %v2644_v44 = vld [vmem:[%s4666_s1 + $0x440] sm:$0xff]  ;;  %v2660_v5 = vld [vmem:[%s4666_s1 + $0x450] sm:$0xff] }
  0x2b   :  { %v367_v46 = vsub.f32 %v2643_v43, %v2644_v44  ;;  %v2645_v47 = vld [vmem:[%s4665_s0 + $0x540] sm:$0xff]  ;;  %360 = vst [vmem:[#allocation0 + $0x340] sm:$0xff] %v357_v45  ;;  %v2661_v6 = vld [vmem:[%s4665_s0 + $0x550] sm:$0xff]  ;;  %v447_v8 = vsub.f32 %v2659_v3, %v2660_v5  ;;  %440 = vst [vmem:[#allocation0 + $0x350] sm:$0xff] %v437_v4 }
  0x2c   :  { %v2646_v48 = vld [vmem:[%s4666_s1 + $0x540] sm:$0xff]  ;;  %v2662_v7 = vld [vmem:[%s4666_s1 + $0x550] sm:$0xff] }
  0x2d   :  { %v2647_v49 = vld [vmem:[%s4665_s0 + $0x640] sm:$0xff]  ;;  %v377_v50 = vsub.f32 %v2645_v47, %v2646_v48  ;;  %370 = vst [vmem:[#allocation0 + $0x440] sm:$0xff] %v367_v46  ;;  %v457_v9 = vsub.f32 %v2661_v6, %v2662_v7  ;;  %v2663_v10 = vld [vmem:[%s4665_s0 + $0x650] sm:$0xff]  ;;  %450 = vst [vmem:[#allocation0 + $0x450] sm:$0xff] %v447_v8 }
  0x2e   :  { %v2648_v51 = vld [vmem:[%s4666_s1 + $0x640] sm:$0xff]  ;;  %v2664_v11 = vld [vmem:[%s4666_s1 + $0x650] sm:$0xff] }
  0x2f   :  { %v2649_v52 = vld [vmem:[%s4665_s0 + $0x740] sm:$0xff]  ;;  %v387_v54 = vsub.f32 %v2647_v49, %v2648_v51  ;;  %380 = vst [vmem:[#allocation0 + $0x540] sm:$0xff] %v377_v50  ;;  %v2665_v12 = vld [vmem:[%s4665_s0 + $0x750] sm:$0xff]  ;;  %v467_v13 = vsub.f32 %v2663_v10, %v2664_v11  ;;  %460 = vst [vmem:[#allocation0 + $0x550] sm:$0xff] %v457_v9 }
  0x30   :  { %v2650_v53 = vld [vmem:[%s4666_s1 + $0x740] sm:$0xff]  ;;  %v2666_v14 = vld [vmem:[%s4666_s1 + $0x750] sm:$0xff] }
  0x31   :  { %v397_v55 = vsub.f32 %v2649_v52, %v2650_v53  ;;  %390 = vst [vmem:[#allocation0 + $0x640] sm:$0xff] %v387_v54  ;;  %v2667_v15 = vld [vmem:[%s4665_s0 + $0x60] sm:$0xff]  ;;  %v477_v17 = vsub.f32 %v2665_v12, %v2666_v14  ;;  %470 = vst [vmem:[#allocation0 + $0x650] sm:$0xff] %v467_v13  ;;  %v2683_v39 = vld [vmem:[%s4665_s0 + $0x70] sm:$0xff] }
  0x32   :  { %v2668_v16 = vld [vmem:[%s4666_s1 + $0x60] sm:$0xff]  ;;  %v2684_v41 = vld [vmem:[%s4666_s1 + $0x70] sm:$0xff] }
  0x33   :  { %400 = vst [vmem:[#allocation0 + $0x740] sm:$0xff] %v397_v55  ;;  %v487_v18 = vsub.f32 %v2667_v15, %v2668_v16  ;;  %v2669_v19 = vld [vmem:[%s4665_s0 + $0x160] sm:$0xff]  ;;  %480 = vst [vmem:[#allocation0 + $0x750] sm:$0xff] %v477_v17  ;;  %v2685_v42 = vld [vmem:[%s4665_s0 + $0x170] sm:$0xff]  ;;  %v567_v44 = vsub.f32 %v2683_v39, %v2684_v41 }
  0x34   :  { %v2670_v20 = vld [vmem:[%s4666_s1 + $0x160] sm:$0xff]  ;;  %v2686_v43 = vld [vmem:[%s4666_s1 + $0x170] sm:$0xff] }
  0x35   :  { %v2671_v21 = vld [vmem:[%s4665_s0 + $0x260] sm:$0xff]  ;;  %v497_v22 = vsub.f32 %v2669_v19, %v2670_v20  ;;  %490 = vst [vmem:[#allocation0 + $0x60] sm:$0xff] %v487_v18  ;;  %v577_v45 = vsub.f32 %v2685_v42, %v2686_v43  ;;  %v2687_v46 = vld [vmem:[%s4665_s0 + $0x270] sm:$0xff]  ;;  %570 = vst [vmem:[#allocation0 + $0x70] sm:$0xff] %v567_v44 }
  0x36   :  { %v2672_v23 = vld [vmem:[%s4666_s1 + $0x260] sm:$0xff]  ;;  %v2688_v47 = vld [vmem:[%s4666_s1 + $0x270] sm:$0xff] }
  0x37   :  { %v2673_v24 = vld [vmem:[%s4665_s0 + $0x360] sm:$0xff]  ;;  %v507_v26 = vsub.f32 %v2671_v21, %v2672_v23  ;;  %500 = vst [vmem:[#allocation0 + $0x160] sm:$0xff] %v497_v22  ;;  %v2689_v48 = vld [vmem:[%s4665_s0 + $0x370] sm:$0xff]  ;;  %v587_v49 = vsub.f32 %v2687_v46, %v2688_v47  ;;  %580 = vst [vmem:[#allocation0 + $0x170] sm:$0xff] %v577_v45 }
  0x38   :  { %v2674_v25 = vld [vmem:[%s4666_s1 + $0x360] sm:$0xff]  ;;  %v2690_v50 = vld [vmem:[%s4666_s1 + $0x370] sm:$0xff] }
  0x39   :  { %v517_v27 = vsub.f32 %v2673_v24, %v2674_v25  ;;  %v2675_v28 = vld [vmem:[%s4665_s0 + $0x460] sm:$0xff]  ;;  %510 = vst [vmem:[#allocation0 + $0x260] sm:$0xff] %v507_v26  ;;  %v2691_v51 = vld [vmem:[%s4665_s0 + $0x470] sm:$0xff]  ;;  %v597_v53 = vsub.f32 %v2689_v48, %v2690_v50  ;;  %590 = vst [vmem:[#allocation0 + $0x270] sm:$0xff] %v587_v49 }
  0x3a   :  { %v2676_v29 = vld [vmem:[%s4666_s1 + $0x460] sm:$0xff]  ;;  %v2692_v52 = vld [vmem:[%s4666_s1 + $0x470] sm:$0xff] }
  0x3b   :  { %v2677_v30 = vld [vmem:[%s4665_s0 + $0x560] sm:$0xff]  ;;  %v527_v31 = vsub.f32 %v2675_v28, %v2676_v29  ;;  %520 = vst [vmem:[#allocation0 + $0x360] sm:$0xff] %v517_v27  ;;  %v607_v54 = vsub.f32 %v2691_v51, %v2692_v52  ;;  %v2693_v55 = vld [vmem:[%s4665_s0 + $0x570] sm:$0xff]  ;;  %600 = vst [vmem:[#allocation0 + $0x370] sm:$0xff] %v597_v53 }
  0x3c   :  { %v2678_v32 = vld [vmem:[%s4666_s1 + $0x560] sm:$0xff]  ;;  %v2694_v56 = vld [vmem:[%s4666_s1 + $0x570] sm:$0xff] }
  0x3d   :  { %v2679_v33 = vld [vmem:[%s4665_s0 + $0x660] sm:$0xff]  ;;  %v537_v35 = vsub.f32 %v2677_v30, %v2678_v32  ;;  %530 = vst [vmem:[#allocation0 + $0x460] sm:$0xff] %v527_v31  ;;  %v2695_v57 = vld [vmem:[%s4665_s0 + $0x670] sm:$0xff]  ;;  %v617_v58 = vsub.f32 %v2693_v55, %v2694_v56  ;;  %610 = vst [vmem:[#allocation0 + $0x470] sm:$0xff] %v607_v54 }
  0x3e   :  { %v2680_v34 = vld [vmem:[%s4666_s1 + $0x660] sm:$0xff]  ;;  %v2696_v59 = vld [vmem:[%s4666_s1 + $0x670] sm:$0xff] }
  0x3f   :  { %v547_v36 = vsub.f32 %v2679_v33, %v2680_v34  ;;  %v2681_v37 = vld [vmem:[%s4665_s0 + $0x760] sm:$0xff]  ;;  %540 = vst [vmem:[#allocation0 + $0x560] sm:$0xff] %v537_v35  ;;  %v2697_v60 = vld [vmem:[%s4665_s0 + $0x770] sm:$0xff]  ;;  %v627_v62 = vsub.f32 %v2695_v57, %v2696_v59  ;;  %620 = vst [vmem:[#allocation0 + $0x570] sm:$0xff] %v617_v58 }
  0x40   :  { %v2682_v38 = vld [vmem:[%s4666_s1 + $0x760] sm:$0xff]  ;;  %v2698_v61 = vld [vmem:[%s4666_s1 + $0x770] sm:$0xff] }
  0x41   :  { %v557_v40 = vsub.f32 %v2681_v37, %v2682_v38  ;;  %550 = vst [vmem:[#allocation0 + $0x660] sm:$0xff] %v547_v36  ;;  %v637_v63 = vsub.f32 %v2697_v60, %v2698_v61  ;;  %v2699_v0 = vld [vmem:[%s4665_s0 + $0x80] sm:$0xff]  ;;  %630 = vst [vmem:[#allocation0 + $0x670] sm:$0xff] %v627_v62  ;;  %v2715_v23 = vld [vmem:[%s4665_s0 + $0x90] sm:$0xff] }
  0x42   :  { %v2700_v1 = vld [vmem:[%s4666_s1 + $0x80] sm:$0xff]  ;;  %v2716_v24 = vld [vmem:[%s4666_s1 + $0x90] sm:$0xff] }
  0x43   :  { %560 = vst [vmem:[#allocation0 + $0x760] sm:$0xff] %v557_v40  ;;  %v2701_v2 = vld [vmem:[%s4665_s0 + $0x180] sm:$0xff]  ;;  %v647_v3 = vsub.f32 %v2699_v0, %v2700_v1  ;;  %640 = vst [vmem:[#allocation0 + $0x770] sm:$0xff] %v637_v63  ;;  %v727_v26 = vsub.f32 %v2715_v23, %v2716_v24  ;;  %v2717_v27 = vld [vmem:[%s4665_s0 + $0x190] sm:$0xff] }
  0x44   :  { %v2702_v4 = vld [vmem:[%s4666_s1 + $0x180] sm:$0xff]  ;;  %v2718_v28 = vld [vmem:[%s4666_s1 + $0x190] sm:$0xff] }
  0x45   :  { %v2703_v5 = vld [vmem:[%s4665_s0 + $0x280] sm:$0xff]  ;;  %v657_v7 = vsub.f32 %v2701_v2, %v2702_v4  ;;  %650 = vst [vmem:[#allocation0 + $0x80] sm:$0xff] %v647_v3  ;;  %v2719_v29 = vld [vmem:[%s4665_s0 + $0x290] sm:$0xff]  ;;  %v737_v30 = vsub.f32 %v2717_v27, %v2718_v28  ;;  %730 = vst [vmem:[#allocation0 + $0x90] sm:$0xff] %v727_v26 }
  0x46   :  { %v2704_v6 = vld [vmem:[%s4666_s1 + $0x280] sm:$0xff]  ;;  %v2720_v31 = vld [vmem:[%s4666_s1 + $0x290] sm:$0xff] }
  0x47   :  { %v667_v8 = vsub.f32 %v2703_v5, %v2704_v6  ;;  %v2705_v9 = vld [vmem:[%s4665_s0 + $0x380] sm:$0xff]  ;;  %660 = vst [vmem:[#allocation0 + $0x180] sm:$0xff] %v657_v7  ;;  %v2721_v32 = vld [vmem:[%s4665_s0 + $0x390] sm:$0xff]  ;;  %v747_v34 = vsub.f32 %v2719_v29, %v2720_v31  ;;  %740 = vst [vmem:[#allocation0 + $0x190] sm:$0xff] %v737_v30 }
  0x48   :  { %v2706_v10 = vld [vmem:[%s4666_s1 + $0x380] sm:$0xff]  ;;  %v2722_v33 = vld [vmem:[%s4666_s1 + $0x390] sm:$0xff] }
  0x49   :  { %v2707_v11 = vld [vmem:[%s4665_s0 + $0x480] sm:$0xff]  ;;  %v677_v12 = vsub.f32 %v2705_v9, %v2706_v10  ;;  %670 = vst [vmem:[#allocation0 + $0x280] sm:$0xff] %v667_v8  ;;  %v757_v35 = vsub.f32 %v2721_v32, %v2722_v33  ;;  %v2723_v36 = vld [vmem:[%s4665_s0 + $0x490] sm:$0xff]  ;;  %750 = vst [vmem:[#allocation0 + $0x290] sm:$0xff] %v747_v34 }
  0x4a   :  { %v2708_v13 = vld [vmem:[%s4666_s1 + $0x480] sm:$0xff]  ;;  %v2724_v37 = vld [vmem:[%s4666_s1 + $0x490] sm:$0xff] }
  0x4b   :  { %v2709_v14 = vld [vmem:[%s4665_s0 + $0x580] sm:$0xff]  ;;  %v687_v16 = vsub.f32 %v2707_v11, %v2708_v13  ;;  %680 = vst [vmem:[#allocation0 + $0x380] sm:$0xff] %v677_v12  ;;  %v2725_v38 = vld [vmem:[%s4665_s0 + $0x590] sm:$0xff]  ;;  %v767_v39 = vsub.f32 %v2723_v36, %v2724_v37  ;;  %760 = vst [vmem:[#allocation0 + $0x390] sm:$0xff] %v757_v35 }
  0x4c   :  { %v2710_v15 = vld [vmem:[%s4666_s1 + $0x580] sm:$0xff]  ;;  %v2726_v40 = vld [vmem:[%s4666_s1 + $0x590] sm:$0xff] }
  0x4d   :  { %v697_v17 = vsub.f32 %v2709_v14, %v2710_v15  ;;  %v2711_v18 = vld [vmem:[%s4665_s0 + $0x680] sm:$0xff]  ;;  %690 = vst [vmem:[#allocation0 + $0x480] sm:$0xff] %v687_v16  ;;  %v2727_v41 = vld [vmem:[%s4665_s0 + $0x690] sm:$0xff]  ;;  %v777_v43 = vsub.f32 %v2725_v38, %v2726_v40  ;;  %770 = vst [vmem:[#allocation0 + $0x490] sm:$0xff] %v767_v39 }
  0x4e   :  { %v2712_v19 = vld [vmem:[%s4666_s1 + $0x680] sm:$0xff]  ;;  %v2728_v42 = vld [vmem:[%s4666_s1 + $0x690] sm:$0xff] }
  0x4f   :  { %v2713_v20 = vld [vmem:[%s4665_s0 + $0x780] sm:$0xff]  ;;  %v707_v21 = vsub.f32 %v2711_v18, %v2712_v19  ;;  %700 = vst [vmem:[#allocation0 + $0x580] sm:$0xff] %v697_v17  ;;  %v787_v44 = vsub.f32 %v2727_v41, %v2728_v42  ;;  %v2729_v45 = vld [vmem:[%s4665_s0 + $0x790] sm:$0xff]  ;;  %780 = vst [vmem:[#allocation0 + $0x590] sm:$0xff] %v777_v43 }
  0x50   :  { %v2714_v22 = vld [vmem:[%s4666_s1 + $0x780] sm:$0xff]  ;;  %v2730_v46 = vld [vmem:[%s4666_s1 + $0x790] sm:$0xff] }
  0x51   :  { %v717_v25 = vsub.f32 %v2713_v20, %v2714_v22  ;;  %710 = vst [vmem:[#allocation0 + $0x680] sm:$0xff] %v707_v21  ;;  %v2731_v47 = vld [vmem:[%s4665_s0 + $0xa0] sm:$0xff]  ;;  %v797_v48 = vsub.f32 %v2729_v45, %v2730_v46  ;;  %790 = vst [vmem:[#allocation0 + $0x690] sm:$0xff] %v787_v44  ;;  %v2747_v8 = vld [vmem:[%s4665_s0 + $0xb0] sm:$0xff] }
  0x52   :  { %v2732_v49 = vld [vmem:[%s4666_s1 + $0xa0] sm:$0xff]  ;;  %v2748_v9 = vld [vmem:[%s4666_s1 + $0xb0] sm:$0xff] }
  0x53   :  { %720 = vst [vmem:[#allocation0 + $0x780] sm:$0xff] %v717_v25  ;;  %v2733_v50 = vld [vmem:[%s4665_s0 + $0x1a0] sm:$0xff]  ;;  %v807_v52 = vsub.f32 %v2731_v47, %v2732_v49  ;;  %800 = vst [vmem:[#allocation0 + $0x790] sm:$0xff] %v797_v48  ;;  %v2749_v10 = vld [vmem:[%s4665_s0 + $0x1b0] sm:$0xff]  ;;  %v887_v11 = vsub.f32 %v2747_v8, %v2748_v9 }
  0x54   :  { %v2734_v51 = vld [vmem:[%s4666_s1 + $0x1a0] sm:$0xff]  ;;  %v2750_v12 = vld [vmem:[%s4666_s1 + $0x1b0] sm:$0xff] }
  0x55   :  { %v817_v53 = vsub.f32 %v2733_v50, %v2734_v51  ;;  %v2735_v54 = vld [vmem:[%s4665_s0 + $0x2a0] sm:$0xff]  ;;  %810 = vst [vmem:[#allocation0 + $0xa0] sm:$0xff] %v807_v52  ;;  %v2751_v13 = vld [vmem:[%s4665_s0 + $0x2b0] sm:$0xff]  ;;  %v897_v15 = vsub.f32 %v2749_v10, %v2750_v12  ;;  %890 = vst [vmem:[#allocation0 + $0xb0] sm:$0xff] %v887_v11 }
  0x56   :  { %v2736_v55 = vld [vmem:[%s4666_s1 + $0x2a0] sm:$0xff]  ;;  %v2752_v14 = vld [vmem:[%s4666_s1 + $0x2b0] sm:$0xff] }
  0x57   :  { %v2737_v56 = vld [vmem:[%s4665_s0 + $0x3a0] sm:$0xff]  ;;  %v827_v57 = vsub.f32 %v2735_v54, %v2736_v55  ;;  %820 = vst [vmem:[#allocation0 + $0x1a0] sm:$0xff] %v817_v53  ;;  %v907_v16 = vsub.f32 %v2751_v13, %v2752_v14  ;;  %v2753_v17 = vld [vmem:[%s4665_s0 + $0x3b0] sm:$0xff]  ;;  %900 = vst [vmem:[#allocation0 + $0x1b0] sm:$0xff] %v897_v15 }
  0x58   :  { %v2738_v58 = vld [vmem:[%s4666_s1 + $0x3a0] sm:$0xff]  ;;  %v2754_v18 = vld [vmem:[%s4666_s1 + $0x3b0] sm:$0xff] }
  0x59   :  { %v2739_v59 = vld [vmem:[%s4665_s0 + $0x4a0] sm:$0xff]  ;;  %v837_v61 = vsub.f32 %v2737_v56, %v2738_v58  ;;  %830 = vst [vmem:[#allocation0 + $0x2a0] sm:$0xff] %v827_v57  ;;  %v2755_v19 = vld [vmem:[%s4665_s0 + $0x4b0] sm:$0xff]  ;;  %v917_v20 = vsub.f32 %v2753_v17, %v2754_v18  ;;  %910 = vst [vmem:[#allocation0 + $0x2b0] sm:$0xff] %v907_v16 }
  0x5a   :  { %v2740_v60 = vld [vmem:[%s4666_s1 + $0x4a0] sm:$0xff]  ;;  %v2756_v21 = vld [vmem:[%s4666_s1 + $0x4b0] sm:$0xff] }
  0x5b   :  { %v847_v62 = vsub.f32 %v2739_v59, %v2740_v60  ;;  %v2741_v63 = vld [vmem:[%s4665_s0 + $0x5a0] sm:$0xff]  ;;  %840 = vst [vmem:[#allocation0 + $0x3a0] sm:$0xff] %v837_v61  ;;  %v2757_v22 = vld [vmem:[%s4665_s0 + $0x5b0] sm:$0xff]  ;;  %v927_v24 = vsub.f32 %v2755_v19, %v2756_v21  ;;  %920 = vst [vmem:[#allocation0 + $0x3b0] sm:$0xff] %v917_v20 }
  0x5c   :  { %v2742_v0 = vld [vmem:[%s4666_s1 + $0x5a0] sm:$0xff]  ;;  %v2758_v23 = vld [vmem:[%s4666_s1 + $0x5b0] sm:$0xff] }
  0x5d   :  { %v2743_v1 = vld [vmem:[%s4665_s0 + $0x6a0] sm:$0xff]  ;;  %v857_v2 = vsub.f32 %v2741_v63, %v2742_v0  ;;  %850 = vst [vmem:[#allocation0 + $0x4a0] sm:$0xff] %v847_v62  ;;  %v937_v25 = vsub.f32 %v2757_v22, %v2758_v23  ;;  %v2759_v26 = vld [vmem:[%s4665_s0 + $0x6b0] sm:$0xff]  ;;  %930 = vst [vmem:[#allocation0 + $0x4b0] sm:$0xff] %v927_v24 }
  0x5e   :  { %v2744_v3 = vld [vmem:[%s4666_s1 + $0x6a0] sm:$0xff]  ;;  %v2760_v27 = vld [vmem:[%s4666_s1 + $0x6b0] sm:$0xff] }
  0x5f   :  { %v2745_v4 = vld [vmem:[%s4665_s0 + $0x7a0] sm:$0xff]  ;;  %v867_v6 = vsub.f32 %v2743_v1, %v2744_v3  ;;  %860 = vst [vmem:[#allocation0 + $0x5a0] sm:$0xff] %v857_v2  ;;  %v2761_v28 = vld [vmem:[%s4665_s0 + $0x7b0] sm:$0xff]  ;;  %v947_v29 = vsub.f32 %v2759_v26, %v2760_v27  ;;  %940 = vst [vmem:[#allocation0 + $0x5b0] sm:$0xff] %v937_v25 }
  0x60   :  { %v2746_v5 = vld [vmem:[%s4666_s1 + $0x7a0] sm:$0xff]  ;;  %v2762_v30 = vld [vmem:[%s4666_s1 + $0x7b0] sm:$0xff] }
  0x61   :  { %v877_v7 = vsub.f32 %v2745_v4, %v2746_v5  ;;  %870 = vst [vmem:[#allocation0 + $0x6a0] sm:$0xff] %v867_v6  ;;  %v2763_v31 = vld [vmem:[%s4665_s0 + $0xc0] sm:$0xff]  ;;  %v957_v33 = vsub.f32 %v2761_v28, %v2762_v30  ;;  %950 = vst [vmem:[#allocation0 + $0x6b0] sm:$0xff] %v947_v29  ;;  %v2779_v55 = vld [vmem:[%s4665_s0 + $0xd0] sm:$0xff] }
  0x62   :  { %v2764_v32 = vld [vmem:[%s4666_s1 + $0xc0] sm:$0xff]  ;;  %v2780_v57 = vld [vmem:[%s4666_s1 + $0xd0] sm:$0xff] }
  0x63   :  { %880 = vst [vmem:[#allocation0 + $0x7a0] sm:$0xff] %v877_v7  ;;  %v967_v34 = vsub.f32 %v2763_v31, %v2764_v32  ;;  %v2765_v35 = vld [vmem:[%s4665_s0 + $0x1c0] sm:$0xff]  ;;  %960 = vst [vmem:[#allocation0 + $0x7b0] sm:$0xff] %v957_v33  ;;  %v2781_v58 = vld [vmem:[%s4665_s0 + $0x1d0] sm:$0xff]  ;;  %v1047_v60 = vsub.f32 %v2779_v55, %v2780_v57 }
  0x64   :  { %v2766_v36 = vld [vmem:[%s4666_s1 + $0x1c0] sm:$0xff]  ;;  %v2782_v59 = vld [vmem:[%s4666_s1 + $0x1d0] sm:$0xff] }
  0x65   :  { %v2767_v37 = vld [vmem:[%s4665_s0 + $0x2c0] sm:$0xff]  ;;  %v977_v38 = vsub.f32 %v2765_v35, %v2766_v36  ;;  %970 = vst [vmem:[#allocation0 + $0xc0] sm:$0xff] %v967_v34  ;;  %v1057_v61 = vsub.f32 %v2781_v58, %v2782_v59  ;;  %v2783_v62 = vld [vmem:[%s4665_s0 + $0x2d0] sm:$0xff]  ;;  %1050 = vst [vmem:[#allocation0 + $0xd0] sm:$0xff] %v1047_v60 }
  0x66   :  { %v2768_v39 = vld [vmem:[%s4666_s1 + $0x2c0] sm:$0xff]  ;;  %v2784_v63 = vld [vmem:[%s4666_s1 + $0x2d0] sm:$0xff] }
  0x67   :  { %v2769_v40 = vld [vmem:[%s4665_s0 + $0x3c0] sm:$0xff]  ;;  %v987_v42 = vsub.f32 %v2767_v37, %v2768_v39  ;;  %980 = vst [vmem:[#allocation0 + $0x1c0] sm:$0xff] %v977_v38  ;;  %v2785_v0 = vld [vmem:[%s4665_s0 + $0x3d0] sm:$0xff]  ;;  %v1067_v1 = vsub.f32 %v2783_v62, %v2784_v63  ;;  %1060 = vst [vmem:[#allocation0 + $0x1d0] sm:$0xff] %v1057_v61 }
  0x68   :  { %v2770_v41 = vld [vmem:[%s4666_s1 + $0x3c0] sm:$0xff]  ;;  %v2786_v2 = vld [vmem:[%s4666_s1 + $0x3d0] sm:$0xff]  ;;  %v2827_v63 = vld [vmem:[%s4665_s0 + $0x8] sm:$0xff] }
  0x69   :  { %v997_v43 = vsub.f32 %v2769_v40, %v2770_v41  ;;  %v2771_v44 = vld [vmem:[%s4665_s0 + $0x4c0] sm:$0xff]  ;;  %990 = vst [vmem:[#allocation0 + $0x2c0] sm:$0xff] %v987_v42  ;;  %v2787_v3 = vld [vmem:[%s4665_s0 + $0x4d0] sm:$0xff]  ;;  %v1077_v5 = vsub.f32 %v2785_v0, %v2786_v2  ;;  %1070 = vst [vmem:[#allocation0 + $0x2d0] sm:$0xff] %v1067_v1 }
  0x6a   :  { %v2772_v45 = vld [vmem:[%s4666_s1 + $0x4c0] sm:$0xff]  ;;  %v2788_v4 = vld [vmem:[%s4666_s1 + $0x4d0] sm:$0xff]  ;;  %v2828_v1 = vld [vmem:[%s4666_s1 + $0x8] sm:$0xff] }
  0x6b   :  { %v2773_v46 = vld [vmem:[%s4665_s0 + $0x5c0] sm:$0xff]  ;;  %v1007_v47 = vsub.f32 %v2771_v44, %v2772_v45  ;;  %1000 = vst [vmem:[#allocation0 + $0x3c0] sm:$0xff] %v997_v43  ;;  %v1087_v6 = vsub.f32 %v2787_v3, %v2788_v4  ;;  %v2789_v7 = vld [vmem:[%s4665_s0 + $0x5d0] sm:$0xff]  ;;  %1080 = vst [vmem:[#allocation0 + $0x3d0] sm:$0xff] %v1077_v5  ;;  %v1287_v4 = vsub.f32 %v2827_v63, %v2828_v1 }
  0x6c   :  { %v2774_v48 = vld [vmem:[%s4666_s1 + $0x5c0] sm:$0xff]  ;;  %v2790_v8 = vld [vmem:[%s4666_s1 + $0x5d0] sm:$0xff]  ;;  %v2829_v2 = vld [vmem:[%s4665_s0 + $0x108] sm:$0xff] }
  0x6d   :  { %v2775_v49 = vld [vmem:[%s4665_s0 + $0x6c0] sm:$0xff]  ;;  %v1017_v51 = vsub.f32 %v2773_v46, %v2774_v48  ;;  %1010 = vst [vmem:[#allocation0 + $0x4c0] sm:$0xff] %v1007_v47  ;;  %v2791_v9 = vld [vmem:[%s4665_s0 + $0x6d0] sm:$0xff]  ;;  %v1097_v10 = vsub.f32 %v2789_v7, %v2790_v8  ;;  %1090 = vst [vmem:[#allocation0 + $0x4d0] sm:$0xff] %v1087_v6 }
  0x6e   :  { %v2776_v50 = vld [vmem:[%s4666_s1 + $0x6c0] sm:$0xff]  ;;  %v2792_v11 = vld [vmem:[%s4666_s1 + $0x6d0] sm:$0xff]  ;;  %v2830_v3 = vld [vmem:[%s4666_s1 + $0x108] sm:$0xff]  ;;  %1290 = vst [vmem:[#allocation0 + $0x8] sm:$0xff] %v1287_v4 }
  0x6f   :  { %v1027_v52 = vsub.f32 %v2775_v49, %v2776_v50  ;;  %v2777_v53 = vld [vmem:[%s4665_s0 + $0x7c0] sm:$0xff]  ;;  %1020 = vst [vmem:[#allocation0 + $0x5c0] sm:$0xff] %v1017_v51  ;;  %v2793_v12 = vld [vmem:[%s4665_s0 + $0x7d0] sm:$0xff]  ;;  %v1107_v14 = vsub.f32 %v2791_v9, %v2792_v11  ;;  %1100 = vst [vmem:[#allocation0 + $0x5d0] sm:$0xff] %v1097_v10  ;;  %v1297_v5 = vsub.f32 %v2829_v2, %v2830_v3 }
  0x70   :  { %v2778_v54 = vld [vmem:[%s4666_s1 + $0x7c0] sm:$0xff]  ;;  %v2794_v13 = vld [vmem:[%s4666_s1 + $0x7d0] sm:$0xff]  ;;  %v2831_v6 = vld [vmem:[%s4665_s0 + $0x208] sm:$0xff] }
  0x71   :  { %v1037_v56 = vsub.f32 %v2777_v53, %v2778_v54  ;;  %1030 = vst [vmem:[#allocation0 + $0x6c0] sm:$0xff] %v1027_v52  ;;  %v1117_v15 = vsub.f32 %v2793_v12, %v2794_v13  ;;  %v2795_v16 = vld [vmem:[%s4665_s0 + $0xe0] sm:$0xff]  ;;  %1110 = vst [vmem:[#allocation0 + $0x6d0] sm:$0xff] %v1107_v14  ;;  %v2811_v39 = vld [vmem:[%s4665_s0 + $0xf0] sm:$0xff] }
  0x72   :  { %v2796_v17 = vld [vmem:[%s4666_s1 + $0xe0] sm:$0xff]  ;;  %v2812_v40 = vld [vmem:[%s4666_s1 + $0xf0] sm:$0xff]  ;;  %v2832_v7 = vld [vmem:[%s4666_s1 + $0x208] sm:$0xff]  ;;  %1300 = vst [vmem:[#allocation0 + $0x108] sm:$0xff] %v1297_v5 }
  0x73   :  { %1040 = vst [vmem:[#allocation0 + $0x7c0] sm:$0xff] %v1037_v56  ;;  %v2797_v18 = vld [vmem:[%s4665_s0 + $0x1e0] sm:$0xff]  ;;  %v1127_v19 = vsub.f32 %v2795_v16, %v2796_v17  ;;  %1120 = vst [vmem:[#allocation0 + $0x7d0] sm:$0xff] %v1117_v15  ;;  %v1207_v42 = vsub.f32 %v2811_v39, %v2812_v40  ;;  %v2813_v43 = vld [vmem:[%s4665_s0 + $0x1f0] sm:$0xff]  ;;  %v1307_v9 = vsub.f32 %v2831_v6, %v2832_v7 }
  0x74   :  { %v2798_v20 = vld [vmem:[%s4666_s1 + $0x1e0] sm:$0xff]  ;;  %v2814_v44 = vld [vmem:[%s4666_s1 + $0x1f0] sm:$0xff]  ;;  %v2833_v8 = vld [vmem:[%s4665_s0 + $0x308] sm:$0xff] }
  0x75   :  { %v2799_v21 = vld [vmem:[%s4665_s0 + $0x2e0] sm:$0xff]  ;;  %v1137_v23 = vsub.f32 %v2797_v18, %v2798_v20  ;;  %1130 = vst [vmem:[#allocation0 + $0xe0] sm:$0xff] %v1127_v19  ;;  %v2815_v45 = vld [vmem:[%s4665_s0 + $0x2f0] sm:$0xff]  ;;  %v1217_v46 = vsub.f32 %v2813_v43, %v2814_v44  ;;  %1210 = vst [vmem:[#allocation0 + $0xf0] sm:$0xff] %v1207_v42 }
  0x76   :  { %v2800_v22 = vld [vmem:[%s4666_s1 + $0x2e0] sm:$0xff]  ;;  %v2816_v47 = vld [vmem:[%s4666_s1 + $0x2f0] sm:$0xff]  ;;  %v2834_v10 = vld [vmem:[%s4666_s1 + $0x308] sm:$0xff]  ;;  %1310 = vst [vmem:[#allocation0 + $0x208] sm:$0xff] %v1307_v9 }
  0x77   :  { %v1147_v24 = vsub.f32 %v2799_v21, %v2800_v22  ;;  %v2801_v25 = vld [vmem:[%s4665_s0 + $0x3e0] sm:$0xff]  ;;  %1140 = vst [vmem:[#allocation0 + $0x1e0] sm:$0xff] %v1137_v23  ;;  %v2817_v48 = vld [vmem:[%s4665_s0 + $0x3f0] sm:$0xff]  ;;  %v1227_v50 = vsub.f32 %v2815_v45, %v2816_v47  ;;  %1220 = vst [vmem:[#allocation0 + $0x1f0] sm:$0xff] %v1217_v46  ;;  %v1317_v13 = vsub.f32 %v2833_v8, %v2834_v10 }
  0x78   :  { %v2802_v26 = vld [vmem:[%s4666_s1 + $0x3e0] sm:$0xff]  ;;  %v2818_v49 = vld [vmem:[%s4666_s1 + $0x3f0] sm:$0xff]  ;;  %v2835_v11 = vld [vmem:[%s4665_s0 + $0x408] sm:$0xff] }
  0x79   :  { %v2803_v27 = vld [vmem:[%s4665_s0 + $0x4e0] sm:$0xff]  ;;  %v1157_v28 = vsub.f32 %v2801_v25, %v2802_v26  ;;  %1150 = vst [vmem:[#allocation0 + $0x2e0] sm:$0xff] %v1147_v24  ;;  %v1237_v51 = vsub.f32 %v2817_v48, %v2818_v49  ;;  %v2819_v52 = vld [vmem:[%s4665_s0 + $0x4f0] sm:$0xff]  ;;  %1230 = vst [vmem:[#allocation0 + $0x2f0] sm:$0xff] %v1227_v50 }
  0x7a   :  { %v2804_v29 = vld [vmem:[%s4666_s1 + $0x4e0] sm:$0xff]  ;;  %v2820_v53 = vld [vmem:[%s4666_s1 + $0x4f0] sm:$0xff]  ;;  %v2836_v12 = vld [vmem:[%s4666_s1 + $0x408] sm:$0xff]  ;;  %1320 = vst [vmem:[#allocation0 + $0x308] sm:$0xff] %v1317_v13 }
  0x7b   :  { %v2805_v30 = vld [vmem:[%s4665_s0 + $0x5e0] sm:$0xff]  ;;  %v1167_v32 = vsub.f32 %v2803_v27, %v2804_v29  ;;  %1160 = vst [vmem:[#allocation0 + $0x3e0] sm:$0xff] %v1157_v28  ;;  %v2821_v54 = vld [vmem:[%s4665_s0 + $0x5f0] sm:$0xff]  ;;  %v1247_v55 = vsub.f32 %v2819_v52, %v2820_v53  ;;  %1240 = vst [vmem:[#allocation0 + $0x3f0] sm:$0xff] %v1237_v51  ;;  %v1327_v14 = vsub.f32 %v2835_v11, %v2836_v12 }
  0x7c   :  { %v2806_v31 = vld [vmem:[%s4666_s1 + $0x5e0] sm:$0xff]  ;;  %v2822_v56 = vld [vmem:[%s4666_s1 + $0x5f0] sm:$0xff]  ;;  %v2837_v15 = vld [vmem:[%s4665_s0 + $0x508] sm:$0xff] }
  0x7d   :  { %v1177_v33 = vsub.f32 %v2805_v30, %v2806_v31  ;;  %v2807_v34 = vld [vmem:[%s4665_s0 + $0x6e0] sm:$0xff]  ;;  %1170 = vst [vmem:[#allocation0 + $0x4e0] sm:$0xff] %v1167_v32  ;;  %v2823_v57 = vld [vmem:[%s4665_s0 + $0x6f0] sm:$0xff]  ;;  %v1257_v59 = vsub.f32 %v2821_v54, %v2822_v56  ;;  %1250 = vst [vmem:[#allocation0 + $0x4f0] sm:$0xff] %v1247_v55 }
  0x7e   :  { %v2808_v35 = vld [vmem:[%s4666_s1 + $0x6e0] sm:$0xff]  ;;  %v2824_v58 = vld [vmem:[%s4666_s1 + $0x6f0] sm:$0xff]  ;;  %v2838_v16 = vld [vmem:[%s4666_s1 + $0x508] sm:$0xff]  ;;  %1330 = vst [vmem:[#allocation0 + $0x408] sm:$0xff] %v1327_v14 }
  0x7f   :  { %v2809_v36 = vld [vmem:[%s4665_s0 + $0x7e0] sm:$0xff]  ;;  %v1187_v37 = vsub.f32 %v2807_v34, %v2808_v35  ;;  %1180 = vst [vmem:[#allocation0 + $0x5e0] sm:$0xff] %v1177_v33  ;;  %v1267_v60 = vsub.f32 %v2823_v57, %v2824_v58  ;;  %v2825_v61 = vld [vmem:[%s4665_s0 + $0x7f0] sm:$0xff]  ;;  %1260 = vst [vmem:[#allocation0 + $0x5f0] sm:$0xff] %v1257_v59  ;;  %v1337_v18 = vsub.f32 %v2837_v15, %v2838_v16 }
  0x80   :  { %v2810_v38 = vld [vmem:[%s4666_s1 + $0x7e0] sm:$0xff]  ;;  %v2826_v62 = vld [vmem:[%s4666_s1 + $0x7f0] sm:$0xff]  ;;  %v2839_v17 = vld [vmem:[%s4665_s0 + $0x608] sm:$0xff] }
  0x81   :  { %v1197_v41 = vsub.f32 %v2809_v36, %v2810_v38  ;;  %1190 = vst [vmem:[#allocation0 + $0x6e0] sm:$0xff] %v1187_v37  ;;  %v1277_v0 = vsub.f32 %v2825_v61, %v2826_v62  ;;  %1270 = vst [vmem:[#allocation0 + $0x6f0] sm:$0xff] %v1267_v60  ;;  %v2840_v19 = vld [vmem:[%s4666_s1 + $0x608] sm:$0xff]  ;;  %v2843_v24 = vld [vmem:[%s4665_s0 + $0x18] sm:$0xff] }
  0x82   :  { %v2841_v20 = vld [vmem:[%s4665_s0 + $0x708] sm:$0xff]  ;;  %v1347_v22 = vsub.f32 %v2839_v17, %v2840_v19  ;;  %v2844_v25 = vld [vmem:[%s4666_s1 + $0x18] sm:$0xff]  ;;  %1340 = vst [vmem:[#allocation0 + $0x508] sm:$0xff] %v1337_v18 }
  0x83   :  { %1200 = vst [vmem:[#allocation0 + $0x7e0] sm:$0xff] %v1197_v41  ;;  %1280 = vst [vmem:[#allocation0 + $0x7f0] sm:$0xff] %v1277_v0  ;;  %v2842_v21 = vld [vmem:[%s4666_s1 + $0x708] sm:$0xff]  ;;  %v2845_v26 = vld [vmem:[%s4665_s0 + $0x118] sm:$0xff]  ;;  %v1367_v27 = vsub.f32 %v2843_v24, %v2844_v25 }
  0x84   :  { %v1357_v23 = vsub.f32 %v2841_v20, %v2842_v21  ;;  %v2846_v28 = vld [vmem:[%s4666_s1 + $0x118] sm:$0xff]  ;;  %1350 = vst [vmem:[#allocation0 + $0x608] sm:$0xff] %v1347_v22  ;;  %v2859_v47 = vld [vmem:[%s4665_s0 + $0x28] sm:$0xff] }
  0x85   :  { %v2847_v29 = vld [vmem:[%s4665_s0 + $0x218] sm:$0xff]  ;;  %v1377_v31 = vsub.f32 %v2845_v26, %v2846_v28  ;;  %1370 = vst [vmem:[#allocation0 + $0x18] sm:$0xff] %v1367_v27  ;;  %v2860_v48 = vld [vmem:[%s4666_s1 + $0x28] sm:$0xff] }
  0x86   :  { %v2848_v30 = vld [vmem:[%s4666_s1 + $0x218] sm:$0xff]  ;;  %1360 = vst [vmem:[#allocation0 + $0x708] sm:$0xff] %v1357_v23  ;;  %v1447_v50 = vsub.f32 %v2859_v47, %v2860_v48  ;;  %v2861_v51 = vld [vmem:[%s4665_s0 + $0x128] sm:$0xff] }
  0x87   :  { %v1387_v32 = vsub.f32 %v2847_v29, %v2848_v30  ;;  %v2849_v33 = vld [vmem:[%s4665_s0 + $0x318] sm:$0xff]  ;;  %1380 = vst [vmem:[#allocation0 + $0x118] sm:$0xff] %v1377_v31  ;;  %v2862_v52 = vld [vmem:[%s4666_s1 + $0x128] sm:$0xff] }
  0x88   :  { %v2850_v34 = vld [vmem:[%s4666_s1 + $0x318] sm:$0xff]  ;;  %v2863_v53 = vld [vmem:[%s4665_s0 + $0x228] sm:$0xff]  ;;  %v1457_v54 = vsub.f32 %v2861_v51, %v2862_v52  ;;  %1450 = vst [vmem:[#allocation0 + $0x28] sm:$0xff] %v1447_v50 }
  0x89   :  { %v2851_v35 = vld [vmem:[%s4665_s0 + $0x418] sm:$0xff]  ;;  %v1397_v36 = vsub.f32 %v2849_v33, %v2850_v34  ;;  %1390 = vst [vmem:[#allocation0 + $0x218] sm:$0xff] %v1387_v32  ;;  %v2864_v55 = vld [vmem:[%s4666_s1 + $0x228] sm:$0xff] }
  0x8a   :  { %v2852_v37 = vld [vmem:[%s4666_s1 + $0x418] sm:$0xff]  ;;  %v2865_v56 = vld [vmem:[%s4665_s0 + $0x328] sm:$0xff]  ;;  %v1467_v58 = vsub.f32 %v2863_v53, %v2864_v55  ;;  %1460 = vst [vmem:[#allocation0 + $0x128] sm:$0xff] %v1457_v54 }
  0x8b   :  { %v2853_v38 = vld [vmem:[%s4665_s0 + $0x518] sm:$0xff]  ;;  %v1407_v40 = vsub.f32 %v2851_v35, %v2852_v37  ;;  %1400 = vst [vmem:[#allocation0 + $0x318] sm:$0xff] %v1397_v36  ;;  %v2866_v57 = vld [vmem:[%s4666_s1 + $0x328] sm:$0xff] }
  0x8c   :  { %v2854_v39 = vld [vmem:[%s4666_s1 + $0x518] sm:$0xff]  ;;  %v1477_v59 = vsub.f32 %v2865_v56, %v2866_v57  ;;  %v2867_v60 = vld [vmem:[%s4665_s0 + $0x428] sm:$0xff]  ;;  %1470 = vst [vmem:[#allocation0 + $0x228] sm:$0xff] %v1467_v58 }
  0x8d   :  { %v1417_v41 = vsub.f32 %v2853_v38, %v2854_v39  ;;  %v2855_v42 = vld [vmem:[%s4665_s0 + $0x618] sm:$0xff]  ;;  %1410 = vst [vmem:[#allocation0 + $0x418] sm:$0xff] %v1407_v40  ;;  %v2868_v61 = vld [vmem:[%s4666_s1 + $0x428] sm:$0xff] }
  0x8e   :  { %v2856_v43 = vld [vmem:[%s4666_s1 + $0x618] sm:$0xff]  ;;  %v2869_v62 = vld [vmem:[%s4665_s0 + $0x528] sm:$0xff]  ;;  %v1487_v63 = vsub.f32 %v2867_v60, %v2868_v61  ;;  %1480 = vst [vmem:[#allocation0 + $0x328] sm:$0xff] %v1477_v59 }
  0x8f   :  { %v2857_v44 = vld [vmem:[%s4665_s0 + $0x718] sm:$0xff]  ;;  %v1427_v45 = vsub.f32 %v2855_v42, %v2856_v43  ;;  %1420 = vst [vmem:[#allocation0 + $0x518] sm:$0xff] %v1417_v41  ;;  %v2870_v0 = vld [vmem:[%s4666_s1 + $0x528] sm:$0xff] }
  0x90   :  { %v2858_v46 = vld [vmem:[%s4666_s1 + $0x718] sm:$0xff]  ;;  %v2871_v1 = vld [vmem:[%s4665_s0 + $0x628] sm:$0xff]  ;;  %v1497_v3 = vsub.f32 %v2869_v62, %v2870_v0  ;;  %1490 = vst [vmem:[#allocation0 + $0x428] sm:$0xff] %v1487_v63 }
  0x91   :  { %v1437_v49 = vsub.f32 %v2857_v44, %v2858_v46  ;;  %1430 = vst [vmem:[#allocation0 + $0x618] sm:$0xff] %v1427_v45  ;;  %v2872_v2 = vld [vmem:[%s4666_s1 + $0x628] sm:$0xff]  ;;  %v2875_v7 = vld [vmem:[%s4665_s0 + $0x38] sm:$0xff] }
  0x92   :  { %v1507_v4 = vsub.f32 %v2871_v1, %v2872_v2  ;;  %v2873_v5 = vld [vmem:[%s4665_s0 + $0x728] sm:$0xff]  ;;  %v2876_v9 = vld [vmem:[%s4666_s1 + $0x38] sm:$0xff]  ;;  %1500 = vst [vmem:[#allocation0 + $0x528] sm:$0xff] %v1497_v3 }
  0x93   :  { %1440 = vst [vmem:[#allocation0 + $0x718] sm:$0xff] %v1437_v49  ;;  %v2874_v6 = vld [vmem:[%s4666_s1 + $0x728] sm:$0xff]  ;;  %v2877_v10 = vld [vmem:[%s4665_s0 + $0x138] sm:$0xff]  ;;  %v1527_v12 = vsub.f32 %v2875_v7, %v2876_v9 }
  0x94   :  { %v1517_v8 = vsub.f32 %v2873_v5, %v2874_v6  ;;  %v2878_v11 = vld [vmem:[%s4666_s1 + $0x138] sm:$0xff]  ;;  %1510 = vst [vmem:[#allocation0 + $0x628] sm:$0xff] %v1507_v4  ;;  %v2891_v32 = vld [vmem:[%s4665_s0 + $0x48] sm:$0xff] }
  0x95   :  { %v1537_v13 = vsub.f32 %v2877_v10, %v2878_v11  ;;  %v2879_v14 = vld [vmem:[%s4665_s0 + $0x238] sm:$0xff]  ;;  %1530 = vst [vmem:[#allocation0 + $0x38] sm:$0xff] %v1527_v12  ;;  %v2892_v33 = vld [vmem:[%s4666_s1 + $0x48] sm:$0xff] }
  0x96   :  { %v2880_v15 = vld [vmem:[%s4666_s1 + $0x238] sm:$0xff]  ;;  %1520 = vst [vmem:[#allocation0 + $0x728] sm:$0xff] %v1517_v8  ;;  %v2893_v34 = vld [vmem:[%s4665_s0 + $0x148] sm:$0xff]  ;;  %v1607_v35 = vsub.f32 %v2891_v32, %v2892_v33 }
  0x97   :  { %v2881_v16 = vld [vmem:[%s4665_s0 + $0x338] sm:$0xff]  ;;  %v1547_v17 = vsub.f32 %v2879_v14, %v2880_v15  ;;  %1540 = vst [vmem:[#allocation0 + $0x138] sm:$0xff] %v1537_v13  ;;  %v2894_v36 = vld [vmem:[%s4666_s1 + $0x148] sm:$0xff] }
  0x98   :  { %v2882_v18 = vld [vmem:[%s4666_s1 + $0x338] sm:$0xff]  ;;  %v2895_v37 = vld [vmem:[%s4665_s0 + $0x248] sm:$0xff]  ;;  %v1617_v39 = vsub.f32 %v2893_v34, %v2894_v36  ;;  %1610 = vst [vmem:[#allocation0 + $0x48] sm:$0xff] %v1607_v35 }
  0x99   :  { %v2883_v19 = vld [vmem:[%s4665_s0 + $0x438] sm:$0xff]  ;;  %v1557_v21 = vsub.f32 %v2881_v16, %v2882_v18  ;;  %1550 = vst [vmem:[#allocation0 + $0x238] sm:$0xff] %v1547_v17  ;;  %v2896_v38 = vld [vmem:[%s4666_s1 + $0x248] sm:$0xff] }
  0x9a   :  { %v2884_v20 = vld [vmem:[%s4666_s1 + $0x438] sm:$0xff]  ;;  %v1627_v40 = vsub.f32 %v2895_v37, %v2896_v38  ;;  %v2897_v41 = vld [vmem:[%s4665_s0 + $0x348] sm:$0xff]  ;;  %1620 = vst [vmem:[#allocation0 + $0x148] sm:$0xff] %v1617_v39 }
  0x9b   :  { %v1567_v22 = vsub.f32 %v2883_v19, %v2884_v20  ;;  %v2885_v23 = vld [vmem:[%s4665_s0 + $0x538] sm:$0xff]  ;;  %1560 = vst [vmem:[#allocation0 + $0x338] sm:$0xff] %v1557_v21  ;;  %v2898_v42 = vld [vmem:[%s4666_s1 + $0x348] sm:$0xff] }
  0x9c   :  { %v2886_v24 = vld [vmem:[%s4666_s1 + $0x538] sm:$0xff]  ;;  %v2899_v43 = vld [vmem:[%s4665_s0 + $0x448] sm:$0xff]  ;;  %v1637_v44 = vsub.f32 %v2897_v41, %v2898_v42  ;;  %1630 = vst [vmem:[#allocation0 + $0x248] sm:$0xff] %v1627_v40 }
  0x9d   :  { %v2887_v25 = vld [vmem:[%s4665_s0 + $0x638] sm:$0xff]  ;;  %v1577_v26 = vsub.f32 %v2885_v23, %v2886_v24  ;;  %1570 = vst [vmem:[#allocation0 + $0x438] sm:$0xff] %v1567_v22  ;;  %v2900_v45 = vld [vmem:[%s4666_s1 + $0x448] sm:$0xff] }
  0x9e   :  { %v2888_v27 = vld [vmem:[%s4666_s1 + $0x638] sm:$0xff]  ;;  %v2901_v46 = vld [vmem:[%s4665_s0 + $0x548] sm:$0xff]  ;;  %v1647_v48 = vsub.f32 %v2899_v43, %v2900_v45  ;;  %1640 = vst [vmem:[#allocation0 + $0x348] sm:$0xff] %v1637_v44 }
  0x9f   :  { %v2889_v28 = vld [vmem:[%s4665_s0 + $0x738] sm:$0xff]  ;;  %v1587_v30 = vsub.f32 %v2887_v25, %v2888_v27  ;;  %1580 = vst [vmem:[#allocation0 + $0x538] sm:$0xff] %v1577_v26  ;;  %v2902_v47 = vld [vmem:[%s4666_s1 + $0x548] sm:$0xff] }
  0xa0   :  { %v2890_v29 = vld [vmem:[%s4666_s1 + $0x738] sm:$0xff]  ;;  %v1657_v49 = vsub.f32 %v2901_v46, %v2902_v47  ;;  %v2903_v50 = vld [vmem:[%s4665_s0 + $0x648] sm:$0xff]  ;;  %1650 = vst [vmem:[#allocation0 + $0x448] sm:$0xff] %v1647_v48 }
  0xa1   :  { %v1597_v31 = vsub.f32 %v2889_v28, %v2890_v29  ;;  %1590 = vst [vmem:[#allocation0 + $0x638] sm:$0xff] %v1587_v30  ;;  %v2904_v51 = vld [vmem:[%s4666_s1 + $0x648] sm:$0xff]  ;;  %v2907_v55 = vld [vmem:[%s4665_s0 + $0x58] sm:$0xff] }
  0xa2   :  { %v2905_v52 = vld [vmem:[%s4665_s0 + $0x748] sm:$0xff]  ;;  %v1667_v53 = vsub.f32 %v2903_v50, %v2904_v51  ;;  %v2908_v56 = vld [vmem:[%s4666_s1 + $0x58] sm:$0xff]  ;;  %1660 = vst [vmem:[#allocation0 + $0x548] sm:$0xff] %v1657_v49 }
  0xa3   :  { %1600 = vst [vmem:[#allocation0 + $0x738] sm:$0xff] %v1597_v31  ;;  %v2906_v54 = vld [vmem:[%s4666_s1 + $0x748] sm:$0xff]  ;;  %v1687_v58 = vsub.f32 %v2907_v55, %v2908_v56  ;;  %v2909_v59 = vld [vmem:[%s4665_s0 + $0x158] sm:$0xff] }
  0xa4   :  { %v1677_v57 = vsub.f32 %v2905_v52, %v2906_v54  ;;  %v2910_v60 = vld [vmem:[%s4666_s1 + $0x158] sm:$0xff]  ;;  %1670 = vst [vmem:[#allocation0 + $0x648] sm:$0xff] %v1667_v53  ;;  %v2923_v15 = vld [vmem:[%s4665_s0 + $0x68] sm:$0xff] }
  0xa5   :  { %v2911_v61 = vld [vmem:[%s4665_s0 + $0x258] sm:$0xff]  ;;  %v1697_v62 = vsub.f32 %v2909_v59, %v2910_v60  ;;  %1690 = vst [vmem:[#allocation0 + $0x58] sm:$0xff] %v1687_v58  ;;  %v2924_v17 = vld [vmem:[%s4666_s1 + $0x68] sm:$0xff] }
  0xa6   :  { %v2912_v63 = vld [vmem:[%s4666_s1 + $0x258] sm:$0xff]  ;;  %1680 = vst [vmem:[#allocation0 + $0x748] sm:$0xff] %v1677_v57  ;;  %v2925_v18 = vld [vmem:[%s4665_s0 + $0x168] sm:$0xff]  ;;  %v1767_v20 = vsub.f32 %v2923_v15, %v2924_v17 }
  0xa7   :  { %v2913_v0 = vld [vmem:[%s4665_s0 + $0x358] sm:$0xff]  ;;  %v1707_v2 = vsub.f32 %v2911_v61, %v2912_v63  ;;  %1700 = vst [vmem:[#allocation0 + $0x158] sm:$0xff] %v1697_v62  ;;  %v2926_v19 = vld [vmem:[%s4666_s1 + $0x168] sm:$0xff] }
  0xa8   :  { %v2914_v1 = vld [vmem:[%s4666_s1 + $0x358] sm:$0xff]  ;;  %v1777_v21 = vsub.f32 %v2925_v18, %v2926_v19  ;;  %v2927_v22 = vld [vmem:[%s4665_s0 + $0x268] sm:$0xff]  ;;  %1770 = vst [vmem:[#allocation0 + $0x68] sm:$0xff] %v1767_v20 }
  0xa9   :  { %v1717_v3 = vsub.f32 %v2913_v0, %v2914_v1  ;;  %v2915_v4 = vld [vmem:[%s4665_s0 + $0x458] sm:$0xff]  ;;  %1710 = vst [vmem:[#allocation0 + $0x258] sm:$0xff] %v1707_v2  ;;  %v2928_v23 = vld [vmem:[%s4666_s1 + $0x268] sm:$0xff] }
  0xaa   :  { %v2916_v5 = vld [vmem:[%s4666_s1 + $0x458] sm:$0xff]  ;;  %v2929_v24 = vld [vmem:[%s4665_s0 + $0x368] sm:$0xff]  ;;  %v1787_v25 = vsub.f32 %v2927_v22, %v2928_v23  ;;  %1780 = vst [vmem:[#allocation0 + $0x168] sm:$0xff] %v1777_v21 }
  0xab   :  { %v2917_v6 = vld [vmem:[%s4665_s0 + $0x558] sm:$0xff]  ;;  %v1727_v7 = vsub.f32 %v2915_v4, %v2916_v5  ;;  %1720 = vst [vmem:[#allocation0 + $0x358] sm:$0xff] %v1717_v3  ;;  %v2930_v26 = vld [vmem:[%s4666_s1 + $0x368] sm:$0xff] }
  0xac   :  { %v2918_v8 = vld [vmem:[%s4666_s1 + $0x558] sm:$0xff]  ;;  %v2931_v27 = vld [vmem:[%s4665_s0 + $0x468] sm:$0xff]  ;;  %v1797_v29 = vsub.f32 %v2929_v24, %v2930_v26  ;;  %1790 = vst [vmem:[#allocation0 + $0x268] sm:$0xff] %v1787_v25 }
  0xad   :  { %v2919_v9 = vld [vmem:[%s4665_s0 + $0x658] sm:$0xff]  ;;  %v1737_v11 = vsub.f32 %v2917_v6, %v2918_v8  ;;  %1730 = vst [vmem:[#allocation0 + $0x458] sm:$0xff] %v1727_v7  ;;  %v2932_v28 = vld [vmem:[%s4666_s1 + $0x468] sm:$0xff] }
  0xae   :  { %v2920_v10 = vld [vmem:[%s4666_s1 + $0x658] sm:$0xff]  ;;  %v1807_v30 = vsub.f32 %v2931_v27, %v2932_v28  ;;  %v2933_v31 = vld [vmem:[%s4665_s0 + $0x568] sm:$0xff]  ;;  %1800 = vst [vmem:[#allocation0 + $0x368] sm:$0xff] %v1797_v29 }
  0xaf   :  { %v1747_v12 = vsub.f32 %v2919_v9, %v2920_v10  ;;  %v2921_v13 = vld [vmem:[%s4665_s0 + $0x758] sm:$0xff]  ;;  %1740 = vst [vmem:[#allocation0 + $0x558] sm:$0xff] %v1737_v11  ;;  %v2934_v32 = vld [vmem:[%s4666_s1 + $0x568] sm:$0xff] }
  0xb0   :  { %v2922_v14 = vld [vmem:[%s4666_s1 + $0x758] sm:$0xff]  ;;  %v2935_v33 = vld [vmem:[%s4665_s0 + $0x668] sm:$0xff]  ;;  %v1817_v34 = vsub.f32 %v2933_v31, %v2934_v32  ;;  %1810 = vst [vmem:[#allocation0 + $0x468] sm:$0xff] %v1807_v30 }
  0xb1   :  { %v1757_v16 = vsub.f32 %v2921_v13, %v2922_v14  ;;  %1750 = vst [vmem:[#allocation0 + $0x658] sm:$0xff] %v1747_v12  ;;  %v2936_v35 = vld [vmem:[%s4666_s1 + $0x668] sm:$0xff]  ;;  %v2939_v40 = vld [vmem:[%s4665_s0 + $0x78] sm:$0xff] }
  0xb2   :  { %v2937_v36 = vld [vmem:[%s4665_s0 + $0x768] sm:$0xff]  ;;  %v1827_v38 = vsub.f32 %v2935_v33, %v2936_v35  ;;  %v2940_v41 = vld [vmem:[%s4666_s1 + $0x78] sm:$0xff]  ;;  %1820 = vst [vmem:[#allocation0 + $0x568] sm:$0xff] %v1817_v34 }
  0xb3   :  { %1760 = vst [vmem:[#allocation0 + $0x758] sm:$0xff] %v1757_v16  ;;  %v2938_v37 = vld [vmem:[%s4666_s1 + $0x768] sm:$0xff]  ;;  %v2941_v42 = vld [vmem:[%s4665_s0 + $0x178] sm:$0xff]  ;;  %v1847_v43 = vsub.f32 %v2939_v40, %v2940_v41 }
  0xb4   :  { %v1837_v39 = vsub.f32 %v2937_v36, %v2938_v37  ;;  %v2942_v44 = vld [vmem:[%s4666_s1 + $0x178] sm:$0xff]  ;;  %1830 = vst [vmem:[#allocation0 + $0x668] sm:$0xff] %v1827_v38  ;;  %v2955_v63 = vld [vmem:[%s4665_s0 + $0x88] sm:$0xff] }
  0xb5   :  { %v2943_v45 = vld [vmem:[%s4665_s0 + $0x278] sm:$0xff]  ;;  %v1857_v47 = vsub.f32 %v2941_v42, %v2942_v44  ;;  %1850 = vst [vmem:[#allocation0 + $0x78] sm:$0xff] %v1847_v43  ;;  %v2956_v0 = vld [vmem:[%s4666_s1 + $0x88] sm:$0xff] }
  0xb6   :  { %v2944_v46 = vld [vmem:[%s4666_s1 + $0x278] sm:$0xff]  ;;  %1840 = vst [vmem:[#allocation0 + $0x768] sm:$0xff] %v1837_v39  ;;  %v1927_v2 = vsub.f32 %v2955_v63, %v2956_v0  ;;  %v2957_v3 = vld [vmem:[%s4665_s0 + $0x188] sm:$0xff] }
  0xb7   :  { %v1867_v48 = vsub.f32 %v2943_v45, %v2944_v46  ;;  %v2945_v49 = vld [vmem:[%s4665_s0 + $0x378] sm:$0xff]  ;;  %1860 = vst [vmem:[#allocation0 + $0x178] sm:$0xff] %v1857_v47  ;;  %v2958_v4 = vld [vmem:[%s4666_s1 + $0x188] sm:$0xff] }
  0xb8   :  { %v2946_v50 = vld [vmem:[%s4666_s1 + $0x378] sm:$0xff]  ;;  %v2959_v5 = vld [vmem:[%s4665_s0 + $0x288] sm:$0xff]  ;;  %v1937_v6 = vsub.f32 %v2957_v3, %v2958_v4  ;;  %1930 = vst [vmem:[#allocation0 + $0x88] sm:$0xff] %v1927_v2 }
  0xb9   :  { %v2947_v51 = vld [vmem:[%s4665_s0 + $0x478] sm:$0xff]  ;;  %v1877_v52 = vsub.f32 %v2945_v49, %v2946_v50  ;;  %1870 = vst [vmem:[#allocation0 + $0x278] sm:$0xff] %v1867_v48  ;;  %v2960_v7 = vld [vmem:[%s4666_s1 + $0x288] sm:$0xff] }
  0xba   :  { %v2948_v53 = vld [vmem:[%s4666_s1 + $0x478] sm:$0xff]  ;;  %v2961_v8 = vld [vmem:[%s4665_s0 + $0x388] sm:$0xff]  ;;  %v1947_v10 = vsub.f32 %v2959_v5, %v2960_v7  ;;  %1940 = vst [vmem:[#allocation0 + $0x188] sm:$0xff] %v1937_v6 }
  0xbb   :  { %v2949_v54 = vld [vmem:[%s4665_s0 + $0x578] sm:$0xff]  ;;  %v1887_v56 = vsub.f32 %v2947_v51, %v2948_v53  ;;  %1880 = vst [vmem:[#allocation0 + $0x378] sm:$0xff] %v1877_v52  ;;  %v2962_v9 = vld [vmem:[%s4666_s1 + $0x388] sm:$0xff] }
  0xbc   :  { %v2950_v55 = vld [vmem:[%s4666_s1 + $0x578] sm:$0xff]  ;;  %v1957_v11 = vsub.f32 %v2961_v8, %v2962_v9  ;;  %v2963_v12 = vld [vmem:[%s4665_s0 + $0x488] sm:$0xff]  ;;  %1950 = vst [vmem:[#allocation0 + $0x288] sm:$0xff] %v1947_v10 }
  0xbd   :  { %v1897_v57 = vsub.f32 %v2949_v54, %v2950_v55  ;;  %v2951_v58 = vld [vmem:[%s4665_s0 + $0x678] sm:$0xff]  ;;  %1890 = vst [vmem:[#allocation0 + $0x478] sm:$0xff] %v1887_v56  ;;  %v2964_v13 = vld [vmem:[%s4666_s1 + $0x488] sm:$0xff] }
  0xbe   :  { %v2952_v59 = vld [vmem:[%s4666_s1 + $0x678] sm:$0xff]  ;;  %v2965_v14 = vld [vmem:[%s4665_s0 + $0x588] sm:$0xff]  ;;  %v1967_v15 = vsub.f32 %v2963_v12, %v2964_v13  ;;  %1960 = vst [vmem:[#allocation0 + $0x388] sm:$0xff] %v1957_v11 }
  0xbf   :  { %v2953_v60 = vld [vmem:[%s4665_s0 + $0x778] sm:$0xff]  ;;  %v1907_v61 = vsub.f32 %v2951_v58, %v2952_v59  ;;  %1900 = vst [vmem:[#allocation0 + $0x578] sm:$0xff] %v1897_v57  ;;  %v2966_v16 = vld [vmem:[%s4666_s1 + $0x588] sm:$0xff] }
  0xc0   :  { %v2954_v62 = vld [vmem:[%s4666_s1 + $0x778] sm:$0xff]  ;;  %v2967_v17 = vld [vmem:[%s4665_s0 + $0x688] sm:$0xff]  ;;  %v1977_v19 = vsub.f32 %v2965_v14, %v2966_v16  ;;  %1970 = vst [vmem:[#allocation0 + $0x488] sm:$0xff] %v1967_v15 }
  0xc1   :  { %v1917_v1 = vsub.f32 %v2953_v60, %v2954_v62  ;;  %1910 = vst [vmem:[#allocation0 + $0x678] sm:$0xff] %v1907_v61  ;;  %v2968_v18 = vld [vmem:[%s4666_s1 + $0x688] sm:$0xff]  ;;  %v2971_v23 = vld [vmem:[%s4665_s0 + $0x98] sm:$0xff] }
  0xc2   :  { %v1987_v20 = vsub.f32 %v2967_v17, %v2968_v18  ;;  %v2969_v21 = vld [vmem:[%s4665_s0 + $0x788] sm:$0xff]  ;;  %v2972_v25 = vld [vmem:[%s4666_s1 + $0x98] sm:$0xff]  ;;  %1980 = vst [vmem:[#allocation0 + $0x588] sm:$0xff] %v1977_v19 }
  0xc3   :  { %1920 = vst [vmem:[#allocation0 + $0x778] sm:$0xff] %v1917_v1  ;;  %v2970_v22 = vld [vmem:[%s4666_s1 + $0x788] sm:$0xff]  ;;  %v2973_v26 = vld [vmem:[%s4665_s0 + $0x198] sm:$0xff]  ;;  %v2007_v28 = vsub.f32 %v2971_v23, %v2972_v25 }
  0xc4   :  { %v1997_v24 = vsub.f32 %v2969_v21, %v2970_v22  ;;  %v2974_v27 = vld [vmem:[%s4666_s1 + $0x198] sm:$0xff]  ;;  %1990 = vst [vmem:[#allocation0 + $0x688] sm:$0xff] %v1987_v20  ;;  %v2987_v48 = vld [vmem:[%s4665_s0 + $0xa8] sm:$0xff] }
  0xc5   :  { %v2017_v29 = vsub.f32 %v2973_v26, %v2974_v27  ;;  %v2975_v30 = vld [vmem:[%s4665_s0 + $0x298] sm:$0xff]  ;;  %2010 = vst [vmem:[#allocation0 + $0x98] sm:$0xff] %v2007_v28  ;;  %v2988_v49 = vld [vmem:[%s4666_s1 + $0xa8] sm:$0xff] }
  0xc6   :  { %v2976_v31 = vld [vmem:[%s4666_s1 + $0x298] sm:$0xff]  ;;  %2000 = vst [vmem:[#allocation0 + $0x788] sm:$0xff] %v1997_v24  ;;  %v2989_v50 = vld [vmem:[%s4665_s0 + $0x1a8] sm:$0xff]  ;;  %v2087_v51 = vsub.f32 %v2987_v48, %v2988_v49 }
  0xc7   :  { %v2977_v32 = vld [vmem:[%s4665_s0 + $0x398] sm:$0xff]  ;;  %v2027_v33 = vsub.f32 %v2975_v30, %v2976_v31  ;;  %2020 = vst [vmem:[#allocation0 + $0x198] sm:$0xff] %v2017_v29  ;;  %v2990_v52 = vld [vmem:[%s4666_s1 + $0x1a8] sm:$0xff] }
  0xc8   :  { %v2978_v34 = vld [vmem:[%s4666_s1 + $0x398] sm:$0xff]  ;;  %v2991_v53 = vld [vmem:[%s4665_s0 + $0x2a8] sm:$0xff]  ;;  %v2097_v55 = vsub.f32 %v2989_v50, %v2990_v52  ;;  %2090 = vst [vmem:[#allocation0 + $0xa8] sm:$0xff] %v2087_v51 }
  0xc9   :  { %v2979_v35 = vld [vmem:[%s4665_s0 + $0x498] sm:$0xff]  ;;  %v2037_v37 = vsub.f32 %v2977_v32, %v2978_v34  ;;  %2030 = vst [vmem:[#allocation0 + $0x298] sm:$0xff] %v2027_v33  ;;  %v2992_v54 = vld [vmem:[%s4666_s1 + $0x2a8] sm:$0xff] }
  0xca   :  { %v2980_v36 = vld [vmem:[%s4666_s1 + $0x498] sm:$0xff]  ;;  %v2107_v56 = vsub.f32 %v2991_v53, %v2992_v54  ;;  %v2993_v57 = vld [vmem:[%s4665_s0 + $0x3a8] sm:$0xff]  ;;  %2100 = vst [vmem:[#allocation0 + $0x1a8] sm:$0xff] %v2097_v55 }
  0xcb   :  { %v2047_v38 = vsub.f32 %v2979_v35, %v2980_v36  ;;  %v2981_v39 = vld [vmem:[%s4665_s0 + $0x598] sm:$0xff]  ;;  %2040 = vst [vmem:[#allocation0 + $0x398] sm:$0xff] %v2037_v37  ;;  %v2994_v58 = vld [vmem:[%s4666_s1 + $0x3a8] sm:$0xff] }
  0xcc   :  { %v2982_v40 = vld [vmem:[%s4666_s1 + $0x598] sm:$0xff]  ;;  %v2995_v59 = vld [vmem:[%s4665_s0 + $0x4a8] sm:$0xff]  ;;  %v2117_v60 = vsub.f32 %v2993_v57, %v2994_v58  ;;  %2110 = vst [vmem:[#allocation0 + $0x2a8] sm:$0xff] %v2107_v56 }
  0xcd   :  { %v2983_v41 = vld [vmem:[%s4665_s0 + $0x698] sm:$0xff]  ;;  %v2057_v42 = vsub.f32 %v2981_v39, %v2982_v40  ;;  %2050 = vst [vmem:[#allocation0 + $0x498] sm:$0xff] %v2047_v38  ;;  %v2996_v61 = vld [vmem:[%s4666_s1 + $0x4a8] sm:$0xff] }
  0xce   :  { %v2984_v43 = vld [vmem:[%s4666_s1 + $0x698] sm:$0xff]  ;;  %v2997_v62 = vld [vmem:[%s4665_s0 + $0x5a8] sm:$0xff]  ;;  %v2127_v0 = vsub.f32 %v2995_v59, %v2996_v61  ;;  %2120 = vst [vmem:[#allocation0 + $0x3a8] sm:$0xff] %v2117_v60 }
  0xcf   :  { %v2985_v44 = vld [vmem:[%s4665_s0 + $0x798] sm:$0xff]  ;;  %v2067_v46 = vsub.f32 %v2983_v41, %v2984_v43  ;;  %2060 = vst [vmem:[#allocation0 + $0x598] sm:$0xff] %v2057_v42  ;;  %v2998_v63 = vld [vmem:[%s4666_s1 + $0x5a8] sm:$0xff] }
  0xd0   :  { %v2986_v45 = vld [vmem:[%s4666_s1 + $0x798] sm:$0xff]  ;;  %v2137_v1 = vsub.f32 %v2997_v62, %v2998_v63  ;;  %v2999_v2 = vld [vmem:[%s4665_s0 + $0x6a8] sm:$0xff]  ;;  %2130 = vst [vmem:[#allocation0 + $0x4a8] sm:$0xff] %v2127_v0 }
  0xd1   :  { %v2077_v47 = vsub.f32 %v2985_v44, %v2986_v45  ;;  %2070 = vst [vmem:[#allocation0 + $0x698] sm:$0xff] %v2067_v46  ;;  %v3000_v3 = vld [vmem:[%s4666_s1 + $0x6a8] sm:$0xff]  ;;  %v3003_v7 = vld [vmem:[%s4665_s0 + $0xb8] sm:$0xff] }
  0xd2   :  { %v3001_v4 = vld [vmem:[%s4665_s0 + $0x7a8] sm:$0xff]  ;;  %v2147_v5 = vsub.f32 %v2999_v2, %v3000_v3  ;;  %v3004_v8 = vld [vmem:[%s4666_s1 + $0xb8] sm:$0xff]  ;;  %2140 = vst [vmem:[#allocation0 + $0x5a8] sm:$0xff] %v2137_v1 }
  0xd3   :  { %2080 = vst [vmem:[#allocation0 + $0x798] sm:$0xff] %v2077_v47  ;;  %v3002_v6 = vld [vmem:[%s4666_s1 + $0x7a8] sm:$0xff]  ;;  %v2167_v10 = vsub.f32 %v3003_v7, %v3004_v8  ;;  %v3005_v11 = vld [vmem:[%s4665_s0 + $0x1b8] sm:$0xff] }
  0xd4   :  { %v2157_v9 = vsub.f32 %v3001_v4, %v3002_v6  ;;  %v3006_v12 = vld [vmem:[%s4666_s1 + $0x1b8] sm:$0xff]  ;;  %2150 = vst [vmem:[#allocation0 + $0x6a8] sm:$0xff] %v2147_v5  ;;  %v3019_v31 = vld [vmem:[%s4665_s0 + $0xc8] sm:$0xff] }
  0xd5   :  { %v3007_v13 = vld [vmem:[%s4665_s0 + $0x2b8] sm:$0xff]  ;;  %v2177_v14 = vsub.f32 %v3005_v11, %v3006_v12  ;;  %2170 = vst [vmem:[#allocation0 + $0xb8] sm:$0xff] %v2167_v10  ;;  %v3020_v33 = vld [vmem:[%s4666_s1 + $0xc8] sm:$0xff] }
  0xd6   :  { %v3008_v15 = vld [vmem:[%s4666_s1 + $0x2b8] sm:$0xff]  ;;  %2160 = vst [vmem:[#allocation0 + $0x7a8] sm:$0xff] %v2157_v9  ;;  %v3021_v34 = vld [vmem:[%s4665_s0 + $0x1c8] sm:$0xff]  ;;  %v2247_v36 = vsub.f32 %v3019_v31, %v3020_v33 }
  0xd7   :  { %v3009_v16 = vld [vmem:[%s4665_s0 + $0x3b8] sm:$0xff]  ;;  %v2187_v18 = vsub.f32 %v3007_v13, %v3008_v15  ;;  %2180 = vst [vmem:[#allocation0 + $0x1b8] sm:$0xff] %v2177_v14  ;;  %v3022_v35 = vld [vmem:[%s4666_s1 + $0x1c8] sm:$0xff] }
  0xd8   :  { %v3010_v17 = vld [vmem:[%s4666_s1 + $0x3b8] sm:$0xff]  ;;  %v2257_v37 = vsub.f32 %v3021_v34, %v3022_v35  ;;  %v3023_v38 = vld [vmem:[%s4665_s0 + $0x2c8] sm:$0xff]  ;;  %2250 = vst [vmem:[#allocation0 + $0xc8] sm:$0xff] %v2247_v36 }
  0xd9   :  { %v2197_v19 = vsub.f32 %v3009_v16, %v3010_v17  ;;  %v3011_v20 = vld [vmem:[%s4665_s0 + $0x4b8] sm:$0xff]  ;;  %2190 = vst [vmem:[#allocation0 + $0x2b8] sm:$0xff] %v2187_v18  ;;  %v3024_v39 = vld [vmem:[%s4666_s1 + $0x2c8] sm:$0xff] }
  0xda   :  { %v3012_v21 = vld [vmem:[%s4666_s1 + $0x4b8] sm:$0xff]  ;;  %v3025_v40 = vld [vmem:[%s4665_s0 + $0x3c8] sm:$0xff]  ;;  %v2267_v41 = vsub.f32 %v3023_v38, %v3024_v39  ;;  %2260 = vst [vmem:[#allocation0 + $0x1c8] sm:$0xff] %v2257_v37 }
  0xdb   :  { %v3013_v22 = vld [vmem:[%s4665_s0 + $0x5b8] sm:$0xff]  ;;  %v2207_v23 = vsub.f32 %v3011_v20, %v3012_v21  ;;  %2200 = vst [vmem:[#allocation0 + $0x3b8] sm:$0xff] %v2197_v19  ;;  %v3026_v42 = vld [vmem:[%s4666_s1 + $0x3c8] sm:$0xff] }
  0xdc   :  { %v3014_v24 = vld [vmem:[%s4666_s1 + $0x5b8] sm:$0xff]  ;;  %v3027_v43 = vld [vmem:[%s4665_s0 + $0x4c8] sm:$0xff]  ;;  %v2277_v45 = vsub.f32 %v3025_v40, %v3026_v42  ;;  %2270 = vst [vmem:[#allocation0 + $0x2c8] sm:$0xff] %v2267_v41 }
  0xdd   :  { %v3015_v25 = vld [vmem:[%s4665_s0 + $0x6b8] sm:$0xff]  ;;  %v2217_v27 = vsub.f32 %v3013_v22, %v3014_v24  ;;  %2210 = vst [vmem:[#allocation0 + $0x4b8] sm:$0xff] %v2207_v23  ;;  %v3028_v44 = vld [vmem:[%s4666_s1 + $0x4c8] sm:$0xff] }
  0xde   :  { %v3016_v26 = vld [vmem:[%s4666_s1 + $0x6b8] sm:$0xff]  ;;  %v2287_v46 = vsub.f32 %v3027_v43, %v3028_v44  ;;  %v3029_v47 = vld [vmem:[%s4665_s0 + $0x5c8] sm:$0xff]  ;;  %2280 = vst [vmem:[#allocation0 + $0x3c8] sm:$0xff] %v2277_v45 }
  0xdf   :  { %v2227_v28 = vsub.f32 %v3015_v25, %v3016_v26  ;;  %v3017_v29 = vld [vmem:[%s4665_s0 + $0x7b8] sm:$0xff]  ;;  %2220 = vst [vmem:[#allocation0 + $0x5b8] sm:$0xff] %v2217_v27  ;;  %v3030_v48 = vld [vmem:[%s4666_s1 + $0x5c8] sm:$0xff] }
  0xe0   :  { %v3018_v30 = vld [vmem:[%s4666_s1 + $0x7b8] sm:$0xff]  ;;  %v3031_v49 = vld [vmem:[%s4665_s0 + $0x6c8] sm:$0xff]  ;;  %v2297_v50 = vsub.f32 %v3029_v47, %v3030_v48  ;;  %2290 = vst [vmem:[#allocation0 + $0x4c8] sm:$0xff] %v2287_v46 }
  0xe1   :  { %v2237_v32 = vsub.f32 %v3017_v29, %v3018_v30  ;;  %2230 = vst [vmem:[#allocation0 + $0x6b8] sm:$0xff] %v2227_v28  ;;  %v3032_v51 = vld [vmem:[%s4666_s1 + $0x6c8] sm:$0xff]  ;;  %v3035_v56 = vld [vmem:[%s4665_s0 + $0xd8] sm:$0xff] }
  0xe2   :  { %v3033_v52 = vld [vmem:[%s4665_s0 + $0x7c8] sm:$0xff]  ;;  %v2307_v54 = vsub.f32 %v3031_v49, %v3032_v51  ;;  %v3036_v57 = vld [vmem:[%s4666_s1 + $0xd8] sm:$0xff]  ;;  %2300 = vst [vmem:[#allocation0 + $0x5c8] sm:$0xff] %v2297_v50 }
  0xe3   :  { %2240 = vst [vmem:[#allocation0 + $0x7b8] sm:$0xff] %v2237_v32  ;;  %v3034_v53 = vld [vmem:[%s4666_s1 + $0x7c8] sm:$0xff]  ;;  %v3037_v58 = vld [vmem:[%s4665_s0 + $0x1d8] sm:$0xff]  ;;  %v2327_v59 = vsub.f32 %v3035_v56, %v3036_v57 }
  0xe4   :  { %v2317_v55 = vsub.f32 %v3033_v52, %v3034_v53  ;;  %v3038_v60 = vld [vmem:[%s4666_s1 + $0x1d8] sm:$0xff]  ;;  %2310 = vst [vmem:[#allocation0 + $0x6c8] sm:$0xff] %v2307_v54  ;;  %v3051_v15 = vld [vmem:[%s4665_s0 + $0xe8] sm:$0xff] }
  0xe5   :  { %v3039_v61 = vld [vmem:[%s4665_s0 + $0x2d8] sm:$0xff]  ;;  %v2337_v63 = vsub.f32 %v3037_v58, %v3038_v60  ;;  %2330 = vst [vmem:[#allocation0 + $0xd8] sm:$0xff] %v2327_v59  ;;  %v3052_v16 = vld [vmem:[%s4666_s1 + $0xe8] sm:$0xff] }
  0xe6   :  { %v3040_v62 = vld [vmem:[%s4666_s1 + $0x2d8] sm:$0xff]  ;;  %2320 = vst [vmem:[#allocation0 + $0x7c8] sm:$0xff] %v2317_v55  ;;  %v2407_v18 = vsub.f32 %v3051_v15, %v3052_v16  ;;  %v3053_v19 = vld [vmem:[%s4665_s0 + $0x1e8] sm:$0xff] }
  0xe7   :  { %v2347_v0 = vsub.f32 %v3039_v61, %v3040_v62  ;;  %v3041_v1 = vld [vmem:[%s4665_s0 + $0x3d8] sm:$0xff]  ;;  %2340 = vst [vmem:[#allocation0 + $0x1d8] sm:$0xff] %v2337_v63  ;;  %v3054_v20 = vld [vmem:[%s4666_s1 + $0x1e8] sm:$0xff] }
  0xe8   :  { %v3042_v2 = vld [vmem:[%s4666_s1 + $0x3d8] sm:$0xff]  ;;  %v3055_v21 = vld [vmem:[%s4665_s0 + $0x2e8] sm:$0xff]  ;;  %v2417_v22 = vsub.f32 %v3053_v19, %v3054_v20  ;;  %2410 = vst [vmem:[#allocation0 + $0xe8] sm:$0xff] %v2407_v18 }
  0xe9   :  { %v3043_v3 = vld [vmem:[%s4665_s0 + $0x4d8] sm:$0xff]  ;;  %v2357_v4 = vsub.f32 %v3041_v1, %v3042_v2  ;;  %2350 = vst [vmem:[#allocation0 + $0x2d8] sm:$0xff] %v2347_v0  ;;  %v3056_v23 = vld [vmem:[%s4666_s1 + $0x2e8] sm:$0xff] }
  0xea   :  { %v3044_v5 = vld [vmem:[%s4666_s1 + $0x4d8] sm:$0xff]  ;;  %v3057_v24 = vld [vmem:[%s4665_s0 + $0x3e8] sm:$0xff]  ;;  %v2427_v26 = vsub.f32 %v3055_v21, %v3056_v23  ;;  %2420 = vst [vmem:[#allocation0 + $0x1e8] sm:$0xff] %v2417_v22 }
  0xeb   :  { %v3045_v6 = vld [vmem:[%s4665_s0 + $0x5d8] sm:$0xff]  ;;  %v2367_v8 = vsub.f32 %v3043_v3, %v3044_v5  ;;  %2360 = vst [vmem:[#allocation0 + $0x3d8] sm:$0xff] %v2357_v4  ;;  %v3058_v25 = vld [vmem:[%s4666_s1 + $0x3e8] sm:$0xff] }
  0xec   :  { %v3046_v7 = vld [vmem:[%s4666_s1 + $0x5d8] sm:$0xff]  ;;  %v2437_v27 = vsub.f32 %v3057_v24, %v3058_v25  ;;  %v3059_v28 = vld [vmem:[%s4665_s0 + $0x4e8] sm:$0xff]  ;;  %2430 = vst [vmem:[#allocation0 + $0x2e8] sm:$0xff] %v2427_v26 }
  0xed   :  { %v2377_v9 = vsub.f32 %v3045_v6, %v3046_v7  ;;  %v3047_v10 = vld [vmem:[%s4665_s0 + $0x6d8] sm:$0xff]  ;;  %2370 = vst [vmem:[#allocation0 + $0x4d8] sm:$0xff] %v2367_v8  ;;  %v3060_v29 = vld [vmem:[%s4666_s1 + $0x4e8] sm:$0xff] }
  0xee   :  { %v3048_v11 = vld [vmem:[%s4666_s1 + $0x6d8] sm:$0xff]  ;;  %v3061_v30 = vld [vmem:[%s4665_s0 + $0x5e8] sm:$0xff]  ;;  %v2447_v31 = vsub.f32 %v3059_v28, %v3060_v29  ;;  %2440 = vst [vmem:[#allocation0 + $0x3e8] sm:$0xff] %v2437_v27 }
  0xef   :  { %v3049_v12 = vld [vmem:[%s4665_s0 + $0x7d8] sm:$0xff]  ;;  %v2387_v13 = vsub.f32 %v3047_v10, %v3048_v11  ;;  %2380 = vst [vmem:[#allocation0 + $0x5d8] sm:$0xff] %v2377_v9  ;;  %v3062_v32 = vld [vmem:[%s4666_s1 + $0x5e8] sm:$0xff] }
  0xf0   :  { %v3050_v14 = vld [vmem:[%s4666_s1 + $0x7d8] sm:$0xff]  ;;  %v3063_v33 = vld [vmem:[%s4665_s0 + $0x6e8] sm:$0xff]  ;;  %v2457_v35 = vsub.f32 %v3061_v30, %v3062_v32  ;;  %2450 = vst [vmem:[#allocation0 + $0x4e8] sm:$0xff] %v2447_v31 }
  0xf1   :  { %v2397_v17 = vsub.f32 %v3049_v12, %v3050_v14  ;;  %2390 = vst [vmem:[#allocation0 + $0x6d8] sm:$0xff] %v2387_v13  ;;  %v3064_v34 = vld [vmem:[%s4666_s1 + $0x6e8] sm:$0xff]  ;;  %v3067_v39 = vld [vmem:[%s4665_s0 + $0xf8] sm:$0xff] }
  0xf2   :  { %v2467_v36 = vsub.f32 %v3063_v33, %v3064_v34  ;;  %v3065_v37 = vld [vmem:[%s4665_s0 + $0x7e8] sm:$0xff]  ;;  %v3068_v41 = vld [vmem:[%s4666_s1 + $0xf8] sm:$0xff]  ;;  %2460 = vst [vmem:[#allocation0 + $0x5e8] sm:$0xff] %v2457_v35 }
  0xf3   :  { %2400 = vst [vmem:[#allocation0 + $0x7d8] sm:$0xff] %v2397_v17  ;;  %v3066_v38 = vld [vmem:[%s4666_s1 + $0x7e8] sm:$0xff]  ;;  %v3069_v42 = vld [vmem:[%s4665_s0 + $0x1f8] sm:$0xff]  ;;  %v2487_v44 = vsub.f32 %v3067_v39, %v3068_v41 }
  0xf4   :  { %v2477_v40 = vsub.f32 %v3065_v37, %v3066_v38  ;;  %v3070_v43 = vld [vmem:[%s4666_s1 + $0x1f8] sm:$0xff]  ;;  %2470 = vst [vmem:[#allocation0 + $0x6e8] sm:$0xff] %v2467_v36 }
  0xf5   :  { %v2497_v45 = vsub.f32 %v3069_v42, %v3070_v43  ;;  %v3071_v46 = vld [vmem:[%s4665_s0 + $0x2f8] sm:$0xff]  ;;  %2490 = vst [vmem:[#allocation0 + $0xf8] sm:$0xff] %v2487_v44 }
  0xf6   :  { %v3072_v47 = vld [vmem:[%s4666_s1 + $0x2f8] sm:$0xff]  ;;  %2480 = vst [vmem:[#allocation0 + $0x7e8] sm:$0xff] %v2477_v40 }
  0xf7   :  { %v3073_v48 = vld [vmem:[%s4665_s0 + $0x3f8] sm:$0xff]  ;;  %v2507_v49 = vsub.f32 %v3071_v46, %v3072_v47  ;;  %2500 = vst [vmem:[#allocation0 + $0x1f8] sm:$0xff] %v2497_v45 }
  0xf8   :  { %v3074_v50 = vld [vmem:[%s4666_s1 + $0x3f8] sm:$0xff] }
  0xf9   :  { %v3075_v51 = vld [vmem:[%s4665_s0 + $0x4f8] sm:$0xff]  ;;  %v2517_v53 = vsub.f32 %v3073_v48, %v3074_v50  ;;  %2510 = vst [vmem:[#allocation0 + $0x2f8] sm:$0xff] %v2507_v49 }
  0xfa   :  { %v3076_v52 = vld [vmem:[%s4666_s1 + $0x4f8] sm:$0xff] }
  0xfb   :  { %v2527_v54 = vsub.f32 %v3075_v51, %v3076_v52  ;;  %v3077_v55 = vld [vmem:[%s4665_s0 + $0x5f8] sm:$0xff]  ;;  %2520 = vst [vmem:[#allocation0 + $0x3f8] sm:$0xff] %v2517_v53 }
  0xfc   :  { %v3078_v56 = vld [vmem:[%s4666_s1 + $0x5f8] sm:$0xff] }
  0xfd   :  { %v3079_v57 = vld [vmem:[%s4665_s0 + $0x6f8] sm:$0xff]  ;;  %v2537_v58 = vsub.f32 %v3077_v55, %v3078_v56  ;;  %2530 = vst [vmem:[#allocation0 + $0x4f8] sm:$0xff] %v2527_v54 }
  0xfe   :  { %v3080_v59 = vld [vmem:[%s4666_s1 + $0x6f8] sm:$0xff] }
  0xff   :  { %v3081_v60 = vld [vmem:[%s4665_s0 + $0x7f8] sm:$0xff]  ;;  %v2547_v62 = vsub.f32 %v3079_v57, %v3080_v59  ;;  %2540 = vst [vmem:[#allocation0 + $0x5f8] sm:$0xff] %v2537_v58 }
 0x100   :  { %v3082_v61 = vld [vmem:[%s4666_s1 + $0x7f8] sm:$0xff]  ;;  %s3086_s1 = scalar_lea.vmem %s2565_s8, 32768 }
 0x101   :  { %v2557_v63 = vsub.f32 %v3081_v60, %v3082_v61  ;;  %2550 = vst [vmem:[#allocation0 + $0x6f8] sm:$0xff] %v2547_v62  ;;  %p3087_p0 = scmp.ne.s32.totalorder %s2565_s8, %s3086_s1  ;;  %p3092_p2 = scmp.lt.s32.totalorder %s3086_s1, %s3086_s1 }
 0x103   :  { %2560 = vst [vmem:[#allocation0 + $0x7f8] sm:$0xff] %v2557_v63  ;;  %p3093_p3 = por %p3092_p2, %p3091_p1 }
 0x105   :  { %p3094_p4 = pnand %p3093_p3, %p3087_p0 }
 0x107   :  { %3097 = shalt.err (!%p3094_p4)
}
 0x108   :  { %s3109_s26 = smov 128   ;;  %s3110_s27 = smov 8  }
 0x109   :  { %2570 = dma.vmem_to_hbm [thread:$0]  %s2565_s8, 32768, %s4667_s2, [#allocation1], %s3109_s26, %s3109_s26, %s3110_s27  }
 0x10a   :  { %3106 = dma.done.wait [#allocation1], 32768  }
 0x10b   :  { %3107 = vsyncadd [#allocation1], 4294934528 }
 0x10c   :  { %2572 = vsyncpa [#allocation1], 1 }

// kernel: standard_geometry.1
= control target key start
LH: loop header
LB: loop body
LE: loop exit
PB: predicated region body
PF: predicated region fallthrough
CT: control target
= control target key end

     0   :  { %8 = vsyncpa [#allocation3], 0  ;;  %s16125_s0 = inlined_call_operand.vmem [shape: bf16[4096,8], index: 0, kind: input, shape index: {}]   ;;  %s16126_s1 = inlined_call_operand.vmem [shape: f32[512,8], index: 1, kind: input, shape index: {}]   ;;  %s16127_s2 = inlined_call_operand.hbm [shape: bf16[512,4096], index: 2, kind: input, shape index: {}]   ;;  %s16128_s3 = inlined_call_operand.vmem [shape: f32[2,8,4096], index: 3, kind: output, shape index: {}]  }
   0x1   :  { %10 = vsyncpa [#allocation3 + $0x1], 0  ;;  %s11919_s12 = smov 0   ;;  %s11921_s13 = smov 0  }
   0x2   :  { %s11923_s14 = smov 0   ;;  %s11925_s15 = smov 0  }
   0x3   :  { %s11927_s16 = smov 0   ;;  %s11929_s17 = smov 0  }
   0x4 LB: > { %s8923_s18 = sadd.s32 4294967295, %s11894_s17   ;;  %s28_s19 = sadd.s32 1, %s11890_s16  ;;  %s11894_s17 = sphi %s11929_s17, %s16_s17   ;;  %s11890_s16 = sphi %s11927_s16, %s17630_s16   ;;  %s11886_s15 = sphi %s11925_s15, %s17629_s15   ;;  %s11882_s14 = sphi %s11923_s14, %s17628_s14   ;;  %s11878_s13 = sphi %s11921_s13, %s17627_s13   ;;  %s11874_s12 = sphi %s11919_s12, %s17626_s12  }
   0x5   : > { %p30_p0 = scmp.ge.s32.totalorder %s28_s19, 2  ;;  %s86_s20 = sadd.s32 1, %s11882_s14 }
   0x6   : > { %p93_p1 = scmp.ne.s32.totalorder %s11882_s14, %s11878_s13  ;;  %p94_p2 = scmp.eq.s32.totalorder %s11894_s17, 0 }
   0x7   : > { %s17632_s19 = smov (%p30_p0, %s28_s19), 0  ;;  %p99_p4 = scmp.ne.s32.totalorder %s11878_s13, %s11874_s12 }
   0x8   : > { %p11955_p3 = por %p94_p2, %p93_p1  ;;  %s83_s22 = ssub.s32 %s11890_s16, %s17632_s19 }
   0x9   : > { %p100_p5 = scmp.eq.s32.totalorder %s8923_s18, 0  ;;  %p84_p6 = scmp.eq.s32.totalorder %s83_s22, 0 }
   0xa   : > { %p11508_p8 = scmp.lt.s32.totalorder %s11894_s17, 2  ;;  %s163_s25 = sand.u32 1, %s11882_s14  }
   0xb   : > { %p11962_p7 = por %p100_p5, %p99_p4  ;;  %s9708_s26 = sshll.u32 %s11890_s16, 16 }
   0xc   : > { %s11968_s24 = scalar_select %p84_p6, %s11882_s14, %s86_s20  }
   0xd   : > { %s8927_s27 = sshll.u32 %s163_s25, 12  ;;  %s175_s30 = scalar_lea.hbm %s16127_s2, %s9708_s26 }
   0xe   : > { %s167_s4 = scalar_lea.vmem [#allocation2], %s8927_s27  ;;  %p11977_p9 = pnand %p11508_p8, %p11955_p3 }
   0xf   : > { %s176_s5 = sshll.u32 %s167_s4, 4  ;;  %s164_s7 = scalar_lea.sflag [#allocation3], %s163_s25  ;;  %s177_s5 = int_to_ptr.vmem [resolvable:$true] %s176_s5 }
  0x10   : > { %p11818_p10 = pneg %p11977_p9  ;;  %s11829_s8 = scalar_lea.vmem %s177_s5, 65536 }
  0x11   : > { %p11830_p11 = scmp.ne.s32.totalorder %s177_s5, %s11829_s8  ;;  %s11896_s9 = smov [#allocation2]  }
  0x12   : > { %s11834_s10 = sshll.u32 %s11896_s9, 4  ;;  %s11835_s10 = int_to_ptr.vmem [resolvable:$false] %s11834_s10 }
  0x13   : > { %p11832_p12 = pnand %p11830_p11, %p11818_p10  ;;  %s11836_s11 = scalar_lea.vmem %s11835_s10, 131072 }
  0x14   : > { %p11837_p0 = scmp.lt.s32.totalorder %s177_s5, %s11835_s10  ;;  %p11838_p1 = scmp.lt.s32.totalorder %s11836_s11, %s11829_s8 }
  0x15   : > { %p11833_p13 = pneg %p11832_p12 }
  0x16   : > { %p11839_p2 = por %p11838_p1, %p11837_p0 }
  0x18   : > { %p11840_p3 = pnand %p11839_p2, %p11833_p13 }
  0x1a   : > { %11843 = shalt.err (!%p11840_p3)
}
  0x1b   : > { %s11897_s12 = smov 2048   ;;  %s11898_s18 = smov 128  }
  0x1c   : > { %11507 = dma.hbm_to_vmem [thread:$0]  (!%p11977_p9), %s175_s30, 65536, %s177_s5, %s164_s7, %s11897_s12, %s11897_s12, %s11898_s18  }
  0x1d   : > { %p8931_p4 = scmp.ge.s32.totalorder %s11894_s17, 1  ;;  %p184_p5 = scmp.lt.s32.totalorder %s11894_s17, 3 }
  0x1f   : > { %p185_p6 = pnand %p8931_p4, %p184_p5 }
  0x21   : > { %188 = sbr.rel (%p185_p6) target bundleno = 2021 (0x7e5), region = 32 }
  0x26   : > { %s190_s20 = sand.u32 1, %s11878_s13  }
  0x27   : > { %s8932_s21 = sshll.u32 %s190_s20, 12  ;;  %s191_s22 = scalar_lea.sflag [#allocation3], %s190_s20 }
  0x28   : > { %s11988_s25 = scalar_lea.vmem [#allocation2], %s8932_s21 }
  0x29   : > { %11869 = dma.done.wait (%p11962_p7), %s191_s22, 65536  }
  0x2a   : > { %11871 = vsyncadd (%p11962_p7), %s191_s22, 4294901760  ;;  %v11560_v0 = vld [vmem:[%s16125_s0 + $0x78] sm:$0xff]   ;;  %v11564_v4 = vld [vmem:[%s16125_s0 + $0x70] sm:$0xff]   ;;  %p233_p8 = scmp.lt.s32.totalorder %s11886_s15, 1 }
  0x2b   : > { %v11561_v1 = vld [vmem:[%s16125_s0 + $0xf8] sm:$0xff]   ;;  %9710 = vmatprep.subr.bf16.mxu0 %v11560_v0  ;;  %v11565_v5 = vld [vmem:[%s16125_s0 + $0xf0] sm:$0xff]   ;;  %v11568_v8 = vld [vmem:[%s16125_s0 + $0x68] sm:$0xff]  }
  0x2c   : > { %v11562_v2 = vld [vmem:[%s16125_s0 + $0x38] sm:$0xff]   ;;  %9822 = vmatprep.subr.bf16.mxu1 %v11561_v1  ;;  %v11566_v6 = vld [vmem:[%s16125_s0 + $0x30] sm:$0xff]   ;;  %v11569_v9 = vld [vmem:[%s16125_s0 + $0xe8] sm:$0xff]  }
  0x2d   : > { %v11563_v3 = vld [vmem:[%s16125_s0 + $0xb8] sm:$0xff]   ;;  %9711 = vmatpush3.bf16.msra.mxu0 %v11562_v2  ;;  %v11567_v7 = vld [vmem:[%s16125_s0 + $0xb0] sm:$0xff]   ;;  %v11570_v10 = vld [vmem:[%s16125_s0 + $0x28] sm:$0xff]  }
  0x2e   : > { %9823 = vmatpush3.bf16.msra.mxu1 %v11563_v3  ;;  %9712 = vmatprep.subr.bf16.mxu0 %v11564_v4  ;;  %v11571_v11 = vld [vmem:[%s16125_s0 + $0xa8] sm:$0xff]   ;;  %v11572_v12 = vld [vmem:[%s16125_s0 + $0x60] sm:$0xff]   ;;  %v11576_v16 = vld [vmem:[%s16125_s0 + $0x58] sm:$0xff]  }
  0x2f   : > { %9824 = vmatprep.subr.bf16.mxu1 %v11565_v5  ;;  %v11573_v13 = vld [vmem:[%s16125_s0 + $0xe0] sm:$0xff]   ;;  %v11577_v17 = vld [vmem:[%s16125_s0 + $0xd8] sm:$0xff]   ;;  %v11580_v20 = vld [vmem:[%s16125_s0 + $0x50] sm:$0xff]  }
  0x30   : > { %v11574_v14 = vld [vmem:[%s16125_s0 + $0x20] sm:$0xff]   ;;  %v11578_v18 = vld [vmem:[%s16125_s0 + $0x18] sm:$0xff]   ;;  %v11581_v21 = vld [vmem:[%s16125_s0 + $0xd0] sm:$0xff]  }
  0x31   : > { %9713 = vmatpush3.bf16.msra.mxu0 %v11566_v6  ;;  %v11575_v15 = vld [vmem:[%s16125_s0 + $0xa0] sm:$0xff]   ;;  %v11579_v19 = vld [vmem:[%s16125_s0 + $0x98] sm:$0xff]   ;;  %v11582_v22 = vld [vmem:[%s16125_s0 + $0x10] sm:$0xff]  }
  0x32   : > { %9825 = vmatpush3.bf16.msra.mxu1 %v11567_v7  ;;  %9714 = vmatprep.subr.bf16.mxu0 %v11568_v8  ;;  %v11583_v23 = vld [vmem:[%s16125_s0 + $0x90] sm:$0xff]   ;;  %v11584_v24 = vld [vmem:[%s16125_s0 + $0x48] sm:$0xff]   ;;  %v11588_v28 = vld [vmem:[%s16125_s0 + $0x40] sm:$0xff]  }
  0x33   : > { %9826 = vmatprep.subr.bf16.mxu1 %v11569_v9  ;;  %v11585_v25 = vld [vmem:[%s16125_s0 + $0xc8] sm:$0xff]   ;;  %v11589_v29 = vld [vmem:[%s16125_s0 + $0xc0] sm:$0xff]   ;;  %v11592_v40 = vld [vmem:[%s16125_s0 + $0x178] sm:$0xff]  }
  0x34   : > { %v11586_v26 = vld [vmem:[%s16125_s0 + $0x8] sm:$0xff]   ;;  %v11590_v30 = vld [vmem:[%s16125_s0] sm:$0xff]   ;;  %v11593_v41 = vld [vmem:[%s16125_s0 + $0x138] sm:$0xff]  }
  0x35   : > { %9715 = vmatpush3.bf16.msra.mxu0 %v11570_v10  ;;  %v11587_v27 = vld [vmem:[%s16125_s0 + $0x88] sm:$0xff]   ;;  %v11591_v31 = vld [vmem:[%s16125_s0 + $0x80] sm:$0xff]   ;;  %v11594_v42 = vld [vmem:[%s16125_s0 + $0x1f8] sm:$0xff]  }
  0x36   : > { %9827 = vmatpush3.bf16.msra.mxu1 %v11571_v11  ;;  %9716 = vmatprep.subr.bf16.mxu0 %v11572_v12  ;;  %v275_v32 = vld [vmem:[%s11988_s25] sm:$0xff]  ;;  %v276_v34 = vld [vmem:[%s11988_s25 + $0x8] sm:$0xff]  ;;  %v11595_v43 = vld [vmem:[%s16125_s0 + $0x1b8] sm:$0xff]  }
  0x37   : > { %9828 = vmatprep.subr.bf16.mxu1 %v11573_v13  ;;  %v291_v33 = vld [vmem:[%s11988_s25 + $0x80] sm:$0xff]  ;;  %v292_v37 = vld [vmem:[%s11988_s25 + $0x88] sm:$0xff]  ;;  %v11596_v55 = vld [vmem:[%s16125_s0 + $0x170] sm:$0xff]  }
  0x38   : > { %v12093_v35 = vcombine.low %v275_v32, %v291_v33  ;;  %v12095_v36 = vcombine.high %v275_v32, %v291_v33  ;;  %v12098_v38 = vcombine.low %v276_v34, %v292_v37  ;;  %v12100_v39 = vcombine.high %v276_v34, %v292_v37  ;;  %v307_v44 = vld [vmem:[%s11988_s25 + $0x100] sm:$0xff]  ;;  %v308_v47 = vld [vmem:[%s11988_s25 + $0x108] sm:$0xff]  ;;  %v11597_v58 = vld [vmem:[%s16125_s0 + $0x130] sm:$0xff]  }
  0x39   : > { %9717 = vmatpush3.bf16.msra.mxu0 %v11574_v14  ;;  %v323_v45 = vld [vmem:[%s11988_s25 + $0x180] sm:$0xff]  ;;  %v324_v48 = vld [vmem:[%s11988_s25 + $0x188] sm:$0xff]  ;;  %v11598_v60 = vld [vmem:[%s16125_s0 + $0x1f0] sm:$0xff]  }
  0x3a   : > { %9829 = vmatpush3.bf16.msra.mxu1 %v11575_v15  ;;  %9718 = vmatprep.subr.bf16.mxu0 %v11576_v16  ;;  %16630 = vst [vmem:[#allocation5_spill] sm:$0xff] %v12093_v35  ;;  %16631 = vst [vmem:[#allocation6_spill] sm:$0xff] %v12095_v36  ;;  %v12120_v46 = vcombine.high %v307_v44, %v323_v45  ;;  %v339_v49 = vld [vmem:[%s11988_s25 + $0x200] sm:$0xff]  ;;  %v12125_v50 = vcombine.high %v308_v47, %v324_v48  ;;  %v340_v52 = vld [vmem:[%s11988_s25 + $0x208] sm:$0xff] }
  0x3b   : > { %9830 = vmatprep.subr.bf16.mxu1 %v11577_v17  ;;  %16632 = vst [vmem:[#allocation7_spill] sm:$0xff] %v12098_v38  ;;  %16633 = vst [vmem:[#allocation8_spill] sm:$0xff] %v12100_v39  ;;  %5427 = vmatprep.mubr.bf16.mxu0 %v12095_v36  ;;  %v355_v51 = vld [vmem:[%s11988_s25 + $0x280] sm:$0xff]  ;;  %v356_v53 = vld [vmem:[%s11988_s25 + $0x288] sm:$0xff]  ;;  %v12131_v54 = vcombine.low %v307_v44, %v323_v45  ;;  %v12137_v56 = vcombine.low %v308_v47, %v324_v48 }
  0x3c   : > { %5588 = vmatprep.mubr.bf16.mxu1 %v12100_v39  ;;  %16634 = vst [vmem:[#allocation9_spill] sm:$0xff] %v12120_v46  ;;  %16635 = vst [vmem:[#allocation10_spill] sm:$0xff] %v12125_v50  ;;  %v12139_v57 = vcombine.high %v339_v49, %v355_v51  ;;  %v12144_v59 = vcombine.high %v340_v52, %v356_v53  ;;  %v11599_v61 = vld [vmem:[%s16125_s0 + $0x1b0] sm:$0xff]   ;;  %v371_v62 = vld [vmem:[%s11988_s25 + $0x300] sm:$0xff]  ;;  %v12163_v3 = vcombine.low %v339_v49, %v355_v51 }
  0x3d   : > { %9719 = vmatpush3.bf16.msra.mxu0 %v11578_v18  ;;  %16636 = vst [vmem:[#allocation11_spill] sm:$0xff] %v12131_v54  ;;  %16637 = vst [vmem:[#allocation12_spill] sm:$0xff] %v12137_v56  ;;  %v387_v63 = vld [vmem:[%s11988_s25 + $0x380] sm:$0xff]  ;;  %v372_v0 = vld [vmem:[%s11988_s25 + $0x308] sm:$0xff]  ;;  %v12168_v5 = vcombine.low %v340_v52, %v356_v53 }
  0x3e   : > { %9831 = vmatpush3.bf16.msra.mxu1 %v11579_v19  ;;  %9720 = vmatprep.subr.bf16.mxu0 %v11580_v20  ;;  %16638 = vst [vmem:[#allocation13_spill] sm:$0xff] %v12139_v57  ;;  %16639 = vst [vmem:[#allocation14_spill] sm:$0xff] %v12144_v59  ;;  %v388_v1 = vld [vmem:[%s11988_s25 + $0x388] sm:$0xff]  ;;  %v12170_v6 = vcombine.high %v371_v62, %v387_v63  ;;  %v403_v10 = vld [vmem:[%s11988_s25 + $0x400] sm:$0xff]  ;;  %v12194_v16 = vcombine.low %v371_v62, %v387_v63 }
  0x3f   : > { %9832 = vmatprep.subr.bf16.mxu1 %v11581_v21  ;;  %v11600_v2 = vld [vmem:[%s16125_s0 + $0x168] sm:$0xff]   ;;  %16640 = vst [vmem:[#allocation15_spill] sm:$0xff] %v12163_v3  ;;  %16641 = vst [vmem:[#allocation16_spill] sm:$0xff] %v12168_v5  ;;  %v12175_v8 = vcombine.high %v372_v0, %v388_v1  ;;  %v419_v11 = vld [vmem:[%s11988_s25 + $0x480] sm:$0xff]  ;;  %v12199_v18 = vcombine.low %v372_v0, %v388_v1 }
  0x40   : > { %v11601_v4 = vld [vmem:[%s16125_s0 + $0x128] sm:$0xff]   ;;  %16642 = vst [vmem:[#allocation17_spill] sm:$0xff] %v12170_v6  ;;  %v11604_v14 = vld [vmem:[%s16125_s0 + $0x160] sm:$0xff]   ;;  %16644 = vst [vmem:[#allocation19_spill] sm:$0xff] %v12194_v16  ;;  %v12201_v19 = vcombine.high %v403_v10, %v419_v11 }
  0x41   : > { %9721 = vmatpush3.bf16.msra.mxu0 %v11582_v22  ;;  %v11602_v7 = vld [vmem:[%s16125_s0 + $0x1e8] sm:$0xff]   ;;  %16643 = vst [vmem:[#allocation18_spill] sm:$0xff] %v12175_v8  ;;  %v11605_v15 = vld [vmem:[%s16125_s0 + $0x120] sm:$0xff]   ;;  %16645 = vst [vmem:[#allocation20_spill] sm:$0xff] %v12199_v18 }
  0x42   : > { %9833 = vmatpush3.bf16.msra.mxu1 %v11583_v23  ;;  %9722 = vmatprep.subr.bf16.mxu0 %v11584_v24  ;;  %v11603_v9 = vld [vmem:[%s16125_s0 + $0x1a8] sm:$0xff]   ;;  %v11606_v17 = vld [vmem:[%s16125_s0 + $0x1e0] sm:$0xff]   ;;  %16646 = vst [vmem:[#allocation21_spill] sm:$0xff] %v12201_v19  ;;  %v11608_v24 = vld [vmem:[%s16125_s0 + $0x158] sm:$0xff]  }
  0x43   : > { %9834 = vmatprep.subr.bf16.mxu1 %v11585_v25  ;;  %v404_v12 = vld [vmem:[%s11988_s25 + $0x408] sm:$0xff]  ;;  %v11607_v20 = vld [vmem:[%s16125_s0 + $0x1a0] sm:$0xff]   ;;  %v11612_v34 = vld [vmem:[%s16125_s0 + $0x150] sm:$0xff]  }
  0x44   : > { %v420_v13 = vld [vmem:[%s11988_s25 + $0x488] sm:$0xff]  ;;  %v435_v22 = vld [vmem:[%s11988_s25 + $0x500] sm:$0xff] }
  0x45   : > { %9723 = vmatpush3.bf16.msra.mxu0 %v11586_v26  ;;  %v12206_v21 = vcombine.high %v404_v12, %v420_v13  ;;  %v451_v23 = vld [vmem:[%s11988_s25 + $0x580] sm:$0xff]  ;;  %v436_v25 = vld [vmem:[%s11988_s25 + $0x508] sm:$0xff] }
  0x46   : > { %9835 = vmatpush3.bf16.msra.mxu1 %v11587_v27  ;;  %9724 = vmatprep.subr.bf16.mxu0 %v11588_v28  ;;  %v452_v26 = vld [vmem:[%s11988_s25 + $0x588] sm:$0xff]  ;;  %v11609_v27 = vld [vmem:[%s16125_s0 + $0x118] sm:$0xff]   ;;  %v12232_v32 = vcombine.high %v435_v22, %v451_v23  ;;  %v467_v37 = vld [vmem:[%s11988_s25 + $0x600] sm:$0xff]  ;;  %v12256_v47 = vcombine.low %v435_v22, %v451_v23 }
  0x47   : > { %9836 = vmatprep.subr.bf16.mxu1 %v11589_v29  ;;  %16647 = vst [vmem:[#allocation22_spill] sm:$0xff] %v12206_v21  ;;  %v11610_v28 = vld [vmem:[%s16125_s0 + $0x1d8] sm:$0xff]   ;;  %v12234_v33 = vcombine.high %v436_v25, %v452_v26  ;;  %v468_v44 = vld [vmem:[%s11988_s25 + $0x608] sm:$0xff]  ;;  %v12258_v48 = vcombine.low %v436_v25, %v452_v26  ;;  %v11620_v1 = vld [vmem:[%s16125_s0 + $0x140] sm:$0xff]  }
  0x48   : > { %v11611_v29 = vld [vmem:[%s16125_s0 + $0x198] sm:$0xff]   ;;  %16650 = vst [vmem:[#allocation25_spill] sm:$0xff] %v12232_v32  ;;  %v484_v45 = vld [vmem:[%s11988_s25 + $0x688] sm:$0xff]  ;;  %16652 = vst [vmem:[#allocation27_spill] sm:$0xff] %v12256_v47 }
  0x49   : > { %9725 = vmatpush3.bf16.msra.mxu0 %v11590_v30  ;;  %v12228_v30 = vcombine.low %v403_v10, %v419_v11  ;;  %16651 = vst [vmem:[#allocation26_spill] sm:$0xff] %v12234_v33  ;;  %16653 = vst [vmem:[#allocation28_spill] sm:$0xff] %v12258_v48  ;;  %v12262_v51 = vcombine.high %v468_v44, %v484_v45  ;;  %v11616_v52 = vld [vmem:[%s16125_s0 + $0x148] sm:$0xff]   ;;  %v11622_v10 = vld [vmem:[%s16125_s0 + $0x1c0] sm:$0xff]  }
  0x4a   : > { %9837 = vmatpush3.bf16.msra.mxu1 %v11591_v31  ;;  %9934 = vmatprep.subr.bf16.mxu0 %v11592_v40  ;;  %v12230_v31 = vcombine.low %v404_v12, %v420_v13  ;;  %v11613_v40 = vld [vmem:[%s16125_s0 + $0x110] sm:$0xff]   ;;  %v11617_v53 = vld [vmem:[%s16125_s0 + $0x108] sm:$0xff]   ;;  %v11623_v11 = vld [vmem:[%s16125_s0 + $0x180] sm:$0xff]  }
  0x4b   : > { %10046 = vmatprep.subr.bf16.mxu1 %v11594_v42  ;;  %16648 = vst [vmem:[#allocation23_spill] sm:$0xff] %v12228_v30  ;;  %v483_v42 = vld [vmem:[%s11988_s25 + $0x680] sm:$0xff]  ;;  %v500_v62 = vld [vmem:[%s11988_s25 + $0x708] sm:$0xff] }
  0x4c   : > { %5428 = vmatmul.mubr.bf16.vlgmr.msra.gmra.mxu0 %v12093_v35  ;;  %16649 = vst [vmem:[#allocation24_spill] sm:$0xff] %v12230_v31  ;;  %v12260_v49 = vcombine.high %v467_v37, %v483_v42  ;;  %v516_v63 = vld [vmem:[%s11988_s25 + $0x788] sm:$0xff]  ;;  %v12284_v0 = vcombine.low %v467_v37, %v483_v42  ;;  %v531_v12 = vld [vmem:[%s11988_s25 + $0x800] sm:$0xff] }
  0x4d   : > { %5589 = vmatmul.mubr.bf16.vlgmr.msra.gmra.mxu1 %v12098_v38  ;;  %9935 = vmatpush3.bf16.msra.mxu0 %v11593_v41  ;;  %v11614_v41 = vld [vmem:[%s16125_s0 + $0x1d0] sm:$0xff]   ;;  %v547_v13 = vld [vmem:[%s11988_s25 + $0x880] sm:$0xff]  ;;  %v12317_v22 = vcombine.low %v500_v62, %v516_v63 }
  0x4e   : > { %10047 = vmatpush3.bf16.msra.mxu1 %v11595_v43  ;;  %5435 = vmatprep.mubr.bf16.mxu0 %v12120_v46  ;;  %v11615_v43 = vld [vmem:[%s16125_s0 + $0x190] sm:$0xff]   ;;  %16654 = vst [vmem:[#allocation29_spill] sm:$0xff] %v12284_v0  ;;  %v12319_v23 = vcombine.high %v531_v12, %v547_v13  ;;  %v563_v26 = vld [vmem:[%s11988_s25 + $0x900] sm:$0xff] }
  0x4f   : > { %5596 = vmatprep.mubr.bf16.mxu1 %v12125_v50  ;;  %9936 = vmatprep.subr.bf16.mxu0 %v11596_v55  ;;  %v11618_v55 = vld [vmem:[%s16125_s0 + $0x1c8] sm:$0xff]   ;;  %v595_v42 = vld [vmem:[%s11988_s25 + $0xa00] sm:$0xff] }
  0x50   : > { %10048 = vmatprep.subr.bf16.mxu1 %v11598_v60  ;;  %v499_v60 = vld [vmem:[%s11988_s25 + $0x700] sm:$0xff]  ;;  %16656 = vst [vmem:[#allocation31_spill] sm:$0xff] %v12319_v23 }
  0x51   : > { %9937 = vmatpush3.bf16.msra.mxu0 %v11597_v58  ;;  %v11619_v58 = vld [vmem:[%s16125_s0 + $0x188] sm:$0xff]  }
  0x52   : > { %10049 = vmatpush3.bf16.msra.mxu1 %v11599_v61  ;;  %9938 = vmatprep.subr.bf16.mxu0 %v11600_v2  ;;  %v515_v61 = vld [vmem:[%s11988_s25 + $0x780] sm:$0xff]  ;;  %v12289_v2 = vcombine.low %v468_v44, %v484_v45  ;;  %v596_v44 = vld [vmem:[%s11988_s25 + $0xa08] sm:$0xff] }
  0x53   : > { %10050 = vmatprep.subr.bf16.mxu1 %v11602_v7  ;;  %v11621_v7 = vld [vmem:[%s16125_s0 + $0x100] sm:$0xff]   ;;  %v612_v45 = vld [vmem:[%s11988_s25 + $0xa88] sm:$0xff] }
  0x54   : > { %5436 = vmatmul.mubr.bf16.gmra.mxu0 %v12131_v54  ;;  %16655 = vst [vmem:[#allocation30_spill] sm:$0xff] %v12289_v2  ;;  %v344_v54 = vld [vmem:[%s11988_s25 + $0x228] sm:$0xff] }
  0x55   : > { %5597 = vmatmul.mubr.bf16.gmra.mxu1 %v12137_v56  ;;  %5443 = vmatprep.mubr.bf16.mxu0 %v12139_v57 }
  0x56   : > { %5604 = vmatprep.mubr.bf16.mxu1 %v12144_v59  ;;  %9939 = vmatpush3.bf16.msra.mxu0 %v11601_v4  ;;  %v12291_v4 = vcombine.high %v499_v60, %v515_v61 }
  0x57   : > { %10051 = vmatpush3.bf16.msra.mxu1 %v11603_v9  ;;  %9940 = vmatprep.subr.bf16.mxu0 %v11604_v14  ;;  %v12296_v9 = vcombine.high %v500_v62, %v516_v63  ;;  %v532_v14 = vld [vmem:[%s11988_s25 + $0x808] sm:$0xff] }
  0x58   : > { %10052 = vmatprep.subr.bf16.mxu1 %v11606_v17  ;;  %v11624_v17 = vld [vmem:[%s16125_s0 + $0x278] sm:$0xff]   ;;  %v628_v62 = vld [vmem:[%s11988_s25 + $0xb08] sm:$0xff] }
  0x59   : > { %v644_v63 = vld [vmem:[%s11988_s25 + $0xb88] sm:$0xff] }
  0x5a   : > { %9941 = vmatpush3.bf16.msra.mxu0 %v11605_v15  ;;  %v548_v15 = vld [vmem:[%s11988_s25 + $0x888] sm:$0xff] }
  0x5b   : > { %10053 = vmatpush3.bf16.msra.mxu1 %v11607_v20  ;;  %9942 = vmatprep.subr.bf16.mxu0 %v11608_v24  ;;  %v12315_v20 = vcombine.low %v499_v60, %v515_v61  ;;  %v11626_v24 = vld [vmem:[%s16125_s0 + $0x2f8] sm:$0xff]   ;;  %v12324_v25 = vcombine.high %v532_v14, %v548_v15  ;;  %v12336_v37 = vcombine.low %v532_v14, %v548_v15  ;;  %v627_v60 = vld [vmem:[%s11988_s25 + $0xb00] sm:$0xff]  ;;  %v660_v14 = vld [vmem:[%s11988_s25 + $0xc08] sm:$0xff] }
  0x5c   : > { %5444 = vmatmul.mubr.bf16.gmra.mxu0 %v12163_v3  ;;  %10054 = vmatprep.subr.bf16.mxu1 %v11610_v28  ;;  %v564_v28 = vld [vmem:[%s11988_s25 + $0x908] sm:$0xff]  ;;  %v643_v61 = vld [vmem:[%s11988_s25 + $0xb80] sm:$0xff] }
  0x5d   : > { %5605 = vmatmul.mubr.bf16.gmra.mxu1 %v12168_v5  ;;  %5451 = vmatprep.mubr.bf16.mxu0 %v12170_v6  ;;  %16657 = vst [vmem:[#allocation32_spill] sm:$0xff] %v12324_v25  ;;  %16659 = vst [vmem:[#allocation34_spill] sm:$0xff] %v12336_v37  ;;  %v676_v15 = vld [vmem:[%s11988_s25 + $0xc88] sm:$0xff] }
  0x5e   : > { %5612 = vmatprep.mubr.bf16.mxu1 %v12175_v8  ;;  %9943 = vmatpush3.bf16.msra.mxu0 %v11609_v27  ;;  %v579_v27 = vld [vmem:[%s11988_s25 + $0x980] sm:$0xff] }
  0x5f   : > { %10055 = vmatpush3.bf16.msra.mxu1 %v11611_v29  ;;  %9944 = vmatprep.subr.bf16.mxu0 %v11612_v34  ;;  %v580_v29 = vld [vmem:[%s11988_s25 + $0x988] sm:$0xff]  ;;  %v12334_v34 = vcombine.low %v531_v12, %v547_v13  ;;  %v659_v12 = vld [vmem:[%s11988_s25 + $0xc00] sm:$0xff] }
  0x60   : > { %10056 = vmatprep.subr.bf16.mxu1 %v11614_v41  ;;  %v12340_v41 = vcombine.high %v564_v28, %v580_v29  ;;  %v675_v13 = vld [vmem:[%s11988_s25 + $0xc80] sm:$0xff] }
  0x61   : > { %16658 = vst [vmem:[#allocation33_spill] sm:$0xff] %v12334_v34 }
  0x62   : > { %9945 = vmatpush3.bf16.msra.mxu0 %v11613_v40  ;;  %v12338_v40 = vcombine.high %v563_v26, %v579_v27  ;;  %16661 = vst [vmem:[#allocation36_spill] sm:$0xff] %v12340_v41 }
  0x63   : > { %10057 = vmatpush3.bf16.msra.mxu1 %v11615_v43  ;;  %9946 = vmatprep.subr.bf16.mxu0 %v11616_v52  ;;  %v611_v43 = vld [vmem:[%s11988_s25 + $0xa80] sm:$0xff]  ;;  %v12350_v52 = vcombine.low %v563_v26, %v579_v27  ;;  %v12386_v26 = vcombine.high %v659_v12, %v675_v13  ;;  %v12388_v27 = vcombine.high %v660_v14, %v676_v15 }
  0x64   : > { %5452 = vmatmul.mubr.bf16.gmra.mxu0 %v12194_v16  ;;  %10058 = vmatprep.subr.bf16.mxu1 %v11618_v55  ;;  %16660 = vst [vmem:[#allocation35_spill] sm:$0xff] %v12338_v40  ;;  %v12354_v55 = vcombine.high %v595_v42, %v611_v43 }
  0x65   : > { %5613 = vmatmul.mubr.bf16.gmra.mxu1 %v12199_v18  ;;  %5459 = vmatprep.mubr.bf16.mxu0 %v12201_v19  ;;  %16662 = vst [vmem:[#allocation37_spill] sm:$0xff] %v12350_v52  ;;  %16672 = vst [vmem:[#allocation47_spill] sm:$0xff] %v12386_v26 }
  0x66   : > { %5620 = vmatprep.mubr.bf16.mxu1 %v12206_v21  ;;  %9947 = vmatpush3.bf16.msra.mxu0 %v11617_v53  ;;  %v12352_v53 = vcombine.low %v564_v28, %v580_v29  ;;  %16664 = vst [vmem:[#allocation39_spill] sm:$0xff] %v12354_v55  ;;  %16673 = vst [vmem:[#allocation48_spill] sm:$0xff] %v12388_v27  ;;  %v691_v28 = vld [vmem:[%s11988_s25 + $0xd00] sm:$0xff] }
  0x67   : > { %10059 = vmatpush3.bf16.msra.mxu1 %v11619_v58  ;;  %9948 = vmatprep.subr.bf16.mxu0 %v11620_v1  ;;  %v12356_v58 = vcombine.high %v596_v44, %v612_v45  ;;  %v12366_v1 = vcombine.low %v595_v42, %v611_v43  ;;  %v707_v29 = vld [vmem:[%s11988_s25 + $0xd80] sm:$0xff]  ;;  %v692_v42 = vld [vmem:[%s11988_s25 + $0xd08] sm:$0xff] }
  0x68   : > { %10060 = vmatprep.subr.bf16.mxu1 %v11622_v10  ;;  %16663 = vst [vmem:[#allocation38_spill] sm:$0xff] %v12352_v53  ;;  %v12370_v10 = vcombine.high %v627_v60, %v643_v61  ;;  %v708_v43 = vld [vmem:[%s11988_s25 + $0xd88] sm:$0xff] }
  0x69   : > { %16665 = vst [vmem:[#allocation40_spill] sm:$0xff] %v12356_v58  ;;  %16666 = vst [vmem:[#allocation41_spill] sm:$0xff] %v12366_v1 }
  0x6a   : > { %9949 = vmatpush3.bf16.msra.mxu0 %v11621_v7  ;;  %v12368_v7 = vcombine.low %v596_v44, %v612_v45  ;;  %16668 = vst [vmem:[#allocation43_spill] sm:$0xff] %v12370_v10  ;;  %v12398_v44 = vcombine.low %v659_v12, %v675_v13  ;;  %v12400_v45 = vcombine.low %v660_v14, %v676_v15  ;;  %v724_v12 = vld [vmem:[%s11988_s25 + $0xe08] sm:$0xff] }
  0x6b   : > { %10061 = vmatpush3.bf16.msra.mxu1 %v11623_v11  ;;  %10158 = vmatprep.subr.bf16.mxu0 %v11624_v17  ;;  %v12372_v11 = vcombine.high %v628_v62, %v644_v63  ;;  %v12382_v17 = vcombine.low %v627_v60, %v643_v61  ;;  %v12402_v60 = vcombine.high %v691_v28, %v707_v29  ;;  %v740_v13 = vld [vmem:[%s11988_s25 + $0xe88] sm:$0xff] }
  0x6c   : > { %5460 = vmatmul.mubr.bf16.gmra.mxu0 %v12228_v30  ;;  %10270 = vmatprep.subr.bf16.mxu1 %v11626_v24  ;;  %16667 = vst [vmem:[#allocation42_spill] sm:$0xff] %v12368_v7  ;;  %v12384_v24 = vcombine.low %v628_v62, %v644_v63  ;;  %16674 = vst [vmem:[#allocation49_spill] sm:$0xff] %v12398_v44  ;;  %v12404_v61 = vcombine.high %v692_v42, %v708_v43  ;;  %v723_v62 = vld [vmem:[%s11988_s25 + $0xe00] sm:$0xff] }
  0x6d   : > { %5621 = vmatmul.mubr.bf16.gmra.mxu1 %v12230_v31  ;;  %5467 = vmatprep.mubr.bf16.mxu0 %v12232_v32  ;;  %16669 = vst [vmem:[#allocation44_spill] sm:$0xff] %v12372_v11  ;;  %16670 = vst [vmem:[#allocation45_spill] sm:$0xff] %v12382_v17  ;;  %v739_v63 = vld [vmem:[%s11988_s25 + $0xe80] sm:$0xff]  ;;  %v12414_v14 = vcombine.low %v691_v28, %v707_v29  ;;  %v12416_v15 = vcombine.low %v692_v42, %v708_v43  ;;  %v756_v28 = vld [vmem:[%s11988_s25 + $0xf08] sm:$0xff] }
  0x6e   : > { %5628 = vmatprep.mubr.bf16.mxu1 %v12234_v33  ;;  %16671 = vst [vmem:[#allocation46_spill] sm:$0xff] %v12384_v24  ;;  %16675 = vst [vmem:[#allocation50_spill] sm:$0xff] %v12400_v45  ;;  %v772_v29 = vld [vmem:[%s11988_s25 + $0xf88] sm:$0xff]  ;;  %v12430_v42 = vcombine.low %v723_v62, %v739_v63  ;;  %v12432_v43 = vcombine.low %v724_v12, %v740_v13 }
  0x6f   : > { %16676 = vst [vmem:[#allocation51_spill] sm:$0xff] %v12402_v60  ;;  %16677 = vst [vmem:[#allocation52_spill] sm:$0xff] %v12404_v61 }
  0x70   : > { %16678 = vst [vmem:[#allocation53_spill] sm:$0xff] %v12414_v14  ;;  %16679 = vst [vmem:[#allocation54_spill] sm:$0xff] %v12416_v15 }
  0x71   : > { %16682 = vst [vmem:[#allocation57_spill] sm:$0xff] %v12430_v42  ;;  %16683 = vst [vmem:[#allocation58_spill] sm:$0xff] %v12432_v43 }
  0x74   : > { %5468 = vmatmul.mubr.bf16.gmra.mxu0 %v12256_v47 }
  0x75   : > { %5629 = vmatmul.mubr.bf16.gmra.mxu1 %v12258_v48  ;;  %5475 = vmatprep.mubr.bf16.mxu0 %v12260_v49 }
  0x76   : > { %5636 = vmatprep.mubr.bf16.mxu1 %v12262_v51 }
  0x7c   : > { %5476 = vmatmul.mubr.bf16.gmra.mxu0 %v12284_v0 }
  0x7d   : > { %5637 = vmatmul.mubr.bf16.gmra.mxu1 %v12289_v2  ;;  %5483 = vmatprep.mubr.bf16.mxu0 %v12291_v4 }
  0x7e   : > { %5644 = vmatprep.mubr.bf16.mxu1 %v12296_v9 }
  0x84   : > { %5484 = vmatmul.mubr.bf16.gmra.mxu0 %v12315_v20 }
  0x85   : > { %5645 = vmatmul.mubr.bf16.gmra.mxu1 %v12317_v22  ;;  %5491 = vmatprep.mubr.bf16.mxu0 %v12319_v23  ;;  %v771_v23 = vld [vmem:[%s11988_s25 + $0xf80] sm:$0xff] }
  0x86   : > { %5652 = vmatprep.mubr.bf16.mxu1 %v12324_v25  ;;  %v755_v25 = vld [vmem:[%s11988_s25 + $0xf00] sm:$0xff] }
  0x8c   : > { %5492 = vmatmul.mubr.bf16.gmra.mxu0 %v12334_v34  ;;  %v12420_v34 = vcombine.high %v724_v12, %v740_v13  ;;  %v12446_v12 = vcombine.low %v755_v25, %v771_v23  ;;  %v12448_v13 = vcombine.low %v756_v28, %v772_v29 }
  0x8d   : > { %5653 = vmatmul.mubr.bf16.gmra.mxu1 %v12336_v37  ;;  %5499 = vmatprep.mubr.bf16.mxu0 %v12338_v40  ;;  %v12418_v37 = vcombine.high %v723_v62, %v739_v63  ;;  %v293_v40 = vld [vmem:[%s11988_s25 + $0x90] sm:$0xff]  ;;  %v278_v62 = vld [vmem:[%s11988_s25 + $0x18] sm:$0xff] }
  0x8e   : > { %5660 = vmatprep.mubr.bf16.mxu1 %v12340_v41  ;;  %16681 = vst [vmem:[#allocation56_spill] sm:$0xff] %v12420_v34  ;;  %v277_v41 = vld [vmem:[%s11988_s25 + $0x10] sm:$0xff]  ;;  %v294_v63 = vld [vmem:[%s11988_s25 + $0x98] sm:$0xff]  ;;  %16686 = vst [vmem:[#allocation61_spill] sm:$0xff] %v12446_v12 }
  0x8f   : > { %16680 = vst [vmem:[#allocation55_spill] sm:$0xff] %v12418_v37  ;;  %16687 = vst [vmem:[#allocation62_spill] sm:$0xff] %v12448_v13 }
  0x94   : > { %5500 = vmatmul.mubr.bf16.gmra.mxu0 %v12350_v52  ;;  %v12436_v52 = vcombine.high %v756_v28, %v772_v29  ;;  %v12462_v28 = vcombine.low %v277_v41, %v293_v40  ;;  %v12464_v29 = vcombine.low %v278_v62, %v294_v63 }
  0x95   : > { %5661 = vmatmul.mubr.bf16.gmra.mxu1 %v12352_v53  ;;  %5507 = vmatprep.mubr.bf16.mxu0 %v12354_v55  ;;  %v12434_v53 = vcombine.high %v755_v25, %v771_v23  ;;  %v325_v55 = vld [vmem:[%s11988_s25 + $0x190] sm:$0xff]  ;;  %v310_v23 = vld [vmem:[%s11988_s25 + $0x118] sm:$0xff] }
  0x96   : > { %5668 = vmatprep.mubr.bf16.mxu1 %v12356_v58  ;;  %16685 = vst [vmem:[#allocation60_spill] sm:$0xff] %v12436_v52  ;;  %v309_v58 = vld [vmem:[%s11988_s25 + $0x110] sm:$0xff]  ;;  %v326_v25 = vld [vmem:[%s11988_s25 + $0x198] sm:$0xff]  ;;  %16690 = vst [vmem:[#allocation65_spill] sm:$0xff] %v12462_v28 }
  0x97   : > { %16684 = vst [vmem:[#allocation59_spill] sm:$0xff] %v12434_v53  ;;  %16691 = vst [vmem:[#allocation66_spill] sm:$0xff] %v12464_v29 }
  0x9c   : > { %5508 = vmatmul.mubr.bf16.gmra.mxu0 %v12366_v1  ;;  %v12452_v1 = vcombine.high %v278_v62, %v294_v63  ;;  %v11629_v62 = vld [vmem:[%s16125_s0 + $0x230] sm:$0xff]  }
  0x9d   : > { %5669 = vmatmul.mubr.bf16.gmra.mxu1 %v12368_v7  ;;  %5515 = vmatprep.mubr.bf16.mxu0 %v12370_v10  ;;  %v12450_v7 = vcombine.high %v277_v41, %v293_v40  ;;  %v11630_v40 = vld [vmem:[%s16125_s0 + $0x2f0] sm:$0xff]   ;;  %v12480_v41 = vcombine.high %v310_v23, %v326_v25 }
  0x9e   : > { %5676 = vmatprep.mubr.bf16.mxu1 %v12372_v11  ;;  %16689 = vst [vmem:[#allocation64_spill] sm:$0xff] %v12452_v1  ;;  %v341_v63 = vld [vmem:[%s11988_s25 + $0x210] sm:$0xff] }
  0x9f   : > { %16688 = vst [vmem:[#allocation63_spill] sm:$0xff] %v12450_v7  ;;  %16693 = vst [vmem:[#allocation68_spill] sm:$0xff] %v12480_v41  ;;  %v357_v11 = vld [vmem:[%s11988_s25 + $0x290] sm:$0xff] }
  0xa0   : > { %v11631_v10 = vld [vmem:[%s16125_s0 + $0x2b0] sm:$0xff]  }
  0xa4   : > { %5516 = vmatmul.mubr.bf16.gmra.mxu0 %v12382_v17  ;;  %v12475_v17 = vcombine.high %v309_v58, %v325_v55 }
  0xa5   : > { %5677 = vmatmul.mubr.bf16.gmra.mxu1 %v12384_v24  ;;  %5523 = vmatprep.mubr.bf16.mxu0 %v12386_v26  ;;  %v11625_v24 = vld [vmem:[%s16125_s0 + $0x238] sm:$0xff]  }
  0xa6   : > { %5684 = vmatprep.mubr.bf16.mxu1 %v12388_v27  ;;  %16692 = vst [vmem:[#allocation67_spill] sm:$0xff] %v12475_v17  ;;  %v11632_v27 = vld [vmem:[%s16125_s0 + $0x268] sm:$0xff]  }
  0xac   : > { %5524 = vmatmul.mubr.bf16.gmra.mxu0 %v12398_v44  ;;  %v358_v44 = vld [vmem:[%s11988_s25 + $0x298] sm:$0xff] }
  0xad   : > { %5685 = vmatmul.mubr.bf16.gmra.mxu1 %v12400_v45  ;;  %5531 = vmatprep.mubr.bf16.mxu0 %v12402_v60  ;;  %v342_v45 = vld [vmem:[%s11988_s25 + $0x218] sm:$0xff] }
  0xae   : > { %5692 = vmatprep.mubr.bf16.mxu1 %v12404_v61  ;;  %v12511_v26 = vcombine.high %v342_v45, %v358_v44 }
  0xb0   : > { %16697 = vst [vmem:[#allocation72_spill] sm:$0xff] %v12511_v26 }
  0xb4   : > { %5532 = vmatmul.mubr.bf16.gmra.mxu0 %v12414_v14 }
  0xb5   : > { %5693 = vmatmul.mubr.bf16.gmra.mxu1 %v12416_v15  ;;  %5539 = vmatprep.mubr.bf16.mxu0 %v12418_v37 }
  0xb6   : > { %5700 = vmatprep.mubr.bf16.mxu1 %v12420_v34 }
  0xbc   : > { %5540 = vmatmul.mubr.bf16.gmra.mxu0 %v12430_v42 }
  0xbd   : > { %5701 = vmatmul.mubr.bf16.gmra.mxu1 %v12432_v43  ;;  %5547 = vmatprep.mubr.bf16.mxu0 %v12434_v53 }
  0xbe   : > { %5708 = vmatprep.mubr.bf16.mxu1 %v12436_v52 }
  0xc4   : > { %5548 = vmatmul.mubr.bf16.gmra.mxu0 %v12446_v12 }
  0xc5   : > { %5709 = vmatmul.mubr.bf16.gmra.mxu1 %v12448_v13  ;;  %5749 = vmatprep.mubr.bf16.mxu0 %v12450_v7  ;;  %v11627_v7 = vld [vmem:[%s16125_s0 + $0x2b8] sm:$0xff]  }
  0xc6   : > { %5910 = vmatprep.mubr.bf16.mxu1 %v12452_v1  ;;  %v11628_v1 = vld [vmem:[%s16125_s0 + $0x270] sm:$0xff]  }
  0xcc   : > { %5750 = vmatmul.mubr.bf16.vlgmr.msra.gmra.mxu0 %v12462_v28  ;;  %v11634_v28 = vld [vmem:[%s16125_s0 + $0x2e8] sm:$0xff]  }
  0xcd   : > { %5911 = vmatmul.mubr.bf16.vlgmr.msra.gmra.mxu1 %v12464_v29  ;;  %10159 = vmatpush3.bf16.msra.mxu0 %v11625_v24  ;;  %v12502_v29 = vcombine.low %v309_v58, %v325_v55  ;;  %v12504_v24 = vcombine.low %v310_v23, %v326_v25  ;;  %v11635_v55 = vld [vmem:[%s16125_s0 + $0x2a8] sm:$0xff]   ;;  %v11636_v58 = vld [vmem:[%s16125_s0 + $0x260] sm:$0xff]   ;;  %v373_v23 = vld [vmem:[%s11988_s25 + $0x310] sm:$0xff] }
  0xce   : > { %10271 = vmatpush3.bf16.msra.mxu1 %v11627_v7  ;;  %5757 = vmatprep.mubr.bf16.mxu0 %v12475_v17  ;;  %v12506_v7 = vcombine.high %v341_v63, %v357_v11  ;;  %v11633_v17 = vld [vmem:[%s16125_s0 + $0x228] sm:$0xff]   ;;  %v389_v25 = vld [vmem:[%s11988_s25 + $0x390] sm:$0xff] }
  0xcf   : > { %5918 = vmatprep.mubr.bf16.mxu1 %v12480_v41  ;;  %10160 = vmatprep.subr.bf16.mxu0 %v11628_v1  ;;  %16694 = vst [vmem:[#allocation69_spill] sm:$0xff] %v12502_v29  ;;  %16695 = vst [vmem:[#allocation70_spill] sm:$0xff] %v12504_v24  ;;  %v11638_v1 = vld [vmem:[%s16125_s0 + $0x2e0] sm:$0xff]   ;;  %v12544_v41 = vcombine.low %v342_v45, %v358_v44  ;;  %v11646_v44 = vld [vmem:[%s16125_s0 + $0x2d0] sm:$0xff]  }
  0xd0   : > { %10272 = vmatprep.subr.bf16.mxu1 %v11630_v40  ;;  %16696 = vst [vmem:[#allocation71_spill] sm:$0xff] %v12506_v7  ;;  %v390_v40 = vld [vmem:[%s11988_s25 + $0x398] sm:$0xff]  ;;  %v405_v45 = vld [vmem:[%s11988_s25 + $0x410] sm:$0xff] }
  0xd1   : > { %10161 = vmatpush3.bf16.msra.mxu0 %v11629_v62  ;;  %v11639_v62 = vld [vmem:[%s16125_s0 + $0x2a0] sm:$0xff]   ;;  %16699 = vst [vmem:[#allocation74_spill] sm:$0xff] %v12544_v41 }
  0xd2   : > { %10273 = vmatpush3.bf16.msra.mxu1 %v11631_v10  ;;  %10162 = vmatprep.subr.bf16.mxu0 %v11632_v27  ;;  %v11637_v10 = vld [vmem:[%s16125_s0 + $0x220] sm:$0xff]   ;;  %v374_v27 = vld [vmem:[%s11988_s25 + $0x318] sm:$0xff] }
  0xd3   : > { %10274 = vmatprep.subr.bf16.mxu1 %v11634_v28  ;;  %v11640_v28 = vld [vmem:[%s16125_s0 + $0x258] sm:$0xff]  }
  0xd4   : > { %5758 = vmatmul.mubr.bf16.gmra.mxu0 %v12502_v29  ;;  %v11642_v29 = vld [vmem:[%s16125_s0 + $0x2d8] sm:$0xff]  }
  0xd5   : > { %5919 = vmatmul.mubr.bf16.gmra.mxu1 %v12504_v24  ;;  %5765 = vmatprep.mubr.bf16.mxu0 %v12506_v7  ;;  %v12542_v24 = vcombine.low %v341_v63, %v357_v11  ;;  %v12546_v7 = vcombine.high %v373_v23, %v389_v25  ;;  %v11644_v11 = vld [vmem:[%s16125_s0 + $0x250] sm:$0xff]   ;;  %v12557_v63 = vcombine.high %v374_v27, %v390_v40 }
  0xd6   : > { %5926 = vmatprep.mubr.bf16.mxu1 %v12511_v26  ;;  %10163 = vmatpush3.bf16.msra.mxu0 %v11633_v17  ;;  %v11641_v17 = vld [vmem:[%s16125_s0 + $0x218] sm:$0xff]  }
  0xd7   : > { %10275 = vmatpush3.bf16.msra.mxu1 %v11635_v55  ;;  %10164 = vmatprep.subr.bf16.mxu0 %v11636_v58  ;;  %16698 = vst [vmem:[#allocation73_spill] sm:$0xff] %v12542_v24  ;;  %16700 = vst [vmem:[#allocation75_spill] sm:$0xff] %v12546_v7  ;;  %v11643_v26 = vld [vmem:[%s16125_s0 + $0x298] sm:$0xff]   ;;  %v421_v55 = vld [vmem:[%s11988_s25 + $0x490] sm:$0xff] }
  0xd8   : > { %10276 = vmatprep.subr.bf16.mxu1 %v11638_v1  ;;  %16701 = vst [vmem:[#allocation76_spill] sm:$0xff] %v12557_v63  ;;  %v11645_v58 = vld [vmem:[%s16125_s0 + $0x210] sm:$0xff]   ;;  %v406_v1 = vld [vmem:[%s11988_s25 + $0x418] sm:$0xff] }
  0xda   : > { %10165 = vmatpush3.bf16.msra.mxu0 %v11637_v10  ;;  %v422_v10 = vld [vmem:[%s11988_s25 + $0x498] sm:$0xff] }
  0xdb   : > { %10277 = vmatpush3.bf16.msra.mxu1 %v11639_v62  ;;  %10166 = vmatprep.subr.bf16.mxu0 %v11640_v28  ;;  %v11647_v62 = vld [vmem:[%s16125_s0 + $0x290] sm:$0xff]   ;;  %v11650_v28 = vld [vmem:[%s16125_s0 + $0x2c8] sm:$0xff]  }
  0xdc   : > { %5766 = vmatmul.mubr.bf16.gmra.mxu0 %v12542_v24  ;;  %10278 = vmatprep.subr.bf16.mxu1 %v11642_v29  ;;  %v11648_v29 = vld [vmem:[%s16125_s0 + $0x248] sm:$0xff]   ;;  %v12584_v24 = vcombine.low %v374_v27, %v390_v40  ;;  %v437_v27 = vld [vmem:[%s11988_s25 + $0x510] sm:$0xff] }
  0xdd   : > { %5927 = vmatmul.mubr.bf16.gmra.mxu1 %v12544_v41  ;;  %5773 = vmatprep.mubr.bf16.mxu0 %v12546_v7  ;;  %v12582_v41 = vcombine.low %v373_v23, %v389_v25  ;;  %v12586_v7 = vcombine.high %v405_v45, %v421_v55  ;;  %v11652_v23 = vld [vmem:[%s16125_s0 + $0x240] sm:$0xff]   ;;  %v453_v40 = vld [vmem:[%s11988_s25 + $0x590] sm:$0xff] }
  0xde   : > { %5934 = vmatprep.mubr.bf16.mxu1 %v12557_v63  ;;  %10167 = vmatpush3.bf16.msra.mxu0 %v11641_v17  ;;  %16703 = vst [vmem:[#allocation78_spill] sm:$0xff] %v12584_v24  ;;  %v11649_v17 = vld [vmem:[%s16125_s0 + $0x208] sm:$0xff]   ;;  %v12591_v63 = vcombine.high %v406_v1, %v422_v10  ;;  %v11654_v25 = vld [vmem:[%s16125_s0 + $0x2c0] sm:$0xff]  }
  0xdf   : > { %10279 = vmatpush3.bf16.msra.mxu1 %v11643_v26  ;;  %10168 = vmatprep.subr.bf16.mxu0 %v11644_v11  ;;  %16702 = vst [vmem:[#allocation77_spill] sm:$0xff] %v12582_v41  ;;  %16704 = vst [vmem:[#allocation79_spill] sm:$0xff] %v12586_v7  ;;  %v11651_v26 = vld [vmem:[%s16125_s0 + $0x288] sm:$0xff]   ;;  %v11653_v11 = vld [vmem:[%s16125_s0 + $0x200] sm:$0xff]  }
  0xe0   : > { %10280 = vmatprep.subr.bf16.mxu1 %v11646_v44  ;;  %16705 = vst [vmem:[#allocation80_spill] sm:$0xff] %v12591_v63  ;;  %v438_v44 = vld [vmem:[%s11988_s25 + $0x518] sm:$0xff] }
  0xe2   : > { %10169 = vmatpush3.bf16.msra.mxu0 %v11645_v58  ;;  %v454_v58 = vld [vmem:[%s11988_s25 + $0x598] sm:$0xff] }
  0xe3   : > { %10281 = vmatpush3.bf16.msra.mxu1 %v11647_v62  ;;  %10170 = vmatprep.subr.bf16.mxu0 %v11648_v29  ;;  %v11655_v62 = vld [vmem:[%s16125_s0 + $0x280] sm:$0xff]   ;;  %v11656_v29 = vld [vmem:[%s16125_s0 + $0x378] sm:$0xff]   ;;  %v12628_v15 = vcombine.high %v438_v44, %v454_v58 }
  0xe4   : > { %5774 = vmatmul.mubr.bf16.gmra.mxu0 %v12582_v41  ;;  %10282 = vmatprep.subr.bf16.mxu1 %v11650_v28  ;;  %v11658_v28 = vld [vmem:[%s16125_s0 + $0x3f8] sm:$0xff]   ;;  %v12624_v41 = vcombine.low %v406_v1, %v422_v10  ;;  %v12638_v1 = vcombine.low %v437_v27, %v453_v40  ;;  %v12640_v10 = vcombine.low %v438_v44, %v454_v58 }
  0xe5   : > { %5935 = vmatmul.mubr.bf16.gmra.mxu1 %v12584_v24  ;;  %5781 = vmatprep.mubr.bf16.mxu0 %v12586_v7  ;;  %v12622_v24 = vcombine.low %v405_v45, %v421_v55  ;;  %v12626_v7 = vcombine.high %v437_v27, %v453_v40  ;;  %16709 = vst [vmem:[#allocation84_spill] sm:$0xff] %v12628_v15  ;;  %v470_v45 = vld [vmem:[%s11988_s25 + $0x618] sm:$0xff] }
  0xe6   : > { %5942 = vmatprep.mubr.bf16.mxu1 %v12591_v63  ;;  %10171 = vmatpush3.bf16.msra.mxu0 %v11649_v17  ;;  %16707 = vst [vmem:[#allocation82_spill] sm:$0xff] %v12624_v41  ;;  %v469_v17 = vld [vmem:[%s11988_s25 + $0x610] sm:$0xff]  ;;  %v486_v55 = vld [vmem:[%s11988_s25 + $0x698] sm:$0xff]  ;;  %16710 = vst [vmem:[#allocation85_spill] sm:$0xff] %v12638_v1 }
  0xe7   : > { %10283 = vmatpush3.bf16.msra.mxu1 %v11651_v26  ;;  %10172 = vmatprep.subr.bf16.mxu0 %v11652_v23  ;;  %16706 = vst [vmem:[#allocation81_spill] sm:$0xff] %v12622_v24  ;;  %16708 = vst [vmem:[#allocation83_spill] sm:$0xff] %v12626_v7  ;;  %v485_v26 = vld [vmem:[%s11988_s25 + $0x690] sm:$0xff]  ;;  %v502_v27 = vld [vmem:[%s11988_s25 + $0x718] sm:$0xff]  ;;  %v12656_v58 = vcombine.low %v470_v45, %v486_v55 }
  0xe8   : > { %10284 = vmatprep.subr.bf16.mxu1 %v11654_v25  ;;  %16711 = vst [vmem:[#allocation86_spill] sm:$0xff] %v12640_v10  ;;  %v12642_v23 = vcombine.high %v469_v17, %v485_v26  ;;  %v12644_v25 = vcombine.high %v470_v45, %v486_v55  ;;  %v518_v40 = vld [vmem:[%s11988_s25 + $0x798] sm:$0xff]  ;;  %v12654_v44 = vcombine.low %v469_v17, %v485_v26 }
  0xe9   : > { %16715 = vst [vmem:[#allocation90_spill] sm:$0xff] %v12656_v58  ;;  %v534_v17 = vld [vmem:[%s11988_s25 + $0x818] sm:$0xff]  ;;  %v12672_v55 = vcombine.low %v502_v27, %v518_v40 }
  0xea   : > { %10173 = vmatpush3.bf16.msra.mxu0 %v11653_v11  ;;  %16712 = vst [vmem:[#allocation87_spill] sm:$0xff] %v12642_v23  ;;  %16713 = vst [vmem:[#allocation88_spill] sm:$0xff] %v12644_v25  ;;  %v501_v11 = vld [vmem:[%s11988_s25 + $0x710] sm:$0xff]  ;;  %v550_v26 = vld [vmem:[%s11988_s25 + $0x898] sm:$0xff] }
  0xeb   : > { %10285 = vmatpush3.bf16.msra.mxu1 %v11655_v62  ;;  %10382 = vmatprep.subr.bf16.mxu0 %v11656_v29  ;;  %v517_v62 = vld [vmem:[%s11988_s25 + $0x790] sm:$0xff]  ;;  %16714 = vst [vmem:[#allocation89_spill] sm:$0xff] %v12654_v44  ;;  %16719 = vst [vmem:[#allocation94_spill] sm:$0xff] %v12672_v55 }
  0xec   : > { %5782 = vmatmul.mubr.bf16.gmra.mxu0 %v12622_v24  ;;  %10494 = vmatprep.subr.bf16.mxu1 %v11658_v28  ;;  %v12658_v29 = vcombine.high %v501_v11, %v517_v62  ;;  %v12660_v28 = vcombine.high %v502_v27, %v518_v40  ;;  %v549_v24 = vld [vmem:[%s11988_s25 + $0x890] sm:$0xff]  ;;  %v12670_v45 = vcombine.low %v501_v11, %v517_v62  ;;  %v582_v11 = vld [vmem:[%s11988_s25 + $0x998] sm:$0xff] }
  0xed   : > { %5943 = vmatmul.mubr.bf16.gmra.mxu1 %v12624_v41  ;;  %5789 = vmatprep.mubr.bf16.mxu0 %v12626_v7  ;;  %v533_v41 = vld [vmem:[%s11988_s25 + $0x810] sm:$0xff]  ;;  %v566_v7 = vld [vmem:[%s11988_s25 + $0x918] sm:$0xff]  ;;  %v12688_v27 = vcombine.low %v534_v17, %v550_v26 }
  0xee   : > { %5950 = vmatprep.mubr.bf16.mxu1 %v12628_v15  ;;  %16716 = vst [vmem:[#allocation91_spill] sm:$0xff] %v12658_v29  ;;  %16717 = vst [vmem:[#allocation92_spill] sm:$0xff] %v12660_v28  ;;  %v12674_v63 = vcombine.high %v533_v41, %v549_v24  ;;  %v581_v15 = vld [vmem:[%s11988_s25 + $0x990] sm:$0xff]  ;;  %v12686_v62 = vcombine.low %v533_v41, %v549_v24  ;;  %v598_v41 = vld [vmem:[%s11988_s25 + $0xa18] sm:$0xff] }
  0xef   : > { %16718 = vst [vmem:[#allocation93_spill] sm:$0xff] %v12670_v45  ;;  %16723 = vst [vmem:[#allocation98_spill] sm:$0xff] %v12688_v27  ;;  %v614_v24 = vld [vmem:[%s11988_s25 + $0xa98] sm:$0xff] }
  0xf0   : > { %16720 = vst [vmem:[#allocation95_spill] sm:$0xff] %v12674_v63  ;;  %16722 = vst [vmem:[#allocation97_spill] sm:$0xff] %v12686_v62  ;;  %v12710_v14 = vcombine.high %v598_v41, %v614_v24  ;;  %v12724_v43 = vcombine.low %v598_v41, %v614_v24 }
  0xf2   : > { %16729 = vst [vmem:[#allocation104_spill] sm:$0xff] %v12710_v14  ;;  %16731 = vst [vmem:[#allocation106_spill] sm:$0xff] %v12724_v43 }
  0xf4   : > { %5790 = vmatmul.mubr.bf16.gmra.mxu0 %v12638_v1  ;;  %v565_v1 = vld [vmem:[%s11988_s25 + $0x910] sm:$0xff] }
  0xf5   : > { %5951 = vmatmul.mubr.bf16.gmra.mxu1 %v12640_v10  ;;  %5797 = vmatprep.mubr.bf16.mxu0 %v12642_v23  ;;  %v12676_v10 = vcombine.high %v534_v17, %v550_v26  ;;  %v12690_v40 = vcombine.high %v565_v1, %v581_v15  ;;  %v613_v23 = vld [vmem:[%s11988_s25 + $0xa90] sm:$0xff] }
  0xf6   : > { %5958 = vmatprep.mubr.bf16.mxu1 %v12644_v25  ;;  %v597_v25 = vld [vmem:[%s11988_s25 + $0xa10] sm:$0xff] }
  0xf7   : > { %16721 = vst [vmem:[#allocation96_spill] sm:$0xff] %v12676_v10  ;;  %16724 = vst [vmem:[#allocation99_spill] sm:$0xff] %v12690_v40 }
  0xfc   : > { %5798 = vmatmul.mubr.bf16.gmra.mxu0 %v12654_v44 }
  0xfd   : > { %5959 = vmatmul.mubr.bf16.gmra.mxu1 %v12656_v58  ;;  %5805 = vmatprep.mubr.bf16.mxu0 %v12658_v29  ;;  %v12692_v58 = vcombine.high %v566_v7, %v582_v11  ;;  %v12704_v29 = vcombine.low %v566_v7, %v582_v11  ;;  %v630_v7 = vld [vmem:[%s11988_s25 + $0xb18] sm:$0xff] }
  0xfe   : > { %5966 = vmatprep.mubr.bf16.mxu1 %v12660_v28  ;;  %v12702_v28 = vcombine.low %v565_v1, %v581_v15  ;;  %v629_v15 = vld [vmem:[%s11988_s25 + $0xb10] sm:$0xff]  ;;  %v646_v11 = vld [vmem:[%s11988_s25 + $0xb98] sm:$0xff] }
  0xff   : > { %16725 = vst [vmem:[#allocation100_spill] sm:$0xff] %v12692_v58  ;;  %16727 = vst [vmem:[#allocation102_spill] sm:$0xff] %v12704_v29 }
 0x100   : > { %16726 = vst [vmem:[#allocation101_spill] sm:$0xff] %v12702_v28 }
 0x104   : > { %5806 = vmatmul.mubr.bf16.gmra.mxu0 %v12670_v45 }
 0x105   : > { %5967 = vmatmul.mubr.bf16.gmra.mxu1 %v12672_v55  ;;  %5813 = vmatprep.mubr.bf16.mxu0 %v12674_v63 }
 0x106   : > { %5974 = vmatprep.mubr.bf16.mxu1 %v12676_v10 }
 0x10c   : > { %v9726_v44 = vpop.f32.mrf.mxu0  ;;  %5814 = vmatmul.mubr.bf16.gmra.mxu0 %v12686_v62 }
 0x10d   : > { %v9838_v63 = vpop.f32.mrf.mxu1  ;;  %5975 = vmatmul.mubr.bf16.gmra.mxu1 %v12688_v27  ;;  %5821 = vmatprep.mubr.bf16.mxu0 %v12690_v40  ;;  %v12706_v27 = vcombine.high %v597_v25, %v613_v23 }
 0x10e   : > { %v9727_v55 = vpop.f32.mrf.mxu0  ;;  %5982 = vmatprep.mubr.bf16.mxu1 %v12692_v58 }
 0x10f   : > { %v9728_v17 = vadd.f32 %v9727_v55, %v9726_v44  ;;  %v9839_v26 = vpop.f32.mrf.mxu1  ;;  %16728 = vst [vmem:[#allocation103_spill] sm:$0xff] %v12706_v27 }
 0x110   : > { %v9840_v10 = vadd.f32 %v9839_v26, %v9838_v63  ;;  %v9729_v45 = vpop.f32.mrf.mxu0  ;;  %v645_v63 = vld [vmem:[%s11988_s25 + $0xb90] sm:$0xff] }
 0x111   : > { %v9841_v62 = vpop.f32.mrf.mxu1 }
 0x112   : > { %v12708_v40 = vadd.f32 %v9840_v10, %v9728_v17  ;;  %v9730_v58 = vpop.f32.mrf.mxu0 }
 0x113   : > { %v9731_v44 = vadd.f32 %v9730_v58, %v9729_v45  ;;  %v9842_v55 = vpop.f32.mrf.mxu1 }
 0x114   : > { %v9843_v61 = vadd.f32 %v9842_v55, %v9841_v62  ;;  %v9732_v60 = vpop.f32.mrf.mxu0  ;;  %5822 = vmatmul.mubr.bf16.gmra.mxu0 %v12702_v28  ;;  %v12722_v55 = vcombine.low %v597_v25, %v613_v23  ;;  %v661_v23 = vld [vmem:[%s11988_s25 + $0xc10] sm:$0xff] }
 0x115   : > { %v9844_v1 = vpop.f32.mrf.mxu1  ;;  %5983 = vmatmul.mubr.bf16.gmra.mxu1 %v12704_v29  ;;  %5829 = vmatprep.mubr.bf16.mxu0 %v12706_v27  ;;  %v12726_v29 = vcombine.high %v629_v15, %v645_v63  ;;  %v677_v25 = vld [vmem:[%s11988_s25 + $0xc90] sm:$0xff] }
 0x116   : > { %v12719_v10 = vadd.f32 %v9843_v61, %v9731_v44  ;;  %v9733_v17 = vpop.f32.mrf.mxu0  ;;  %5990 = vmatprep.mubr.bf16.mxu1 %v12710_v14  ;;  %16730 = vst [vmem:[#allocation105_spill] sm:$0xff] %v12722_v55  ;;  %v12730_v44 = vcombine.high %v630_v7, %v646_v11 }
 0x117   : > { %v9734_v58 = vadd.f32 %v9733_v17, %v9732_v60  ;;  %v9845_v45 = vpop.f32.mrf.mxu1  ;;  %16732 = vst [vmem:[#allocation107_spill] sm:$0xff] %v12726_v29 }
 0x118   : > { %v9846_v62 = vadd.f32 %v9845_v45, %v9844_v1  ;;  %v9735_v26 = vpop.f32.mrf.mxu0  ;;  %16733 = vst [vmem:[#allocation108_spill] sm:$0xff] %v12730_v44 }
 0x119   : > { %v9847_v28 = vpop.f32.mrf.mxu1 }
 0x11a   : > { %v12728_v27 = vadd.f32 %v9846_v62, %v9734_v58  ;;  %v9736_v61 = vpop.f32.mrf.mxu0  ;;  %v662_v62 = vld [vmem:[%s11988_s25 + $0xc18] sm:$0xff] }
 0x11b   : > { %v9737_v14 = vadd.f32 %v9736_v61, %v9735_v26  ;;  %v9848_v60 = vpop.f32.mrf.mxu1 }
 0x11c   : > { %v9849_v17 = vadd.f32 %v9848_v60, %v9847_v28  ;;  %v9738_v42 = vpop.f32.mrf.mxu0  ;;  %5830 = vmatmul.mubr.bf16.gmra.mxu0 %v12722_v55  ;;  %v678_v28 = vld [vmem:[%s11988_s25 + $0xc98] sm:$0xff]  ;;  %v12742_v60 = vcombine.low %v629_v15, %v645_v63  ;;  %v693_v15 = vld [vmem:[%s11988_s25 + $0xd10] sm:$0xff] }
 0x11d   : > { %v9850_v1 = vpop.f32.mrf.mxu1  ;;  %5991 = vmatmul.mubr.bf16.gmra.mxu1 %v12724_v43  ;;  %5837 = vmatprep.mubr.bf16.mxu0 %v12726_v29  ;;  %v12744_v43 = vcombine.low %v630_v7, %v646_v11  ;;  %v709_v63 = vld [vmem:[%s11988_s25 + $0xd90] sm:$0xff]  ;;  %v694_v7 = vld [vmem:[%s11988_s25 + $0xd18] sm:$0xff]  ;;  %v12764_v13 = vcombine.low %v662_v62, %v678_v28 }
 0x11e   : > { %v12737_v41 = vadd.f32 %v9849_v17, %v9737_v14  ;;  %v9739_v24 = vpop.f32.mrf.mxu0  ;;  %5998 = vmatprep.mubr.bf16.mxu1 %v12730_v44  ;;  %16734 = vst [vmem:[#allocation109_spill] sm:$0xff] %v12742_v60  ;;  %v12746_v14 = vcombine.high %v661_v23, %v677_v25  ;;  %v710_v11 = vld [vmem:[%s11988_s25 + $0xd98] sm:$0xff] }
 0x11f   : > { %v9740_v58 = vadd.f32 %v9739_v24, %v9738_v42  ;;  %v9851_v45 = vpop.f32.mrf.mxu1  ;;  %16735 = vst [vmem:[#allocation110_spill] sm:$0xff] %v12744_v43  ;;  %v12750_v42 = vcombine.high %v662_v62, %v678_v28  ;;  %16739 = vst [vmem:[#allocation114_spill] sm:$0xff] %v12764_v13 }
 0x120   : > { %v9852_v26 = vadd.f32 %v9851_v45, %v9850_v1  ;;  %v9741_v61 = vpop.f32.mrf.mxu0  ;;  %16736 = vst [vmem:[#allocation111_spill] sm:$0xff] %v12746_v14 }
 0x121   : > { %v9853_v55 = vpop.f32.mrf.mxu1  ;;  %16737 = vst [vmem:[#allocation112_spill] sm:$0xff] %v12750_v42 }
 0x122   : > { %v12748_v17 = vadd.f32 %v9852_v26, %v9740_v58  ;;  %v9742_v44 = vpop.f32.mrf.mxu0 }
 0x123   : > { %v9743_v24 = vadd.f32 %v9742_v44, %v9741_v61  ;;  %v9854_v29 = vpop.f32.mrf.mxu1  ;;  %v12762_v61 = vcombine.low %v661_v23, %v677_v25  ;;  %v725_v23 = vld [vmem:[%s11988_s25 + $0xe10] sm:$0xff] }
 0x124   : > { %v9855_v34 = vadd.f32 %v9854_v29, %v9853_v55  ;;  %v9744_v37 = vpop.f32.mrf.mxu0  ;;  %5838 = vmatmul.mubr.bf16.gmra.mxu0 %v12742_v60  ;;  %v741_v25 = vld [vmem:[%s11988_s25 + $0xe90] sm:$0xff] }
 0x125   : > { %v9856_v1 = vpop.f32.mrf.mxu1  ;;  %5999 = vmatmul.mubr.bf16.gmra.mxu1 %v12744_v43  ;;  %5845 = vmatprep.mubr.bf16.mxu0 %v12746_v14  ;;  %16738 = vst [vmem:[#allocation113_spill] sm:$0xff] %v12762_v61  ;;  %v12766_v43 = vcombine.high %v693_v15, %v709_v63 }
 0x126   : > { %v12759_v58 = vadd.f32 %v9855_v34, %v9743_v24  ;;  %v9745_v45 = vpop.f32.mrf.mxu0  ;;  %6006 = vmatprep.mubr.bf16.mxu1 %v12750_v42  ;;  %v12770_v24 = vcombine.high %v694_v7, %v710_v11 }
 0x127   : > { %v9746_v44 = vadd.f32 %v9745_v45, %v9744_v37  ;;  %v9857_v29 = vpop.f32.mrf.mxu1  ;;  %16740 = vst [vmem:[#allocation115_spill] sm:$0xff] %v12766_v43 }
 0x128   : > { %v9858_v55 = vadd.f32 %v9857_v29, %v9856_v1  ;;  %v9747_v26 = vpop.f32.mrf.mxu0  ;;  %16741 = vst [vmem:[#allocation116_spill] sm:$0xff] %v12770_v24 }
 0x129   : > { %v9859_v60 = vpop.f32.mrf.mxu1 }
 0x12a   : > { %v12768_v14 = vadd.f32 %v9858_v55, %v9746_v44  ;;  %v9748_v34 = vpop.f32.mrf.mxu0  ;;  %v726_v55 = vld [vmem:[%s11988_s25 + $0xe18] sm:$0xff] }
 0x12b   : > { %v9749_v42 = vadd.f32 %v9748_v34, %v9747_v26  ;;  %v9860_v37 = vpop.f32.mrf.mxu1 }
 0x12c   : > { %v9861_v45 = vadd.f32 %v9860_v37, %v9859_v60  ;;  %v9750_v12 = vpop.f32.mrf.mxu0  ;;  %5846 = vmatmul.mubr.bf16.gmra.mxu0 %v12762_v61  ;;  %v742_v60 = vld [vmem:[%s11988_s25 + $0xe98] sm:$0xff]  ;;  %v12782_v37 = vcombine.low %v693_v15, %v709_v63  ;;  %v757_v15 = vld [vmem:[%s11988_s25 + $0xf10] sm:$0xff] }
 0x12d   : > { %v9862_v1 = vpop.f32.mrf.mxu1  ;;  %6007 = vmatmul.mubr.bf16.gmra.mxu1 %v12764_v13  ;;  %5853 = vmatprep.mubr.bf16.mxu0 %v12766_v43  ;;  %v12784_v13 = vcombine.low %v694_v7, %v710_v11  ;;  %v773_v63 = vld [vmem:[%s11988_s25 + $0xf90] sm:$0xff]  ;;  %v758_v7 = vld [vmem:[%s11988_s25 + $0xf18] sm:$0xff]  ;;  %v12804_v38 = vcombine.low %v726_v55, %v742_v60 }
 0x12e   : > { %v12777_v62 = vadd.f32 %v9861_v45, %v9749_v42  ;;  %v9751_v28 = vpop.f32.mrf.mxu0  ;;  %6014 = vmatprep.mubr.bf16.mxu1 %v12770_v24  ;;  %16742 = vst [vmem:[#allocation117_spill] sm:$0xff] %v12782_v37  ;;  %v12786_v42 = vcombine.high %v725_v23, %v741_v25  ;;  %v774_v11 = vld [vmem:[%s11988_s25 + $0xf98] sm:$0xff]  ;;  %v12822_v35 = vcombine.low %v757_v15, %v773_v63 }
 0x12f   : > { %v9752_v44 = vadd.f32 %v9751_v28, %v9750_v12  ;;  %v9863_v29 = vpop.f32.mrf.mxu1  ;;  %16743 = vst [vmem:[#allocation118_spill] sm:$0xff] %v12784_v13  ;;  %v12790_v12 = vcombine.high %v726_v55, %v742_v60  ;;  %16747 = vst [vmem:[#allocation122_spill] sm:$0xff] %v12804_v38  ;;  %v279_v60 = vld [vmem:[%s11988_s25 + $0x20] sm:$0xff]  ;;  %v12824_v39 = vcombine.low %v758_v7, %v774_v11 }
 0x130   : > { %v9864_v26 = vadd.f32 %v9863_v29, %v9862_v1  ;;  %v9753_v34 = vpop.f32.mrf.mxu0  ;;  %16744 = vst [vmem:[#allocation119_spill] sm:$0xff] %v12786_v42  ;;  %16750 = vst [vmem:[#allocation125_spill] sm:$0xff] %v12822_v35 }
 0x131   : > { %v9865_v61 = vpop.f32.mrf.mxu1  ;;  %16745 = vst [vmem:[#allocation120_spill] sm:$0xff] %v12790_v12  ;;  %16751 = vst [vmem:[#allocation126_spill] sm:$0xff] %v12824_v39 }
 0x132   : > { %v12788_v45 = vadd.f32 %v9864_v26, %v9752_v44  ;;  %v9754_v24 = vpop.f32.mrf.mxu0 }
 0x133   : > { %v9755_v28 = vadd.f32 %v9754_v24, %v9753_v34  ;;  %v9866_v43 = vpop.f32.mrf.mxu1  ;;  %v12802_v34 = vcombine.low %v725_v23, %v741_v25 }
 0x134   : > { %v9867_v52 = vadd.f32 %v9866_v43, %v9865_v61  ;;  %v9756_v53 = vpop.f32.mrf.mxu0  ;;  %5854 = vmatmul.mubr.bf16.gmra.mxu0 %v12782_v37 }
 0x135   : > { %v9868_v1 = vpop.f32.mrf.mxu1  ;;  %6015 = vmatmul.mubr.bf16.gmra.mxu1 %v12784_v13  ;;  %5861 = vmatprep.mubr.bf16.mxu0 %v12786_v42  ;;  %16746 = vst [vmem:[#allocation121_spill] sm:$0xff] %v12802_v34  ;;  %v12806_v13 = vcombine.high %v757_v15, %v773_v63 }
 0x136   : > { %v12799_v44 = vadd.f32 %v9867_v52, %v9755_v28  ;;  %v9757_v29 = vpop.f32.mrf.mxu0  ;;  %6022 = vmatprep.mubr.bf16.mxu1 %v12790_v12  ;;  %v12810_v28 = vcombine.high %v758_v7, %v774_v11 }
 0x137   : > { %v9758_v24 = vadd.f32 %v9757_v29, %v9756_v53  ;;  %v9869_v26 = vpop.f32.mrf.mxu1  ;;  %16748 = vst [vmem:[#allocation123_spill] sm:$0xff] %v12806_v13 }
 0x138   : > { %v9870_v43 = vadd.f32 %v9869_v26, %v9868_v1  ;;  %v9759_v61 = vpop.f32.mrf.mxu0  ;;  %16749 = vst [vmem:[#allocation124_spill] sm:$0xff] %v12810_v28 }
 0x139   : > { %v9871_v37 = vpop.f32.mrf.mxu1 }
 0x13a   : > { %v12808_v42 = vadd.f32 %v9870_v43, %v9758_v24  ;;  %v9760_v52 = vpop.f32.mrf.mxu0  ;;  %v295_v24 = vld [vmem:[%s11988_s25 + $0xa0] sm:$0xff] }
 0x13b   : > { %v9761_v12 = vadd.f32 %v9760_v52, %v9759_v61  ;;  %v9872_v53 = vpop.f32.mrf.mxu1  ;;  %v280_v61 = vld [vmem:[%s11988_s25 + $0x28] sm:$0xff] }
 0x13c   : > { %v9873_v1 = vadd.f32 %v9872_v53, %v9871_v37  ;;  %v9762_v29 = vpop.f32.mrf.mxu0  ;;  %5862 = vmatmul.mubr.bf16.gmra.mxu0 %v12802_v34  ;;  %v296_v52 = vld [vmem:[%s11988_s25 + $0xa8] sm:$0xff] }
 0x13d   : > { %v9874_v23 = vpop.f32.mrf.mxu1  ;;  %6023 = vmatmul.mubr.bf16.gmra.mxu1 %v12804_v38  ;;  %5869 = vmatprep.mubr.bf16.mxu0 %v12806_v13  ;;  %v12826_v38 = vcombine.high %v279_v60, %v295_v24  ;;  %v12844_v56 = vcombine.low %v280_v61, %v296_v52 }
 0x13e   : > { %v12815_v25 = vadd.f32 %v9873_v1, %v9761_v12  ;;  %v9763_v55 = vpop.f32.mrf.mxu0  ;;  %6030 = vmatprep.mubr.bf16.mxu1 %v12810_v28  ;;  %v12830_v28 = vcombine.high %v280_v61, %v296_v52  ;;  %v11660_v61 = vld [vmem:[%s16125_s0 + $0x370] sm:$0xff]  }
 0x13f   : > { %v9764_v26 = vadd.f32 %v9763_v55, %v9762_v29  ;;  %v9875_v43 = vpop.f32.mrf.mxu1  ;;  %16752 = vst [vmem:[#allocation127_spill] sm:$0xff] %v12826_v38  ;;  %16755 = vst [vmem:[#allocation130_spill] sm:$0xff] %v12844_v56 }
 0x140   : > { %v9876_v37 = vadd.f32 %v9875_v43, %v9874_v23  ;;  %v9765_v53 = vpop.f32.mrf.mxu0  ;;  %16753 = vst [vmem:[#allocation128_spill] sm:$0xff] %v12830_v28  ;;  %v311_v43 = vld [vmem:[%s11988_s25 + $0x120] sm:$0xff] }
 0x141   : > { %v9877_v34 = vpop.f32.mrf.mxu1 }
 0x142   : > { %v12828_v12 = vadd.f32 %v9876_v37, %v9764_v26  ;;  %v9766_v1 = vpop.f32.mrf.mxu0  ;;  %v327_v37 = vld [vmem:[%s11988_s25 + $0x1a0] sm:$0xff] }
 0x143   : > { %v9767_v29 = vadd.f32 %v9766_v1, %v9765_v53  ;;  %v9878_v55 = vpop.f32.mrf.mxu1  ;;  %v12840_v1 = vcombine.low %v279_v60, %v295_v24  ;;  %v12886_v50 = vcombine.low %v311_v43, %v327_v37 }
 0x144   : > { %v9879_v13 = vadd.f32 %v9878_v55, %v9877_v34  ;;  %v9768_v23 = vpop.f32.mrf.mxu0  ;;  %5870 = vmatmul.mubr.bf16.gmra.mxu0 %v12822_v35  ;;  %v312_v55 = vld [vmem:[%s11988_s25 + $0x128] sm:$0xff] }
 0x145   : > { %v9880_v15 = vpop.f32.mrf.mxu1  ;;  %6031 = vmatmul.mubr.bf16.gmra.mxu1 %v12824_v39  ;;  %6071 = vmatprep.mubr.bf16.mxu0 %v12826_v38  ;;  %16754 = vst [vmem:[#allocation129_spill] sm:$0xff] %v12840_v1  ;;  %v328_v35 = vld [vmem:[%s11988_s25 + $0x1a8] sm:$0xff]  ;;  %16758 = vst [vmem:[#allocation133_spill] sm:$0xff] %v12886_v50 }
 0x146   : > { %v12835_v63 = vadd.f32 %v9879_v13, %v9767_v29  ;;  %v9769_v7 = vpop.f32.mrf.mxu0  ;;  %6232 = vmatprep.mubr.bf16.mxu1 %v12830_v28  ;;  %v11657_v13 = vld [vmem:[%s16125_s0 + $0x338] sm:$0xff]   ;;  %v12888_v5 = vcombine.low %v312_v55, %v328_v35 }
 0x147   : > { %v9770_v11 = vadd.f32 %v9769_v7, %v9768_v23  ;;  %v9881_v26 = vpop.f32.mrf.mxu1  ;;  %v12854_v7 = vcombine.high %v311_v43, %v327_v37 }
 0x148   : > { %v9882_v34 = vadd.f32 %v9881_v26, %v9880_v15  ;;  %v9771_v53 = vpop.f32.mrf.mxu0  ;;  %v11659_v15 = vld [vmem:[%s16125_s0 + $0x3b8] sm:$0xff]   ;;  %v12856_v26 = vcombine.high %v312_v55, %v328_v35  ;;  %16759 = vst [vmem:[#allocation134_spill] sm:$0xff] %v12888_v5  ;;  %v11667_v35 = vld [vmem:[%s16125_s0 + $0x3a8] sm:$0xff]  }
 0x149   : > { %v9883_v36 = vpop.f32.mrf.mxu1  ;;  %16756 = vst [vmem:[#allocation131_spill] sm:$0xff] %v12854_v7 }
 0x14a   : > { %v12849_v29 = vadd.f32 %v9882_v34, %v9770_v11  ;;  %v9772_v23 = vpop.f32.mrf.mxu0  ;;  %16757 = vst [vmem:[#allocation132_spill] sm:$0xff] %v12856_v26  ;;  %v11662_v11 = vld [vmem:[%s16125_s0 + $0x3f0] sm:$0xff]  }
 0x14b   : > { %v9773_v60 = vadd.f32 %v9772_v23, %v9771_v53  ;;  %v9884_v24 = vpop.f32.mrf.mxu1  ;;  %v343_v53 = vld [vmem:[%s11988_s25 + $0x220] sm:$0xff]  ;;  %v11661_v23 = vld [vmem:[%s16125_s0 + $0x330] sm:$0xff]  }
 0x14c   : > { %v9885_v52 = vadd.f32 %v9884_v24, %v9883_v36  ;;  %v9774_v28 = vpop.f32.mrf.mxu0  ;;  %6072 = vmatmul.mubr.bf16.vlgmr.msra.gmra.mxu0 %v12840_v1  ;;  %v359_v24 = vld [vmem:[%s11988_s25 + $0x2a0] sm:$0xff]  ;;  %v11663_v1 = vld [vmem:[%s16125_s0 + $0x3b0] sm:$0xff]  }
 0x14d   : > { %v9886_v34 = vpop.f32.mrf.mxu1  ;;  %6233 = vmatmul.mubr.bf16.vlgmr.msra.gmra.mxu1 %v12844_v56  ;;  %10383 = vmatpush3.bf16.msra.mxu0 %v11657_v13  ;;  %v11664_v13 = vld [vmem:[%s16125_s0 + $0x368] sm:$0xff]   ;;  %v12890_v3 = vcombine.high %v343_v53, %v359_v24 }
 0x14e   : > { %v12870_v38 = vadd.f32 %v9885_v52, %v9773_v60  ;;  %v9775_v36 = vpop.f32.mrf.mxu0  ;;  %10495 = vmatpush3.bf16.msra.mxu1 %v11659_v15  ;;  %6079 = vmatprep.mubr.bf16.mxu0 %v12854_v7  ;;  %v360_v60 = vld [vmem:[%s11988_s25 + $0x2a8] sm:$0xff] }
 0x14f   : > { %v9776_v56 = vadd.f32 %v9775_v36, %v9774_v28  ;;  %v9887_v39 = vpop.f32.mrf.mxu1  ;;  %6240 = vmatprep.mubr.bf16.mxu1 %v12856_v26  ;;  %10384 = vmatprep.subr.bf16.mxu0 %v11660_v61  ;;  %v11666_v15 = vld [vmem:[%s16125_s0 + $0x3e8] sm:$0xff]   ;;  %16760 = vst [vmem:[#allocation135_spill] sm:$0xff] %v12890_v3  ;;  %v12894_v26 = vcombine.high %v344_v54, %v360_v60 }
 0x150   : > { %v9888_v52 = vadd.f32 %v9887_v39, %v9886_v34  ;;  %v9777_v7 = vpop.f32.mrf.mxu0  ;;  %10496 = vmatprep.subr.bf16.mxu1 %v11662_v11  ;;  %v11665_v39 = vld [vmem:[%s16125_s0 + $0x328] sm:$0xff]   ;;  %v375_v11 = vld [vmem:[%s11988_s25 + $0x320] sm:$0xff] }
 0x151   : > { %v9889_v46 = vpop.f32.mrf.mxu1  ;;  %10385 = vmatpush3.bf16.msra.mxu0 %v11661_v23  ;;  %16761 = vst [vmem:[#allocation136_spill] sm:$0xff] %v12894_v26 }
 0x152   : > { %v12892_v28 = vadd.f32 %v9888_v52, %v9776_v56  ;;  %v9778_v36 = vpop.f32.mrf.mxu0  ;;  %10497 = vmatpush3.bf16.msra.mxu1 %v11663_v1  ;;  %10386 = vmatprep.subr.bf16.mxu0 %v11664_v13  ;;  %v11668_v56 = vld [vmem:[%s16125_s0 + $0x360] sm:$0xff]   ;;  %v376_v13 = vld [vmem:[%s11988_s25 + $0x328] sm:$0xff] }
 0x153   : > { %v9779_v43 = vadd.f32 %v9778_v36, %v9777_v7  ;;  %v9890_v37 = vpop.f32.mrf.mxu1  ;;  %10498 = vmatprep.subr.bf16.mxu1 %v11666_v15  ;;  %v11670_v7 = vld [vmem:[%s16125_s0 + $0x3e0] sm:$0xff]  }
 0x154   : > { %v9891_v55 = vadd.f32 %v9890_v37, %v9889_v46  ;;  %v9780_v1 = vpop.f32.mrf.mxu0  ;;  %6080 = vmatmul.mubr.bf16.gmra.mxu0 %v12886_v50  ;;  %v391_v46 = vld [vmem:[%s11988_s25 + $0x3a0] sm:$0xff]  ;;  %v392_v37 = vld [vmem:[%s11988_s25 + $0x3a8] sm:$0xff] }
 0x155   : > { %v9892_v61 = vpop.f32.mrf.mxu1  ;;  %6241 = vmatmul.mubr.bf16.gmra.mxu1 %v12888_v5  ;;  %6087 = vmatprep.mubr.bf16.mxu0 %v12890_v3  ;;  %v11669_v15 = vld [vmem:[%s16125_s0 + $0x320] sm:$0xff]   ;;  %v12938_v59 = vcombine.high %v376_v13, %v392_v37 }
 0x156   : > { %v12912_v34 = vadd.f32 %v9891_v55, %v9779_v43  ;;  %v9781_v23 = vpop.f32.mrf.mxu0  ;;  %6248 = vmatprep.mubr.bf16.mxu1 %v12894_v26  ;;  %10387 = vmatpush3.bf16.msra.mxu0 %v11665_v39  ;;  %v11671_v43 = vld [vmem:[%s16125_s0 + $0x3a0] sm:$0xff]   ;;  %v11672_v55 = vld [vmem:[%s16125_s0 + $0x358] sm:$0xff]   ;;  %v12927_v39 = vcombine.low %v343_v53, %v359_v24 }
 0x157   : > { %v9782_v52 = vadd.f32 %v9781_v23, %v9780_v1  ;;  %v9893_v36 = vpop.f32.mrf.mxu1  ;;  %10499 = vmatpush3.bf16.msra.mxu1 %v11667_v35  ;;  %10388 = vmatprep.subr.bf16.mxu0 %v11668_v56  ;;  %v11674_v1 = vld [vmem:[%s16125_s0 + $0x3d8] sm:$0xff]   ;;  %v12932_v35 = vcombine.low %v344_v54, %v360_v60  ;;  %v12934_v56 = vcombine.high %v375_v11, %v391_v46 }
 0x158   : > { %v9894_v5 = vadd.f32 %v9893_v36, %v9892_v61  ;;  %v9783_v50 = vpop.f32.mrf.mxu0  ;;  %16762 = vst [vmem:[#allocation137_spill] sm:$0xff] %v12927_v39  ;;  %10500 = vmatprep.subr.bf16.mxu1 %v11670_v7  ;;  %16765 = vst [vmem:[#allocation140_spill] sm:$0xff] %v12938_v59  ;;  %v11673_v53 = vld [vmem:[%s16125_s0 + $0x318] sm:$0xff]  }
 0x159   : > { %v9895_v23 = vpop.f32.mrf.mxu1  ;;  %16763 = vst [vmem:[#allocation138_spill] sm:$0xff] %v12932_v35  ;;  %16764 = vst [vmem:[#allocation139_spill] sm:$0xff] %v12934_v56  ;;  %v11675_v54 = vld [vmem:[%s16125_s0 + $0x398] sm:$0xff]  }
 0x15a   : > { %v12936_v26 = vadd.f32 %v9894_v5, %v9782_v52  ;;  %v9784_v3 = vpop.f32.mrf.mxu0  ;;  %10389 = vmatpush3.bf16.msra.mxu0 %v11669_v15  ;;  %v11676_v5 = vld [vmem:[%s16125_s0 + $0x350] sm:$0xff]   ;;  %v407_v15 = vld [vmem:[%s11988_s25 + $0x420] sm:$0xff] }
 0x15b   : > { %v9785_v24 = vadd.f32 %v9784_v3, %v9783_v50  ;;  %v9896_v7 = vpop.f32.mrf.mxu1  ;;  %10501 = vmatpush3.bf16.msra.mxu1 %v11671_v43  ;;  %10390 = vmatprep.subr.bf16.mxu0 %v11672_v55  ;;  %v11678_v50 = vld [vmem:[%s16125_s0 + $0x3d0] sm:$0xff]   ;;  %v423_v43 = vld [vmem:[%s11988_s25 + $0x4a0] sm:$0xff]  ;;  %v408_v55 = vld [vmem:[%s11988_s25 + $0x428] sm:$0xff] }
 0x15c   : > { %v9897_v60 = vadd.f32 %v9896_v7, %v9895_v23  ;;  %v9786_v61 = vpop.f32.mrf.mxu0  ;;  %6088 = vmatmul.mubr.bf16.gmra.mxu0 %v12927_v39  ;;  %10502 = vmatprep.subr.bf16.mxu1 %v11674_v1  ;;  %v11677_v1 = vld [vmem:[%s16125_s0 + $0x310] sm:$0xff]   ;;  %v424_v39 = vld [vmem:[%s11988_s25 + $0x4a8] sm:$0xff] }
 0x15d   : > { %v9898_v3 = vpop.f32.mrf.mxu1  ;;  %6249 = vmatmul.mubr.bf16.gmra.mxu1 %v12932_v35  ;;  %6095 = vmatprep.mubr.bf16.mxu0 %v12934_v56  ;;  %v12982_v18 = vcombine.high %v408_v55, %v424_v39 }
 0x15e   : > { %v12956_v52 = vadd.f32 %v9897_v60, %v9785_v24  ;;  %v9787_v36 = vpop.f32.mrf.mxu0  ;;  %6256 = vmatprep.mubr.bf16.mxu1 %v12938_v59  ;;  %10391 = vmatpush3.bf16.msra.mxu0 %v11673_v53  ;;  %v11679_v24 = vld [vmem:[%s16125_s0 + $0x390] sm:$0xff]   ;;  %v11680_v60 = vld [vmem:[%s16125_s0 + $0x348] sm:$0xff]   ;;  %v12971_v53 = vcombine.low %v375_v11, %v391_v46 }
 0x15f   : > { %v9788_v23 = vadd.f32 %v9787_v36, %v9786_v61  ;;  %v9899_v7 = vpop.f32.mrf.mxu1  ;;  %10503 = vmatpush3.bf16.msra.mxu1 %v11675_v54  ;;  %10392 = vmatprep.subr.bf16.mxu0 %v11676_v5  ;;  %v11682_v61 = vld [vmem:[%s16125_s0 + $0x3c8] sm:$0xff]   ;;  %v12976_v54 = vcombine.low %v376_v13, %v392_v37  ;;  %v12978_v5 = vcombine.high %v407_v15, %v423_v43  ;;  %v11684_v37 = vld [vmem:[%s16125_s0 + $0x340] sm:$0xff]  }
 0x160   : > { %v9900_v35 = vadd.f32 %v9899_v7, %v9898_v3  ;;  %v9789_v59 = vpop.f32.mrf.mxu0  ;;  %16766 = vst [vmem:[#allocation141_spill] sm:$0xff] %v12971_v53  ;;  %10504 = vmatprep.subr.bf16.mxu1 %v11678_v50  ;;  %16769 = vst [vmem:[#allocation144_spill] sm:$0xff] %v12982_v18  ;;  %v11681_v11 = vld [vmem:[%s16125_s0 + $0x308] sm:$0xff]  }
 0x161   : > { %v9901_v36 = vpop.f32.mrf.mxu1  ;;  %16767 = vst [vmem:[#allocation142_spill] sm:$0xff] %v12976_v54  ;;  %16768 = vst [vmem:[#allocation143_spill] sm:$0xff] %v12978_v5  ;;  %v11683_v13 = vld [vmem:[%s16125_s0 + $0x388] sm:$0xff]  }
 0x162   : > { %v12980_v56 = vadd.f32 %v9900_v35, %v9788_v23  ;;  %v9790_v57 = vpop.f32.mrf.mxu0  ;;  %10393 = vmatpush3.bf16.msra.mxu0 %v11677_v1  ;;  %v439_v1 = vld [vmem:[%s11988_s25 + $0x520] sm:$0xff] }
 0x163   : > { %v9791_v46 = vadd.f32 %v9790_v57, %v9789_v59  ;;  %v9902_v50 = vpop.f32.mrf.mxu1  ;;  %10505 = vmatpush3.bf16.msra.mxu1 %v11679_v24  ;;  %10394 = vmatprep.subr.bf16.mxu0 %v11680_v60  ;;  %v11686_v57 = vld [vmem:[%s16125_s0 + $0x3c0] sm:$0xff]   ;;  %v440_v60 = vld [vmem:[%s11988_s25 + $0x528] sm:$0xff] }
 0x164   : > { %v9903_v35 = vadd.f32 %v9902_v50, %v9901_v36  ;;  %v9792_v3 = vpop.f32.mrf.mxu0  ;;  %6096 = vmatmul.mubr.bf16.gmra.mxu0 %v12971_v53  ;;  %10506 = vmatprep.subr.bf16.mxu1 %v11682_v61  ;;  %v455_v24 = vld [vmem:[%s11988_s25 + $0x5a0] sm:$0xff]  ;;  %v456_v53 = vld [vmem:[%s11988_s25 + $0x5a8] sm:$0xff] }
 0x165   : > { %v9904_v59 = vpop.f32.mrf.mxu1  ;;  %6257 = vmatmul.mubr.bf16.gmra.mxu1 %v12976_v54  ;;  %6103 = vmatprep.mubr.bf16.mxu0 %v12978_v5  ;;  %v11685_v61 = vld [vmem:[%s16125_s0 + $0x300] sm:$0xff]   ;;  %v13026_v8 = vcombine.high %v440_v60, %v456_v53 }
 0x166   : > { %v13000_v23 = vadd.f32 %v9903_v35, %v9791_v46  ;;  %v9793_v7 = vpop.f32.mrf.mxu0  ;;  %6264 = vmatprep.mubr.bf16.mxu1 %v12982_v18  ;;  %10395 = vmatpush3.bf16.msra.mxu0 %v11681_v11  ;;  %v11687_v46 = vld [vmem:[%s16125_s0 + $0x380] sm:$0xff]   ;;  %v11688_v35 = vld [vmem:[%s16125_s0 + $0x478] sm:$0xff]   ;;  %v13015_v11 = vcombine.low %v407_v15, %v423_v43 }
 0x167   : > { %v9794_v36 = vadd.f32 %v9793_v7, %v9792_v3  ;;  %v9905_v50 = vpop.f32.mrf.mxu1  ;;  %10507 = vmatpush3.bf16.msra.mxu1 %v11683_v13  ;;  %10396 = vmatprep.subr.bf16.mxu0 %v11684_v37  ;;  %v11690_v3 = vld [vmem:[%s16125_s0 + $0x4f8] sm:$0xff]   ;;  %v13020_v13 = vcombine.low %v408_v55, %v424_v39  ;;  %v13022_v37 = vcombine.high %v439_v1, %v455_v24 }
 0x168   : > { %v9906_v54 = vadd.f32 %v9905_v50, %v9904_v59  ;;  %v9795_v18 = vpop.f32.mrf.mxu0  ;;  %16770 = vst [vmem:[#allocation145_spill] sm:$0xff] %v13015_v11  ;;  %10508 = vmatprep.subr.bf16.mxu1 %v11686_v57  ;;  %16773 = vst [vmem:[#allocation148_spill] sm:$0xff] %v13026_v8  ;;  %v472_v50 = vld [vmem:[%s11988_s25 + $0x628] sm:$0xff] }
 0x169   : > { %v9907_v7 = vpop.f32.mrf.mxu1  ;;  %16771 = vst [vmem:[#allocation146_spill] sm:$0xff] %v13020_v13  ;;  %16772 = vst [vmem:[#allocation147_spill] sm:$0xff] %v13022_v37 }
 0x16a   : > { %v13024_v5 = vadd.f32 %v9906_v54, %v9794_v36  ;;  %v9796_v16 = vpop.f32.mrf.mxu0  ;;  %10397 = vmatpush3.bf16.msra.mxu0 %v11685_v61 }
 0x16b   : > { %v9797_v15 = vadd.f32 %v9796_v16, %v9795_v18  ;;  %v9908_v43 = vpop.f32.mrf.mxu1  ;;  %10509 = vmatpush3.bf16.msra.mxu1 %v11687_v46  ;;  %10606 = vmatprep.subr.bf16.mxu0 %v11688_v35  ;;  %v471_v16 = vld [vmem:[%s11988_s25 + $0x620] sm:$0xff]  ;;  %v488_v46 = vld [vmem:[%s11988_s25 + $0x6a8] sm:$0xff] }
 0x16c   : > { %v9909_v57 = vadd.f32 %v9908_v43, %v9907_v7  ;;  %v9798_v59 = vpop.f32.mrf.mxu0  ;;  %6104 = vmatmul.mubr.bf16.gmra.mxu0 %v13015_v11  ;;  %10718 = vmatprep.subr.bf16.mxu1 %v11690_v3  ;;  %v487_v18 = vld [vmem:[%s11988_s25 + $0x6a0] sm:$0xff]  ;;  %v13038_v43 = vcombine.low %v439_v1, %v455_v24  ;;  %v13040_v11 = vcombine.low %v440_v60, %v456_v53 }
 0x16d   : > { %v9910_v39 = vpop.f32.mrf.mxu1  ;;  %6265 = vmatmul.mubr.bf16.gmra.mxu1 %v13020_v13  ;;  %6111 = vmatprep.mubr.bf16.mxu0 %v13022_v37  ;;  %v13042_v13 = vcombine.high %v471_v16, %v487_v18  ;;  %v503_v60 = vld [vmem:[%s11988_s25 + $0x720] sm:$0xff]  ;;  %v520_v37 = vld [vmem:[%s11988_s25 + $0x7a8] sm:$0xff]  ;;  %v13058_v6 = vcombine.low %v471_v16, %v487_v18  ;;  %v13060_v31 = vcombine.low %v472_v50, %v488_v46 }
 0x16e   : > { %v13031_v55 = vadd.f32 %v9909_v57, %v9797_v15  ;;  %v9799_v54 = vpop.f32.mrf.mxu0  ;;  %6272 = vmatprep.mubr.bf16.mxu1 %v13026_v8  ;;  %16774 = vst [vmem:[#allocation149_spill] sm:$0xff] %v13038_v43  ;;  %16775 = vst [vmem:[#allocation150_spill] sm:$0xff] %v13040_v11  ;;  %v13046_v8 = vcombine.high %v472_v50, %v488_v46  ;;  %v535_v46 = vld [vmem:[%s11988_s25 + $0x820] sm:$0xff] }
 0x16f   : > { %v9800_v61 = vadd.f32 %v9799_v54, %v9798_v59  ;;  %v9911_v36 = vpop.f32.mrf.mxu1  ;;  %16776 = vst [vmem:[#allocation151_spill] sm:$0xff] %v13042_v13  ;;  %16778 = vst [vmem:[#allocation153_spill] sm:$0xff] %v13058_v6 }
 0x170   : > { %v9912_v35 = vadd.f32 %v9911_v36, %v9910_v39  ;;  %v9801_v7 = vpop.f32.mrf.mxu0  ;;  %16777 = vst [vmem:[#allocation152_spill] sm:$0xff] %v13046_v8  ;;  %16779 = vst [vmem:[#allocation154_spill] sm:$0xff] %v13060_v31 }
 0x171   : > { %v9913_v3 = vpop.f32.mrf.mxu1 }
 0x172   : > { %v13044_v15 = vadd.f32 %v9912_v35, %v9800_v61  ;;  %v9802_v57 = vpop.f32.mrf.mxu0  ;;  %v519_v61 = vld [vmem:[%s11988_s25 + $0x7a0] sm:$0xff] }
 0x173   : > { %v9803_v59 = vadd.f32 %v9802_v57, %v9801_v7  ;;  %v9914_v54 = vpop.f32.mrf.mxu1  ;;  %v504_v57 = vld [vmem:[%s11988_s25 + $0x728] sm:$0xff]  ;;  %v13078_v30 = vcombine.low %v503_v60, %v519_v61 }
 0x174   : > { %v9915_v39 = vadd.f32 %v9914_v54, %v9913_v3  ;;  %v9804_v36 = vpop.f32.mrf.mxu0  ;;  %6112 = vmatmul.mubr.bf16.gmra.mxu0 %v13038_v43  ;;  %v13080_v21 = vcombine.low %v504_v57, %v520_v37 }
 0x175   : > { %v9916_v1 = vpop.f32.mrf.mxu1  ;;  %6273 = vmatmul.mubr.bf16.gmra.mxu1 %v13040_v11  ;;  %6119 = vmatprep.mubr.bf16.mxu0 %v13042_v13  ;;  %v13062_v11 = vcombine.high %v503_v60, %v519_v61  ;;  %v552_v13 = vld [vmem:[%s11988_s25 + $0x8a8] sm:$0xff]  ;;  %16782 = vst [vmem:[#allocation157_spill] sm:$0xff] %v13078_v30 }
 0x176   : > { %v13051_v53 = vadd.f32 %v9915_v39, %v9803_v59  ;;  %v9805_v24 = vpop.f32.mrf.mxu0  ;;  %6280 = vmatprep.mubr.bf16.mxu1 %v13046_v8  ;;  %v13066_v8 = vcombine.high %v504_v57, %v520_v37  ;;  %16783 = vst [vmem:[#allocation158_spill] sm:$0xff] %v13080_v21  ;;  %v567_v57 = vld [vmem:[%s11988_s25 + $0x920] sm:$0xff] }
 0x177   : > { %v9806_v35 = vadd.f32 %v9805_v24, %v9804_v36  ;;  %v9917_v7 = vpop.f32.mrf.mxu1  ;;  %16780 = vst [vmem:[#allocation155_spill] sm:$0xff] %v13062_v11 }
 0x178   : > { %v9918_v3 = vadd.f32 %v9917_v7, %v9916_v1  ;;  %v9807_v54 = vpop.f32.mrf.mxu0  ;;  %16781 = vst [vmem:[#allocation156_spill] sm:$0xff] %v13066_v8 }
 0x179   : > { %v9919_v43 = vpop.f32.mrf.mxu1 }
 0x17a   : > { %v13064_v59 = vadd.f32 %v9918_v3, %v9806_v35  ;;  %v9808_v39 = vpop.f32.mrf.mxu0  ;;  %v551_v35 = vld [vmem:[%s11988_s25 + $0x8a0] sm:$0xff] }
 0x17b   : > { %v9809_v36 = vadd.f32 %v9808_v39, %v9807_v54  ;;  %v9920_v24 = vpop.f32.mrf.mxu1  ;;  %v536_v39 = vld [vmem:[%s11988_s25 + $0x828] sm:$0xff]  ;;  %v13098_v19 = vcombine.low %v535_v46, %v551_v35 }
 0x17c   : > { %v9921_v1 = vadd.f32 %v9920_v24, %v9919_v43  ;;  %v9810_v7 = vpop.f32.mrf.mxu0  ;;  %6120 = vmatmul.mubr.bf16.gmra.mxu0 %v13058_v6  ;;  %v13100_v48 = vcombine.low %v536_v39, %v552_v13 }
 0x17d   : > { %v9922_v16 = vpop.f32.mrf.mxu1  ;;  %6281 = vmatmul.mubr.bf16.gmra.mxu1 %v13060_v31  ;;  %6127 = vmatprep.mubr.bf16.mxu0 %v13062_v11  ;;  %v13082_v31 = vcombine.high %v535_v46, %v551_v35  ;;  %v584_v11 = vld [vmem:[%s11988_s25 + $0x9a8] sm:$0xff]  ;;  %16786 = vst [vmem:[#allocation161_spill] sm:$0xff] %v13098_v19 }
 0x17e   : > { %v13071_v18 = vadd.f32 %v9921_v1, %v9809_v36  ;;  %v9811_v50 = vpop.f32.mrf.mxu0  ;;  %6288 = vmatprep.mubr.bf16.mxu1 %v13066_v8  ;;  %v13086_v8 = vcombine.high %v536_v39, %v552_v13  ;;  %16787 = vst [vmem:[#allocation162_spill] sm:$0xff] %v13100_v48  ;;  %v599_v39 = vld [vmem:[%s11988_s25 + $0xa20] sm:$0xff] }
 0x17f   : > { %v9812_v3 = vadd.f32 %v9811_v50, %v9810_v7  ;;  %v9923_v54 = vpop.f32.mrf.mxu1  ;;  %16784 = vst [vmem:[#allocation159_spill] sm:$0xff] %v13082_v31 }
 0x180   : > { %v9924_v43 = vadd.f32 %v9923_v54, %v9922_v16  ;;  %v9813_v24 = vpop.f32.mrf.mxu0  ;;  %16785 = vst [vmem:[#allocation160_spill] sm:$0xff] %v13086_v8 }
 0x181   : > { %v9925_v6 = vpop.f32.mrf.mxu1 }
 0x182   : > { %v13084_v36 = vadd.f32 %v9924_v43, %v9812_v3  ;;  %v9814_v1 = vpop.f32.mrf.mxu0  ;;  %v583_v3 = vld [vmem:[%s11988_s25 + $0x9a0] sm:$0xff] }
 0x183   : > { %v9815_v7 = vadd.f32 %v9814_v1, %v9813_v24  ;;  %v9926_v50 = vpop.f32.mrf.mxu1  ;;  %v568_v1 = vld [vmem:[%s11988_s25 + $0x928] sm:$0xff]  ;;  %v13118_v47 = vcombine.low %v567_v57, %v583_v3 }
 0x184   : > { %v9927_v16 = vadd.f32 %v9926_v50, %v9925_v6  ;;  %v9816_v54 = vpop.f32.mrf.mxu0  ;;  %6128 = vmatmul.mubr.bf16.gmra.mxu0 %v13078_v30  ;;  %v13121_v33 = vcombine.low %v568_v1, %v584_v11 }
 0x185   : > { %v9928_v60 = vpop.f32.mrf.mxu1  ;;  %6289 = vmatmul.mubr.bf16.gmra.mxu1 %v13080_v21  ;;  %6135 = vmatprep.mubr.bf16.mxu0 %v13082_v31  ;;  %v13102_v31 = vcombine.high %v567_v57, %v583_v3  ;;  %v616_v21 = vld [vmem:[%s11988_s25 + $0xaa8] sm:$0xff]  ;;  %16790 = vst [vmem:[#allocation165_spill] sm:$0xff] %v13118_v47 }
 0x186   : > { %v13091_v37 = vadd.f32 %v9927_v16, %v9815_v7  ;;  %v9817_v61 = vpop.f32.mrf.mxu0  ;;  %6296 = vmatprep.mubr.bf16.mxu1 %v13086_v8  ;;  %v13106_v8 = vcombine.high %v568_v1, %v584_v11  ;;  %16791 = vst [vmem:[#allocation166_spill] sm:$0xff] %v13121_v33 }
 0x187   : > { %v9818_v43 = vadd.f32 %v9817_v61, %v9816_v54  ;;  %v9929_v24 = vpop.f32.mrf.mxu1  ;;  %16788 = vst [vmem:[#allocation163_spill] sm:$0xff] %v13102_v31 }
 0x188   : > { %v9930_v6 = vadd.f32 %v9929_v24, %v9928_v60  ;;  %v9819_v50 = vpop.f32.mrf.mxu0  ;;  %16789 = vst [vmem:[#allocation164_spill] sm:$0xff] %v13106_v8 }
 0x189   : > { %v9931_v30 = vpop.f32.mrf.mxu1 }
 0x18a   : > { %v13104_v7 = vadd.f32 %v9930_v6, %v9818_v43  ;;  %v9820_v16 = vpop.f32.mrf.mxu0  ;;  %v615_v43 = vld [vmem:[%s11988_s25 + $0xaa0] sm:$0xff] }
 0x18b   : > { %v9821_v54 = vadd.f32 %v9820_v16, %v9819_v50  ;;  %v9932_v61 = vpop.f32.mrf.mxu1  ;;  %v600_v16 = vld [vmem:[%s11988_s25 + $0xa28] sm:$0xff] }
 0x18c   : > { %v9933_v60 = vadd.f32 %v9932_v61, %v9931_v30  ;;  %v9950_v24 = vpop.f32.mrf.mxu0  ;;  %6136 = vmatmul.mubr.bf16.gmra.mxu0 %v13098_v19 }
 0x18d   : > { %v10062_v46 = vpop.f32.mrf.mxu1  ;;  %6297 = vmatmul.mubr.bf16.gmra.mxu1 %v13100_v48  ;;  %6143 = vmatprep.mubr.bf16.mxu0 %v13102_v31  ;;  %v13140_v31 = vcombine.low %v599_v39, %v615_v43 }
 0x18e   : > { %v13111_v13 = vadd.f32 %v9933_v60, %v9821_v54  ;;  %v9951_v35 = vpop.f32.mrf.mxu0  ;;  %6304 = vmatprep.mubr.bf16.mxu1 %v13106_v8  ;;  %v13123_v54 = vcombine.high %v599_v39, %v615_v43  ;;  %v13125_v8 = vcombine.high %v600_v16, %v616_v21 }
 0x18f   : > { %v9952_v6 = vadd.f32 %v9951_v35, %v9950_v24  ;;  %v10063_v50 = vpop.f32.mrf.mxu1  ;;  %16794 = vst [vmem:[#allocation169_spill] sm:$0xff] %v13140_v31 }
 0x190   : > { %v10064_v30 = vadd.f32 %v10063_v50, %v10062_v46  ;;  %v9953_v61 = vpop.f32.mrf.mxu0  ;;  %16792 = vst [vmem:[#allocation167_spill] sm:$0xff] %v13123_v54  ;;  %16793 = vst [vmem:[#allocation168_spill] sm:$0xff] %v13125_v8 }
 0x191   : > { %v5752_v19 = vadd.f32 %v9952_v6, %v12708_v40  ;;  %v10065_v48 = vpop.f32.mrf.mxu1  ;;  %v647_v6 = vld [vmem:[%s11988_s25 + $0xba0] sm:$0xff] }
 0x192   : > { %v9954_v60 = vpop.f32.mrf.mxu0 }
 0x193   : > { %v13127_v24 = vadd.f32 %v10064_v30, %v5752_v19  ;;  %v9955_v35 = vadd.f32 %v9954_v60, %v9953_v61  ;;  %v10066_v46 = vpop.f32.mrf.mxu1  ;;  %v631_v19 = vld [vmem:[%s11988_s25 + $0xb20] sm:$0xff]  ;;  %v648_v60 = vld [vmem:[%s11988_s25 + $0xba8] sm:$0xff] }
 0x194   : > { %v10067_v57 = vadd.f32 %v10066_v46, %v10065_v48  ;;  %v9956_v3 = vpop.f32.mrf.mxu0  ;;  %6144 = vmatmul.mubr.bf16.gmra.mxu0 %v13118_v47  ;;  %v632_v48 = vld [vmem:[%s11988_s25 + $0xb28] sm:$0xff] }
 0x195   : > { %v5755_v40 = vadd.f32 %v9955_v35, %v12719_v10  ;;  %v10068_v11 = vpop.f32.mrf.mxu1  ;;  %6305 = vmatmul.mubr.bf16.gmra.mxu1 %v13121_v33  ;;  %6151 = vmatprep.mubr.bf16.mxu0 %v13123_v54  ;;  %v13143_v33 = vcombine.low %v600_v16, %v616_v21  ;;  %v13145_v54 = vcombine.high %v631_v19, %v647_v6 }
 0x196   : > { %v9957_v1 = vpop.f32.mrf.mxu0  ;;  %6312 = vmatprep.mubr.bf16.mxu1 %v13125_v8 }
 0x197   : > { %v13136_v50 = vadd.f32 %v10067_v57, %v5755_v40  ;;  %v9958_v30 = vadd.f32 %v9957_v1, %v9956_v3  ;;  %v10069_v61 = vpop.f32.mrf.mxu1  ;;  %16795 = vst [vmem:[#allocation170_spill] sm:$0xff] %v13143_v33  ;;  %16796 = vst [vmem:[#allocation171_spill] sm:$0xff] %v13145_v54  ;;  %v13147_v57 = vcombine.high %v632_v48, %v648_v60  ;;  %v663_v1 = vld [vmem:[%s11988_s25 + $0xc20] sm:$0xff] }
 0x198   : > { %v10070_v46 = vadd.f32 %v10069_v61, %v10068_v11  ;;  %v9959_v47 = vpop.f32.mrf.mxu0 }
 0x199   : > { %v5760_v10 = vadd.f32 %v9958_v30, %v12728_v27  ;;  %v10071_v35 = vpop.f32.mrf.mxu1  ;;  %16797 = vst [vmem:[#allocation172_spill] sm:$0xff] %v13147_v57  ;;  %v679_v30 = vld [vmem:[%s11988_s25 + $0xca0] sm:$0xff] }
 0x19a   : > { %v9960_v8 = vpop.f32.mrf.mxu0 }
 0x19b   : > { %v13149_v3 = vadd.f32 %v10070_v46, %v5760_v10  ;;  %v9961_v40 = vadd.f32 %v9960_v8, %v9959_v47  ;;  %v10072_v11 = vpop.f32.mrf.mxu1  ;;  %v664_v46 = vld [vmem:[%s11988_s25 + $0xc28] sm:$0xff] }
 0x19c   : > { %v10073_v39 = vadd.f32 %v10072_v11, %v10071_v35  ;;  %v9962_v43 = vpop.f32.mrf.mxu0  ;;  %6152 = vmatmul.mubr.bf16.gmra.mxu0 %v13140_v31  ;;  %v680_v10 = vld [vmem:[%s11988_s25 + $0xca8] sm:$0xff]  ;;  %v13162_v31 = vcombine.low %v631_v19, %v647_v6 }
 0x19d   : > { %v5763_v21 = vadd.f32 %v9961_v40, %v12737_v41  ;;  %v10074_v27 = vpop.f32.mrf.mxu1  ;;  %6313 = vmatmul.mubr.bf16.gmra.mxu1 %v13143_v33  ;;  %6159 = vmatprep.mubr.bf16.mxu0 %v13145_v54  ;;  %v13165_v33 = vcombine.low %v632_v48, %v648_v60  ;;  %v13167_v54 = vcombine.high %v663_v1, %v679_v30 }
 0x19e   : > { %v9963_v16 = vpop.f32.mrf.mxu0  ;;  %6320 = vmatprep.mubr.bf16.mxu1 %v13147_v57  ;;  %16798 = vst [vmem:[#allocation173_spill] sm:$0xff] %v13162_v31 }
 0x19f   : > { %v13158_v8 = vadd.f32 %v10073_v39, %v5763_v21  ;;  %v9964_v47 = vadd.f32 %v9963_v16, %v9962_v43  ;;  %v10075_v61 = vpop.f32.mrf.mxu1  ;;  %16799 = vst [vmem:[#allocation174_spill] sm:$0xff] %v13165_v33  ;;  %16800 = vst [vmem:[#allocation175_spill] sm:$0xff] %v13167_v54  ;;  %v13169_v39 = vcombine.high %v664_v46, %v680_v10  ;;  %v695_v16 = vld [vmem:[%s11988_s25 + $0xd20] sm:$0xff] }
 0x1a0   : > { %v10076_v35 = vadd.f32 %v10075_v61, %v10074_v27  ;;  %v9965_v11 = vpop.f32.mrf.mxu0 }
 0x1a1   : > { %v5768_v41 = vadd.f32 %v9964_v47, %v12748_v17  ;;  %v10077_v40 = vpop.f32.mrf.mxu1  ;;  %16801 = vst [vmem:[#allocation176_spill] sm:$0xff] %v13169_v39  ;;  %v711_v47 = vld [vmem:[%s11988_s25 + $0xda0] sm:$0xff] }
 0x1a2   : > { %v9966_v57 = vpop.f32.mrf.mxu0 }
 0x1a3   : > { %v13171_v43 = vadd.f32 %v10076_v35, %v5768_v41  ;;  %v9967_v21 = vadd.f32 %v9966_v57, %v9965_v11  ;;  %v10078_v27 = vpop.f32.mrf.mxu1  ;;  %v696_v11 = vld [vmem:[%s11988_s25 + $0xd28] sm:$0xff] }
 0x1a4   : > { %v10079_v19 = vadd.f32 %v10078_v27, %v10077_v40  ;;  %v9968_v6 = vpop.f32.mrf.mxu0  ;;  %6160 = vmatmul.mubr.bf16.gmra.mxu0 %v13162_v31  ;;  %v712_v41 = vld [vmem:[%s11988_s25 + $0xda8] sm:$0xff]  ;;  %v13184_v31 = vcombine.low %v663_v1, %v679_v30 }
 0x1a5   : > { %v5771_v17 = vadd.f32 %v9967_v21, %v12759_v58  ;;  %v10080_v48 = vpop.f32.mrf.mxu1  ;;  %6321 = vmatmul.mubr.bf16.gmra.mxu1 %v13165_v33  ;;  %6167 = vmatprep.mubr.bf16.mxu0 %v13167_v54  ;;  %v13187_v33 = vcombine.low %v664_v46, %v680_v10  ;;  %v13189_v54 = vcombine.high %v695_v16, %v711_v47 }
 0x1a6   : > { %v9969_v60 = vpop.f32.mrf.mxu0  ;;  %6328 = vmatprep.mubr.bf16.mxu1 %v13169_v39  ;;  %16802 = vst [vmem:[#allocation177_spill] sm:$0xff] %v13184_v31 }
 0x1a7   : > { %v13180_v57 = vadd.f32 %v10079_v19, %v5771_v17  ;;  %v9970_v61 = vadd.f32 %v9969_v60, %v9968_v6  ;;  %v10081_v35 = vpop.f32.mrf.mxu1  ;;  %16803 = vst [vmem:[#allocation178_spill] sm:$0xff] %v13187_v33  ;;  %16804 = vst [vmem:[#allocation179_spill] sm:$0xff] %v13189_v54  ;;  %v13191_v19 = vcombine.high %v696_v11, %v712_v41  ;;  %v727_v60 = vld [vmem:[%s11988_s25 + $0xe20] sm:$0xff] }
 0x1a8   : > { %v10082_v40 = vadd.f32 %v10081_v35, %v10080_v48  ;;  %v9971_v27 = vpop.f32.mrf.mxu0 }
 0x1a9   : > { %v5776_v58 = vadd.f32 %v9970_v61, %v12768_v14  ;;  %v10083_v21 = vpop.f32.mrf.mxu1  ;;  %16805 = vst [vmem:[#allocation180_spill] sm:$0xff] %v13191_v19  ;;  %v743_v61 = vld [vmem:[%s11988_s25 + $0xea0] sm:$0xff] }
 0x1aa   : > { %v9972_v39 = vpop.f32.mrf.mxu0 }
 0x1ab   : > { %v13193_v6 = vadd.f32 %v10082_v40, %v5776_v58  ;;  %v9973_v17 = vadd.f32 %v9972_v39, %v9971_v27  ;;  %v10084_v48 = vpop.f32.mrf.mxu1  ;;  %v728_v27 = vld [vmem:[%s11988_s25 + $0xe28] sm:$0xff] }
 0x1ac   : > { %v10085_v1 = vadd.f32 %v10084_v48, %v10083_v21  ;;  %v9974_v30 = vpop.f32.mrf.mxu0  ;;  %6168 = vmatmul.mubr.bf16.gmra.mxu0 %v13184_v31  ;;  %v744_v58 = vld [vmem:[%s11988_s25 + $0xea8] sm:$0xff]  ;;  %v13206_v31 = vcombine.low %v695_v16, %v711_v47 }
 0x1ad   : > { %v5779_v14 = vadd.f32 %v9973_v17, %v12777_v62  ;;  %v10086_v46 = vpop.f32.mrf.mxu1  ;;  %6329 = vmatmul.mubr.bf16.gmra.mxu1 %v13187_v33  ;;  %6175 = vmatprep.mubr.bf16.mxu0 %v13189_v54  ;;  %v13209_v33 = vcombine.low %v696_v11, %v712_v41  ;;  %v13211_v54 = vcombine.high %v727_v60, %v743_v61 }
 0x1ae   : > { %v9975_v10 = vpop.f32.mrf.mxu0  ;;  %6336 = vmatprep.mubr.bf16.mxu1 %v13191_v19  ;;  %16806 = vst [vmem:[#allocation181_spill] sm:$0xff] %v13206_v31 }
 0x1af   : > { %v13202_v39 = vadd.f32 %v10085_v1, %v5779_v14  ;;  %v9976_v35 = vadd.f32 %v9975_v10, %v9974_v30  ;;  %v10087_v40 = vpop.f32.mrf.mxu1  ;;  %16807 = vst [vmem:[#allocation182_spill] sm:$0xff] %v13209_v33  ;;  %16808 = vst [vmem:[#allocation183_spill] sm:$0xff] %v13211_v54  ;;  %v13213_v1 = vcombine.high %v728_v27, %v744_v58  ;;  %v759_v10 = vld [vmem:[%s11988_s25 + $0xf20] sm:$0xff] }
 0x1b0   : > { %v10088_v21 = vadd.f32 %v10087_v40, %v10086_v46  ;;  %v9977_v48 = vpop.f32.mrf.mxu0 }
 0x1b1   : > { %v5784_v62 = vadd.f32 %v9976_v35, %v12788_v45  ;;  %v10089_v17 = vpop.f32.mrf.mxu1  ;;  %16809 = vst [vmem:[#allocation184_spill] sm:$0xff] %v13213_v1  ;;  %v775_v35 = vld [vmem:[%s11988_s25 + $0xfa0] sm:$0xff] }
 0x1b2   : > { %v9978_v19 = vpop.f32.mrf.mxu0 }
 0x1b3   : > { %v13215_v30 = vadd.f32 %v10088_v21, %v5784_v62  ;;  %v9979_v14 = vadd.f32 %v9978_v19, %v9977_v48  ;;  %v10090_v46 = vpop.f32.mrf.mxu1  ;;  %v760_v48 = vld [vmem:[%s11988_s25 + $0xf28] sm:$0xff] }
 0x1b4   : > { %v10091_v16 = vadd.f32 %v10090_v46, %v10089_v17  ;;  %v9980_v47 = vpop.f32.mrf.mxu0  ;;  %6176 = vmatmul.mubr.bf16.gmra.mxu0 %v13206_v31  ;;  %v776_v62 = vld [vmem:[%s11988_s25 + $0xfa8] sm:$0xff]  ;;  %v13228_v31 = vcombine.low %v727_v60, %v743_v61 }
 0x1b5   : > { %v5787_v45 = vadd.f32 %v9979_v14, %v12799_v44  ;;  %v10092_v11 = vpop.f32.mrf.mxu1  ;;  %6337 = vmatmul.mubr.bf16.gmra.mxu1 %v13209_v33  ;;  %6183 = vmatprep.mubr.bf16.mxu0 %v13211_v54  ;;  %v13231_v33 = vcombine.low %v728_v27, %v744_v58  ;;  %v13233_v54 = vcombine.high %v759_v10, %v775_v35 }
 0x1b6   : > { %v9981_v41 = vpop.f32.mrf.mxu0  ;;  %6344 = vmatprep.mubr.bf16.mxu1 %v13213_v1  ;;  %16810 = vst [vmem:[#allocation185_spill] sm:$0xff] %v13228_v31 }
 0x1b7   : > { %v13224_v19 = vadd.f32 %v10091_v16, %v5787_v45  ;;  %v9982_v40 = vadd.f32 %v9981_v41, %v9980_v47  ;;  %v10093_v21 = vpop.f32.mrf.mxu1  ;;  %16811 = vst [vmem:[#allocation186_spill] sm:$0xff] %v13231_v33  ;;  %16812 = vst [vmem:[#allocation187_spill] sm:$0xff] %v13233_v54  ;;  %v13235_v16 = vcombine.high %v760_v48, %v776_v62  ;;  %v281_v41 = vld [vmem:[%s11988_s25 + $0x30] sm:$0xff] }
 0x1b8   : > { %v10094_v17 = vadd.f32 %v10093_v21, %v10092_v11  ;;  %v9983_v46 = vpop.f32.mrf.mxu0 }
 0x1b9   : > { %v5792_v44 = vadd.f32 %v9982_v40, %v12808_v42  ;;  %v10095_v14 = vpop.f32.mrf.mxu1  ;;  %16813 = vst [vmem:[#allocation188_spill] sm:$0xff] %v13235_v16  ;;  %v297_v40 = vld [vmem:[%s11988_s25 + $0xb0] sm:$0xff] }
 0x1ba   : > { %v9984_v1 = vpop.f32.mrf.mxu0 }
 0x1bb   : > { %v13237_v47 = vadd.f32 %v10094_v17, %v5792_v44  ;;  %v9985_v45 = vadd.f32 %v9984_v1, %v9983_v46  ;;  %v10096_v11 = vpop.f32.mrf.mxu1  ;;  %v282_v46 = vld [vmem:[%s11988_s25 + $0x38] sm:$0xff] }
 0x1bc   : > { %v10097_v60 = vadd.f32 %v10096_v11, %v10095_v14  ;;  %v9986_v61 = vpop.f32.mrf.mxu0  ;;  %6184 = vmatmul.mubr.bf16.gmra.mxu0 %v13228_v31  ;;  %v298_v44 = vld [vmem:[%s11988_s25 + $0xb8] sm:$0xff]  ;;  %v13250_v31 = vcombine.low %v759_v10, %v775_v35 }
 0x1bd   : > { %v5795_v42 = vadd.f32 %v9985_v45, %v12815_v25  ;;  %v10098_v27 = vpop.f32.mrf.mxu1  ;;  %6345 = vmatmul.mubr.bf16.gmra.mxu1 %v13231_v33  ;;  %6191 = vmatprep.mubr.bf16.mxu0 %v13233_v54  ;;  %v13253_v33 = vcombine.low %v760_v48, %v776_v62  ;;  %v13255_v54 = vcombine.high %v281_v41, %v297_v40 }
 0x1be   : > { %v9987_v58 = vpop.f32.mrf.mxu0  ;;  %6352 = vmatprep.mubr.bf16.mxu1 %v13235_v16  ;;  %16814 = vst [vmem:[#allocation189_spill] sm:$0xff] %v13250_v31  ;;  %v13257_v32 = vcombine.high %v282_v46, %v298_v44 }
 0x1bf   : > { %v13246_v1 = vadd.f32 %v10097_v60, %v5795_v42  ;;  %v9988_v21 = vadd.f32 %v9987_v58, %v9986_v61  ;;  %v10099_v17 = vpop.f32.mrf.mxu1  ;;  %16815 = vst [vmem:[#allocation190_spill] sm:$0xff] %v13253_v33  ;;  %16816 = vst [vmem:[#allocation191_spill] sm:$0xff] %v13255_v54 }
 0x1c0   : > { %v10100_v14 = vadd.f32 %v10099_v17, %v10098_v27  ;;  %v9989_v11 = vpop.f32.mrf.mxu0  ;;  %16817 = vst [vmem:[#allocation192_spill] sm:$0xff] %v13257_v32  ;;  %v329_v17 = vld [vmem:[%s11988_s25 + $0x1b0] sm:$0xff] }
 0x1c1   : > { %v5800_v25 = vadd.f32 %v9988_v21, %v12828_v12  ;;  %v10101_v45 = vpop.f32.mrf.mxu1  ;;  %v313_v21 = vld [vmem:[%s11988_s25 + $0x130] sm:$0xff] }
 0x1c2   : > { %v9990_v16 = vpop.f32.mrf.mxu0  ;;  %v13318_v2 = vcombine.low %v313_v21, %v329_v17 }
 0x1c3   : > { %v13259_v60 = vadd.f32 %v10100_v14, %v5800_v25  ;;  %v9991_v61 = vadd.f32 %v9990_v16, %v9989_v11  ;;  %v10102_v42 = vpop.f32.mrf.mxu1  ;;  %v13270_v25 = vcombine.low %v281_v41, %v297_v40 }
 0x1c4   : > { %v10103_v27 = vadd.f32 %v10102_v42, %v10101_v45  ;;  %v9992_v58 = vpop.f32.mrf.mxu0  ;;  %6192 = vmatmul.mubr.bf16.gmra.mxu0 %v13250_v31  ;;  %v314_v45 = vld [vmem:[%s11988_s25 + $0x138] sm:$0xff]  ;;  %16822 = vst [vmem:[#allocation197_spill] sm:$0xff] %v13318_v2 }
 0x1c5   : > { %v5803_v12 = vadd.f32 %v9991_v61, %v12835_v63  ;;  %v10104_v10 = vpop.f32.mrf.mxu1  ;;  %6353 = vmatmul.mubr.bf16.gmra.mxu1 %v13253_v33  ;;  %6393 = vmatprep.mubr.bf16.mxu0 %v13255_v54  ;;  %16818 = vst [vmem:[#allocation193_spill] sm:$0xff] %v13270_v25  ;;  %v330_v63 = vld [vmem:[%s11988_s25 + $0x1b8] sm:$0xff]  ;;  %v13275_v33 = vcombine.low %v282_v46, %v298_v44  ;;  %v11692_v46 = vld [vmem:[%s16125_s0 + $0x470] sm:$0xff]  }
 0x1c6   : > { %v9993_v35 = vpop.f32.mrf.mxu0  ;;  %6554 = vmatprep.mubr.bf16.mxu1 %v13257_v32  ;;  %v346_v32 = vld [vmem:[%s11988_s25 + $0x238] sm:$0xff] }
 0x1c7   : > { %v13266_v48 = vadd.f32 %v10103_v27, %v5803_v12  ;;  %v9994_v62 = vadd.f32 %v9993_v35, %v9992_v58  ;;  %v10105_v16 = vpop.f32.mrf.mxu1  ;;  %16819 = vst [vmem:[#allocation194_spill] sm:$0xff] %v13275_v33  ;;  %v11689_v27 = vld [vmem:[%s16125_s0 + $0x438] sm:$0xff]  }
 0x1c8   : > { %v10106_v14 = vadd.f32 %v10105_v16, %v10104_v10  ;;  %v9995_v11 = vpop.f32.mrf.mxu0  ;;  %v11691_v58 = vld [vmem:[%s16125_s0 + $0x4b8] sm:$0xff]   ;;  %v13283_v10 = vcombine.high %v313_v21, %v329_v17  ;;  %v11694_v16 = vld [vmem:[%s16125_s0 + $0x4f0] sm:$0xff]   ;;  %v11697_v21 = vld [vmem:[%s16125_s0 + $0x428] sm:$0xff]  }
 0x1c9   : > { %v5808_v61 = vadd.f32 %v9994_v62, %v12849_v29  ;;  %v10107_v42 = vpop.f32.mrf.mxu1  ;;  %v13287_v29 = vcombine.high %v314_v45, %v330_v63  ;;  %v362_v54 = vld [vmem:[%s11988_s25 + $0x2b8] sm:$0xff] }
 0x1ca   : > { %v9996_v12 = vpop.f32.mrf.mxu0  ;;  %16820 = vst [vmem:[#allocation195_spill] sm:$0xff] %v13283_v10 }
 0x1cb   : > { %v13285_v41 = vadd.f32 %v10106_v14, %v5808_v61  ;;  %v9997_v40 = vadd.f32 %v9996_v12, %v9995_v11  ;;  %v10108_v35 = vpop.f32.mrf.mxu1  ;;  %16821 = vst [vmem:[#allocation196_spill] sm:$0xff] %v13287_v29  ;;  %v345_v61 = vld [vmem:[%s11988_s25 + $0x230] sm:$0xff] }
 0x1cc   : > { %v10109_v44 = vadd.f32 %v10108_v35, %v10107_v42  ;;  %v9998_v62 = vpop.f32.mrf.mxu0  ;;  %6394 = vmatmul.mubr.bf16.vlgmr.msra.gmra.mxu0 %v13270_v25  ;;  %v11693_v42 = vld [vmem:[%s16125_s0 + $0x430] sm:$0xff]  }
 0x1cd   : > { %v5811_v14 = vadd.f32 %v9997_v40, %v12870_v38  ;;  %v10110_v11 = vpop.f32.mrf.mxu1  ;;  %6555 = vmatmul.mubr.bf16.vlgmr.msra.gmra.mxu1 %v13275_v33  ;;  %10607 = vmatpush3.bf16.msra.mxu0 %v11689_v27  ;;  %v361_v35 = vld [vmem:[%s11988_s25 + $0x2b0] sm:$0xff]  ;;  %v11696_v40 = vld [vmem:[%s16125_s0 + $0x468] sm:$0xff]  }
 0x1ce   : > { %v9999_v12 = vpop.f32.mrf.mxu0  ;;  %10719 = vmatpush3.bf16.msra.mxu1 %v11691_v58  ;;  %6401 = vmatprep.mubr.bf16.mxu0 %v13283_v10  ;;  %v11695_v38 = vld [vmem:[%s16125_s0 + $0x4b0] sm:$0xff]   ;;  %v11698_v58 = vld [vmem:[%s16125_s0 + $0x4e8] sm:$0xff]  }
 0x1cf   : > { %v13310_v33 = vadd.f32 %v10109_v44, %v5811_v14  ;;  %v10000_v27 = vadd.f32 %v9999_v12, %v9998_v62  ;;  %v10111_v25 = vpop.f32.mrf.mxu1  ;;  %6562 = vmatprep.mubr.bf16.mxu1 %v13287_v29  ;;  %10608 = vmatprep.subr.bf16.mxu0 %v11692_v46  ;;  %v13321_v14 = vcombine.low %v314_v45, %v330_v63  ;;  %v11699_v45 = vld [vmem:[%s16125_s0 + $0x4a8] sm:$0xff]   ;;  %v11700_v63 = vld [vmem:[%s16125_s0 + $0x460] sm:$0xff]  }
 0x1d0   : > { %v10112_v10 = vadd.f32 %v10111_v25, %v10110_v11  ;;  %v10001_v31 = vpop.f32.mrf.mxu0  ;;  %10720 = vmatprep.subr.bf16.mxu1 %v11694_v16  ;;  %v13323_v62 = vcombine.high %v345_v61, %v361_v35  ;;  %v13325_v29 = vcombine.high %v346_v32, %v362_v54  ;;  %v377_v11 = vld [vmem:[%s11988_s25 + $0x330] sm:$0xff] }
 0x1d1   : > { %v5816_v0 = vadd.f32 %v10000_v27, %v12892_v28  ;;  %v10113_v44 = vpop.f32.mrf.mxu1  ;;  %16823 = vst [vmem:[#allocation198_spill] sm:$0xff] %v13321_v14  ;;  %10609 = vmatpush3.bf16.msra.mxu0 %v11693_v42  ;;  %v11701_v27 = vld [vmem:[%s16125_s0 + $0x420] sm:$0xff]  }
 0x1d2   : > { %16824 = vst [vmem:[#allocation199_spill] sm:$0xff] %v13323_v62  ;;  %v10002_v12 = vpop.f32.mrf.mxu0  ;;  %16825 = vst [vmem:[#allocation200_spill] sm:$0xff] %v13325_v29  ;;  %10721 = vmatpush3.bf16.msra.mxu1 %v11695_v38  ;;  %10610 = vmatprep.subr.bf16.mxu0 %v11696_v40  ;;  %v393_v38 = vld [vmem:[%s11988_s25 + $0x3b0] sm:$0xff]  ;;  %v378_v40 = vld [vmem:[%s11988_s25 + $0x338] sm:$0xff] }
 0x1d3   : > { %v13330_v17 = vadd.f32 %v10112_v10, %v5816_v0  ;;  %v10003_v25 = vadd.f32 %v10002_v12, %v10001_v31  ;;  %v10114_v28 = vpop.f32.mrf.mxu1  ;;  %10722 = vmatprep.subr.bf16.mxu1 %v11698_v58  ;;  %v11702_v31 = vld [vmem:[%s16125_s0 + $0x4e0] sm:$0xff]   ;;  %v394_v12 = vld [vmem:[%s11988_s25 + $0x3b8] sm:$0xff] }
 0x1d4   : > { %v10115_v46 = vadd.f32 %v10114_v28, %v10113_v44  ;;  %v10004_v16 = vpop.f32.mrf.mxu0  ;;  %6402 = vmatmul.mubr.bf16.gmra.mxu0 %v13318_v2  ;;  %v11704_v28 = vld [vmem:[%s16125_s0 + $0x458] sm:$0xff]   ;;  %v13361_v2 = vcombine.low %v345_v61, %v361_v35 }
 0x1d5   : > { %v5819_v0 = vadd.f32 %v10003_v25, %v12912_v34  ;;  %v10116_v10 = vpop.f32.mrf.mxu1  ;;  %6563 = vmatmul.mubr.bf16.gmra.mxu1 %v13321_v14  ;;  %6409 = vmatprep.mubr.bf16.mxu0 %v13323_v62  ;;  %v11703_v25 = vld [vmem:[%s16125_s0 + $0x4a0] sm:$0xff]   ;;  %v11705_v61 = vld [vmem:[%s16125_s0 + $0x418] sm:$0xff]   ;;  %v13407_v62 = vcombine.low %v377_v11, %v393_v38 }
 0x1d6   : > { %v10005_v42 = vpop.f32.mrf.mxu0  ;;  %6570 = vmatprep.mubr.bf16.mxu1 %v13325_v29  ;;  %10611 = vmatpush3.bf16.msra.mxu0 %v11697_v21  ;;  %16826 = vst [vmem:[#allocation201_spill] sm:$0xff] %v13361_v2  ;;  %v13371_v29 = vcombine.high %v378_v40, %v394_v12 }
 0x1d7   : > { %v13352_v58 = vadd.f32 %v10115_v46, %v5819_v0  ;;  %v10006_v44 = vadd.f32 %v10005_v42, %v10004_v16  ;;  %v10117_v34 = vpop.f32.mrf.mxu1  ;;  %10723 = vmatpush3.bf16.msra.mxu1 %v11699_v45  ;;  %10612 = vmatprep.subr.bf16.mxu0 %v11700_v63  ;;  %v11706_v46 = vld [vmem:[%s16125_s0 + $0x4d8] sm:$0xff]   ;;  %v13367_v16 = vcombine.low %v346_v32, %v362_v54 }
 0x1d8   : > { %v10118_v21 = vadd.f32 %v10117_v34, %v10116_v10  ;;  %v10007_v14 = vpop.f32.mrf.mxu0  ;;  %10724 = vmatprep.subr.bf16.mxu1 %v11702_v31  ;;  %v13369_v0 = vcombine.high %v377_v11, %v393_v38  ;;  %16829 = vst [vmem:[#allocation204_spill] sm:$0xff] %v13371_v29  ;;  %v11707_v32 = vld [vmem:[%s16125_s0 + $0x498] sm:$0xff]   ;;  %16830 = vst [vmem:[#allocation205_spill] sm:$0xff] %v13407_v62  ;;  %v11713_v11 = vld [vmem:[%s16125_s0 + $0x408] sm:$0xff]  }
 0x1d9   : > { %v5824_v45 = vadd.f32 %v10006_v44, %v12936_v26  ;;  %v10119_v63 = vpop.f32.mrf.mxu1  ;;  %16827 = vst [vmem:[#allocation202_spill] sm:$0xff] %v13367_v16  ;;  %v11708_v26 = vld [vmem:[%s16125_s0 + $0x450] sm:$0xff]  }
 0x1da   : > { %16828 = vst [vmem:[#allocation203_spill] sm:$0xff] %v13369_v0  ;;  %v10008_v42 = vpop.f32.mrf.mxu0  ;;  %10613 = vmatpush3.bf16.msra.mxu0 %v11701_v27 }
 0x1db   : > { %v13376_v35 = vadd.f32 %v10118_v21, %v5824_v45  ;;  %v10009_v31 = vadd.f32 %v10008_v42, %v10007_v14  ;;  %v10120_v10 = vpop.f32.mrf.mxu1  ;;  %10725 = vmatpush3.bf16.msra.mxu1 %v11703_v25  ;;  %10614 = vmatprep.subr.bf16.mxu0 %v11704_v28  ;;  %v11710_v14 = vld [vmem:[%s16125_s0 + $0x4d0] sm:$0xff]   ;;  %v410_v45 = vld [vmem:[%s11988_s25 + $0x438] sm:$0xff] }
 0x1dc   : > { %v10121_v54 = vadd.f32 %v10120_v10, %v10119_v63  ;;  %v10010_v27 = vpop.f32.mrf.mxu0  ;;  %6410 = vmatmul.mubr.bf16.gmra.mxu0 %v13361_v2  ;;  %10726 = vmatprep.subr.bf16.mxu1 %v11706_v46  ;;  %v409_v25 = vld [vmem:[%s11988_s25 + $0x430] sm:$0xff] }
 0x1dd   : > { %v5827_v44 = vadd.f32 %v10009_v31, %v12956_v52  ;;  %v10122_v34 = vpop.f32.mrf.mxu1  ;;  %6571 = vmatmul.mubr.bf16.gmra.mxu1 %v13367_v16  ;;  %6417 = vmatprep.mubr.bf16.mxu0 %v13369_v0  ;;  %v425_v21 = vld [vmem:[%s11988_s25 + $0x4b0] sm:$0xff]  ;;  %v426_v31 = vld [vmem:[%s11988_s25 + $0x4b8] sm:$0xff]  ;;  %v11712_v16 = vld [vmem:[%s16125_s0 + $0x448] sm:$0xff]  }
 0x1de   : > { %v10011_v28 = vpop.f32.mrf.mxu0  ;;  %6578 = vmatprep.mubr.bf16.mxu1 %v13371_v29  ;;  %10615 = vmatpush3.bf16.msra.mxu0 %v11705_v61  ;;  %v11709_v46 = vld [vmem:[%s16125_s0 + $0x410] sm:$0xff]   ;;  %v13417_v29 = vcombine.high %v410_v45, %v426_v31  ;;  %v13453_v0 = vcombine.low %v409_v25, %v425_v21 }
 0x1df   : > { %v13398_v63 = vadd.f32 %v10121_v54, %v5827_v44  ;;  %v10012_v42 = vadd.f32 %v10011_v28, %v10010_v27  ;;  %v10123_v52 = vpop.f32.mrf.mxu1  ;;  %10727 = vmatpush3.bf16.msra.mxu1 %v11707_v32  ;;  %10616 = vmatprep.subr.bf16.mxu0 %v11708_v26  ;;  %v11711_v10 = vld [vmem:[%s16125_s0 + $0x490] sm:$0xff]   ;;  %v11714_v54 = vld [vmem:[%s16125_s0 + $0x4c8] sm:$0xff]   ;;  %v13413_v27 = vcombine.low %v378_v40, %v394_v12  ;;  %v11716_v40 = vld [vmem:[%s16125_s0 + $0x440] sm:$0xff]  }
 0x1e0   : > { %v10124_v61 = vadd.f32 %v10123_v52, %v10122_v34  ;;  %v10013_v2 = vpop.f32.mrf.mxu0  ;;  %10728 = vmatprep.subr.bf16.mxu1 %v11710_v14  ;;  %v13415_v44 = vcombine.high %v409_v25, %v425_v21  ;;  %16833 = vst [vmem:[#allocation208_spill] sm:$0xff] %v13417_v29  ;;  %v441_v52 = vld [vmem:[%s11988_s25 + $0x530] sm:$0xff]  ;;  %16834 = vst [vmem:[#allocation209_spill] sm:$0xff] %v13453_v0 }
 0x1e1   : > { %v5832_v32 = vadd.f32 %v10012_v42, %v12980_v56  ;;  %v10125_v26 = vpop.f32.mrf.mxu1  ;;  %16831 = vst [vmem:[#allocation206_spill] sm:$0xff] %v13413_v27  ;;  %v11715_v56 = vld [vmem:[%s16125_s0 + $0x488] sm:$0xff]  }
 0x1e2   : > { %16832 = vst [vmem:[#allocation207_spill] sm:$0xff] %v13415_v44  ;;  %v10014_v28 = vpop.f32.mrf.mxu0  ;;  %10617 = vmatpush3.bf16.msra.mxu0 %v11709_v46 }
 0x1e3   : > { %v13422_v38 = vadd.f32 %v10124_v61, %v5832_v32  ;;  %v10015_v14 = vadd.f32 %v10014_v28, %v10013_v2  ;;  %v10126_v34 = vpop.f32.mrf.mxu1  ;;  %10729 = vmatpush3.bf16.msra.mxu1 %v11711_v10  ;;  %10618 = vmatprep.subr.bf16.mxu0 %v11712_v16  ;;  %v11718_v2 = vld [vmem:[%s16125_s0 + $0x4c0] sm:$0xff]   ;;  %v457_v61 = vld [vmem:[%s11988_s25 + $0x5b0] sm:$0xff]  ;;  %v442_v32 = vld [vmem:[%s11988_s25 + $0x538] sm:$0xff] }
 0x1e4   : > { %v10127_v12 = vadd.f32 %v10126_v34, %v10125_v26  ;;  %v10016_v46 = vpop.f32.mrf.mxu0  ;;  %6418 = vmatmul.mubr.bf16.gmra.mxu0 %v13407_v62  ;;  %10730 = vmatprep.subr.bf16.mxu1 %v11714_v54  ;;  %v11717_v54 = vld [vmem:[%s16125_s0 + $0x400] sm:$0xff]  }
 0x1e5   : > { %v5835_v16 = vadd.f32 %v10015_v14, %v13000_v23  ;;  %v10128_v42 = vpop.f32.mrf.mxu1  ;;  %6579 = vmatmul.mubr.bf16.gmra.mxu1 %v13413_v27  ;;  %6425 = vmatprep.mubr.bf16.mxu0 %v13415_v44  ;;  %v458_v14 = vld [vmem:[%s11988_s25 + $0x5b8] sm:$0xff]  ;;  %v11719_v34 = vld [vmem:[%s16125_s0 + $0x480] sm:$0xff]  }
 0x1e6   : > { %v10017_v10 = vpop.f32.mrf.mxu0  ;;  %6586 = vmatprep.mubr.bf16.mxu1 %v13417_v29  ;;  %10619 = vmatpush3.bf16.msra.mxu0 %v11713_v11  ;;  %v11720_v27 = vld [vmem:[%s16125_s0 + $0x578] sm:$0xff]   ;;  %v13463_v29 = vcombine.high %v442_v32, %v458_v14 }
 0x1e7   : > { %v13444_v26 = vadd.f32 %v10127_v12, %v5835_v16  ;;  %v10018_v28 = vadd.f32 %v10017_v10, %v10016_v46  ;;  %v10129_v23 = vpop.f32.mrf.mxu1  ;;  %10731 = vmatpush3.bf16.msra.mxu1 %v11715_v56  ;;  %10620 = vmatprep.subr.bf16.mxu0 %v11716_v40  ;;  %v11722_v12 = vld [vmem:[%s16125_s0 + $0x5f8] sm:$0xff]   ;;  %v13459_v46 = vcombine.low %v410_v45, %v426_v31 }
 0x1e8   : > { %v10130_v11 = vadd.f32 %v10129_v23, %v10128_v42  ;;  %v10019_v62 = vpop.f32.mrf.mxu0  ;;  %10732 = vmatprep.subr.bf16.mxu1 %v11718_v2  ;;  %v13461_v16 = vcombine.high %v441_v52, %v457_v61  ;;  %16837 = vst [vmem:[#allocation212_spill] sm:$0xff] %v13463_v29 }
 0x1e9   : > { %v5840_v56 = vadd.f32 %v10018_v28, %v13024_v5  ;;  %v10131_v40 = vpop.f32.mrf.mxu1  ;;  %16835 = vst [vmem:[#allocation210_spill] sm:$0xff] %v13459_v46  ;;  %v489_v28 = vld [vmem:[%s11988_s25 + $0x6b0] sm:$0xff] }
 0x1ea   : > { %16836 = vst [vmem:[#allocation211_spill] sm:$0xff] %v13461_v16  ;;  %v10020_v10 = vpop.f32.mrf.mxu0  ;;  %10621 = vmatpush3.bf16.msra.mxu0 %v11717_v54 }
 0x1eb   : > { %v13465_v42 = vadd.f32 %v10130_v11, %v5840_v56  ;;  %v10021_v25 = vadd.f32 %v10020_v10, %v10019_v62  ;;  %v10132_v21 = vpop.f32.mrf.mxu1  ;;  %10733 = vmatpush3.bf16.msra.mxu1 %v11719_v34  ;;  %10830 = vmatprep.subr.bf16.mxu0 %v11720_v27  ;;  %v473_v62 = vld [vmem:[%s11988_s25 + $0x630] sm:$0xff]  ;;  %v474_v11 = vld [vmem:[%s11988_s25 + $0x638] sm:$0xff]  ;;  %v13478_v10 = vcombine.low %v441_v52, %v457_v61 }
 0x1ec   : > { %v10133_v2 = vadd.f32 %v10132_v21, %v10131_v40  ;;  %v10022_v5 = vpop.f32.mrf.mxu0  ;;  %6426 = vmatmul.mubr.bf16.gmra.mxu0 %v13453_v0  ;;  %10942 = vmatprep.subr.bf16.mxu1 %v11722_v12  ;;  %v490_v56 = vld [vmem:[%s11988_s25 + $0x6b8] sm:$0xff]  ;;  %v13481_v21 = vcombine.low %v442_v32, %v458_v14  ;;  %v13500_v44 = vcombine.low %v473_v62, %v489_v28 }
 0x1ed   : > { %v5843_v45 = vadd.f32 %v10021_v25, %v13031_v55  ;;  %v10134_v31 = vpop.f32.mrf.mxu1  ;;  %6587 = vmatmul.mubr.bf16.gmra.mxu1 %v13459_v46  ;;  %6433 = vmatprep.mubr.bf16.mxu0 %v13461_v16  ;;  %16838 = vst [vmem:[#allocation213_spill] sm:$0xff] %v13478_v10  ;;  %v13483_v46 = vcombine.high %v473_v62, %v489_v28 }
 0x1ee   : > { %v10023_v54 = vpop.f32.mrf.mxu0  ;;  %6594 = vmatprep.mubr.bf16.mxu1 %v13463_v29  ;;  %16839 = vst [vmem:[#allocation214_spill] sm:$0xff] %v13481_v21  ;;  %16842 = vst [vmem:[#allocation217_spill] sm:$0xff] %v13500_v44 }
 0x1ef   : > { %v13474_v27 = vadd.f32 %v10133_v2, %v5843_v45  ;;  %v10024_v23 = vadd.f32 %v10023_v54, %v10022_v5  ;;  %v10135_v34 = vpop.f32.mrf.mxu1  ;;  %16840 = vst [vmem:[#allocation215_spill] sm:$0xff] %v13483_v46  ;;  %v13485_v2 = vcombine.high %v474_v11, %v490_v56  ;;  %v505_v54 = vld [vmem:[%s11988_s25 + $0x730] sm:$0xff] }
 0x1f0   : > { %v10136_v40 = vadd.f32 %v10135_v34, %v10134_v31  ;;  %v10025_v12 = vpop.f32.mrf.mxu0 }
 0x1f1   : > { %v5848_v55 = vadd.f32 %v10024_v23, %v13044_v15  ;;  %v10137_v25 = vpop.f32.mrf.mxu1  ;;  %16841 = vst [vmem:[#allocation216_spill] sm:$0xff] %v13485_v2  ;;  %v521_v23 = vld [vmem:[%s11988_s25 + $0x7b0] sm:$0xff] }
 0x1f2   : > { %v10026_v0 = vpop.f32.mrf.mxu0  ;;  %v13522_v16 = vcombine.low %v505_v54, %v521_v23 }
 0x1f3   : > { %v13487_v5 = vadd.f32 %v10136_v40, %v5848_v55  ;;  %v10027_v45 = vadd.f32 %v10026_v0, %v10025_v12  ;;  %v10138_v31 = vpop.f32.mrf.mxu1  ;;  %v506_v12 = vld [vmem:[%s11988_s25 + $0x738] sm:$0xff] }
 0x1f4   : > { %v10139_v52 = vadd.f32 %v10138_v31, %v10137_v25  ;;  %v10028_v61 = vpop.f32.mrf.mxu0  ;;  %6434 = vmatmul.mubr.bf16.gmra.mxu0 %v13478_v10  ;;  %v522_v55 = vld [vmem:[%s11988_s25 + $0x7b8] sm:$0xff]  ;;  %v13505_v10 = vcombine.high %v505_v54, %v521_v23  ;;  %16846 = vst [vmem:[#allocation221_spill] sm:$0xff] %v13522_v16 }
 0x1f5   : > { %v5851_v15 = vadd.f32 %v10027_v45, %v13051_v53  ;;  %v10140_v32 = vpop.f32.mrf.mxu1  ;;  %6595 = vmatmul.mubr.bf16.gmra.mxu1 %v13481_v21  ;;  %6441 = vmatprep.mubr.bf16.mxu0 %v13483_v46  ;;  %v13503_v21 = vcombine.low %v474_v11, %v490_v56 }
 0x1f6   : > { %v10029_v14 = vpop.f32.mrf.mxu0  ;;  %6602 = vmatprep.mubr.bf16.mxu1 %v13485_v2  ;;  %16844 = vst [vmem:[#allocation219_spill] sm:$0xff] %v13505_v10 }
 0x1f7   : > { %v13496_v0 = vadd.f32 %v10139_v52, %v5851_v15  ;;  %v10030_v34 = vadd.f32 %v10029_v14, %v10028_v61  ;;  %v10141_v40 = vpop.f32.mrf.mxu1  ;;  %16843 = vst [vmem:[#allocation218_spill] sm:$0xff] %v13503_v21  ;;  %v13507_v52 = vcombine.high %v506_v12, %v522_v55  ;;  %v537_v14 = vld [vmem:[%s11988_s25 + $0x830] sm:$0xff] }
 0x1f8   : > { %v10142_v25 = vadd.f32 %v10141_v40, %v10140_v32  ;;  %v10031_v31 = vpop.f32.mrf.mxu0 }
 0x1f9   : > { %v5856_v53 = vadd.f32 %v10030_v34, %v13064_v59  ;;  %v10143_v45 = vpop.f32.mrf.mxu1  ;;  %16845 = vst [vmem:[#allocation220_spill] sm:$0xff] %v13507_v52  ;;  %v553_v34 = vld [vmem:[%s11988_s25 + $0x8b0] sm:$0xff] }
 0x1fa   : > { %v10032_v29 = vpop.f32.mrf.mxu0  ;;  %v13544_v46 = vcombine.low %v537_v14, %v553_v34 }
 0x1fb   : > { %v13509_v61 = vadd.f32 %v10142_v25, %v5856_v53  ;;  %v10033_v15 = vadd.f32 %v10032_v29, %v10031_v31  ;;  %v10144_v32 = vpop.f32.mrf.mxu1  ;;  %v538_v31 = vld [vmem:[%s11988_s25 + $0x838] sm:$0xff] }
 0x1fc   : > { %v10145_v62 = vadd.f32 %v10144_v32, %v10143_v45  ;;  %v10034_v28 = vpop.f32.mrf.mxu0  ;;  %6442 = vmatmul.mubr.bf16.gmra.mxu0 %v13500_v44  ;;  %v554_v53 = vld [vmem:[%s11988_s25 + $0x8b8] sm:$0xff]  ;;  %v13527_v44 = vcombine.high %v537_v14, %v553_v34  ;;  %16850 = vst [vmem:[#allocation225_spill] sm:$0xff] %v13544_v46 }
 0x1fd   : > { %v5859_v59 = vadd.f32 %v10033_v15, %v13071_v18  ;;  %v10146_v11 = vpop.f32.mrf.mxu1  ;;  %6603 = vmatmul.mubr.bf16.gmra.mxu1 %v13503_v21  ;;  %6449 = vmatprep.mubr.bf16.mxu0 %v13505_v10  ;;  %v13525_v21 = vcombine.low %v506_v12, %v522_v55 }
 0x1fe   : > { %v10035_v56 = vpop.f32.mrf.mxu0  ;;  %6610 = vmatprep.mubr.bf16.mxu1 %v13507_v52  ;;  %16848 = vst [vmem:[#allocation223_spill] sm:$0xff] %v13527_v44 }
 0x1ff   : > { %v13518_v29 = vadd.f32 %v10145_v62, %v5859_v59  ;;  %v10036_v40 = vadd.f32 %v10035_v56, %v10034_v28  ;;  %v10147_v25 = vpop.f32.mrf.mxu1  ;;  %16847 = vst [vmem:[#allocation222_spill] sm:$0xff] %v13525_v21  ;;  %v13529_v62 = vcombine.high %v538_v31, %v554_v53  ;;  %v569_v56 = vld [vmem:[%s11988_s25 + $0x930] sm:$0xff] }
 0x200   : > { %v10148_v45 = vadd.f32 %v10147_v25, %v10146_v11  ;;  %v10037_v32 = vpop.f32.mrf.mxu0 }
 0x201   : > { %v5864_v18 = vadd.f32 %v10036_v40, %v13084_v36  ;;  %v10149_v15 = vpop.f32.mrf.mxu1  ;;  %16849 = vst [vmem:[#allocation224_spill] sm:$0xff] %v13529_v62  ;;  %v585_v40 = vld [vmem:[%s11988_s25 + $0x9b0] sm:$0xff] }
 0x202   : > { %v10038_v2 = vpop.f32.mrf.mxu0 }
 0x203   : > { %v13531_v28 = vadd.f32 %v10148_v45, %v5864_v18  ;;  %v10039_v59 = vadd.f32 %v10038_v2, %v10037_v32  ;;  %v10150_v11 = vpop.f32.mrf.mxu1  ;;  %v570_v32 = vld [vmem:[%s11988_s25 + $0x938] sm:$0xff] }
 0x204   : > { %v10151_v54 = vadd.f32 %v10150_v11, %v10149_v15  ;;  %v10040_v23 = vpop.f32.mrf.mxu0  ;;  %6450 = vmatmul.mubr.bf16.gmra.mxu0 %v13522_v16  ;;  %v586_v18 = vld [vmem:[%s11988_s25 + $0x9b8] sm:$0xff] }
 0x205   : > { %v5867_v36 = vadd.f32 %v10039_v59, %v13091_v37  ;;  %v10152_v12 = vpop.f32.mrf.mxu1  ;;  %6611 = vmatmul.mubr.bf16.gmra.mxu1 %v13525_v21  ;;  %6457 = vmatprep.mubr.bf16.mxu0 %v13527_v44  ;;  %v13547_v21 = vcombine.low %v538_v31, %v554_v53  ;;  %v13549_v44 = vcombine.high %v569_v56, %v585_v40 }
 0x206   : > { %v10041_v55 = vpop.f32.mrf.mxu0  ;;  %6618 = vmatprep.mubr.bf16.mxu1 %v13529_v62 }
 0x207   : > { %v13540_v2 = vadd.f32 %v10151_v54, %v5867_v36  ;;  %v10042_v25 = vadd.f32 %v10041_v55, %v10040_v23  ;;  %v10153_v45 = vpop.f32.mrf.mxu1  ;;  %16851 = vst [vmem:[#allocation226_spill] sm:$0xff] %v13547_v21  ;;  %16852 = vst [vmem:[#allocation227_spill] sm:$0xff] %v13549_v44  ;;  %v13551_v54 = vcombine.high %v570_v32, %v586_v18  ;;  %v601_v55 = vld [vmem:[%s11988_s25 + $0xa30] sm:$0xff] }
 0x208   : > { %v10154_v15 = vadd.f32 %v10153_v45, %v10152_v12  ;;  %v10043_v11 = vpop.f32.mrf.mxu0 }
 0x209   : > { %v5872_v37 = vadd.f32 %v10042_v25, %v13104_v7  ;;  %v10155_v59 = vpop.f32.mrf.mxu1  ;;  %16853 = vst [vmem:[#allocation228_spill] sm:$0xff] %v13551_v54  ;;  %v617_v25 = vld [vmem:[%s11988_s25 + $0xab0] sm:$0xff] }
 0x20a   : > { %v10044_v62 = vpop.f32.mrf.mxu0 }
 0x20b   : > { %v13553_v23 = vadd.f32 %v10154_v15, %v5872_v37  ;;  %v10045_v36 = vadd.f32 %v10044_v62, %v10043_v11  ;;  %v10156_v12 = vpop.f32.mrf.mxu1  ;;  %v602_v11 = vld [vmem:[%s11988_s25 + $0xa38] sm:$0xff] }
 0x20c   : > { %v10157_v14 = vadd.f32 %v10156_v12, %v10155_v59  ;;  %v10174_v34 = vpop.f32.mrf.mxu0  ;;  %6458 = vmatmul.mubr.bf16.gmra.mxu0 %v13544_v46  ;;  %v618_v37 = vld [vmem:[%s11988_s25 + $0xab8] sm:$0xff]  ;;  %v13566_v46 = vcombine.low %v569_v56, %v585_v40 }
 0x20d   : > { %v5875_v7 = vadd.f32 %v10045_v36, %v13111_v13  ;;  %v10286_v31 = vpop.f32.mrf.mxu1  ;;  %6619 = vmatmul.mubr.bf16.gmra.mxu1 %v13547_v21  ;;  %6465 = vmatprep.mubr.bf16.mxu0 %v13549_v44  ;;  %v13569_v21 = vcombine.low %v570_v32, %v586_v18  ;;  %v13571_v44 = vcombine.high %v601_v55, %v617_v25 }
 0x20e   : > { %v10175_v53 = vpop.f32.mrf.mxu0  ;;  %6626 = vmatprep.mubr.bf16.mxu1 %v13551_v54  ;;  %16854 = vst [vmem:[#allocation229_spill] sm:$0xff] %v13566_v46 }
 0x20f   : > { %v13562_v62 = vadd.f32 %v10157_v14, %v5875_v7  ;;  %v10176_v45 = vadd.f32 %v10175_v53, %v10174_v34  ;;  %v10287_v15 = vpop.f32.mrf.mxu1  ;;  %16855 = vst [vmem:[#allocation230_spill] sm:$0xff] %v13569_v21  ;;  %16856 = vst [vmem:[#allocation231_spill] sm:$0xff] %v13571_v44  ;;  %v13573_v14 = vcombine.high %v602_v11, %v618_v37  ;;  %v633_v53 = vld [vmem:[%s11988_s25 + $0xb30] sm:$0xff] }
 0x210   : > { %v10288_v59 = vadd.f32 %v10287_v15, %v10286_v31  ;;  %v10177_v12 = vpop.f32.mrf.mxu0 }
 0x211   : > { %v6074_v13 = vadd.f32 %v10176_v45, %v13127_v24  ;;  %v10289_v36 = vpop.f32.mrf.mxu1  ;;  %16857 = vst [vmem:[#allocation232_spill] sm:$0xff] %v13573_v14  ;;  %v649_v45 = vld [vmem:[%s11988_s25 + $0xbb0] sm:$0xff] }
 0x212   : > { %v10178_v54 = vpop.f32.mrf.mxu0 }
 0x213   : > { %v13575_v34 = vadd.f32 %v10288_v59, %v6074_v13  ;;  %v10179_v7 = vadd.f32 %v10178_v54, %v10177_v12  ;;  %v10290_v31 = vpop.f32.mrf.mxu1  ;;  %v634_v12 = vld [vmem:[%s11988_s25 + $0xb38] sm:$0xff] }
 0x214   : > { %v10291_v56 = vadd.f32 %v10290_v31, %v10289_v36  ;;  %v10180_v40 = vpop.f32.mrf.mxu0  ;;  %6466 = vmatmul.mubr.bf16.gmra.mxu0 %v13566_v46  ;;  %v650_v13 = vld [vmem:[%s11988_s25 + $0xbb8] sm:$0xff]  ;;  %v13588_v46 = vcombine.low %v601_v55, %v617_v25 }
 0x215   : > { %v6077_v24 = vadd.f32 %v10179_v7, %v13136_v50  ;;  %v10292_v32 = vpop.f32.mrf.mxu1  ;;  %6627 = vmatmul.mubr.bf16.gmra.mxu1 %v13569_v21  ;;  %6473 = vmatprep.mubr.bf16.mxu0 %v13571_v44  ;;  %v13591_v21 = vcombine.low %v602_v11, %v618_v37  ;;  %v13593_v44 = vcombine.high %v633_v53, %v649_v45 }
 0x216   : > { %v10181_v18 = vpop.f32.mrf.mxu0  ;;  %6634 = vmatprep.mubr.bf16.mxu1 %v13573_v14  ;;  %16858 = vst [vmem:[#allocation233_spill] sm:$0xff] %v13588_v46 }
 0x217   : > { %v13584_v54 = vadd.f32 %v10291_v56, %v6077_v24  ;;  %v10182_v15 = vadd.f32 %v10181_v18, %v10180_v40  ;;  %v10293_v59 = vpop.f32.mrf.mxu1  ;;  %16859 = vst [vmem:[#allocation234_spill] sm:$0xff] %v13591_v21  ;;  %16860 = vst [vmem:[#allocation235_spill] sm:$0xff] %v13593_v44  ;;  %v13595_v56 = vcombine.high %v634_v12, %v650_v13  ;;  %v665_v18 = vld [vmem:[%s11988_s25 + $0xc30] sm:$0xff] }
 0x218   : > { %v10294_v36 = vadd.f32 %v10293_v59, %v10292_v32  ;;  %v10183_v31 = vpop.f32.mrf.mxu0 }
 0x219   : > { %v6082_v50 = vadd.f32 %v10182_v15, %v13149_v3  ;;  %v10295_v7 = vpop.f32.mrf.mxu1  ;;  %16861 = vst [vmem:[#allocation236_spill] sm:$0xff] %v13595_v56  ;;  %v681_v15 = vld [vmem:[%s11988_s25 + $0xcb0] sm:$0xff] }
 0x21a   : > { %v10184_v14 = vpop.f32.mrf.mxu0 }
 0x21b   : > { %v13597_v40 = vadd.f32 %v10294_v36, %v6082_v50  ;;  %v10185_v24 = vadd.f32 %v10184_v14, %v10183_v31  ;;  %v10296_v32 = vpop.f32.mrf.mxu1  ;;  %v666_v31 = vld [vmem:[%s11988_s25 + $0xc38] sm:$0xff] }
 0x21c   : > { %v10297_v55 = vadd.f32 %v10296_v32, %v10295_v7  ;;  %v10186_v25 = vpop.f32.mrf.mxu0  ;;  %6474 = vmatmul.mubr.bf16.gmra.mxu0 %v13588_v46  ;;  %v682_v50 = vld [vmem:[%s11988_s25 + $0xcb8] sm:$0xff]  ;;  %v13610_v46 = vcombine.low %v633_v53, %v649_v45 }
 0x21d   : > { %v6085_v3 = vadd.f32 %v10185_v24, %v13158_v8  ;;  %v10298_v11 = vpop.f32.mrf.mxu1  ;;  %6635 = vmatmul.mubr.bf16.gmra.mxu1 %v13591_v21  ;;  %6481 = vmatprep.mubr.bf16.mxu0 %v13593_v44  ;;  %v13613_v21 = vcombine.low %v634_v12, %v650_v13  ;;  %v13615_v44 = vcombine.high %v665_v18, %v681_v15 }
 0x21e   : > { %v10187_v37 = vpop.f32.mrf.mxu0  ;;  %6642 = vmatprep.mubr.bf16.mxu1 %v13595_v56  ;;  %16862 = vst [vmem:[#allocation237_spill] sm:$0xff] %v13610_v46 }
 0x21f   : > { %v13606_v14 = vadd.f32 %v10297_v55, %v6085_v3  ;;  %v10188_v59 = vadd.f32 %v10187_v37, %v10186_v25  ;;  %v10299_v36 = vpop.f32.mrf.mxu1  ;;  %16863 = vst [vmem:[#allocation238_spill] sm:$0xff] %v13613_v21  ;;  %16864 = vst [vmem:[#allocation239_spill] sm:$0xff] %v13615_v44  ;;  %v13617_v55 = vcombine.high %v666_v31, %v682_v50  ;;  %v697_v37 = vld [vmem:[%s11988_s25 + $0xd30] sm:$0xff] }
 0x220   : > { %v10300_v7 = vadd.f32 %v10299_v36, %v10298_v11  ;;  %v10189_v32 = vpop.f32.mrf.mxu0 }
 0x221   : > { %v6090_v8 = vadd.f32 %v10188_v59, %v13171_v43  ;;  %v10301_v24 = vpop.f32.mrf.mxu1  ;;  %16865 = vst [vmem:[#allocation240_spill] sm:$0xff] %v13617_v55  ;;  %v713_v59 = vld [vmem:[%s11988_s25 + $0xdb0] sm:$0xff] }
 0x222   : > { %v10190_v56 = vpop.f32.mrf.mxu0 }
 0x223   : > { %v13619_v25 = vadd.f32 %v10300_v7, %v6090_v8  ;;  %v10191_v3 = vadd.f32 %v10190_v56, %v10189_v32  ;;  %v10302_v11 = vpop.f32.mrf.mxu1  ;;  %v698_v32 = vld [vmem:[%s11988_s25 + $0xd38] sm:$0xff] }
 0x224   : > { %v10303_v53 = vadd.f32 %v10302_v11, %v10301_v24  ;;  %v10192_v45 = vpop.f32.mrf.mxu0  ;;  %6482 = vmatmul.mubr.bf16.gmra.mxu0 %v13610_v46  ;;  %v714_v8 = vld [vmem:[%s11988_s25 + $0xdb8] sm:$0xff]  ;;  %v13632_v46 = vcombine.low %v665_v18, %v681_v15 }
 0x225   : > { %v6093_v43 = vadd.f32 %v10191_v3, %v13180_v57  ;;  %v10304_v12 = vpop.f32.mrf.mxu1  ;;  %6643 = vmatmul.mubr.bf16.gmra.mxu1 %v13613_v21  ;;  %6489 = vmatprep.mubr.bf16.mxu0 %v13615_v44  ;;  %v13635_v21 = vcombine.low %v666_v31, %v682_v50  ;;  %v13637_v44 = vcombine.high %v697_v37, %v713_v59 }
 0x226   : > { %v10193_v13 = vpop.f32.mrf.mxu0  ;;  %6650 = vmatprep.mubr.bf16.mxu1 %v13617_v55  ;;  %16866 = vst [vmem:[#allocation241_spill] sm:$0xff] %v13632_v46 }
 0x227   : > { %v13628_v56 = vadd.f32 %v10303_v53, %v6093_v43  ;;  %v10194_v36 = vadd.f32 %v10193_v13, %v10192_v45  ;;  %v10305_v7 = vpop.f32.mrf.mxu1  ;;  %16867 = vst [vmem:[#allocation242_spill] sm:$0xff] %v13635_v21  ;;  %16868 = vst [vmem:[#allocation243_spill] sm:$0xff] %v13637_v44  ;;  %v13639_v53 = vcombine.high %v698_v32, %v714_v8  ;;  %v729_v13 = vld [vmem:[%s11988_s25 + $0xe30] sm:$0xff] }
 0x228   : > { %v10306_v24 = vadd.f32 %v10305_v7, %v10304_v12  ;;  %v10195_v11 = vpop.f32.mrf.mxu0 }
 0x229   : > { %v6098_v57 = vadd.f32 %v10194_v36, %v13193_v6  ;;  %v10307_v3 = vpop.f32.mrf.mxu1  ;;  %16869 = vst [vmem:[#allocation244_spill] sm:$0xff] %v13639_v53  ;;  %v745_v36 = vld [vmem:[%s11988_s25 + $0xeb0] sm:$0xff] }
 0x22a   : > { %v10196_v55 = vpop.f32.mrf.mxu0 }
 0x22b   : > { %v13641_v45 = vadd.f32 %v10306_v24, %v6098_v57  ;;  %v10197_v43 = vadd.f32 %v10196_v55, %v10195_v11  ;;  %v10308_v12 = vpop.f32.mrf.mxu1  ;;  %v730_v11 = vld [vmem:[%s11988_s25 + $0xe38] sm:$0xff] }
 0x22c   : > { %v10309_v18 = vadd.f32 %v10308_v12, %v10307_v3  ;;  %v10198_v15 = vpop.f32.mrf.mxu0  ;;  %6490 = vmatmul.mubr.bf16.gmra.mxu0 %v13632_v46  ;;  %v746_v57 = vld [vmem:[%s11988_s25 + $0xeb8] sm:$0xff]  ;;  %v13654_v46 = vcombine.low %v697_v37, %v713_v59 }
 0x22d   : > { %v6101_v6 = vadd.f32 %v10197_v43, %v13202_v39  ;;  %v10310_v31 = vpop.f32.mrf.mxu1  ;;  %6651 = vmatmul.mubr.bf16.gmra.mxu1 %v13635_v21  ;;  %6497 = vmatprep.mubr.bf16.mxu0 %v13637_v44  ;;  %v13657_v21 = vcombine.low %v698_v32, %v714_v8  ;;  %v13659_v44 = vcombine.high %v729_v13, %v745_v36 }
 0x22e   : > { %v10199_v50 = vpop.f32.mrf.mxu0  ;;  %6658 = vmatprep.mubr.bf16.mxu1 %v13639_v53  ;;  %16870 = vst [vmem:[#allocation245_spill] sm:$0xff] %v13654_v46 }
 0x22f   : > { %v13650_v55 = vadd.f32 %v10309_v18, %v6101_v6  ;;  %v10200_v7 = vadd.f32 %v10199_v50, %v10198_v15  ;;  %v10311_v24 = vpop.f32.mrf.mxu1  ;;  %16871 = vst [vmem:[#allocation246_spill] sm:$0xff] %v13657_v21  ;;  %16872 = vst [vmem:[#allocation247_spill] sm:$0xff] %v13659_v44  ;;  %v13661_v18 = vcombine.high %v730_v11, %v746_v57  ;;  %v761_v50 = vld [vmem:[%s11988_s25 + $0xf30] sm:$0xff] }
 0x230   : > { %v10312_v3 = vadd.f32 %v10311_v24, %v10310_v31  ;;  %v10201_v12 = vpop.f32.mrf.mxu0 }
 0x231   : > { %v6106_v39 = vadd.f32 %v10200_v7, %v13215_v30  ;;  %v10313_v43 = vpop.f32.mrf.mxu1  ;;  %16873 = vst [vmem:[#allocation248_spill] sm:$0xff] %v13661_v18  ;;  %v777_v7 = vld [vmem:[%s11988_s25 + $0xfb0] sm:$0xff] }
 0x232   : > { %v10202_v53 = vpop.f32.mrf.mxu0 }
 0x233   : > { %v13663_v15 = vadd.f32 %v10312_v3, %v6106_v39  ;;  %v10203_v6 = vadd.f32 %v10202_v53, %v10201_v12  ;;  %v10314_v31 = vpop.f32.mrf.mxu1  ;;  %v762_v12 = vld [vmem:[%s11988_s25 + $0xf38] sm:$0xff] }
 0x234   : > { %v10315_v37 = vadd.f32 %v10314_v31, %v10313_v43  ;;  %v10204_v59 = vpop.f32.mrf.mxu0  ;;  %6498 = vmatmul.mubr.bf16.gmra.mxu0 %v13654_v46  ;;  %v778_v39 = vld [vmem:[%s11988_s25 + $0xfb8] sm:$0xff]  ;;  %v13676_v46 = vcombine.low %v729_v13, %v745_v36 }
 0x235   : > { %v6109_v30 = vadd.f32 %v10203_v6, %v13224_v19  ;;  %v10316_v32 = vpop.f32.mrf.mxu1  ;;  %6659 = vmatmul.mubr.bf16.gmra.mxu1 %v13657_v21  ;;  %6505 = vmatprep.mubr.bf16.mxu0 %v13659_v44  ;;  %v13679_v21 = vcombine.low %v730_v11, %v746_v57  ;;  %v13681_v44 = vcombine.high %v761_v50, %v777_v7 }
 0x236   : > { %v10205_v8 = vpop.f32.mrf.mxu0  ;;  %6666 = vmatprep.mubr.bf16.mxu1 %v13661_v18  ;;  %16874 = vst [vmem:[#allocation249_spill] sm:$0xff] %v13676_v46 }
 0x237   : > { %v13672_v53 = vadd.f32 %v10315_v37, %v6109_v30  ;;  %v10206_v24 = vadd.f32 %v10205_v8, %v10204_v59  ;;  %v10317_v3 = vpop.f32.mrf.mxu1  ;;  %16875 = vst [vmem:[#allocation250_spill] sm:$0xff] %v13679_v21  ;;  %16876 = vst [vmem:[#allocation251_spill] sm:$0xff] %v13681_v44  ;;  %v13683_v37 = vcombine.high %v762_v12, %v778_v39  ;;  %v283_v8 = vld [vmem:[%s11988_s25 + $0x40] sm:$0xff] }
 0x238   : > { %v10318_v43 = vadd.f32 %v10317_v3, %v10316_v32  ;;  %v10207_v31 = vpop.f32.mrf.mxu0 }
 0x239   : > { %v6114_v19 = vadd.f32 %v10206_v24, %v13237_v47  ;;  %v10319_v6 = vpop.f32.mrf.mxu1  ;;  %16877 = vst [vmem:[#allocation252_spill] sm:$0xff] %v13683_v37  ;;  %v299_v24 = vld [vmem:[%s11988_s25 + $0xc0] sm:$0xff] }
 0x23a   : > { %v10208_v18 = vpop.f32.mrf.mxu0 }
 0x23b   : > { %v13685_v59 = vadd.f32 %v10318_v43, %v6114_v19  ;;  %v10209_v30 = vadd.f32 %v10208_v18, %v10207_v31  ;;  %v10320_v32 = vpop.f32.mrf.mxu1  ;;  %v284_v31 = vld [vmem:[%s11988_s25 + $0x48] sm:$0xff] }
 0x23c   : > { %v10321_v13 = vadd.f32 %v10320_v32, %v10319_v6  ;;  %v10210_v36 = vpop.f32.mrf.mxu0  ;;  %6506 = vmatmul.mubr.bf16.gmra.mxu0 %v13676_v46  ;;  %v300_v19 = vld [vmem:[%s11988_s25 + $0xc8] sm:$0xff]  ;;  %v13698_v46 = vcombine.low %v761_v50, %v777_v7 }
 0x23d   : > { %v6117_v47 = vadd.f32 %v10209_v30, %v13246_v1  ;;  %v10322_v11 = vpop.f32.mrf.mxu1  ;;  %6667 = vmatmul.mubr.bf16.gmra.mxu1 %v13679_v21  ;;  %6513 = vmatprep.mubr.bf16.mxu0 %v13681_v44  ;;  %v13701_v21 = vcombine.low %v762_v12, %v778_v39  ;;  %v13703_v44 = vcombine.high %v283_v8, %v299_v24 }
 0x23e   : > { %v10211_v57 = vpop.f32.mrf.mxu0  ;;  %6674 = vmatprep.mubr.bf16.mxu1 %v13683_v37  ;;  %16878 = vst [vmem:[#allocation253_spill] sm:$0xff] %v13698_v46  ;;  %v13705_v16 = vcombine.high %v284_v31, %v300_v19 }
 0x23f   : > { %v13694_v18 = vadd.f32 %v10321_v13, %v6117_v47  ;;  %v10212_v3 = vadd.f32 %v10211_v57, %v10210_v36  ;;  %v10323_v43 = vpop.f32.mrf.mxu1  ;;  %16879 = vst [vmem:[#allocation254_spill] sm:$0xff] %v13701_v21  ;;  %16880 = vst [vmem:[#allocation255_spill] sm:$0xff] %v13703_v44 }
 0x240   : > { %v10324_v6 = vadd.f32 %v10323_v43, %v10322_v11  ;;  %v10213_v32 = vpop.f32.mrf.mxu0  ;;  %16881 = vst [vmem:[#allocation256_spill] sm:$0xff] %v13705_v16  ;;  %v331_v43 = vld [vmem:[%s11988_s25 + $0x1c0] sm:$0xff] }
 0x241   : > { %v6122_v1 = vadd.f32 %v10212_v3, %v13259_v60  ;;  %v10325_v30 = vpop.f32.mrf.mxu1  ;;  %v315_v3 = vld [vmem:[%s11988_s25 + $0x140] sm:$0xff] }
 0x242   : > { %v10214_v37 = vpop.f32.mrf.mxu0  ;;  %v13766_v52 = vcombine.low %v315_v3, %v331_v43 }
 0x243   : > { %v13707_v13 = vadd.f32 %v10324_v6, %v6122_v1  ;;  %v10215_v36 = vadd.f32 %v10214_v37, %v10213_v32  ;;  %v10326_v47 = vpop.f32.mrf.mxu1  ;;  %v13718_v1 = vcombine.low %v283_v8, %v299_v24 }
 0x244   : > { %v10327_v11 = vadd.f32 %v10326_v47, %v10325_v30  ;;  %v10216_v57 = vpop.f32.mrf.mxu0  ;;  %6514 = vmatmul.mubr.bf16.gmra.mxu0 %v13698_v46  ;;  %v316_v30 = vld [vmem:[%s11988_s25 + $0x148] sm:$0xff]  ;;  %16886 = vst [vmem:[#allocation261_spill] sm:$0xff] %v13766_v52 }
 0x245   : > { %v6125_v60 = vadd.f32 %v10215_v36, %v13266_v48  ;;  %v10328_v50 = vpop.f32.mrf.mxu1  ;;  %6675 = vmatmul.mubr.bf16.gmra.mxu1 %v13701_v21  ;;  %6715 = vmatprep.mubr.bf16.mxu0 %v13703_v44  ;;  %16882 = vst [vmem:[#allocation257_spill] sm:$0xff] %v13718_v1  ;;  %v332_v48 = vld [vmem:[%s11988_s25 + $0x1c8] sm:$0xff]  ;;  %v13723_v21 = vcombine.low %v284_v31, %v300_v19  ;;  %v11724_v31 = vld [vmem:[%s16125_s0 + $0x570] sm:$0xff]  }
 0x246   : > { %v10217_v7 = vpop.f32.mrf.mxu0  ;;  %6876 = vmatprep.mubr.bf16.mxu1 %v13705_v16  ;;  %v348_v16 = vld [vmem:[%s11988_s25 + $0x248] sm:$0xff] }
 0x247   : > { %v13714_v12 = vadd.f32 %v10327_v11, %v6125_v60  ;;  %v10218_v39 = vadd.f32 %v10217_v7, %v10216_v57  ;;  %v10329_v37 = vpop.f32.mrf.mxu1  ;;  %16883 = vst [vmem:[#allocation258_spill] sm:$0xff] %v13723_v21  ;;  %v11721_v11 = vld [vmem:[%s16125_s0 + $0x538] sm:$0xff]   ;;  %v364_v44 = vld [vmem:[%s11988_s25 + $0x2c8] sm:$0xff] }
 0x248   : > { %v10330_v6 = vadd.f32 %v10329_v37, %v10328_v50  ;;  %v10219_v32 = vpop.f32.mrf.mxu0  ;;  %v11723_v57 = vld [vmem:[%s16125_s0 + $0x5b8] sm:$0xff]   ;;  %v13731_v50 = vcombine.high %v315_v3, %v331_v43  ;;  %v11726_v37 = vld [vmem:[%s16125_s0 + $0x5f0] sm:$0xff]   ;;  %v11729_v3 = vld [vmem:[%s16125_s0 + $0x528] sm:$0xff]  }
 0x249   : > { %v6130_v36 = vadd.f32 %v10218_v39, %v13285_v41  ;;  %v10331_v47 = vpop.f32.mrf.mxu1  ;;  %v13735_v41 = vcombine.high %v316_v30, %v332_v48 }
 0x24a   : > { %v10220_v60 = vpop.f32.mrf.mxu0  ;;  %16884 = vst [vmem:[#allocation259_spill] sm:$0xff] %v13731_v50 }
 0x24b   : > { %v13733_v8 = vadd.f32 %v10330_v6, %v6130_v36  ;;  %v10221_v24 = vadd.f32 %v10220_v60, %v10219_v32  ;;  %v10332_v7 = vpop.f32.mrf.mxu1  ;;  %16885 = vst [vmem:[#allocation260_spill] sm:$0xff] %v13735_v41  ;;  %v347_v36 = vld [vmem:[%s11988_s25 + $0x240] sm:$0xff] }
 0x24c   : > { %v10333_v19 = vadd.f32 %v10332_v7, %v10331_v47  ;;  %v10222_v39 = vpop.f32.mrf.mxu0  ;;  %6716 = vmatmul.mubr.bf16.vlgmr.msra.gmra.mxu0 %v13718_v1  ;;  %v11725_v47 = vld [vmem:[%s16125_s0 + $0x530] sm:$0xff]   ;;  %v363_v7 = vld [vmem:[%s11988_s25 + $0x2c0] sm:$0xff] }
 0x24d   : > { %v6133_v6 = vadd.f32 %v10221_v24, %v13310_v33  ;;  %v10334_v32 = vpop.f32.mrf.mxu1  ;;  %6877 = vmatmul.mubr.bf16.vlgmr.msra.gmra.mxu1 %v13723_v21  ;;  %10831 = vmatpush3.bf16.msra.mxu0 %v11721_v11  ;;  %v11727_v33 = vld [vmem:[%s16125_s0 + $0x5b0] sm:$0xff]   ;;  %v11728_v24 = vld [vmem:[%s16125_s0 + $0x568] sm:$0xff]  }
 0x24e   : > { %v10223_v60 = vpop.f32.mrf.mxu0  ;;  %10943 = vmatpush3.bf16.msra.mxu1 %v11723_v57  ;;  %6723 = vmatprep.mubr.bf16.mxu0 %v13731_v50  ;;  %v11730_v57 = vld [vmem:[%s16125_s0 + $0x5e8] sm:$0xff]  }
 0x24f   : > { %v13758_v21 = vadd.f32 %v10333_v19, %v6133_v6  ;;  %v10224_v11 = vadd.f32 %v10223_v60, %v10222_v39  ;;  %v10335_v1 = vpop.f32.mrf.mxu1  ;;  %6884 = vmatprep.mubr.bf16.mxu1 %v13735_v41  ;;  %10832 = vmatprep.subr.bf16.mxu0 %v11724_v31  ;;  %v13769_v6 = vcombine.low %v316_v30, %v332_v48  ;;  %v11731_v30 = vld [vmem:[%s16125_s0 + $0x5a8] sm:$0xff]   ;;  %v11732_v48 = vld [vmem:[%s16125_s0 + $0x560] sm:$0xff]  }
 0x250   : > { %v10336_v50 = vadd.f32 %v10335_v1, %v10334_v32  ;;  %v10225_v46 = vpop.f32.mrf.mxu0  ;;  %10944 = vmatprep.subr.bf16.mxu1 %v11726_v37  ;;  %v13771_v39 = vcombine.high %v347_v36, %v363_v7  ;;  %v13773_v41 = vcombine.high %v348_v16, %v364_v44  ;;  %v379_v32 = vld [vmem:[%s11988_s25 + $0x340] sm:$0xff] }
 0x251   : > { %v6138_v10 = vadd.f32 %v10224_v11, %v13330_v17  ;;  %v10337_v19 = vpop.f32.mrf.mxu1  ;;  %16887 = vst [vmem:[#allocation262_spill] sm:$0xff] %v13769_v6  ;;  %10833 = vmatpush3.bf16.msra.mxu0 %v11725_v47  ;;  %v11733_v11 = vld [vmem:[%s16125_s0 + $0x520] sm:$0xff]  }
 0x252   : > { %16888 = vst [vmem:[#allocation263_spill] sm:$0xff] %v13771_v39  ;;  %v10226_v60 = vpop.f32.mrf.mxu0  ;;  %16889 = vst [vmem:[#allocation264_spill] sm:$0xff] %v13773_v41  ;;  %10945 = vmatpush3.bf16.msra.mxu1 %v11727_v33  ;;  %10834 = vmatprep.subr.bf16.mxu0 %v11728_v24  ;;  %v395_v33 = vld [vmem:[%s11988_s25 + $0x3c0] sm:$0xff]  ;;  %v380_v24 = vld [vmem:[%s11988_s25 + $0x348] sm:$0xff] }
 0x253   : > { %v13778_v43 = vadd.f32 %v10336_v50, %v6138_v10  ;;  %v10227_v1 = vadd.f32 %v10226_v60, %v10225_v46  ;;  %v10338_v17 = vpop.f32.mrf.mxu1  ;;  %10946 = vmatprep.subr.bf16.mxu1 %v11730_v57  ;;  %v11734_v46 = vld [vmem:[%s16125_s0 + $0x5e0] sm:$0xff]   ;;  %v396_v60 = vld [vmem:[%s11988_s25 + $0x3c8] sm:$0xff] }
 0x254   : > { %v10339_v31 = vadd.f32 %v10338_v17, %v10337_v19  ;;  %v10228_v37 = vpop.f32.mrf.mxu0  ;;  %6724 = vmatmul.mubr.bf16.gmra.mxu0 %v13766_v52  ;;  %v11736_v17 = vld [vmem:[%s16125_s0 + $0x558] sm:$0xff]   ;;  %v13809_v52 = vcombine.low %v347_v36, %v363_v7 }
 0x255   : > { %v6141_v10 = vadd.f32 %v10227_v1, %v13352_v58  ;;  %v10340_v50 = vpop.f32.mrf.mxu1  ;;  %6885 = vmatmul.mubr.bf16.gmra.mxu1 %v13769_v6  ;;  %6731 = vmatprep.mubr.bf16.mxu0 %v13771_v39  ;;  %v11735_v1 = vld [vmem:[%s16125_s0 + $0x5a0] sm:$0xff]   ;;  %v11737_v36 = vld [vmem:[%s16125_s0 + $0x518] sm:$0xff]   ;;  %v13855_v39 = vcombine.low %v379_v32, %v395_v33 }
 0x256   : > { %v10229_v47 = vpop.f32.mrf.mxu0  ;;  %6892 = vmatprep.mubr.bf16.mxu1 %v13773_v41  ;;  %10835 = vmatpush3.bf16.msra.mxu0 %v11729_v3  ;;  %16890 = vst [vmem:[#allocation265_spill] sm:$0xff] %v13809_v52  ;;  %v13819_v41 = vcombine.high %v380_v24, %v396_v60 }
 0x257   : > { %v13800_v57 = vadd.f32 %v10339_v31, %v6141_v10  ;;  %v10230_v19 = vadd.f32 %v10229_v47, %v10228_v37  ;;  %v10341_v58 = vpop.f32.mrf.mxu1  ;;  %10947 = vmatpush3.bf16.msra.mxu1 %v11731_v30  ;;  %10836 = vmatprep.subr.bf16.mxu0 %v11732_v48  ;;  %v11738_v31 = vld [vmem:[%s16125_s0 + $0x5d8] sm:$0xff]   ;;  %v13815_v37 = vcombine.low %v348_v16, %v364_v44  ;;  %v11740_v44 = vld [vmem:[%s16125_s0 + $0x550] sm:$0xff]  }
 0x258   : > { %v10342_v3 = vadd.f32 %v10341_v58, %v10340_v50  ;;  %v10231_v6 = vpop.f32.mrf.mxu0  ;;  %10948 = vmatprep.subr.bf16.mxu1 %v11734_v46  ;;  %v13817_v10 = vcombine.high %v379_v32, %v395_v33  ;;  %16893 = vst [vmem:[#allocation268_spill] sm:$0xff] %v13819_v41  ;;  %16894 = vst [vmem:[#allocation269_spill] sm:$0xff] %v13855_v39  ;;  %v11745_v32 = vld [vmem:[%s16125_s0 + $0x508] sm:$0xff]  }
 0x259   : > { %v6146_v30 = vadd.f32 %v10230_v19, %v13376_v35  ;;  %v10343_v48 = vpop.f32.mrf.mxu1  ;;  %16891 = vst [vmem:[#allocation266_spill] sm:$0xff] %v13815_v37  ;;  %v11739_v35 = vld [vmem:[%s16125_s0 + $0x598] sm:$0xff]  }
 0x25a   : > { %16892 = vst [vmem:[#allocation267_spill] sm:$0xff] %v13817_v10  ;;  %v10232_v47 = vpop.f32.mrf.mxu0  ;;  %10837 = vmatpush3.bf16.msra.mxu0 %v11733_v11 }
 0x25b   : > { %v13824_v7 = vadd.f32 %v10342_v3, %v6146_v30  ;;  %v10233_v46 = vadd.f32 %v10232_v47, %v10231_v6  ;;  %v10344_v50 = vpop.f32.mrf.mxu1  ;;  %10949 = vmatpush3.bf16.msra.mxu1 %v11735_v1  ;;  %10838 = vmatprep.subr.bf16.mxu0 %v11736_v17  ;;  %v11742_v6 = vld [vmem:[%s16125_s0 + $0x5d0] sm:$0xff]   ;;  %v411_v1 = vld [vmem:[%s11988_s25 + $0x440] sm:$0xff]  ;;  %v412_v30 = vld [vmem:[%s11988_s25 + $0x448] sm:$0xff] }
 0x25c   : > { %v10345_v16 = vadd.f32 %v10344_v50, %v10343_v48  ;;  %v10234_v11 = vpop.f32.mrf.mxu0  ;;  %6732 = vmatmul.mubr.bf16.gmra.mxu0 %v13809_v52  ;;  %10950 = vmatprep.subr.bf16.mxu1 %v11738_v31  ;;  %v427_v3 = vld [vmem:[%s11988_s25 + $0x4c0] sm:$0xff]  ;;  %v11741_v31 = vld [vmem:[%s16125_s0 + $0x510] sm:$0xff]  }
 0x25d   : > { %v6149_v19 = vadd.f32 %v10233_v46, %v13398_v63  ;;  %v10346_v58 = vpop.f32.mrf.mxu1  ;;  %6893 = vmatmul.mubr.bf16.gmra.mxu1 %v13815_v37  ;;  %6739 = vmatprep.mubr.bf16.mxu0 %v13817_v10  ;;  %v428_v46 = vld [vmem:[%s11988_s25 + $0x4c8] sm:$0xff]  ;;  %v11743_v50 = vld [vmem:[%s16125_s0 + $0x590] sm:$0xff]   ;;  %v13901_v10 = vcombine.low %v411_v1, %v427_v3 }
 0x25e   : > { %v10235_v17 = vpop.f32.mrf.mxu0  ;;  %6900 = vmatprep.mubr.bf16.mxu1 %v13819_v41  ;;  %10839 = vmatpush3.bf16.msra.mxu0 %v11737_v36  ;;  %v11744_v37 = vld [vmem:[%s16125_s0 + $0x548] sm:$0xff]   ;;  %v13865_v41 = vcombine.high %v412_v30, %v428_v46 }
 0x25f   : > { %v13846_v48 = vadd.f32 %v10345_v16, %v6149_v19  ;;  %v10236_v47 = vadd.f32 %v10235_v17, %v10234_v11  ;;  %v10347_v63 = vpop.f32.mrf.mxu1  ;;  %10951 = vmatpush3.bf16.msra.mxu1 %v11739_v35  ;;  %10840 = vmatprep.subr.bf16.mxu0 %v11740_v44  ;;  %v11746_v16 = vld [vmem:[%s16125_s0 + $0x5c8] sm:$0xff]   ;;  %v13861_v11 = vcombine.low %v380_v24, %v396_v60  ;;  %v11748_v24 = vld [vmem:[%s16125_s0 + $0x540] sm:$0xff]  }
 0x260   : > { %v10348_v36 = vadd.f32 %v10347_v63, %v10346_v58  ;;  %v10237_v52 = vpop.f32.mrf.mxu0  ;;  %10952 = vmatprep.subr.bf16.mxu1 %v11742_v6  ;;  %v13863_v19 = vcombine.high %v411_v1, %v427_v3  ;;  %16897 = vst [vmem:[#allocation272_spill] sm:$0xff] %v13865_v41  ;;  %v443_v63 = vld [vmem:[%s11988_s25 + $0x540] sm:$0xff]  ;;  %16898 = vst [vmem:[#allocation273_spill] sm:$0xff] %v13901_v10 }
 0x261   : > { %v6154_v35 = vadd.f32 %v10236_v47, %v13422_v38  ;;  %v10349_v44 = vpop.f32.mrf.mxu1  ;;  %16895 = vst [vmem:[#allocation270_spill] sm:$0xff] %v13861_v11  ;;  %v11747_v38 = vld [vmem:[%s16125_s0 + $0x588] sm:$0xff]  }
 0x262   : > { %16896 = vst [vmem:[#allocation271_spill] sm:$0xff] %v13863_v19  ;;  %v10238_v17 = vpop.f32.mrf.mxu0  ;;  %10841 = vmatpush3.bf16.msra.mxu0 %v11741_v31 }
 0x263   : > { %v13870_v33 = vadd.f32 %v10348_v36, %v6154_v35  ;;  %v10239_v6 = vadd.f32 %v10238_v17, %v10237_v52  ;;  %v10350_v58 = vpop.f32.mrf.mxu1  ;;  %10953 = vmatpush3.bf16.msra.mxu1 %v11743_v50  ;;  %10842 = vmatprep.subr.bf16.mxu0 %v11744_v37  ;;  %v11750_v52 = vld [vmem:[%s16125_s0 + $0x5c0] sm:$0xff]   ;;  %v444_v35 = vld [vmem:[%s11988_s25 + $0x548] sm:$0xff] }
 0x264   : > { %v10351_v60 = vadd.f32 %v10350_v58, %v10349_v44  ;;  %v10240_v31 = vpop.f32.mrf.mxu0  ;;  %6740 = vmatmul.mubr.bf16.gmra.mxu0 %v13855_v39  ;;  %10954 = vmatprep.subr.bf16.mxu1 %v11746_v16  ;;  %v459_v36 = vld [vmem:[%s11988_s25 + $0x5c0] sm:$0xff] }
 0x265   : > { %v6157_v37 = vadd.f32 %v10239_v6, %v13444_v26  ;;  %v10352_v47 = vpop.f32.mrf.mxu1  ;;  %6901 = vmatmul.mubr.bf16.gmra.mxu1 %v13861_v11  ;;  %6747 = vmatprep.mubr.bf16.mxu0 %v13863_v19  ;;  %v11749_v16 = vld [vmem:[%s16125_s0 + $0x500] sm:$0xff]   ;;  %v460_v6 = vld [vmem:[%s11988_s25 + $0x5c8] sm:$0xff]  ;;  %v11752_v11 = vld [vmem:[%s16125_s0 + $0x678] sm:$0xff]  }
 0x266   : > { %v10241_v50 = vpop.f32.mrf.mxu0  ;;  %6908 = vmatprep.mubr.bf16.mxu1 %v13865_v41  ;;  %10843 = vmatpush3.bf16.msra.mxu0 %v11745_v32  ;;  %v11751_v58 = vld [vmem:[%s16125_s0 + $0x580] sm:$0xff]   ;;  %v13911_v41 = vcombine.high %v444_v35, %v460_v6 }
 0x267   : > { %v13892_v44 = vadd.f32 %v10351_v60, %v6157_v37  ;;  %v10242_v17 = vadd.f32 %v10241_v50, %v10240_v31  ;;  %v10353_v26 = vpop.f32.mrf.mxu1  ;;  %10955 = vmatpush3.bf16.msra.mxu1 %v11747_v38  ;;  %10844 = vmatprep.subr.bf16.mxu0 %v11748_v24  ;;  %v11754_v60 = vld [vmem:[%s16125_s0 + $0x6f8] sm:$0xff]   ;;  %v13907_v31 = vcombine.low %v412_v30, %v428_v46 }
 0x268   : > { %v10354_v32 = vadd.f32 %v10353_v26, %v10352_v47  ;;  %v10243_v39 = vpop.f32.mrf.mxu0  ;;  %10956 = vmatprep.subr.bf16.mxu1 %v11750_v52  ;;  %v13909_v37 = vcombine.high %v443_v63, %v459_v36  ;;  %16901 = vst [vmem:[#allocation276_spill] sm:$0xff] %v13911_v41 }
 0x269   : > { %v6162_v38 = vadd.f32 %v10242_v17, %v13465_v42  ;;  %v10355_v24 = vpop.f32.mrf.mxu1  ;;  %16899 = vst [vmem:[#allocation274_spill] sm:$0xff] %v13907_v31  ;;  %v491_v17 = vld [vmem:[%s11988_s25 + $0x6c0] sm:$0xff] }
 0x26a   : > { %16900 = vst [vmem:[#allocation275_spill] sm:$0xff] %v13909_v37  ;;  %v10244_v50 = vpop.f32.mrf.mxu0  ;;  %10845 = vmatpush3.bf16.msra.mxu0 %v11749_v16 }
 0x26b   : > { %v13913_v47 = vadd.f32 %v10354_v32, %v6162_v38  ;;  %v10245_v1 = vadd.f32 %v10244_v50, %v10243_v39  ;;  %v10356_v3 = vpop.f32.mrf.mxu1  ;;  %10957 = vmatpush3.bf16.msra.mxu1 %v11751_v58  ;;  %11054 = vmatprep.subr.bf16.mxu0 %v11752_v11  ;;  %v475_v39 = vld [vmem:[%s11988_s25 + $0x640] sm:$0xff]  ;;  %v476_v32 = vld [vmem:[%s11988_s25 + $0x648] sm:$0xff]  ;;  %v13926_v50 = vcombine.low %v443_v63, %v459_v36 }
 0x26c   : > { %v10357_v52 = vadd.f32 %v10356_v3, %v10355_v24  ;;  %v10246_v42 = vpop.f32.mrf.mxu0  ;;  %6748 = vmatmul.mubr.bf16.gmra.mxu0 %v13901_v10  ;;  %11166 = vmatprep.subr.bf16.mxu1 %v11754_v60  ;;  %v492_v38 = vld [vmem:[%s11988_s25 + $0x6c8] sm:$0xff]  ;;  %v13929_v3 = vcombine.low %v444_v35, %v460_v6  ;;  %v13948_v19 = vcombine.low %v475_v39, %v491_v17 }
 0x26d   : > { %v6165_v30 = vadd.f32 %v10245_v1, %v13474_v27  ;;  %v10358_v46 = vpop.f32.mrf.mxu1  ;;  %6909 = vmatmul.mubr.bf16.gmra.mxu1 %v13907_v31  ;;  %6755 = vmatprep.mubr.bf16.mxu0 %v13909_v37  ;;  %16902 = vst [vmem:[#allocation277_spill] sm:$0xff] %v13926_v50  ;;  %v13931_v31 = vcombine.high %v475_v39, %v491_v17 }
 0x26e   : > { %v10247_v16 = vpop.f32.mrf.mxu0  ;;  %6916 = vmatprep.mubr.bf16.mxu1 %v13911_v41  ;;  %16903 = vst [vmem:[#allocation278_spill] sm:$0xff] %v13929_v3  ;;  %16906 = vst [vmem:[#allocation281_spill] sm:$0xff] %v13948_v19 }
 0x26f   : > { %v13922_v11 = vadd.f32 %v10357_v52, %v6165_v30  ;;  %v10248_v26 = vadd.f32 %v10247_v16, %v10246_v42  ;;  %v10359_v58 = vpop.f32.mrf.mxu1  ;;  %16904 = vst [vmem:[#allocation279_spill] sm:$0xff] %v13931_v31  ;;  %v13933_v52 = vcombine.high %v476_v32, %v492_v38  ;;  %v507_v16 = vld [vmem:[%s11988_s25 + $0x740] sm:$0xff] }
 0x270   : > { %v10360_v24 = vadd.f32 %v10359_v58, %v10358_v46  ;;  %v10249_v60 = vpop.f32.mrf.mxu0 }
 0x271   : > { %v6170_v27 = vadd.f32 %v10248_v26, %v13487_v5  ;;  %v10361_v1 = vpop.f32.mrf.mxu1  ;;  %16905 = vst [vmem:[#allocation280_spill] sm:$0xff] %v13933_v52  ;;  %v523_v26 = vld [vmem:[%s11988_s25 + $0x7c0] sm:$0xff] }
 0x272   : > { %v10250_v10 = vpop.f32.mrf.mxu0  ;;  %v13970_v37 = vcombine.low %v507_v16, %v523_v26 }
 0x273   : > { %v13935_v42 = vadd.f32 %v10360_v24, %v6170_v27  ;;  %v10251_v30 = vadd.f32 %v10250_v10, %v10249_v60  ;;  %v10362_v46 = vpop.f32.mrf.mxu1  ;;  %v508_v60 = vld [vmem:[%s11988_s25 + $0x748] sm:$0xff] }
 0x274   : > { %v10363_v63 = vadd.f32 %v10362_v46, %v10361_v1  ;;  %v10252_v36 = vpop.f32.mrf.mxu0  ;;  %6756 = vmatmul.mubr.bf16.gmra.mxu0 %v13926_v50  ;;  %v524_v27 = vld [vmem:[%s11988_s25 + $0x7c8] sm:$0xff]  ;;  %v13953_v50 = vcombine.high %v507_v16, %v523_v26  ;;  %16910 = vst [vmem:[#allocation285_spill] sm:$0xff] %v13970_v37 }
 0x275   : > { %v6173_v5 = vadd.f32 %v10251_v30, %v13496_v0  ;;  %v10364_v35 = vpop.f32.mrf.mxu1  ;;  %6917 = vmatmul.mubr.bf16.gmra.mxu1 %v13929_v3  ;;  %6763 = vmatprep.mubr.bf16.mxu0 %v13931_v31  ;;  %v13951_v3 = vcombine.low %v476_v32, %v492_v38 }
 0x276   : > { %v10253_v6 = vpop.f32.mrf.mxu0  ;;  %6924 = vmatprep.mubr.bf16.mxu1 %v13933_v52  ;;  %16908 = vst [vmem:[#allocation283_spill] sm:$0xff] %v13953_v50 }
 0x277   : > { %v13944_v10 = vadd.f32 %v10363_v63, %v6173_v5  ;;  %v10254_v58 = vadd.f32 %v10253_v6, %v10252_v36  ;;  %v10365_v24 = vpop.f32.mrf.mxu1  ;;  %16907 = vst [vmem:[#allocation282_spill] sm:$0xff] %v13951_v3  ;;  %v13955_v63 = vcombine.high %v508_v60, %v524_v27  ;;  %v539_v6 = vld [vmem:[%s11988_s25 + $0x840] sm:$0xff] }
 0x278   : > { %v10366_v1 = vadd.f32 %v10365_v24, %v10364_v35  ;;  %v10255_v46 = vpop.f32.mrf.mxu0 }
 0x279   : > { %v6178_v0 = vadd.f32 %v10254_v58, %v13509_v61  ;;  %v10367_v30 = vpop.f32.mrf.mxu1  ;;  %16909 = vst [vmem:[#allocation284_spill] sm:$0xff] %v13955_v63  ;;  %v555_v58 = vld [vmem:[%s11988_s25 + $0x8c0] sm:$0xff] }
 0x27a   : > { %v10256_v41 = vpop.f32.mrf.mxu0  ;;  %v13992_v31 = vcombine.low %v539_v6, %v555_v58 }
 0x27b   : > { %v13957_v36 = vadd.f32 %v10366_v1, %v6178_v0  ;;  %v10257_v5 = vadd.f32 %v10256_v41, %v10255_v46  ;;  %v10368_v35 = vpop.f32.mrf.mxu1  ;;  %v540_v46 = vld [vmem:[%s11988_s25 + $0x848] sm:$0xff] }
 0x27c   : > { %v10369_v39 = vadd.f32 %v10368_v35, %v10367_v30  ;;  %v10258_v17 = vpop.f32.mrf.mxu0  ;;  %6764 = vmatmul.mubr.bf16.gmra.mxu0 %v13948_v19  ;;  %v556_v0 = vld [vmem:[%s11988_s25 + $0x8c8] sm:$0xff]  ;;  %v13975_v19 = vcombine.high %v539_v6, %v555_v58  ;;  %16914 = vst [vmem:[#allocation289_spill] sm:$0xff] %v13992_v31 }
 0x27d   : > { %v6181_v61 = vadd.f32 %v10257_v5, %v13518_v29  ;;  %v10370_v32 = vpop.f32.mrf.mxu1  ;;  %6925 = vmatmul.mubr.bf16.gmra.mxu1 %v13951_v3  ;;  %6771 = vmatprep.mubr.bf16.mxu0 %v13953_v50  ;;  %v13973_v3 = vcombine.low %v508_v60, %v524_v27 }
 0x27e   : > { %v10259_v38 = vpop.f32.mrf.mxu0  ;;  %6932 = vmatprep.mubr.bf16.mxu1 %v13955_v63  ;;  %16912 = vst [vmem:[#allocation287_spill] sm:$0xff] %v13975_v19 }
 0x27f   : > { %v13966_v41 = vadd.f32 %v10369_v39, %v6181_v61  ;;  %v10260_v24 = vadd.f32 %v10259_v38, %v10258_v17  ;;  %v10371_v1 = vpop.f32.mrf.mxu1  ;;  %16911 = vst [vmem:[#allocation286_spill] sm:$0xff] %v13973_v3  ;;  %v13977_v39 = vcombine.high %v540_v46, %v556_v0  ;;  %v571_v38 = vld [vmem:[%s11988_s25 + $0x940] sm:$0xff] }
 0x280   : > { %v10372_v30 = vadd.f32 %v10371_v1, %v10370_v32  ;;  %v10261_v35 = vpop.f32.mrf.mxu0 }
 0x281   : > { %v6186_v29 = vadd.f32 %v10260_v24, %v13531_v28  ;;  %v10373_v5 = vpop.f32.mrf.mxu1  ;;  %16913 = vst [vmem:[#allocation288_spill] sm:$0xff] %v13977_v39  ;;  %v587_v24 = vld [vmem:[%s11988_s25 + $0x9c0] sm:$0xff] }
 0x282   : > { %v10262_v52 = vpop.f32.mrf.mxu0 }
 0x283   : > { %v13979_v17 = vadd.f32 %v10372_v30, %v6186_v29  ;;  %v10263_v61 = vadd.f32 %v10262_v52, %v10261_v35  ;;  %v10374_v32 = vpop.f32.mrf.mxu1  ;;  %v572_v35 = vld [vmem:[%s11988_s25 + $0x948] sm:$0xff] }
 0x284   : > { %v10375_v16 = vadd.f32 %v10374_v32, %v10373_v5  ;;  %v10264_v26 = vpop.f32.mrf.mxu0  ;;  %6772 = vmatmul.mubr.bf16.gmra.mxu0 %v13970_v37  ;;  %v588_v29 = vld [vmem:[%s11988_s25 + $0x9c8] sm:$0xff] }
 0x285   : > { %v6189_v28 = vadd.f32 %v10263_v61, %v13540_v2  ;;  %v10376_v60 = vpop.f32.mrf.mxu1  ;;  %6933 = vmatmul.mubr.bf16.gmra.mxu1 %v13973_v3  ;;  %6779 = vmatprep.mubr.bf16.mxu0 %v13975_v19  ;;  %v13995_v3 = vcombine.low %v540_v46, %v556_v0  ;;  %v13997_v19 = vcombine.high %v571_v38, %v587_v24 }
 0x286   : > { %v10265_v27 = vpop.f32.mrf.mxu0  ;;  %6940 = vmatprep.mubr.bf16.mxu1 %v13977_v39 }
 0x287   : > { %v13988_v52 = vadd.f32 %v10375_v16, %v6189_v28  ;;  %v10266_v1 = vadd.f32 %v10265_v27, %v10264_v26  ;;  %v10377_v30 = vpop.f32.mrf.mxu1  ;;  %16915 = vst [vmem:[#allocation290_spill] sm:$0xff] %v13995_v3  ;;  %16916 = vst [vmem:[#allocation291_spill] sm:$0xff] %v13997_v19  ;;  %v13999_v16 = vcombine.high %v572_v35, %v588_v29  ;;  %v603_v27 = vld [vmem:[%s11988_s25 + $0xa40] sm:$0xff] }
 0x288   : > { %v10378_v5 = vadd.f32 %v10377_v30, %v10376_v60  ;;  %v10267_v32 = vpop.f32.mrf.mxu0 }
 0x289   : > { %v6194_v2 = vadd.f32 %v10266_v1, %v13553_v23  ;;  %v10379_v61 = vpop.f32.mrf.mxu1  ;;  %16917 = vst [vmem:[#allocation292_spill] sm:$0xff] %v13999_v16  ;;  %v619_v1 = vld [vmem:[%s11988_s25 + $0xac0] sm:$0xff] }
 0x28a   : > { %v10268_v39 = vpop.f32.mrf.mxu0 }
 0x28b   : > { %v14001_v26 = vadd.f32 %v10378_v5, %v6194_v2  ;;  %v10269_v28 = vadd.f32 %v10268_v39, %v10267_v32  ;;  %v10380_v60 = vpop.f32.mrf.mxu1  ;;  %v604_v32 = vld [vmem:[%s11988_s25 + $0xa48] sm:$0xff] }
 0x28c   : > { %v10381_v6 = vadd.f32 %v10380_v60, %v10379_v61  ;;  %v10398_v58 = vpop.f32.mrf.mxu0  ;;  %6780 = vmatmul.mubr.bf16.gmra.mxu0 %v13992_v31  ;;  %v620_v2 = vld [vmem:[%s11988_s25 + $0xac8] sm:$0xff]  ;;  %v14014_v31 = vcombine.low %v571_v38, %v587_v24 }
 0x28d   : > { %v6197_v23 = vadd.f32 %v10269_v28, %v13562_v62  ;;  %v10510_v46 = vpop.f32.mrf.mxu1  ;;  %6941 = vmatmul.mubr.bf16.gmra.mxu1 %v13995_v3  ;;  %6787 = vmatprep.mubr.bf16.mxu0 %v13997_v19  ;;  %v14017_v3 = vcombine.low %v572_v35, %v588_v29  ;;  %v14019_v19 = vcombine.high %v603_v27, %v619_v1 }
 0x28e   : > { %v10399_v0 = vpop.f32.mrf.mxu0  ;;  %6948 = vmatprep.mubr.bf16.mxu1 %v13999_v16  ;;  %16918 = vst [vmem:[#allocation293_spill] sm:$0xff] %v14014_v31 }
 0x28f   : > { %v14010_v39 = vadd.f32 %v10381_v6, %v6197_v23  ;;  %v10400_v30 = vadd.f32 %v10399_v0, %v10398_v58  ;;  %v10511_v5 = vpop.f32.mrf.mxu1  ;;  %16919 = vst [vmem:[#allocation294_spill] sm:$0xff] %v14017_v3  ;;  %16920 = vst [vmem:[#allocation295_spill] sm:$0xff] %v14019_v19  ;;  %v14021_v6 = vcombine.high %v604_v32, %v620_v2  ;;  %v635_v0 = vld [vmem:[%s11988_s25 + $0xb40] sm:$0xff] }
 0x290   : > { %v10512_v61 = vadd.f32 %v10511_v5, %v10510_v46  ;;  %v10401_v60 = vpop.f32.mrf.mxu0 }
 0x291   : > { %v6396_v62 = vadd.f32 %v10400_v30, %v13575_v34  ;;  %v10513_v28 = vpop.f32.mrf.mxu1  ;;  %16921 = vst [vmem:[#allocation296_spill] sm:$0xff] %v14021_v6  ;;  %v651_v30 = vld [vmem:[%s11988_s25 + $0xbc0] sm:$0xff] }
 0x292   : > { %v10402_v16 = vpop.f32.mrf.mxu0 }
 0x293   : > { %v14023_v58 = vadd.f32 %v10512_v61, %v6396_v62  ;;  %v10403_v23 = vadd.f32 %v10402_v16, %v10401_v60  ;;  %v10514_v46 = vpop.f32.mrf.mxu1  ;;  %v636_v60 = vld [vmem:[%s11988_s25 + $0xb48] sm:$0xff] }
 0x294   : > { %v10515_v38 = vadd.f32 %v10514_v46, %v10513_v28  ;;  %v10404_v24 = vpop.f32.mrf.mxu0  ;;  %6788 = vmatmul.mubr.bf16.gmra.mxu0 %v14014_v31  ;;  %v652_v62 = vld [vmem:[%s11988_s25 + $0xbc8] sm:$0xff]  ;;  %v14036_v31 = vcombine.low %v603_v27, %v619_v1 }
 0x295   : > { %v6399_v34 = vadd.f32 %v10403_v23, %v13584_v54  ;;  %v10516_v35 = vpop.f32.mrf.mxu1  ;;  %6949 = vmatmul.mubr.bf16.gmra.mxu1 %v14017_v3  ;;  %6795 = vmatprep.mubr.bf16.mxu0 %v14019_v19  ;;  %v14039_v3 = vcombine.low %v604_v32, %v620_v2  ;;  %v14041_v19 = vcombine.high %v635_v0, %v651_v30 }
 0x296   : > { %v10405_v29 = vpop.f32.mrf.mxu0  ;;  %6956 = vmatprep.mubr.bf16.mxu1 %v14021_v6  ;;  %16922 = vst [vmem:[#allocation297_spill] sm:$0xff] %v14036_v31 }
 0x297   : > { %v14032_v16 = vadd.f32 %v10515_v38, %v6399_v34  ;;  %v10406_v5 = vadd.f32 %v10405_v29, %v10404_v24  ;;  %v10517_v61 = vpop.f32.mrf.mxu1  ;;  %16923 = vst [vmem:[#allocation298_spill] sm:$0xff] %v14039_v3  ;;  %16924 = vst [vmem:[#allocation299_spill] sm:$0xff] %v14041_v19  ;;  %v14043_v38 = vcombine.high %v636_v60, %v652_v62  ;;  %v667_v29 = vld [vmem:[%s11988_s25 + $0xc40] sm:$0xff] }
 0x298   : > { %v10518_v28 = vadd.f32 %v10517_v61, %v10516_v35  ;;  %v10407_v46 = vpop.f32.mrf.mxu0 }
 0x299   : > { %v6404_v54 = vadd.f32 %v10406_v5, %v13597_v40  ;;  %v10519_v23 = vpop.f32.mrf.mxu1  ;;  %16925 = vst [vmem:[#allocation300_spill] sm:$0xff] %v14043_v38  ;;  %v683_v5 = vld [vmem:[%s11988_s25 + $0xcc0] sm:$0xff] }
 0x29a   : > { %v10408_v6 = vpop.f32.mrf.mxu0 }
 0x29b   : > { %v14045_v24 = vadd.f32 %v10518_v28, %v6404_v54  ;;  %v10409_v34 = vadd.f32 %v10408_v6, %v10407_v46  ;;  %v10520_v35 = vpop.f32.mrf.mxu1  ;;  %v668_v46 = vld [vmem:[%s11988_s25 + $0xc48] sm:$0xff] }
 0x29c   : > { %v10521_v27 = vadd.f32 %v10520_v35, %v10519_v23  ;;  %v10410_v1 = vpop.f32.mrf.mxu0  ;;  %6796 = vmatmul.mubr.bf16.gmra.mxu0 %v14036_v31  ;;  %v684_v54 = vld [vmem:[%s11988_s25 + $0xcc8] sm:$0xff]  ;;  %v14058_v31 = vcombine.low %v635_v0, %v651_v30 }
 0x29d   : > { %v6407_v40 = vadd.f32 %v10409_v34, %v13606_v14  ;;  %v10522_v32 = vpop.f32.mrf.mxu1  ;;  %6957 = vmatmul.mubr.bf16.gmra.mxu1 %v14039_v3  ;;  %6803 = vmatprep.mubr.bf16.mxu0 %v14041_v19  ;;  %v14061_v3 = vcombine.low %v636_v60, %v652_v62  ;;  %v14063_v19 = vcombine.high %v667_v29, %v683_v5 }
 0x29e   : > { %v10411_v2 = vpop.f32.mrf.mxu0  ;;  %6964 = vmatprep.mubr.bf16.mxu1 %v14043_v38  ;;  %16926 = vst [vmem:[#allocation301_spill] sm:$0xff] %v14058_v31 }
 0x29f   : > { %v14054_v6 = vadd.f32 %v10521_v27, %v6407_v40  ;;  %v10412_v61 = vadd.f32 %v10411_v2, %v10410_v1  ;;  %v10523_v28 = vpop.f32.mrf.mxu1  ;;  %16927 = vst [vmem:[#allocation302_spill] sm:$0xff] %v14061_v3  ;;  %16928 = vst [vmem:[#allocation303_spill] sm:$0xff] %v14063_v19  ;;  %v14065_v27 = vcombine.high %v668_v46, %v684_v54  ;;  %v699_v2 = vld [vmem:[%s11988_s25 + $0xd40] sm:$0xff] }
 0x2a0   : > { %v10524_v23 = vadd.f32 %v10523_v28, %v10522_v32  ;;  %v10413_v35 = vpop.f32.mrf.mxu0 }
 0x2a1   : > { %v6412_v14 = vadd.f32 %v10412_v61, %v13619_v25  ;;  %v10525_v34 = vpop.f32.mrf.mxu1  ;;  %16929 = vst [vmem:[#allocation304_spill] sm:$0xff] %v14065_v27  ;;  %v715_v61 = vld [vmem:[%s11988_s25 + $0xdc0] sm:$0xff] }
 0x2a2   : > { %v10414_v38 = vpop.f32.mrf.mxu0 }
 0x2a3   : > { %v14067_v1 = vadd.f32 %v10524_v23, %v6412_v14  ;;  %v10415_v40 = vadd.f32 %v10414_v38, %v10413_v35  ;;  %v10526_v32 = vpop.f32.mrf.mxu1  ;;  %v700_v35 = vld [vmem:[%s11988_s25 + $0xd48] sm:$0xff] }
 0x2a4   : > { %v10527_v0 = vadd.f32 %v10526_v32, %v10525_v34  ;;  %v10416_v30 = vpop.f32.mrf.mxu0  ;;  %6804 = vmatmul.mubr.bf16.gmra.mxu0 %v14058_v31  ;;  %v716_v14 = vld [vmem:[%s11988_s25 + $0xdc8] sm:$0xff]  ;;  %v14080_v31 = vcombine.low %v667_v29, %v683_v5 }
 0x2a5   : > { %v6415_v25 = vadd.f32 %v10415_v40, %v13628_v56  ;;  %v10528_v60 = vpop.f32.mrf.mxu1  ;;  %6965 = vmatmul.mubr.bf16.gmra.mxu1 %v14061_v3  ;;  %6811 = vmatprep.mubr.bf16.mxu0 %v14063_v19  ;;  %v14083_v3 = vcombine.low %v668_v46, %v684_v54  ;;  %v14085_v19 = vcombine.high %v699_v2, %v715_v61 }
 0x2a6   : > { %v10417_v62 = vpop.f32.mrf.mxu0  ;;  %6972 = vmatprep.mubr.bf16.mxu1 %v14065_v27  ;;  %16930 = vst [vmem:[#allocation305_spill] sm:$0xff] %v14080_v31 }
 0x2a7   : > { %v14076_v38 = vadd.f32 %v10527_v0, %v6415_v25  ;;  %v10418_v28 = vadd.f32 %v10417_v62, %v10416_v30  ;;  %v10529_v23 = vpop.f32.mrf.mxu1  ;;  %16931 = vst [vmem:[#allocation306_spill] sm:$0xff] %v14083_v3  ;;  %16932 = vst [vmem:[#allocation307_spill] sm:$0xff] %v14085_v19  ;;  %v14087_v0 = vcombine.high %v700_v35, %v716_v14  ;;  %v731_v62 = vld [vmem:[%s11988_s25 + $0xe40] sm:$0xff] }
 0x2a8   : > { %v10530_v34 = vadd.f32 %v10529_v23, %v10528_v60  ;;  %v10419_v32 = vpop.f32.mrf.mxu0 }
 0x2a9   : > { %v6420_v56 = vadd.f32 %v10418_v28, %v13641_v45  ;;  %v10531_v40 = vpop.f32.mrf.mxu1  ;;  %16933 = vst [vmem:[#allocation308_spill] sm:$0xff] %v14087_v0  ;;  %v747_v28 = vld [vmem:[%s11988_s25 + $0xec0] sm:$0xff] }
 0x2aa   : > { %v10420_v27 = vpop.f32.mrf.mxu0 }
 0x2ab   : > { %v14089_v30 = vadd.f32 %v10530_v34, %v6420_v56  ;;  %v10421_v25 = vadd.f32 %v10420_v27, %v10419_v32  ;;  %v10532_v60 = vpop.f32.mrf.mxu1  ;;  %v732_v32 = vld [vmem:[%s11988_s25 + $0xe48] sm:$0xff] }
 0x2ac   : > { %v10533_v29 = vadd.f32 %v10532_v60, %v10531_v40  ;;  %v10422_v5 = vpop.f32.mrf.mxu0  ;;  %6812 = vmatmul.mubr.bf16.gmra.mxu0 %v14080_v31  ;;  %v748_v56 = vld [vmem:[%s11988_s25 + $0xec8] sm:$0xff]  ;;  %v14102_v31 = vcombine.low %v699_v2, %v715_v61 }
 0x2ad   : > { %v6423_v45 = vadd.f32 %v10421_v25, %v13650_v55  ;;  %v10534_v46 = vpop.f32.mrf.mxu1  ;;  %6973 = vmatmul.mubr.bf16.gmra.mxu1 %v14083_v3  ;;  %6819 = vmatprep.mubr.bf16.mxu0 %v14085_v19  ;;  %v14105_v3 = vcombine.low %v700_v35, %v716_v14  ;;  %v14107_v19 = vcombine.high %v731_v62, %v747_v28 }
 0x2ae   : > { %v10423_v54 = vpop.f32.mrf.mxu0  ;;  %6980 = vmatprep.mubr.bf16.mxu1 %v14087_v0  ;;  %16934 = vst [vmem:[#allocation309_spill] sm:$0xff] %v14102_v31 }
 0x2af   : > { %v14098_v27 = vadd.f32 %v10533_v29, %v6423_v45  ;;  %v10424_v23 = vadd.f32 %v10423_v54, %v10422_v5  ;;  %v10535_v34 = vpop.f32.mrf.mxu1  ;;  %16935 = vst [vmem:[#allocation310_spill] sm:$0xff] %v14105_v3  ;;  %16936 = vst [vmem:[#allocation311_spill] sm:$0xff] %v14107_v19  ;;  %v14109_v29 = vcombine.high %v732_v32, %v748_v56  ;;  %v763_v54 = vld [vmem:[%s11988_s25 + $0xf40] sm:$0xff] }
 0x2b0   : > { %v10536_v40 = vadd.f32 %v10535_v34, %v10534_v46  ;;  %v10425_v60 = vpop.f32.mrf.mxu0 }
 0x2b1   : > { %v6428_v55 = vadd.f32 %v10424_v23, %v13663_v15  ;;  %v10537_v25 = vpop.f32.mrf.mxu1  ;;  %16937 = vst [vmem:[#allocation312_spill] sm:$0xff] %v14109_v29  ;;  %v779_v23 = vld [vmem:[%s11988_s25 + $0xfc0] sm:$0xff] }
 0x2b2   : > { %v10426_v0 = vpop.f32.mrf.mxu0 }
 0x2b3   : > { %v14111_v5 = vadd.f32 %v10536_v40, %v6428_v55  ;;  %v10427_v45 = vadd.f32 %v10426_v0, %v10425_v60  ;;  %v10538_v46 = vpop.f32.mrf.mxu1  ;;  %v764_v60 = vld [vmem:[%s11988_s25 + $0xf48] sm:$0xff] }
 0x2b4   : > { %v10539_v2 = vadd.f32 %v10538_v46, %v10537_v25  ;;  %v10428_v61 = vpop.f32.mrf.mxu0  ;;  %6820 = vmatmul.mubr.bf16.gmra.mxu0 %v14102_v31  ;;  %v780_v55 = vld [vmem:[%s11988_s25 + $0xfc8] sm:$0xff]  ;;  %v14124_v31 = vcombine.low %v731_v62, %v747_v28 }
 0x2b5   : > { %v6431_v15 = vadd.f32 %v10427_v45, %v13672_v53  ;;  %v10540_v35 = vpop.f32.mrf.mxu1  ;;  %6981 = vmatmul.mubr.bf16.gmra.mxu1 %v14105_v3  ;;  %6827 = vmatprep.mubr.bf16.mxu0 %v14107_v19  ;;  %v14127_v3 = vcombine.low %v732_v32, %v748_v56  ;;  %v14129_v19 = vcombine.high %v763_v54, %v779_v23 }
 0x2b6   : > { %v10429_v14 = vpop.f32.mrf.mxu0  ;;  %6988 = vmatprep.mubr.bf16.mxu1 %v14109_v29  ;;  %16938 = vst [vmem:[#allocation313_spill] sm:$0xff] %v14124_v31 }
 0x2b7   : > { %v14120_v0 = vadd.f32 %v10539_v2, %v6431_v15  ;;  %v10430_v34 = vadd.f32 %v10429_v14, %v10428_v61  ;;  %v10541_v40 = vpop.f32.mrf.mxu1  ;;  %16939 = vst [vmem:[#allocation314_spill] sm:$0xff] %v14127_v3  ;;  %16940 = vst [vmem:[#allocation315_spill] sm:$0xff] %v14129_v19  ;;  %v14131_v2 = vcombine.high %v764_v60, %v780_v55  ;;  %v285_v14 = vld [vmem:[%s11988_s25 + $0x50] sm:$0xff] }
 0x2b8   : > { %v10542_v25 = vadd.f32 %v10541_v40, %v10540_v35  ;;  %v10431_v46 = vpop.f32.mrf.mxu0 }
 0x2b9   : > { %v6436_v53 = vadd.f32 %v10430_v34, %v13685_v59  ;;  %v10543_v45 = vpop.f32.mrf.mxu1  ;;  %16941 = vst [vmem:[#allocation316_spill] sm:$0xff] %v14131_v2  ;;  %v301_v34 = vld [vmem:[%s11988_s25 + $0xd0] sm:$0xff] }
 0x2ba   : > { %v10432_v29 = vpop.f32.mrf.mxu0 }
 0x2bb   : > { %v14133_v61 = vadd.f32 %v10542_v25, %v6436_v53  ;;  %v10433_v15 = vadd.f32 %v10432_v29, %v10431_v46  ;;  %v10544_v35 = vpop.f32.mrf.mxu1  ;;  %v286_v46 = vld [vmem:[%s11988_s25 + $0x58] sm:$0xff] }
 0x2bc   : > { %v10545_v62 = vadd.f32 %v10544_v35, %v10543_v45  ;;  %v10434_v28 = vpop.f32.mrf.mxu0  ;;  %6828 = vmatmul.mubr.bf16.gmra.mxu0 %v14124_v31  ;;  %v302_v53 = vld [vmem:[%s11988_s25 + $0xd8] sm:$0xff]  ;;  %v14146_v31 = vcombine.low %v763_v54, %v779_v23 }
 0x2bd   : > { %v6439_v59 = vadd.f32 %v10433_v15, %v13694_v18  ;;  %v10546_v32 = vpop.f32.mrf.mxu1  ;;  %6989 = vmatmul.mubr.bf16.gmra.mxu1 %v14127_v3  ;;  %6835 = vmatprep.mubr.bf16.mxu0 %v14129_v19  ;;  %v14149_v3 = vcombine.low %v764_v60, %v780_v55  ;;  %v14151_v19 = vcombine.high %v285_v14, %v301_v34 }
 0x2be   : > { %v10435_v56 = vpop.f32.mrf.mxu0  ;;  %6996 = vmatprep.mubr.bf16.mxu1 %v14131_v2  ;;  %16942 = vst [vmem:[#allocation317_spill] sm:$0xff] %v14146_v31  ;;  %v14153_v37 = vcombine.high %v286_v46, %v302_v53 }
 0x2bf   : > { %v14142_v29 = vadd.f32 %v10545_v62, %v6439_v59  ;;  %v10436_v40 = vadd.f32 %v10435_v56, %v10434_v28  ;;  %v10547_v25 = vpop.f32.mrf.mxu1  ;;  %16943 = vst [vmem:[#allocation318_spill] sm:$0xff] %v14149_v3  ;;  %16944 = vst [vmem:[#allocation319_spill] sm:$0xff] %v14151_v19 }
 0x2c0   : > { %v10548_v45 = vadd.f32 %v10547_v25, %v10546_v32  ;;  %v10437_v35 = vpop.f32.mrf.mxu0  ;;  %16945 = vst [vmem:[#allocation320_spill] sm:$0xff] %v14153_v37  ;;  %v333_v25 = vld [vmem:[%s11988_s25 + $0x1d0] sm:$0xff] }
 0x2c1   : > { %v6444_v18 = vadd.f32 %v10436_v40, %v13707_v13  ;;  %v10549_v15 = vpop.f32.mrf.mxu1  ;;  %v317_v40 = vld [vmem:[%s11988_s25 + $0x150] sm:$0xff] }
 0x2c2   : > { %v10438_v2 = vpop.f32.mrf.mxu0  ;;  %v14214_v63 = vcombine.low %v317_v40, %v333_v25 }
 0x2c3   : > { %v14155_v62 = vadd.f32 %v10548_v45, %v6444_v18  ;;  %v10439_v28 = vadd.f32 %v10438_v2, %v10437_v35  ;;  %v10550_v59 = vpop.f32.mrf.mxu1  ;;  %v14166_v18 = vcombine.low %v285_v14, %v301_v34 }
 0x2c4   : > { %v10551_v32 = vadd.f32 %v10550_v59, %v10549_v15  ;;  %v10440_v56 = vpop.f32.mrf.mxu0  ;;  %6836 = vmatmul.mubr.bf16.gmra.mxu0 %v14146_v31  ;;  %v318_v15 = vld [vmem:[%s11988_s25 + $0x158] sm:$0xff]  ;;  %16950 = vst [vmem:[#allocation325_spill] sm:$0xff] %v14214_v63 }
 0x2c5   : > { %v6447_v13 = vadd.f32 %v10439_v28, %v13714_v12  ;;  %v10552_v54 = vpop.f32.mrf.mxu1  ;;  %6997 = vmatmul.mubr.bf16.gmra.mxu1 %v14149_v3  ;;  %7037 = vmatprep.mubr.bf16.mxu0 %v14151_v19  ;;  %16946 = vst [vmem:[#allocation321_spill] sm:$0xff] %v14166_v18  ;;  %v334_v12 = vld [vmem:[%s11988_s25 + $0x1d8] sm:$0xff]  ;;  %v14171_v3 = vcombine.low %v286_v46, %v302_v53  ;;  %v11756_v46 = vld [vmem:[%s16125_s0 + $0x670] sm:$0xff]  }
 0x2c6   : > { %v10441_v23 = vpop.f32.mrf.mxu0  ;;  %7198 = vmatprep.mubr.bf16.mxu1 %v14153_v37  ;;  %v350_v37 = vld [vmem:[%s11988_s25 + $0x258] sm:$0xff] }
 0x2c7   : > { %v14162_v60 = vadd.f32 %v10551_v32, %v6447_v13  ;;  %v10442_v55 = vadd.f32 %v10441_v23, %v10440_v56  ;;  %v10553_v2 = vpop.f32.mrf.mxu1  ;;  %16947 = vst [vmem:[#allocation322_spill] sm:$0xff] %v14171_v3  ;;  %v11753_v32 = vld [vmem:[%s16125_s0 + $0x638] sm:$0xff]  }
 0x2c8   : > { %v10554_v45 = vadd.f32 %v10553_v2, %v10552_v54  ;;  %v10443_v35 = vpop.f32.mrf.mxu0  ;;  %v11755_v56 = vld [vmem:[%s16125_s0 + $0x6b8] sm:$0xff]   ;;  %v14179_v54 = vcombine.high %v317_v40, %v333_v25  ;;  %v11758_v2 = vld [vmem:[%s16125_s0 + $0x6f0] sm:$0xff]   ;;  %v11761_v40 = vld [vmem:[%s16125_s0 + $0x628] sm:$0xff]  }
 0x2c9   : > { %v6452_v28 = vadd.f32 %v10442_v55, %v13733_v8  ;;  %v10555_v59 = vpop.f32.mrf.mxu1  ;;  %v14183_v8 = vcombine.high %v318_v15, %v334_v12  ;;  %v366_v19 = vld [vmem:[%s11988_s25 + $0x2d8] sm:$0xff] }
 0x2ca   : > { %v10444_v13 = vpop.f32.mrf.mxu0  ;;  %16948 = vst [vmem:[#allocation323_spill] sm:$0xff] %v14179_v54 }
 0x2cb   : > { %v14181_v14 = vadd.f32 %v10554_v45, %v6452_v28  ;;  %v10445_v34 = vadd.f32 %v10444_v13, %v10443_v35  ;;  %v10556_v23 = vpop.f32.mrf.mxu1  ;;  %16949 = vst [vmem:[#allocation324_spill] sm:$0xff] %v14183_v8  ;;  %v349_v28 = vld [vmem:[%s11988_s25 + $0x250] sm:$0xff] }
 0x2cc   : > { %v10557_v53 = vadd.f32 %v10556_v23, %v10555_v59  ;;  %v10446_v55 = vpop.f32.mrf.mxu0  ;;  %7038 = vmatmul.mubr.bf16.vlgmr.msra.gmra.mxu0 %v14166_v18  ;;  %v11757_v59 = vld [vmem:[%s16125_s0 + $0x630] sm:$0xff]  }
 0x2cd   : > { %v6455_v45 = vadd.f32 %v10445_v34, %v13758_v21  ;;  %v10558_v35 = vpop.f32.mrf.mxu1  ;;  %7199 = vmatmul.mubr.bf16.vlgmr.msra.gmra.mxu1 %v14171_v3  ;;  %11055 = vmatpush3.bf16.msra.mxu0 %v11753_v32  ;;  %v365_v23 = vld [vmem:[%s11988_s25 + $0x2d0] sm:$0xff]  ;;  %v11760_v34 = vld [vmem:[%s16125_s0 + $0x668] sm:$0xff]  }
 0x2ce   : > { %v10447_v13 = vpop.f32.mrf.mxu0  ;;  %11167 = vmatpush3.bf16.msra.mxu1 %v11755_v56  ;;  %7045 = vmatprep.mubr.bf16.mxu0 %v14179_v54  ;;  %v11759_v21 = vld [vmem:[%s16125_s0 + $0x6b0] sm:$0xff]   ;;  %v11762_v56 = vld [vmem:[%s16125_s0 + $0x6e8] sm:$0xff]  }
 0x2cf   : > { %v14206_v3 = vadd.f32 %v10557_v53, %v6455_v45  ;;  %v10448_v32 = vadd.f32 %v10447_v13, %v10446_v55  ;;  %v10559_v18 = vpop.f32.mrf.mxu1  ;;  %7206 = vmatprep.mubr.bf16.mxu1 %v14183_v8  ;;  %11056 = vmatprep.subr.bf16.mxu0 %v11756_v46  ;;  %v14217_v45 = vcombine.low %v318_v15, %v334_v12  ;;  %v11763_v15 = vld [vmem:[%s16125_s0 + $0x6a8] sm:$0xff]   ;;  %v11764_v12 = vld [vmem:[%s16125_s0 + $0x660] sm:$0xff]  }
 0x2d0   : > { %v10560_v54 = vadd.f32 %v10559_v18, %v10558_v35  ;;  %v10449_v31 = vpop.f32.mrf.mxu0  ;;  %11168 = vmatprep.subr.bf16.mxu1 %v11758_v2  ;;  %v14219_v55 = vcombine.high %v349_v28, %v365_v23  ;;  %v14221_v8 = vcombine.high %v350_v37, %v366_v19  ;;  %v381_v35 = vld [vmem:[%s11988_s25 + $0x350] sm:$0xff] }
 0x2d1   : > { %v6460_v50 = vadd.f32 %v10448_v32, %v13778_v43  ;;  %v10561_v53 = vpop.f32.mrf.mxu1  ;;  %16951 = vst [vmem:[#allocation326_spill] sm:$0xff] %v14217_v45  ;;  %11057 = vmatpush3.bf16.msra.mxu0 %v11757_v59  ;;  %v11765_v32 = vld [vmem:[%s16125_s0 + $0x620] sm:$0xff]  }
 0x2d2   : > { %16952 = vst [vmem:[#allocation327_spill] sm:$0xff] %v14219_v55  ;;  %v10450_v13 = vpop.f32.mrf.mxu0  ;;  %16953 = vst [vmem:[#allocation328_spill] sm:$0xff] %v14221_v8  ;;  %11169 = vmatpush3.bf16.msra.mxu1 %v11759_v21  ;;  %11058 = vmatprep.subr.bf16.mxu0 %v11760_v34  ;;  %v397_v21 = vld [vmem:[%s11988_s25 + $0x3d0] sm:$0xff]  ;;  %v382_v34 = vld [vmem:[%s11988_s25 + $0x358] sm:$0xff] }
 0x2d3   : > { %v14226_v25 = vadd.f32 %v10560_v54, %v6460_v50  ;;  %v10451_v18 = vadd.f32 %v10450_v13, %v10449_v31  ;;  %v10562_v43 = vpop.f32.mrf.mxu1  ;;  %11170 = vmatprep.subr.bf16.mxu1 %v11762_v56  ;;  %v11766_v31 = vld [vmem:[%s16125_s0 + $0x6e0] sm:$0xff]   ;;  %v398_v13 = vld [vmem:[%s11988_s25 + $0x3d8] sm:$0xff] }
 0x2d4   : > { %v10563_v46 = vadd.f32 %v10562_v43, %v10561_v53  ;;  %v10452_v2 = vpop.f32.mrf.mxu0  ;;  %7046 = vmatmul.mubr.bf16.gmra.mxu0 %v14214_v63  ;;  %v11768_v43 = vld [vmem:[%s16125_s0 + $0x658] sm:$0xff]   ;;  %v14257_v63 = vcombine.low %v349_v28, %v365_v23 }
 0x2d5   : > { %v6463_v50 = vadd.f32 %v10451_v18, %v13800_v57  ;;  %v10564_v54 = vpop.f32.mrf.mxu1  ;;  %7207 = vmatmul.mubr.bf16.gmra.mxu1 %v14217_v45  ;;  %7053 = vmatprep.mubr.bf16.mxu0 %v14219_v55  ;;  %v11767_v18 = vld [vmem:[%s16125_s0 + $0x6a0] sm:$0xff]   ;;  %v11769_v28 = vld [vmem:[%s16125_s0 + $0x618] sm:$0xff]   ;;  %v14303_v55 = vcombine.low %v381_v35, %v397_v21 }
 0x2d6   : > { %v10453_v59 = vpop.f32.mrf.mxu0  ;;  %7214 = vmatprep.mubr.bf16.mxu1 %v14221_v8  ;;  %11059 = vmatpush3.bf16.msra.mxu0 %v11761_v40  ;;  %16954 = vst [vmem:[#allocation329_spill] sm:$0xff] %v14257_v63  ;;  %v14267_v8 = vcombine.high %v382_v34, %v398_v13 }
 0x2d7   : > { %v14248_v56 = vadd.f32 %v10563_v46, %v6463_v50  ;;  %v10454_v53 = vadd.f32 %v10453_v59, %v10452_v2  ;;  %v10565_v57 = vpop.f32.mrf.mxu1  ;;  %11171 = vmatpush3.bf16.msra.mxu1 %v11763_v15  ;;  %11060 = vmatprep.subr.bf16.mxu0 %v11764_v12  ;;  %v11770_v46 = vld [vmem:[%s16125_s0 + $0x6d8] sm:$0xff]   ;;  %v14263_v2 = vcombine.low %v350_v37, %v366_v19  ;;  %v11772_v19 = vld [vmem:[%s16125_s0 + $0x650] sm:$0xff]  }
 0x2d8   : > { %v10566_v40 = vadd.f32 %v10565_v57, %v10564_v54  ;;  %v10455_v45 = vpop.f32.mrf.mxu0  ;;  %11172 = vmatprep.subr.bf16.mxu1 %v11766_v31  ;;  %v14265_v50 = vcombine.high %v381_v35, %v397_v21  ;;  %16957 = vst [vmem:[#allocation332_spill] sm:$0xff] %v14267_v8  ;;  %16958 = vst [vmem:[#allocation333_spill] sm:$0xff] %v14303_v55  ;;  %v11777_v35 = vld [vmem:[%s16125_s0 + $0x608] sm:$0xff]  }
 0x2d9   : > { %v6468_v15 = vadd.f32 %v10454_v53, %v13824_v7  ;;  %v10567_v12 = vpop.f32.mrf.mxu1  ;;  %16955 = vst [vmem:[#allocation330_spill] sm:$0xff] %v14263_v2  ;;  %v11771_v7 = vld [vmem:[%s16125_s0 + $0x698] sm:$0xff]  }
 0x2da   : > { %16956 = vst [vmem:[#allocation331_spill] sm:$0xff] %v14265_v50  ;;  %v10456_v59 = vpop.f32.mrf.mxu0  ;;  %11061 = vmatpush3.bf16.msra.mxu0 %v11765_v32 }
 0x2db   : > { %v14272_v23 = vadd.f32 %v10566_v40, %v6468_v15  ;;  %v10457_v31 = vadd.f32 %v10456_v59, %v10455_v45  ;;  %v10568_v54 = vpop.f32.mrf.mxu1  ;;  %11173 = vmatpush3.bf16.msra.mxu1 %v11767_v18  ;;  %11062 = vmatprep.subr.bf16.mxu0 %v11768_v43  ;;  %v11774_v45 = vld [vmem:[%s16125_s0 + $0x6d0] sm:$0xff]   ;;  %v414_v15 = vld [vmem:[%s11988_s25 + $0x458] sm:$0xff] }
 0x2dc   : > { %v10569_v37 = vadd.f32 %v10568_v54, %v10567_v12  ;;  %v10458_v32 = vpop.f32.mrf.mxu0  ;;  %7054 = vmatmul.mubr.bf16.gmra.mxu0 %v14257_v63  ;;  %11174 = vmatprep.subr.bf16.mxu1 %v11770_v46  ;;  %v413_v18 = vld [vmem:[%s11988_s25 + $0x450] sm:$0xff] }
 0x2dd   : > { %v6471_v53 = vadd.f32 %v10457_v31, %v13846_v48  ;;  %v10570_v57 = vpop.f32.mrf.mxu1  ;;  %7215 = vmatmul.mubr.bf16.gmra.mxu1 %v14263_v2  ;;  %7061 = vmatprep.mubr.bf16.mxu0 %v14265_v50  ;;  %v429_v40 = vld [vmem:[%s11988_s25 + $0x4d0] sm:$0xff]  ;;  %v430_v31 = vld [vmem:[%s11988_s25 + $0x4d8] sm:$0xff]  ;;  %v11776_v2 = vld [vmem:[%s16125_s0 + $0x648] sm:$0xff]  }
 0x2de   : > { %v10459_v43 = vpop.f32.mrf.mxu0  ;;  %7222 = vmatprep.mubr.bf16.mxu1 %v14267_v8  ;;  %11063 = vmatpush3.bf16.msra.mxu0 %v11769_v28  ;;  %v11773_v46 = vld [vmem:[%s16125_s0 + $0x610] sm:$0xff]   ;;  %v14313_v8 = vcombine.high %v414_v15, %v430_v31  ;;  %v14349_v50 = vcombine.low %v413_v18, %v429_v40 }
 0x2df   : > { %v14294_v12 = vadd.f32 %v10569_v37, %v6471_v53  ;;  %v10460_v59 = vadd.f32 %v10459_v43, %v10458_v32  ;;  %v10571_v48 = vpop.f32.mrf.mxu1  ;;  %11175 = vmatpush3.bf16.msra.mxu1 %v11771_v7  ;;  %11064 = vmatprep.subr.bf16.mxu0 %v11772_v19  ;;  %v11775_v54 = vld [vmem:[%s16125_s0 + $0x690] sm:$0xff]   ;;  %v11778_v37 = vld [vmem:[%s16125_s0 + $0x6c8] sm:$0xff]   ;;  %v14309_v32 = vcombine.low %v382_v34, %v398_v13  ;;  %v11780_v34 = vld [vmem:[%s16125_s0 + $0x640] sm:$0xff]  }
 0x2e0   : > { %v10572_v28 = vadd.f32 %v10571_v48, %v10570_v57  ;;  %v10461_v63 = vpop.f32.mrf.mxu0  ;;  %11176 = vmatprep.subr.bf16.mxu1 %v11774_v45  ;;  %v14311_v53 = vcombine.high %v413_v18, %v429_v40  ;;  %16961 = vst [vmem:[#allocation336_spill] sm:$0xff] %v14313_v8  ;;  %v445_v48 = vld [vmem:[%s11988_s25 + $0x550] sm:$0xff]  ;;  %16962 = vst [vmem:[#allocation337_spill] sm:$0xff] %v14349_v50 }
 0x2e1   : > { %v6476_v7 = vadd.f32 %v10460_v59, %v13870_v33  ;;  %v10573_v19 = vpop.f32.mrf.mxu1  ;;  %16959 = vst [vmem:[#allocation334_spill] sm:$0xff] %v14309_v32  ;;  %v11779_v33 = vld [vmem:[%s16125_s0 + $0x688] sm:$0xff]  }
 0x2e2   : > { %16960 = vst [vmem:[#allocation335_spill] sm:$0xff] %v14311_v53  ;;  %v10462_v43 = vpop.f32.mrf.mxu0  ;;  %11065 = vmatpush3.bf16.msra.mxu0 %v11773_v46 }
 0x2e3   : > { %v14318_v21 = vadd.f32 %v10572_v28, %v6476_v7  ;;  %v10463_v45 = vadd.f32 %v10462_v43, %v10461_v63  ;;  %v10574_v57 = vpop.f32.mrf.mxu1  ;;  %11177 = vmatpush3.bf16.msra.mxu1 %v11775_v54  ;;  %11066 = vmatprep.subr.bf16.mxu0 %v11776_v2  ;;  %v11782_v63 = vld [vmem:[%s16125_s0 + $0x6c0] sm:$0xff]   ;;  %v461_v28 = vld [vmem:[%s11988_s25 + $0x5d0] sm:$0xff]  ;;  %v446_v7 = vld [vmem:[%s11988_s25 + $0x558] sm:$0xff] }
 0x2e4   : > { %v10575_v13 = vadd.f32 %v10574_v57, %v10573_v19  ;;  %v10464_v46 = vpop.f32.mrf.mxu0  ;;  %7062 = vmatmul.mubr.bf16.gmra.mxu0 %v14303_v55  ;;  %11178 = vmatprep.subr.bf16.mxu1 %v11778_v37  ;;  %v11781_v37 = vld [vmem:[%s16125_s0 + $0x600] sm:$0xff]  }
 0x2e5   : > { %v6479_v2 = vadd.f32 %v10463_v45, %v13892_v44  ;;  %v10576_v59 = vpop.f32.mrf.mxu1  ;;  %7223 = vmatmul.mubr.bf16.gmra.mxu1 %v14309_v32  ;;  %7069 = vmatprep.mubr.bf16.mxu0 %v14311_v53  ;;  %v462_v45 = vld [vmem:[%s11988_s25 + $0x5d8] sm:$0xff]  ;;  %v11783_v57 = vld [vmem:[%s16125_s0 + $0x680] sm:$0xff]  }
 0x2e6   : > { %v10465_v54 = vpop.f32.mrf.mxu0  ;;  %7230 = vmatprep.mubr.bf16.mxu1 %v14313_v8  ;;  %11067 = vmatpush3.bf16.msra.mxu0 %v11777_v35  ;;  %v11784_v32 = vld [vmem:[%s16125_s0 + $0x778] sm:$0xff]   ;;  %v14359_v8 = vcombine.high %v446_v7, %v462_v45 }
 0x2e7   : > { %v14340_v19 = vadd.f32 %v10575_v13, %v6479_v2  ;;  %v10466_v43 = vadd.f32 %v10465_v54, %v10464_v46  ;;  %v10577_v44 = vpop.f32.mrf.mxu1  ;;  %11179 = vmatpush3.bf16.msra.mxu1 %v11779_v33  ;;  %11068 = vmatprep.subr.bf16.mxu0 %v11780_v34  ;;  %v11786_v13 = vld [vmem:[%s16125_s0 + $0x7f8] sm:$0xff]   ;;  %v14355_v46 = vcombine.low %v414_v15, %v430_v31 }
 0x2e8   : > { %v10578_v35 = vadd.f32 %v10577_v44, %v10576_v59  ;;  %v10467_v55 = vpop.f32.mrf.mxu0  ;;  %11180 = vmatprep.subr.bf16.mxu1 %v11782_v63  ;;  %v14357_v2 = vcombine.high %v445_v48, %v461_v28  ;;  %16965 = vst [vmem:[#allocation340_spill] sm:$0xff] %v14359_v8 }
 0x2e9   : > { %v6484_v33 = vadd.f32 %v10466_v43, %v13913_v47  ;;  %v10579_v34 = vpop.f32.mrf.mxu1  ;;  %16963 = vst [vmem:[#allocation338_spill] sm:$0xff] %v14355_v46  ;;  %v493_v43 = vld [vmem:[%s11988_s25 + $0x6d0] sm:$0xff] }
 0x2ea   : > { %16964 = vst [vmem:[#allocation339_spill] sm:$0xff] %v14357_v2  ;;  %v10468_v54 = vpop.f32.mrf.mxu0  ;;  %11069 = vmatpush3.bf16.msra.mxu0 %v11781_v37 }
 0x2eb   : > { %v14361_v59 = vadd.f32 %v10578_v35, %v6484_v33  ;;  %v10469_v18 = vadd.f32 %v10468_v54, %v10467_v55  ;;  %v10580_v40 = vpop.f32.mrf.mxu1  ;;  %11181 = vmatpush3.bf16.msra.mxu1 %v11783_v57  ;;  %11278 = vmatprep.subr.bf16.mxu0 %v11784_v32  ;;  %v477_v55 = vld [vmem:[%s11988_s25 + $0x650] sm:$0xff]  ;;  %v478_v35 = vld [vmem:[%s11988_s25 + $0x658] sm:$0xff]  ;;  %v14374_v54 = vcombine.low %v445_v48, %v461_v28 }
 0x2ec   : > { %v10581_v63 = vadd.f32 %v10580_v40, %v10579_v34  ;;  %v10470_v47 = vpop.f32.mrf.mxu0  ;;  %7070 = vmatmul.mubr.bf16.gmra.mxu0 %v14349_v50  ;;  %11390 = vmatprep.subr.bf16.mxu1 %v11786_v13  ;;  %v494_v33 = vld [vmem:[%s11988_s25 + $0x6d8] sm:$0xff]  ;;  %v14377_v40 = vcombine.low %v446_v7, %v462_v45  ;;  %v14396_v53 = vcombine.low %v477_v55, %v493_v43 }
 0x2ed   : > { %v6487_v15 = vadd.f32 %v10469_v18, %v13922_v11  ;;  %v10582_v31 = vpop.f32.mrf.mxu1  ;;  %7231 = vmatmul.mubr.bf16.gmra.mxu1 %v14355_v46  ;;  %7077 = vmatprep.mubr.bf16.mxu0 %v14357_v2  ;;  %16966 = vst [vmem:[#allocation341_spill] sm:$0xff] %v14374_v54  ;;  %v14379_v46 = vcombine.high %v477_v55, %v493_v43 }
 0x2ee   : > { %v10471_v37 = vpop.f32.mrf.mxu0  ;;  %7238 = vmatprep.mubr.bf16.mxu1 %v14359_v8  ;;  %16967 = vst [vmem:[#allocation342_spill] sm:$0xff] %v14377_v40  ;;  %16970 = vst [vmem:[#allocation345_spill] sm:$0xff] %v14396_v53 }
 0x2ef   : > { %v14370_v32 = vadd.f32 %v10581_v63, %v6487_v15  ;;  %v10472_v44 = vadd.f32 %v10471_v37, %v10470_v47  ;;  %v10583_v57 = vpop.f32.mrf.mxu1  ;;  %16968 = vst [vmem:[#allocation343_spill] sm:$0xff] %v14379_v46  ;;  %v14381_v63 = vcombine.high %v478_v35, %v494_v33  ;;  %v509_v37 = vld [vmem:[%s11988_s25 + $0x750] sm:$0xff] }
 0x2f0   : > { %v10584_v34 = vadd.f32 %v10583_v57, %v10582_v31  ;;  %v10473_v13 = vpop.f32.mrf.mxu0 }
 0x2f1   : > { %v6492_v11 = vadd.f32 %v10472_v44, %v13935_v42  ;;  %v10585_v18 = vpop.f32.mrf.mxu1  ;;  %16969 = vst [vmem:[#allocation344_spill] sm:$0xff] %v14381_v63  ;;  %v525_v44 = vld [vmem:[%s11988_s25 + $0x7d0] sm:$0xff] }
 0x2f2   : > { %v10474_v50 = vpop.f32.mrf.mxu0  ;;  %v14418_v2 = vcombine.low %v509_v37, %v525_v44 }
 0x2f3   : > { %v14383_v47 = vadd.f32 %v10584_v34, %v6492_v11  ;;  %v10475_v15 = vadd.f32 %v10474_v50, %v10473_v13  ;;  %v10586_v31 = vpop.f32.mrf.mxu1  ;;  %v510_v13 = vld [vmem:[%s11988_s25 + $0x758] sm:$0xff] }
 0x2f4   : > { %v10587_v48 = vadd.f32 %v10586_v31, %v10585_v18  ;;  %v10476_v28 = vpop.f32.mrf.mxu0  ;;  %7078 = vmatmul.mubr.bf16.gmra.mxu0 %v14374_v54  ;;  %v526_v11 = vld [vmem:[%s11988_s25 + $0x7d8] sm:$0xff]  ;;  %v14401_v54 = vcombine.high %v509_v37, %v525_v44  ;;  %16974 = vst [vmem:[#allocation349_spill] sm:$0xff] %v14418_v2 }
 0x2f5   : > { %v6495_v42 = vadd.f32 %v10475_v15, %v13944_v10  ;;  %v10588_v7 = vpop.f32.mrf.mxu1  ;;  %7239 = vmatmul.mubr.bf16.gmra.mxu1 %v14377_v40  ;;  %7085 = vmatprep.mubr.bf16.mxu0 %v14379_v46  ;;  %v14399_v40 = vcombine.low %v478_v35, %v494_v33 }
 0x2f6   : > { %v10477_v45 = vpop.f32.mrf.mxu0  ;;  %7246 = vmatprep.mubr.bf16.mxu1 %v14381_v63  ;;  %16972 = vst [vmem:[#allocation347_spill] sm:$0xff] %v14401_v54 }
 0x2f7   : > { %v14392_v50 = vadd.f32 %v10587_v48, %v6495_v42  ;;  %v10478_v57 = vadd.f32 %v10477_v45, %v10476_v28  ;;  %v10589_v34 = vpop.f32.mrf.mxu1  ;;  %16971 = vst [vmem:[#allocation346_spill] sm:$0xff] %v14399_v40  ;;  %v14403_v48 = vcombine.high %v510_v13, %v526_v11  ;;  %v541_v45 = vld [vmem:[%s11988_s25 + $0x850] sm:$0xff] }
 0x2f8   : > { %v10590_v18 = vadd.f32 %v10589_v34, %v10588_v7  ;;  %v10479_v31 = vpop.f32.mrf.mxu0 }
 0x2f9   : > { %v6500_v10 = vadd.f32 %v10478_v57, %v13957_v36  ;;  %v10591_v15 = vpop.f32.mrf.mxu1  ;;  %16973 = vst [vmem:[#allocation348_spill] sm:$0xff] %v14403_v48  ;;  %v557_v57 = vld [vmem:[%s11988_s25 + $0x8d0] sm:$0xff] }
 0x2fa   : > { %v10480_v8 = vpop.f32.mrf.mxu0  ;;  %v14440_v46 = vcombine.low %v541_v45, %v557_v57 }
 0x2fb   : > { %v14405_v28 = vadd.f32 %v10590_v18, %v6500_v10  ;;  %v10481_v42 = vadd.f32 %v10480_v8, %v10479_v31  ;;  %v10592_v7 = vpop.f32.mrf.mxu1  ;;  %v542_v31 = vld [vmem:[%s11988_s25 + $0x858] sm:$0xff] }
 0x2fc   : > { %v10593_v55 = vadd.f32 %v10592_v7, %v10591_v15  ;;  %v10482_v43 = vpop.f32.mrf.mxu0  ;;  %7086 = vmatmul.mubr.bf16.gmra.mxu0 %v14396_v53  ;;  %v558_v10 = vld [vmem:[%s11988_s25 + $0x8d8] sm:$0xff]  ;;  %v14423_v53 = vcombine.high %v541_v45, %v557_v57  ;;  %16978 = vst [vmem:[#allocation353_spill] sm:$0xff] %v14440_v46 }
 0x2fd   : > { %v6503_v36 = vadd.f32 %v10481_v42, %v13966_v41  ;;  %v10594_v35 = vpop.f32.mrf.mxu1  ;;  %7247 = vmatmul.mubr.bf16.gmra.mxu1 %v14399_v40  ;;  %7093 = vmatprep.mubr.bf16.mxu0 %v14401_v54  ;;  %v14421_v40 = vcombine.low %v510_v13, %v526_v11 }
 0x2fe   : > { %v10483_v33 = vpop.f32.mrf.mxu0  ;;  %7254 = vmatprep.mubr.bf16.mxu1 %v14403_v48  ;;  %16976 = vst [vmem:[#allocation351_spill] sm:$0xff] %v14423_v53 }
 0x2ff   : > { %v14414_v8 = vadd.f32 %v10593_v55, %v6503_v36  ;;  %v10484_v34 = vadd.f32 %v10483_v33, %v10482_v43  ;;  %v10595_v18 = vpop.f32.mrf.mxu1  ;;  %16975 = vst [vmem:[#allocation350_spill] sm:$0xff] %v14421_v40  ;;  %v14425_v55 = vcombine.high %v542_v31, %v558_v10  ;;  %v573_v33 = vld [vmem:[%s11988_s25 + $0x950] sm:$0xff] }
 0x300   : > { %v10596_v15 = vadd.f32 %v10595_v18, %v10594_v35  ;;  %v10485_v7 = vpop.f32.mrf.mxu0 }
 0x301   : > { %v6508_v41 = vadd.f32 %v10484_v34, %v13979_v17  ;;  %v10597_v42 = vpop.f32.mrf.mxu1  ;;  %16977 = vst [vmem:[#allocation352_spill] sm:$0xff] %v14425_v55  ;;  %v589_v34 = vld [vmem:[%s11988_s25 + $0x9d0] sm:$0xff] }
 0x302   : > { %v10486_v63 = vpop.f32.mrf.mxu0 }
 0x303   : > { %v14427_v43 = vadd.f32 %v10596_v15, %v6508_v41  ;;  %v10487_v36 = vadd.f32 %v10486_v63, %v10485_v7  ;;  %v10598_v35 = vpop.f32.mrf.mxu1  ;;  %v574_v7 = vld [vmem:[%s11988_s25 + $0x958] sm:$0xff] }
 0x304   : > { %v10599_v37 = vadd.f32 %v10598_v35, %v10597_v42  ;;  %v10488_v44 = vpop.f32.mrf.mxu0  ;;  %7094 = vmatmul.mubr.bf16.gmra.mxu0 %v14418_v2  ;;  %v590_v41 = vld [vmem:[%s11988_s25 + $0x9d8] sm:$0xff] }
 0x305   : > { %v6511_v17 = vadd.f32 %v10487_v36, %v13988_v52  ;;  %v10600_v13 = vpop.f32.mrf.mxu1  ;;  %7255 = vmatmul.mubr.bf16.gmra.mxu1 %v14421_v40  ;;  %7101 = vmatprep.mubr.bf16.mxu0 %v14423_v53  ;;  %v14443_v40 = vcombine.low %v542_v31, %v558_v10  ;;  %v14445_v53 = vcombine.high %v573_v33, %v589_v34 }
 0x306   : > { %v10489_v11 = vpop.f32.mrf.mxu0  ;;  %7262 = vmatprep.mubr.bf16.mxu1 %v14425_v55 }
 0x307   : > { %v14436_v63 = vadd.f32 %v10599_v37, %v6511_v17  ;;  %v10490_v18 = vadd.f32 %v10489_v11, %v10488_v44  ;;  %v10601_v15 = vpop.f32.mrf.mxu1  ;;  %16979 = vst [vmem:[#allocation354_spill] sm:$0xff] %v14443_v40  ;;  %16980 = vst [vmem:[#allocation355_spill] sm:$0xff] %v14445_v53  ;;  %v14447_v37 = vcombine.high %v574_v7, %v590_v41  ;;  %v605_v11 = vld [vmem:[%s11988_s25 + $0xa50] sm:$0xff] }
 0x308   : > { %v10602_v42 = vadd.f32 %v10601_v15, %v10600_v13  ;;  %v10491_v35 = vpop.f32.mrf.mxu0 }
 0x309   : > { %v6516_v52 = vadd.f32 %v10490_v18, %v14001_v26  ;;  %v10603_v36 = vpop.f32.mrf.mxu1  ;;  %16981 = vst [vmem:[#allocation356_spill] sm:$0xff] %v14447_v37  ;;  %v621_v18 = vld [vmem:[%s11988_s25 + $0xad0] sm:$0xff] }
 0x30a   : > { %v10492_v55 = vpop.f32.mrf.mxu0 }
 0x30b   : > { %v14449_v44 = vadd.f32 %v10602_v42, %v6516_v52  ;;  %v10493_v17 = vadd.f32 %v10492_v55, %v10491_v35  ;;  %v10604_v13 = vpop.f32.mrf.mxu1  ;;  %v606_v35 = vld [vmem:[%s11988_s25 + $0xa58] sm:$0xff] }
 0x30c   : > { %v10605_v45 = vadd.f32 %v10604_v13, %v10603_v36  ;;  %v10622_v57 = vpop.f32.mrf.mxu0  ;;  %7102 = vmatmul.mubr.bf16.gmra.mxu0 %v14440_v46  ;;  %v622_v52 = vld [vmem:[%s11988_s25 + $0xad8] sm:$0xff]  ;;  %v14462_v46 = vcombine.low %v573_v33, %v589_v34 }
 0x30d   : > { %v6519_v26 = vadd.f32 %v10493_v17, %v14010_v39  ;;  %v10734_v31 = vpop.f32.mrf.mxu1  ;;  %7263 = vmatmul.mubr.bf16.gmra.mxu1 %v14443_v40  ;;  %7109 = vmatprep.mubr.bf16.mxu0 %v14445_v53  ;;  %v14465_v40 = vcombine.low %v574_v7, %v590_v41  ;;  %v14467_v53 = vcombine.high %v605_v11, %v621_v18 }
 0x30e   : > { %v10623_v10 = vpop.f32.mrf.mxu0  ;;  %7270 = vmatprep.mubr.bf16.mxu1 %v14447_v37  ;;  %16982 = vst [vmem:[#allocation357_spill] sm:$0xff] %v14462_v46 }
 0x30f   : > { %v14458_v55 = vadd.f32 %v10605_v45, %v6519_v26  ;;  %v10624_v15 = vadd.f32 %v10623_v10, %v10622_v57  ;;  %v10735_v42 = vpop.f32.mrf.mxu1  ;;  %16983 = vst [vmem:[#allocation358_spill] sm:$0xff] %v14465_v40  ;;  %16984 = vst [vmem:[#allocation359_spill] sm:$0xff] %v14467_v53  ;;  %v14469_v45 = vcombine.high %v606_v35, %v622_v52  ;;  %v637_v10 = vld [vmem:[%s11988_s25 + $0xb50] sm:$0xff] }
 0x310   : > { %v10736_v36 = vadd.f32 %v10735_v42, %v10734_v31  ;;  %v10625_v13 = vpop.f32.mrf.mxu0 }
 0x311   : > { %v6718_v39 = vadd.f32 %v10624_v15, %v14023_v58  ;;  %v10737_v17 = vpop.f32.mrf.mxu1  ;;  %16985 = vst [vmem:[#allocation360_spill] sm:$0xff] %v14469_v45  ;;  %v653_v15 = vld [vmem:[%s11988_s25 + $0xbd0] sm:$0xff] }
 0x312   : > { %v10626_v37 = vpop.f32.mrf.mxu0 }
 0x313   : > { %v14471_v57 = vadd.f32 %v10736_v36, %v6718_v39  ;;  %v10627_v26 = vadd.f32 %v10626_v37, %v10625_v13  ;;  %v10738_v31 = vpop.f32.mrf.mxu1  ;;  %v638_v13 = vld [vmem:[%s11988_s25 + $0xb58] sm:$0xff] }
 0x314   : > { %v10739_v33 = vadd.f32 %v10738_v31, %v10737_v17  ;;  %v10628_v34 = vpop.f32.mrf.mxu0  ;;  %7110 = vmatmul.mubr.bf16.gmra.mxu0 %v14462_v46  ;;  %v654_v39 = vld [vmem:[%s11988_s25 + $0xbd8] sm:$0xff]  ;;  %v14484_v46 = vcombine.low %v605_v11, %v621_v18 }
 0x315   : > { %v6721_v58 = vadd.f32 %v10627_v26, %v14032_v16  ;;  %v10740_v7 = vpop.f32.mrf.mxu1  ;;  %7271 = vmatmul.mubr.bf16.gmra.mxu1 %v14465_v40  ;;  %7117 = vmatprep.mubr.bf16.mxu0 %v14467_v53  ;;  %v14487_v40 = vcombine.low %v606_v35, %v622_v52  ;;  %v14489_v53 = vcombine.high %v637_v10, %v653_v15 }
 0x316   : > { %v10629_v41 = vpop.f32.mrf.mxu0  ;;  %7278 = vmatprep.mubr.bf16.mxu1 %v14469_v45  ;;  %16986 = vst [vmem:[#allocation361_spill] sm:$0xff] %v14484_v46 }
 0x317   : > { %v14480_v37 = vadd.f32 %v10739_v33, %v6721_v58  ;;  %v10630_v42 = vadd.f32 %v10629_v41, %v10628_v34  ;;  %v10741_v36 = vpop.f32.mrf.mxu1  ;;  %16987 = vst [vmem:[#allocation362_spill] sm:$0xff] %v14487_v40  ;;  %16988 = vst [vmem:[#allocation363_spill] sm:$0xff] %v14489_v53  ;;  %v14491_v33 = vcombine.high %v638_v13, %v654_v39  ;;  %v669_v41 = vld [vmem:[%s11988_s25 + $0xc50] sm:$0xff] }
 0x318   : > { %v10742_v17 = vadd.f32 %v10741_v36, %v10740_v7  ;;  %v10631_v31 = vpop.f32.mrf.mxu0 }
 0x319   : > { %v6726_v16 = vadd.f32 %v10630_v42, %v14045_v24  ;;  %v10743_v26 = vpop.f32.mrf.mxu1  ;;  %16989 = vst [vmem:[#allocation364_spill] sm:$0xff] %v14491_v33  ;;  %v685_v42 = vld [vmem:[%s11988_s25 + $0xcd0] sm:$0xff] }
 0x31a   : > { %v10632_v45 = vpop.f32.mrf.mxu0 }
 0x31b   : > { %v14493_v34 = vadd.f32 %v10742_v17, %v6726_v16  ;;  %v10633_v58 = vadd.f32 %v10632_v45, %v10631_v31  ;;  %v10744_v7 = vpop.f32.mrf.mxu1  ;;  %v670_v31 = vld [vmem:[%s11988_s25 + $0xc58] sm:$0xff] }
 0x31c   : > { %v10745_v11 = vadd.f32 %v10744_v7, %v10743_v26  ;;  %v10634_v18 = vpop.f32.mrf.mxu0  ;;  %7118 = vmatmul.mubr.bf16.gmra.mxu0 %v14484_v46  ;;  %v686_v16 = vld [vmem:[%s11988_s25 + $0xcd8] sm:$0xff]  ;;  %v14506_v46 = vcombine.low %v637_v10, %v653_v15 }
 0x31d   : > { %v6729_v24 = vadd.f32 %v10633_v58, %v14054_v6  ;;  %v10746_v35 = vpop.f32.mrf.mxu1  ;;  %7279 = vmatmul.mubr.bf16.gmra.mxu1 %v14487_v40  ;;  %7125 = vmatprep.mubr.bf16.mxu0 %v14489_v53  ;;  %v14509_v40 = vcombine.low %v638_v13, %v654_v39  ;;  %v14511_v53 = vcombine.high %v669_v41, %v685_v42 }
 0x31e   : > { %v10635_v52 = vpop.f32.mrf.mxu0  ;;  %7286 = vmatprep.mubr.bf16.mxu1 %v14491_v33  ;;  %16990 = vst [vmem:[#allocation365_spill] sm:$0xff] %v14506_v46 }
 0x31f   : > { %v14502_v45 = vadd.f32 %v10745_v11, %v6729_v24  ;;  %v10636_v36 = vadd.f32 %v10635_v52, %v10634_v18  ;;  %v10747_v17 = vpop.f32.mrf.mxu1  ;;  %16991 = vst [vmem:[#allocation366_spill] sm:$0xff] %v14509_v40  ;;  %16992 = vst [vmem:[#allocation367_spill] sm:$0xff] %v14511_v53  ;;  %v14513_v11 = vcombine.high %v670_v31, %v686_v16  ;;  %v701_v52 = vld [vmem:[%s11988_s25 + $0xd50] sm:$0xff] }
 0x320   : > { %v10748_v26 = vadd.f32 %v10747_v17, %v10746_v35  ;;  %v10637_v7 = vpop.f32.mrf.mxu0 }
 0x321   : > { %v6734_v6 = vadd.f32 %v10636_v36, %v14067_v1  ;;  %v10749_v58 = vpop.f32.mrf.mxu1  ;;  %16993 = vst [vmem:[#allocation368_spill] sm:$0xff] %v14513_v11  ;;  %v717_v36 = vld [vmem:[%s11988_s25 + $0xdd0] sm:$0xff] }
 0x322   : > { %v10638_v33 = vpop.f32.mrf.mxu0 }
 0x323   : > { %v14515_v18 = vadd.f32 %v10748_v26, %v6734_v6  ;;  %v10639_v24 = vadd.f32 %v10638_v33, %v10637_v7  ;;  %v10750_v35 = vpop.f32.mrf.mxu1  ;;  %v702_v7 = vld [vmem:[%s11988_s25 + $0xd58] sm:$0xff] }
 0x324   : > { %v10751_v10 = vadd.f32 %v10750_v35, %v10749_v58  ;;  %v10640_v15 = vpop.f32.mrf.mxu0  ;;  %7126 = vmatmul.mubr.bf16.gmra.mxu0 %v14506_v46  ;;  %v718_v6 = vld [vmem:[%s11988_s25 + $0xdd8] sm:$0xff]  ;;  %v14528_v46 = vcombine.low %v669_v41, %v685_v42 }
 0x325   : > { %v6737_v1 = vadd.f32 %v10639_v24, %v14076_v38  ;;  %v10752_v13 = vpop.f32.mrf.mxu1  ;;  %7287 = vmatmul.mubr.bf16.gmra.mxu1 %v14509_v40  ;;  %7133 = vmatprep.mubr.bf16.mxu0 %v14511_v53  ;;  %v14531_v40 = vcombine.low %v670_v31, %v686_v16  ;;  %v14533_v53 = vcombine.high %v701_v52, %v717_v36 }
 0x326   : > { %v10641_v39 = vpop.f32.mrf.mxu0  ;;  %7294 = vmatprep.mubr.bf16.mxu1 %v14513_v11  ;;  %16994 = vst [vmem:[#allocation369_spill] sm:$0xff] %v14528_v46 }
 0x327   : > { %v14524_v33 = vadd.f32 %v10751_v10, %v6737_v1  ;;  %v10642_v17 = vadd.f32 %v10641_v39, %v10640_v15  ;;  %v10753_v26 = vpop.f32.mrf.mxu1  ;;  %16995 = vst [vmem:[#allocation370_spill] sm:$0xff] %v14531_v40  ;;  %16996 = vst [vmem:[#allocation371_spill] sm:$0xff] %v14533_v53  ;;  %v14535_v10 = vcombine.high %v702_v7, %v718_v6  ;;  %v733_v39 = vld [vmem:[%s11988_s25 + $0xe50] sm:$0xff] }
 0x328   : > { %v10754_v58 = vadd.f32 %v10753_v26, %v10752_v13  ;;  %v10643_v35 = vpop.f32.mrf.mxu0 }
 0x329   : > { %v6742_v38 = vadd.f32 %v10642_v17, %v14089_v30  ;;  %v10755_v24 = vpop.f32.mrf.mxu1  ;;  %16997 = vst [vmem:[#allocation372_spill] sm:$0xff] %v14535_v10  ;;  %v749_v17 = vld [vmem:[%s11988_s25 + $0xed0] sm:$0xff] }
 0x32a   : > { %v10644_v11 = vpop.f32.mrf.mxu0 }
 0x32b   : > { %v14537_v15 = vadd.f32 %v10754_v58, %v6742_v38  ;;  %v10645_v1 = vadd.f32 %v10644_v11, %v10643_v35  ;;  %v10756_v13 = vpop.f32.mrf.mxu1  ;;  %v734_v35 = vld [vmem:[%s11988_s25 + $0xe58] sm:$0xff] }
 0x32c   : > { %v10757_v41 = vadd.f32 %v10756_v13, %v10755_v24  ;;  %v10646_v42 = vpop.f32.mrf.mxu0  ;;  %7134 = vmatmul.mubr.bf16.gmra.mxu0 %v14528_v46  ;;  %v750_v38 = vld [vmem:[%s11988_s25 + $0xed8] sm:$0xff]  ;;  %v14550_v46 = vcombine.low %v701_v52, %v717_v36 }
 0x32d   : > { %v6745_v30 = vadd.f32 %v10645_v1, %v14098_v27  ;;  %v10758_v31 = vpop.f32.mrf.mxu1  ;;  %7295 = vmatmul.mubr.bf16.gmra.mxu1 %v14531_v40  ;;  %7141 = vmatprep.mubr.bf16.mxu0 %v14533_v53  ;;  %v14553_v40 = vcombine.low %v702_v7, %v718_v6  ;;  %v14555_v53 = vcombine.high %v733_v39, %v749_v17 }
 0x32e   : > { %v10647_v16 = vpop.f32.mrf.mxu0  ;;  %7302 = vmatprep.mubr.bf16.mxu1 %v14535_v10  ;;  %16998 = vst [vmem:[#allocation373_spill] sm:$0xff] %v14550_v46 }
 0x32f   : > { %v14546_v11 = vadd.f32 %v10757_v41, %v6745_v30  ;;  %v10648_v26 = vadd.f32 %v10647_v16, %v10646_v42  ;;  %v10759_v58 = vpop.f32.mrf.mxu1  ;;  %16999 = vst [vmem:[#allocation374_spill] sm:$0xff] %v14553_v40  ;;  %17000 = vst [vmem:[#allocation375_spill] sm:$0xff] %v14555_v53  ;;  %v14557_v41 = vcombine.high %v734_v35, %v750_v38  ;;  %v765_v16 = vld [vmem:[%s11988_s25 + $0xf50] sm:$0xff] }
 0x330   : > { %v10760_v24 = vadd.f32 %v10759_v58, %v10758_v31  ;;  %v10649_v13 = vpop.f32.mrf.mxu0 }
 0x331   : > { %v6750_v27 = vadd.f32 %v10648_v26, %v14111_v5  ;;  %v10761_v1 = vpop.f32.mrf.mxu1  ;;  %17001 = vst [vmem:[#allocation376_spill] sm:$0xff] %v14557_v41  ;;  %v781_v26 = vld [vmem:[%s11988_s25 + $0xfd0] sm:$0xff] }
 0x332   : > { %v10650_v10 = vpop.f32.mrf.mxu0 }
 0x333   : > { %v14559_v42 = vadd.f32 %v10760_v24, %v6750_v27  ;;  %v10651_v30 = vadd.f32 %v10650_v10, %v10649_v13  ;;  %v10762_v31 = vpop.f32.mrf.mxu1  ;;  %v766_v13 = vld [vmem:[%s11988_s25 + $0xf58] sm:$0xff] }
 0x334   : > { %v10763_v52 = vadd.f32 %v10762_v31, %v10761_v1  ;;  %v10652_v36 = vpop.f32.mrf.mxu0  ;;  %7142 = vmatmul.mubr.bf16.gmra.mxu0 %v14550_v46  ;;  %v782_v27 = vld [vmem:[%s11988_s25 + $0xfd8] sm:$0xff]  ;;  %v14572_v46 = vcombine.low %v733_v39, %v749_v17 }
 0x335   : > { %v6753_v5 = vadd.f32 %v10651_v30, %v14120_v0  ;;  %v10764_v7 = vpop.f32.mrf.mxu1  ;;  %7303 = vmatmul.mubr.bf16.gmra.mxu1 %v14553_v40  ;;  %7149 = vmatprep.mubr.bf16.mxu0 %v14555_v53  ;;  %v14575_v40 = vcombine.low %v734_v35, %v750_v38  ;;  %v14577_v53 = vcombine.high %v765_v16, %v781_v26 }
 0x336   : > { %v10653_v6 = vpop.f32.mrf.mxu0  ;;  %7310 = vmatprep.mubr.bf16.mxu1 %v14557_v41  ;;  %17002 = vst [vmem:[#allocation377_spill] sm:$0xff] %v14572_v46 }
 0x337   : > { %v14568_v10 = vadd.f32 %v10763_v52, %v6753_v5  ;;  %v10654_v58 = vadd.f32 %v10653_v6, %v10652_v36  ;;  %v10765_v24 = vpop.f32.mrf.mxu1  ;;  %17003 = vst [vmem:[#allocation378_spill] sm:$0xff] %v14575_v40  ;;  %17004 = vst [vmem:[#allocation379_spill] sm:$0xff] %v14577_v53  ;;  %v14579_v52 = vcombine.high %v766_v13, %v782_v27  ;;  %v287_v6 = vld [vmem:[%s11988_s25 + $0x60] sm:$0xff] }
 0x338   : > { %v10766_v1 = vadd.f32 %v10765_v24, %v10764_v7  ;;  %v10655_v31 = vpop.f32.mrf.mxu0 }
 0x339   : > { %v6758_v0 = vadd.f32 %v10654_v58, %v14133_v61  ;;  %v10767_v30 = vpop.f32.mrf.mxu1  ;;  %17005 = vst [vmem:[#allocation380_spill] sm:$0xff] %v14579_v52  ;;  %v303_v58 = vld [vmem:[%s11988_s25 + $0xe0] sm:$0xff] }
 0x33a   : > { %v10656_v41 = vpop.f32.mrf.mxu0 }
 0x33b   : > { %v14581_v36 = vadd.f32 %v10766_v1, %v6758_v0  ;;  %v10657_v5 = vadd.f32 %v10656_v41, %v10655_v31  ;;  %v10768_v7 = vpop.f32.mrf.mxu1  ;;  %v288_v31 = vld [vmem:[%s11988_s25 + $0x68] sm:$0xff] }
 0x33c   : > { %v10769_v39 = vadd.f32 %v10768_v7, %v10767_v30  ;;  %v10658_v17 = vpop.f32.mrf.mxu0  ;;  %7150 = vmatmul.mubr.bf16.gmra.mxu0 %v14572_v46  ;;  %v304_v0 = vld [vmem:[%s11988_s25 + $0xe8] sm:$0xff]  ;;  %v14594_v46 = vcombine.low %v765_v16, %v781_v26 }
 0x33d   : > { %v6761_v61 = vadd.f32 %v10657_v5, %v14142_v29  ;;  %v10770_v35 = vpop.f32.mrf.mxu1  ;;  %7311 = vmatmul.mubr.bf16.gmra.mxu1 %v14575_v40  ;;  %7157 = vmatprep.mubr.bf16.mxu0 %v14577_v53  ;;  %v14597_v40 = vcombine.low %v766_v13, %v782_v27  ;;  %v14599_v53 = vcombine.high %v287_v6, %v303_v58 }
 0x33e   : > { %v10659_v38 = vpop.f32.mrf.mxu0  ;;  %7318 = vmatprep.mubr.bf16.mxu1 %v14579_v52  ;;  %17006 = vst [vmem:[#allocation381_spill] sm:$0xff] %v14594_v46  ;;  %v14601_v2 = vcombine.high %v288_v31, %v304_v0 }
 0x33f   : > { %v14590_v41 = vadd.f32 %v10769_v39, %v6761_v61  ;;  %v10660_v24 = vadd.f32 %v10659_v38, %v10658_v17  ;;  %v10771_v1 = vpop.f32.mrf.mxu1  ;;  %17007 = vst [vmem:[#allocation382_spill] sm:$0xff] %v14597_v40  ;;  %17008 = vst [vmem:[#allocation383_spill] sm:$0xff] %v14599_v53 }
 0x340   : > { %v10772_v30 = vadd.f32 %v10771_v1, %v10770_v35  ;;  %v10661_v7 = vpop.f32.mrf.mxu0  ;;  %17009 = vst [vmem:[#allocation384_spill] sm:$0xff] %v14601_v2  ;;  %v335_v1 = vld [vmem:[%s11988_s25 + $0x1e0] sm:$0xff] }
 0x341   : > { %v6766_v29 = vadd.f32 %v10660_v24, %v14155_v62  ;;  %v10773_v5 = vpop.f32.mrf.mxu1  ;;  %v319_v24 = vld [vmem:[%s11988_s25 + $0x160] sm:$0xff] }
 0x342   : > { %v10662_v52 = vpop.f32.mrf.mxu0  ;;  %v14662_v48 = vcombine.low %v319_v24, %v335_v1 }
 0x343   : > { %v14603_v39 = vadd.f32 %v10772_v30, %v6766_v29  ;;  %v10663_v17 = vadd.f32 %v10662_v52, %v10661_v7  ;;  %v10774_v61 = vpop.f32.mrf.mxu1  ;;  %v14614_v29 = vcombine.low %v287_v6, %v303_v58 }
 0x344   : > { %v10775_v35 = vadd.f32 %v10774_v61, %v10773_v5  ;;  %v10664_v38 = vpop.f32.mrf.mxu0  ;;  %7158 = vmatmul.mubr.bf16.gmra.mxu0 %v14594_v46  ;;  %v320_v5 = vld [vmem:[%s11988_s25 + $0x168] sm:$0xff]  ;;  %17014 = vst [vmem:[#allocation389_spill] sm:$0xff] %v14662_v48 }
 0x345   : > { %v6769_v62 = vadd.f32 %v10663_v17, %v14162_v60  ;;  %v10776_v16 = vpop.f32.mrf.mxu1  ;;  %7319 = vmatmul.mubr.bf16.gmra.mxu1 %v14597_v40  ;;  %7359 = vmatprep.mubr.bf16.mxu0 %v14599_v53  ;;  %17010 = vst [vmem:[#allocation385_spill] sm:$0xff] %v14614_v29  ;;  %v336_v60 = vld [vmem:[%s11988_s25 + $0x1e8] sm:$0xff]  ;;  %v14619_v40 = vcombine.low %v288_v31, %v304_v0  ;;  %v11788_v31 = vld [vmem:[%s16125_s0 + $0x770] sm:$0xff]  }
 0x346   : > { %v10665_v26 = vpop.f32.mrf.mxu0  ;;  %7520 = vmatprep.mubr.bf16.mxu1 %v14601_v2  ;;  %v352_v2 = vld [vmem:[%s11988_s25 + $0x268] sm:$0xff] }
 0x347   : > { %v14610_v13 = vadd.f32 %v10775_v35, %v6769_v62  ;;  %v10666_v27 = vadd.f32 %v10665_v26, %v10664_v38  ;;  %v10777_v52 = vpop.f32.mrf.mxu1  ;;  %17011 = vst [vmem:[#allocation386_spill] sm:$0xff] %v14619_v40  ;;  %v11785_v35 = vld [vmem:[%s16125_s0 + $0x738] sm:$0xff]   ;;  %v368_v53 = vld [vmem:[%s11988_s25 + $0x2e8] sm:$0xff] }
 0x348   : > { %v10778_v30 = vadd.f32 %v10777_v52, %v10776_v16  ;;  %v10667_v7 = vpop.f32.mrf.mxu0  ;;  %v11787_v38 = vld [vmem:[%s16125_s0 + $0x7b8] sm:$0xff]   ;;  %v14627_v16 = vcombine.high %v319_v24, %v335_v1  ;;  %v11790_v52 = vld [vmem:[%s16125_s0 + $0x7f0] sm:$0xff]   ;;  %v11793_v24 = vld [vmem:[%s16125_s0 + $0x728] sm:$0xff]  }
 0x349   : > { %v6774_v17 = vadd.f32 %v10666_v27, %v14181_v14  ;;  %v10779_v61 = vpop.f32.mrf.mxu1  ;;  %v14631_v14 = vcombine.high %v320_v5, %v336_v60 }
 0x34a   : > { %v10668_v62 = vpop.f32.mrf.mxu0  ;;  %17012 = vst [vmem:[#allocation387_spill] sm:$0xff] %v14627_v16 }
 0x34b   : > { %v14629_v6 = vadd.f32 %v10778_v30, %v6774_v17  ;;  %v10669_v58 = vadd.f32 %v10668_v62, %v10667_v7  ;;  %v10780_v26 = vpop.f32.mrf.mxu1  ;;  %17013 = vst [vmem:[#allocation388_spill] sm:$0xff] %v14631_v14  ;;  %v351_v17 = vld [vmem:[%s11988_s25 + $0x260] sm:$0xff] }
 0x34c   : > { %v10781_v0 = vadd.f32 %v10780_v26, %v10779_v61  ;;  %v10670_v27 = vpop.f32.mrf.mxu0  ;;  %7360 = vmatmul.mubr.bf16.vlgmr.msra.gmra.mxu0 %v14614_v29  ;;  %v11789_v61 = vld [vmem:[%s16125_s0 + $0x730] sm:$0xff]   ;;  %v367_v26 = vld [vmem:[%s11988_s25 + $0x2e0] sm:$0xff] }
 0x34d   : > { %v6777_v30 = vadd.f32 %v10669_v58, %v14206_v3  ;;  %v10782_v7 = vpop.f32.mrf.mxu1  ;;  %7521 = vmatmul.mubr.bf16.vlgmr.msra.gmra.mxu1 %v14619_v40  ;;  %11279 = vmatpush3.bf16.msra.mxu0 %v11785_v35  ;;  %v11791_v3 = vld [vmem:[%s16125_s0 + $0x7b0] sm:$0xff]   ;;  %v11792_v58 = vld [vmem:[%s16125_s0 + $0x768] sm:$0xff]  }
 0x34e   : > { %v10671_v62 = vpop.f32.mrf.mxu0  ;;  %11391 = vmatpush3.bf16.msra.mxu1 %v11787_v38  ;;  %7367 = vmatprep.mubr.bf16.mxu0 %v14627_v16  ;;  %v11794_v38 = vld [vmem:[%s16125_s0 + $0x7e8] sm:$0xff]  }
 0x34f   : > { %v14654_v40 = vadd.f32 %v10781_v0, %v6777_v30  ;;  %v10672_v35 = vadd.f32 %v10671_v62, %v10670_v27  ;;  %v10783_v29 = vpop.f32.mrf.mxu1  ;;  %7528 = vmatprep.mubr.bf16.mxu1 %v14631_v14  ;;  %11280 = vmatprep.subr.bf16.mxu0 %v11788_v31  ;;  %v14665_v30 = vcombine.low %v320_v5, %v336_v60  ;;  %v11795_v5 = vld [vmem:[%s16125_s0 + $0x7a8] sm:$0xff]   ;;  %v11796_v60 = vld [vmem:[%s16125_s0 + $0x760] sm:$0xff]  }
 0x350   : > { %v10784_v16 = vadd.f32 %v10783_v29, %v10782_v7  ;;  %v10673_v46 = vpop.f32.mrf.mxu0  ;;  %11392 = vmatprep.subr.bf16.mxu1 %v11790_v52  ;;  %v14667_v27 = vcombine.high %v351_v17, %v367_v26  ;;  %v14669_v14 = vcombine.high %v352_v2, %v368_v53  ;;  %v383_v7 = vld [vmem:[%s11988_s25 + $0x360] sm:$0xff] }
 0x351   : > { %v6782_v54 = vadd.f32 %v10672_v35, %v14226_v25  ;;  %v10785_v0 = vpop.f32.mrf.mxu1  ;;  %17015 = vst [vmem:[#allocation390_spill] sm:$0xff] %v14665_v30  ;;  %11281 = vmatpush3.bf16.msra.mxu0 %v11789_v61  ;;  %v11797_v35 = vld [vmem:[%s16125_s0 + $0x720] sm:$0xff]  }
 0x352   : > { %17016 = vst [vmem:[#allocation391_spill] sm:$0xff] %v14667_v27  ;;  %v10674_v62 = vpop.f32.mrf.mxu0  ;;  %17017 = vst [vmem:[#allocation392_spill] sm:$0xff] %v14669_v14  ;;  %11393 = vmatpush3.bf16.msra.mxu1 %v11791_v3  ;;  %11282 = vmatprep.subr.bf16.mxu0 %v11792_v58  ;;  %v399_v3 = vld [vmem:[%s11988_s25 + $0x3e0] sm:$0xff]  ;;  %v384_v58 = vld [vmem:[%s11988_s25 + $0x368] sm:$0xff] }
 0x353   : > { %v14674_v1 = vadd.f32 %v10784_v16, %v6782_v54  ;;  %v10675_v29 = vadd.f32 %v10674_v62, %v10673_v46  ;;  %v10786_v25 = vpop.f32.mrf.mxu1  ;;  %11394 = vmatprep.subr.bf16.mxu1 %v11794_v38  ;;  %v11798_v46 = vld [vmem:[%s16125_s0 + $0x7e0] sm:$0xff]   ;;  %v400_v62 = vld [vmem:[%s11988_s25 + $0x3e8] sm:$0xff] }
 0x354   : > { %v10787_v31 = vadd.f32 %v10786_v25, %v10785_v0  ;;  %v10676_v52 = vpop.f32.mrf.mxu0  ;;  %7368 = vmatmul.mubr.bf16.gmra.mxu0 %v14662_v48  ;;  %v11800_v25 = vld [vmem:[%s16125_s0 + $0x758] sm:$0xff]   ;;  %v14705_v48 = vcombine.low %v351_v17, %v367_v26 }
 0x355   : > { %v6785_v54 = vadd.f32 %v10675_v29, %v14248_v56  ;;  %v10788_v16 = vpop.f32.mrf.mxu1  ;;  %7529 = vmatmul.mubr.bf16.gmra.mxu1 %v14665_v30  ;;  %7375 = vmatprep.mubr.bf16.mxu0 %v14667_v27  ;;  %v11799_v29 = vld [vmem:[%s16125_s0 + $0x7a0] sm:$0xff]   ;;  %v11801_v17 = vld [vmem:[%s16125_s0 + $0x718] sm:$0xff]   ;;  %v14751_v27 = vcombine.low %v383_v7, %v399_v3 }
 0x356   : > { %v10677_v61 = vpop.f32.mrf.mxu0  ;;  %7536 = vmatprep.mubr.bf16.mxu1 %v14669_v14  ;;  %11283 = vmatpush3.bf16.msra.mxu0 %v11793_v24  ;;  %17018 = vst [vmem:[#allocation393_spill] sm:$0xff] %v14705_v48  ;;  %v14715_v14 = vcombine.high %v384_v58, %v400_v62 }
 0x357   : > { %v14696_v38 = vadd.f32 %v10787_v31, %v6785_v54  ;;  %v10678_v0 = vadd.f32 %v10677_v61, %v10676_v52  ;;  %v10789_v56 = vpop.f32.mrf.mxu1  ;;  %11395 = vmatpush3.bf16.msra.mxu1 %v11795_v5  ;;  %11284 = vmatprep.subr.bf16.mxu0 %v11796_v60  ;;  %v11802_v31 = vld [vmem:[%s16125_s0 + $0x7d8] sm:$0xff]   ;;  %v14711_v52 = vcombine.low %v352_v2, %v368_v53  ;;  %v11804_v53 = vld [vmem:[%s16125_s0 + $0x750] sm:$0xff]  }
 0x358   : > { %v10790_v24 = vadd.f32 %v10789_v56, %v10788_v16  ;;  %v10679_v30 = vpop.f32.mrf.mxu0  ;;  %11396 = vmatprep.subr.bf16.mxu1 %v11798_v46  ;;  %v14713_v54 = vcombine.high %v383_v7, %v399_v3  ;;  %17021 = vst [vmem:[#allocation396_spill] sm:$0xff] %v14715_v14  ;;  %17022 = vst [vmem:[#allocation397_spill] sm:$0xff] %v14751_v27  ;;  %v11809_v7 = vld [vmem:[%s16125_s0 + $0x708] sm:$0xff]  }
 0x359   : > { %v6790_v5 = vadd.f32 %v10678_v0, %v14272_v23  ;;  %v10791_v60 = vpop.f32.mrf.mxu1  ;;  %17019 = vst [vmem:[#allocation394_spill] sm:$0xff] %v14711_v52  ;;  %v11803_v23 = vld [vmem:[%s16125_s0 + $0x798] sm:$0xff]  }
 0x35a   : > { %17020 = vst [vmem:[#allocation395_spill] sm:$0xff] %v14713_v54  ;;  %v10680_v61 = vpop.f32.mrf.mxu0  ;;  %11285 = vmatpush3.bf16.msra.mxu0 %v11797_v35 }
 0x35b   : > { %v14720_v26 = vadd.f32 %v10790_v24, %v6790_v5  ;;  %v10681_v46 = vadd.f32 %v10680_v61, %v10679_v30  ;;  %v10792_v16 = vpop.f32.mrf.mxu1  ;;  %11397 = vmatpush3.bf16.msra.mxu1 %v11799_v29  ;;  %11286 = vmatprep.subr.bf16.mxu0 %v11800_v25  ;;  %v11806_v30 = vld [vmem:[%s16125_s0 + $0x7d0] sm:$0xff]   ;;  %v415_v29 = vld [vmem:[%s11988_s25 + $0x460] sm:$0xff]  ;;  %v416_v5 = vld [vmem:[%s11988_s25 + $0x468] sm:$0xff] }
 0x35c   : > { %v10793_v2 = vadd.f32 %v10792_v16, %v10791_v60  ;;  %v10682_v35 = vpop.f32.mrf.mxu0  ;;  %7376 = vmatmul.mubr.bf16.gmra.mxu0 %v14705_v48  ;;  %11398 = vmatprep.subr.bf16.mxu1 %v11802_v31  ;;  %v431_v24 = vld [vmem:[%s11988_s25 + $0x4e0] sm:$0xff]  ;;  %v11805_v31 = vld [vmem:[%s16125_s0 + $0x710] sm:$0xff]  }
 0x35d   : > { %v6793_v0 = vadd.f32 %v10681_v46, %v14294_v12  ;;  %v10794_v56 = vpop.f32.mrf.mxu1  ;;  %7537 = vmatmul.mubr.bf16.gmra.mxu1 %v14711_v52  ;;  %7383 = vmatprep.mubr.bf16.mxu0 %v14713_v54  ;;  %v432_v46 = vld [vmem:[%s11988_s25 + $0x4e8] sm:$0xff]  ;;  %v11807_v16 = vld [vmem:[%s16125_s0 + $0x790] sm:$0xff]   ;;  %v14794_v54 = vcombine.low %v415_v29, %v431_v24 }
 0x35e   : > { %v10683_v25 = vpop.f32.mrf.mxu0  ;;  %7544 = vmatprep.mubr.bf16.mxu1 %v14715_v14  ;;  %11287 = vmatpush3.bf16.msra.mxu0 %v11801_v17  ;;  %v11808_v52 = vld [vmem:[%s16125_s0 + $0x748] sm:$0xff]   ;;  %v14761_v14 = vcombine.high %v416_v5, %v432_v46 }
 0x35f   : > { %v14742_v60 = vadd.f32 %v10793_v2, %v6793_v0  ;;  %v10684_v61 = vadd.f32 %v10683_v25, %v10682_v35  ;;  %v10795_v12 = vpop.f32.mrf.mxu1  ;;  %11399 = vmatpush3.bf16.msra.mxu1 %v11803_v23  ;;  %11288 = vmatprep.subr.bf16.mxu0 %v11804_v53  ;;  %v11810_v2 = vld [vmem:[%s16125_s0 + $0x7c8] sm:$0xff]   ;;  %v14757_v35 = vcombine.low %v384_v58, %v400_v62  ;;  %v11812_v58 = vld [vmem:[%s16125_s0 + $0x740] sm:$0xff]  }
 0x360   : > { %v10796_v17 = vadd.f32 %v10795_v12, %v10794_v56  ;;  %v10685_v48 = vpop.f32.mrf.mxu0  ;;  %11400 = vmatprep.subr.bf16.mxu1 %v11806_v30  ;;  %v14759_v0 = vcombine.high %v415_v29, %v431_v24  ;;  %17025 = vst [vmem:[#allocation400_spill] sm:$0xff] %v14761_v14  ;;  %17026 = vst [vmem:[#allocation401_spill] sm:$0xff] %v14794_v54 }
 0x361   : > { %v6798_v23 = vadd.f32 %v10684_v61, %v14318_v21  ;;  %v10797_v53 = vpop.f32.mrf.mxu1  ;;  %17023 = vst [vmem:[#allocation398_spill] sm:$0xff] %v14757_v35  ;;  %v11811_v21 = vld [vmem:[%s16125_s0 + $0x788] sm:$0xff]  }
 0x362   : > { %17024 = vst [vmem:[#allocation399_spill] sm:$0xff] %v14759_v0  ;;  %v10686_v25 = vpop.f32.mrf.mxu0  ;;  %11289 = vmatpush3.bf16.msra.mxu0 %v11805_v31 }
 0x363   : > { %v14766_v3 = vadd.f32 %v10796_v17, %v6798_v23  ;;  %v10687_v30 = vadd.f32 %v10686_v25, %v10685_v48  ;;  %v10798_v56 = vpop.f32.mrf.mxu1  ;;  %11401 = vmatpush3.bf16.msra.mxu1 %v11807_v16  ;;  %11290 = vmatprep.subr.bf16.mxu0 %v11808_v52  ;;  %v11814_v48 = vld [vmem:[%s16125_s0 + $0x7c0] sm:$0xff]  }
 0x364   : > { %v10799_v62 = vadd.f32 %v10798_v56, %v10797_v53  ;;  %v10688_v31 = vpop.f32.mrf.mxu0  ;;  %7384 = vmatmul.mubr.bf16.gmra.mxu0 %v14751_v27  ;;  %11402 = vmatprep.subr.bf16.mxu1 %v11810_v2  ;;  %v447_v16 = vld [vmem:[%s11988_s25 + $0x560] sm:$0xff] }
 0x365   : > { %v6801_v52 = vadd.f32 %v10687_v30, %v14340_v19  ;;  %v10800_v61 = vpop.f32.mrf.mxu1  ;;  %7545 = vmatmul.mubr.bf16.gmra.mxu1 %v14757_v35  ;;  %7391 = vmatprep.mubr.bf16.mxu0 %v14759_v0  ;;  %v463_v17 = vld [vmem:[%s11988_s25 + $0x5e0] sm:$0xff]  ;;  %v448_v19 = vld [vmem:[%s11988_s25 + $0x568] sm:$0xff] }
 0x366   : > { %v10689_v12 = vpop.f32.mrf.mxu0  ;;  %7552 = vmatprep.mubr.bf16.mxu1 %v14761_v14  ;;  %11291 = vmatpush3.bf16.msra.mxu0 %v11809_v7  ;;  %v11813_v2 = vld [vmem:[%s16125_s0 + $0x700] sm:$0xff]   ;;  %v464_v30 = vld [vmem:[%s11988_s25 + $0x5e8] sm:$0xff] }
 0x367   : > { %v14787_v23 = vadd.f32 %v10799_v62, %v6801_v52  ;;  %v10690_v53 = vadd.f32 %v10689_v12, %v10688_v31  ;;  %v10801_v25 = vpop.f32.mrf.mxu1  ;;  %11403 = vmatpush3.bf16.msra.mxu1 %v11811_v21  ;;  %11292 = vmatprep.subr.bf16.mxu0 %v11812_v58  ;;  %v11815_v56 = vld [vmem:[%s16125_s0 + $0x780] sm:$0xff]   ;;  %v14797_v62 = vcombine.low %v416_v5, %v432_v46 }
 0x368   : > { %v10802_v35 = vadd.f32 %v10801_v25, %v10800_v61  ;;  %v10691_v27 = vpop.f32.mrf.mxu0  ;;  %11404 = vmatprep.subr.bf16.mxu1 %v11814_v48  ;;  %v14799_v31 = vcombine.high %v447_v16, %v463_v17  ;;  %v14801_v12 = vcombine.high %v448_v19, %v464_v30 }
 0x369   : > { %v6806_v7 = vadd.f32 %v10690_v53, %v14361_v59  ;;  %v10803_v14 = vpop.f32.mrf.mxu1  ;;  %17027 = vst [vmem:[#allocation402_spill] sm:$0xff] %v14797_v62  ;;  %v480_v53 = vld [vmem:[%s11988_s25 + $0x668] sm:$0xff] }
 0x36a   : > { %17028 = vst [vmem:[#allocation403_spill] sm:$0xff] %v14799_v31  ;;  %v10692_v52 = vpop.f32.mrf.mxu0  ;;  %17029 = vst [vmem:[#allocation404_spill] sm:$0xff] %v14801_v12  ;;  %11293 = vmatpush3.bf16.msra.mxu0 %v11813_v2 }
 0x36b   : > { %v14803_v21 = vadd.f32 %v10802_v35, %v6806_v7  ;;  %v10693_v58 = vadd.f32 %v10692_v52, %v10691_v27  ;;  %v10804_v61 = vpop.f32.mrf.mxu1  ;;  %11405 = vmatpush3.bf16.msra.mxu1 %v11815_v56  ;;  %8083 = vmatprep.subr.bf16.mxu0 %v12291_v4  ;;  %v479_v27 = vld [vmem:[%s11988_s25 + $0x660] sm:$0xff]  ;;  %v496_v4 = vld [vmem:[%s11988_s25 + $0x6e8] sm:$0xff]  ;;  %v14818_v56 = vcombine.low %v447_v16, %v463_v17 }
 0x36c   : > { %v10805_v29 = vadd.f32 %v10804_v61, %v10803_v14  ;;  %v10694_v24 = vpop.f32.mrf.mxu0  ;;  %7392 = vmatmul.mubr.bf16.gmra.mxu0 %v14794_v54  ;;  %v495_v35 = vld [vmem:[%s11988_s25 + $0x6e0] sm:$0xff]  ;;  %8124 = vmatprep.subr.bf16.mxu1 %v12296_v9  ;;  %v14843_v54 = vcombine.low %v480_v53, %v496_v4 }
 0x36d   : > { %v6809_v59 = vadd.f32 %v10693_v58, %v14370_v32  ;;  %v10806_v5 = vpop.f32.mrf.mxu1  ;;  %7553 = vmatmul.mubr.bf16.gmra.mxu1 %v14797_v62  ;;  %7399 = vmatprep.mubr.bf16.mxu0 %v14799_v31  ;;  %17030 = vst [vmem:[#allocation405_spill] sm:$0xff] %v14818_v56  ;;  %v14821_v58 = vcombine.low %v448_v19, %v464_v30 }
 0x36e   : > { %v10695_v46 = vpop.f32.mrf.mxu0  ;;  %7560 = vmatprep.mubr.bf16.mxu1 %v14801_v12  ;;  %v14823_v61 = vcombine.high %v479_v27, %v495_v35  ;;  %v14840_v62 = vcombine.low %v479_v27, %v495_v35  ;;  %17034 = vst [vmem:[#allocation409_spill] sm:$0xff] %v14843_v54 }
 0x36f   : > { %v14814_v14 = vadd.f32 %v10805_v29, %v6809_v59  ;;  %v10696_v48 = vadd.f32 %v10695_v46, %v10694_v24  ;;  %v10807_v2 = vpop.f32.mrf.mxu1  ;;  %17031 = vst [vmem:[#allocation406_spill] sm:$0xff] %v14821_v58  ;;  %v14825_v29 = vcombine.high %v480_v53, %v496_v4  ;;  %v511_v46 = vld [vmem:[%s11988_s25 + $0x760] sm:$0xff] }
 0x370   : > { %v10808_v25 = vadd.f32 %v10807_v2, %v10806_v5  ;;  %v10697_v32 = vpop.f32.mrf.mxu0  ;;  %17033 = vst [vmem:[#allocation408_spill] sm:$0xff] %v14840_v62 }
 0x371   : > { %v6814_v7 = vadd.f32 %v10696_v48, %v14383_v47  ;;  %v10809_v52 = vpop.f32.mrf.mxu1  ;;  %17032 = vst [vmem:[#allocation407_spill] sm:$0xff] %v14825_v29  ;;  %v527_v48 = vld [vmem:[%s11988_s25 + $0x7e0] sm:$0xff] }
 0x372   : > { %v10698_v9 = vpop.f32.mrf.mxu0  ;;  %v14845_v0 = vcombine.high %v511_v46, %v527_v48 }
 0x373   : > { %v14827_v24 = vadd.f32 %v10808_v25, %v6814_v7  ;;  %v10699_v59 = vadd.f32 %v10698_v9, %v10697_v32  ;;  %v10810_v5 = vpop.f32.mrf.mxu1  ;;  %v512_v7 = vld [vmem:[%s11988_s25 + $0x768] sm:$0xff] }
 0x374   : > { %v10811_v16 = vadd.f32 %v10810_v5, %v10809_v52  ;;  %v10700_v17 = vpop.f32.mrf.mxu0  ;;  %7400 = vmatmul.mubr.bf16.gmra.mxu0 %v14818_v56  ;;  %v528_v52 = vld [vmem:[%s11988_s25 + $0x7e8] sm:$0xff]  ;;  %v14862_v56 = vcombine.low %v511_v46, %v527_v48 }
 0x375   : > { %v6817_v47 = vadd.f32 %v10699_v59, %v14392_v50  ;;  %v10812_v19 = vpop.f32.mrf.mxu1  ;;  %7561 = vmatmul.mubr.bf16.gmra.mxu1 %v14821_v58  ;;  %7407 = vmatprep.mubr.bf16.mxu0 %v14823_v61  ;;  %v14865_v12 = vcombine.low %v512_v7, %v528_v52 }
 0x376   : > { %v10701_v30 = vpop.f32.mrf.mxu0  ;;  %7568 = vmatprep.mubr.bf16.mxu1 %v14825_v29 }
 0x377   : > { %v14836_v2 = vadd.f32 %v10811_v16, %v6817_v47  ;;  %v10702_v25 = vadd.f32 %v10701_v30, %v10700_v17  ;;  %v10813_v32 = vpop.f32.mrf.mxu1  ;;  %v14847_v16 = vcombine.high %v512_v7, %v528_v52  ;;  %v543_v30 = vld [vmem:[%s11988_s25 + $0x860] sm:$0xff] }
 0x378   : > { %v10814_v9 = vadd.f32 %v10813_v32, %v10812_v19  ;;  %v10703_v5 = vpop.f32.mrf.mxu0 }
 0x379   : > { %v6822_v50 = vadd.f32 %v10702_v25, %v14405_v28  ;;  %v10815_v59 = vpop.f32.mrf.mxu1  ;;  %v559_v25 = vld [vmem:[%s11988_s25 + $0x8e0] sm:$0xff] }
 0x37a   : > { %v10704_v58 = vpop.f32.mrf.mxu0  ;;  %v14867_v31 = vcombine.high %v543_v30, %v559_v25 }
 0x37b   : > { %v14849_v17 = vadd.f32 %v10814_v9, %v6822_v50  ;;  %v10705_v47 = vadd.f32 %v10704_v58, %v10703_v5  ;;  %v10816_v19 = vpop.f32.mrf.mxu1  ;;  %v544_v5 = vld [vmem:[%s11988_s25 + $0x868] sm:$0xff] }
 0x37c   : > { %v10817_v27 = vadd.f32 %v10816_v19, %v10815_v59  ;;  %v10706_v35 = vpop.f32.mrf.mxu0  ;;  %7408 = vmatmul.mubr.bf16.gmra.mxu0 %v14840_v62  ;;  %v560_v50 = vld [vmem:[%s11988_s25 + $0x8e8] sm:$0xff]  ;;  %17035 = vst [vmem:[#allocation410_spill] sm:$0xff] %v14867_v31  ;;  %v14884_v62 = vcombine.low %v543_v30, %v559_v25 }
 0x37d   : > { %v6825_v28 = vadd.f32 %v10705_v47, %v14414_v8  ;;  %v10818_v53 = vpop.f32.mrf.mxu1  ;;  %7569 = vmatmul.mubr.bf16.gmra.mxu1 %v14843_v54  ;;  %7415 = vmatprep.mubr.bf16.mxu0 %v14845_v0  ;;  %v14887_v29 = vcombine.low %v544_v5, %v560_v50 }
 0x37e   : > { %v10707_v4 = vpop.f32.mrf.mxu0  ;;  %7576 = vmatprep.mubr.bf16.mxu1 %v14847_v16  ;;  %17037 = vst [vmem:[#allocation412_spill] sm:$0xff] %v14884_v62 }
 0x37f   : > { %v14858_v58 = vadd.f32 %v10817_v27, %v6825_v28  ;;  %v10708_v32 = vadd.f32 %v10707_v4, %v10706_v35  ;;  %v10819_v9 = vpop.f32.mrf.mxu1  ;;  %v14869_v27 = vcombine.high %v544_v5, %v560_v50  ;;  %v575_v4 = vld [vmem:[%s11988_s25 + $0x960] sm:$0xff]  ;;  %17038 = vst [vmem:[#allocation413_spill] sm:$0xff] %v14887_v29 }
 0x380   : > { %v10820_v59 = vadd.f32 %v10819_v9, %v10818_v53  ;;  %v10709_v19 = vpop.f32.mrf.mxu0 }
 0x381   : > { %v6830_v8 = vadd.f32 %v10708_v32, %v14427_v43  ;;  %v10821_v47 = vpop.f32.mrf.mxu1  ;;  %17036 = vst [vmem:[#allocation411_spill] sm:$0xff] %v14869_v27  ;;  %v591_v32 = vld [vmem:[%s11988_s25 + $0x9e0] sm:$0xff] }
 0x382   : > { %v10710_v54 = vpop.f32.mrf.mxu0 }
 0x383   : > { %v14871_v35 = vadd.f32 %v10820_v59, %v6830_v8  ;;  %v10711_v28 = vadd.f32 %v10710_v54, %v10709_v19  ;;  %v10822_v53 = vpop.f32.mrf.mxu1  ;;  %v576_v19 = vld [vmem:[%s11988_s25 + $0x968] sm:$0xff] }
 0x384   : > { %v10823_v46 = vadd.f32 %v10822_v53, %v10821_v47  ;;  %v10712_v48 = vpop.f32.mrf.mxu0  ;;  %7416 = vmatmul.mubr.bf16.gmra.mxu0 %v14862_v56  ;;  %v592_v8 = vld [vmem:[%s11988_s25 + $0x9e8] sm:$0xff] }
 0x385   : > { %v6833_v43 = vadd.f32 %v10711_v28, %v14436_v63  ;;  %v10824_v7 = vpop.f32.mrf.mxu1  ;;  %7577 = vmatmul.mubr.bf16.gmra.mxu1 %v14865_v12  ;;  %7423 = vmatprep.mubr.bf16.mxu0 %v14867_v31  ;;  %v14889_v31 = vcombine.high %v575_v4, %v591_v32 }
 0x386   : > { %v10713_v52 = vpop.f32.mrf.mxu0  ;;  %7584 = vmatprep.mubr.bf16.mxu1 %v14869_v27 }
 0x387   : > { %v14880_v54 = vadd.f32 %v10823_v46, %v6833_v43  ;;  %v10714_v9 = vadd.f32 %v10713_v52, %v10712_v48  ;;  %v10825_v59 = vpop.f32.mrf.mxu1  ;;  %17039 = vst [vmem:[#allocation414_spill] sm:$0xff] %v14889_v31  ;;  %v14891_v46 = vcombine.high %v576_v19, %v592_v8  ;;  %v607_v52 = vld [vmem:[%s11988_s25 + $0xa60] sm:$0xff] }
 0x388   : > { %v10826_v47 = vadd.f32 %v10825_v59, %v10824_v7  ;;  %v10715_v53 = vpop.f32.mrf.mxu0 }
 0x389   : > { %v6838_v63 = vadd.f32 %v10714_v9, %v14449_v44  ;;  %v10827_v28 = vpop.f32.mrf.mxu1  ;;  %17040 = vst [vmem:[#allocation415_spill] sm:$0xff] %v14891_v46  ;;  %v623_v9 = vld [vmem:[%s11988_s25 + $0xae0] sm:$0xff] }
 0x38a   : > { %v10716_v27 = vpop.f32.mrf.mxu0 }
 0x38b   : > { %v14893_v48 = vadd.f32 %v10826_v47, %v6838_v63  ;;  %v10717_v43 = vadd.f32 %v10716_v27, %v10715_v53  ;;  %v10828_v7 = vpop.f32.mrf.mxu1  ;;  %v608_v53 = vld [vmem:[%s11988_s25 + $0xa68] sm:$0xff] }
 0x38c   : > { %v10829_v30 = vadd.f32 %v10828_v7, %v10827_v28  ;;  %v10846_v25 = vpop.f32.mrf.mxu0  ;;  %7424 = vmatmul.mubr.bf16.gmra.mxu0 %v14884_v62  ;;  %v624_v63 = vld [vmem:[%s11988_s25 + $0xae8] sm:$0xff]  ;;  %v14906_v62 = vcombine.low %v575_v4, %v591_v32 }
 0x38d   : > { %v6841_v44 = vadd.f32 %v10717_v43, %v14458_v55  ;;  %v10958_v5 = vpop.f32.mrf.mxu1  ;;  %7585 = vmatmul.mubr.bf16.gmra.mxu1 %v14887_v29  ;;  %7431 = vmatprep.mubr.bf16.mxu0 %v14889_v31  ;;  %v14909_v29 = vcombine.low %v576_v19, %v592_v8  ;;  %v14911_v31 = vcombine.high %v607_v52, %v623_v9 }
 0x38e   : > { %v10847_v50 = vpop.f32.mrf.mxu0  ;;  %7592 = vmatprep.mubr.bf16.mxu1 %v14891_v46  ;;  %17041 = vst [vmem:[#allocation416_spill] sm:$0xff] %v14906_v62 }
 0x38f   : > { %v14902_v27 = vadd.f32 %v10829_v30, %v6841_v44  ;;  %v10848_v59 = vadd.f32 %v10847_v50, %v10846_v25  ;;  %v10959_v47 = vpop.f32.mrf.mxu1  ;;  %17042 = vst [vmem:[#allocation417_spill] sm:$0xff] %v14909_v29  ;;  %17043 = vst [vmem:[#allocation418_spill] sm:$0xff] %v14911_v31  ;;  %v14913_v30 = vcombine.high %v608_v53, %v624_v63  ;;  %v639_v50 = vld [vmem:[%s11988_s25 + $0xb60] sm:$0xff] }
 0x390   : > { %v10960_v28 = vadd.f32 %v10959_v47, %v10958_v5  ;;  %v10849_v7 = vpop.f32.mrf.mxu0 }
 0x391   : > { %v7040_v55 = vadd.f32 %v10848_v59, %v14471_v57  ;;  %v10961_v43 = vpop.f32.mrf.mxu1  ;;  %17044 = vst [vmem:[#allocation419_spill] sm:$0xff] %v14913_v30  ;;  %v655_v59 = vld [vmem:[%s11988_s25 + $0xbe0] sm:$0xff] }
 0x392   : > { %v10850_v46 = vpop.f32.mrf.mxu0 }
 0x393   : > { %v14915_v25 = vadd.f32 %v10960_v28, %v7040_v55  ;;  %v10851_v44 = vadd.f32 %v10850_v46, %v10849_v7  ;;  %v10962_v5 = vpop.f32.mrf.mxu1  ;;  %v640_v7 = vld [vmem:[%s11988_s25 + $0xb68] sm:$0xff] }
 0x394   : > { %v10963_v4 = vadd.f32 %v10962_v5, %v10961_v43  ;;  %v10852_v32 = vpop.f32.mrf.mxu0  ;;  %7432 = vmatmul.mubr.bf16.gmra.mxu0 %v14906_v62  ;;  %v656_v55 = vld [vmem:[%s11988_s25 + $0xbe8] sm:$0xff]  ;;  %v14928_v62 = vcombine.low %v607_v52, %v623_v9 }
 0x395   : > { %v7043_v57 = vadd.f32 %v10851_v44, %v14480_v37  ;;  %v10964_v19 = vpop.f32.mrf.mxu1  ;;  %7593 = vmatmul.mubr.bf16.gmra.mxu1 %v14909_v29  ;;  %7439 = vmatprep.mubr.bf16.mxu0 %v14911_v31  ;;  %v14931_v29 = vcombine.low %v608_v53, %v624_v63  ;;  %v14933_v31 = vcombine.high %v639_v50, %v655_v59 }
 0x396   : > { %v10853_v8 = vpop.f32.mrf.mxu0  ;;  %7600 = vmatprep.mubr.bf16.mxu1 %v14913_v30  ;;  %17045 = vst [vmem:[#allocation420_spill] sm:$0xff] %v14928_v62 }
 0x397   : > { %v14924_v46 = vadd.f32 %v10963_v4, %v7043_v57  ;;  %v10854_v47 = vadd.f32 %v10853_v8, %v10852_v32  ;;  %v10965_v28 = vpop.f32.mrf.mxu1  ;;  %17046 = vst [vmem:[#allocation421_spill] sm:$0xff] %v14931_v29  ;;  %17047 = vst [vmem:[#allocation422_spill] sm:$0xff] %v14933_v31  ;;  %v14935_v4 = vcombine.high %v640_v7, %v656_v55  ;;  %v671_v8 = vld [vmem:[%s11988_s25 + $0xc60] sm:$0xff] }
 0x398   : > { %v10966_v43 = vadd.f32 %v10965_v28, %v10964_v19  ;;  %v10855_v5 = vpop.f32.mrf.mxu0 }
 0x399   : > { %v7048_v37 = vadd.f32 %v10854_v47, %v14493_v34  ;;  %v10967_v44 = vpop.f32.mrf.mxu1  ;;  %17048 = vst [vmem:[#allocation423_spill] sm:$0xff] %v14935_v4  ;;  %v687_v47 = vld [vmem:[%s11988_s25 + $0xce0] sm:$0xff] }
 0x39a   : > { %v10856_v30 = vpop.f32.mrf.mxu0 }
 0x39b   : > { %v14937_v32 = vadd.f32 %v10966_v43, %v7048_v37  ;;  %v10857_v57 = vadd.f32 %v10856_v30, %v10855_v5  ;;  %v10968_v19 = vpop.f32.mrf.mxu1  ;;  %v672_v5 = vld [vmem:[%s11988_s25 + $0xc68] sm:$0xff] }
 0x39c   : > { %v10969_v52 = vadd.f32 %v10968_v19, %v10967_v44  ;;  %v10858_v9 = vpop.f32.mrf.mxu0  ;;  %7440 = vmatmul.mubr.bf16.gmra.mxu0 %v14928_v62  ;;  %v688_v37 = vld [vmem:[%s11988_s25 + $0xce8] sm:$0xff]  ;;  %v14950_v62 = vcombine.low %v639_v50, %v655_v59 }
 0x39d   : > { %v7051_v34 = vadd.f32 %v10857_v57, %v14502_v45  ;;  %v10970_v53 = vpop.f32.mrf.mxu1  ;;  %7601 = vmatmul.mubr.bf16.gmra.mxu1 %v14931_v29  ;;  %7447 = vmatprep.mubr.bf16.mxu0 %v14933_v31  ;;  %v14953_v29 = vcombine.low %v640_v7, %v656_v55  ;;  %v14955_v31 = vcombine.high %v671_v8, %v687_v47 }
 0x39e   : > { %v10859_v63 = vpop.f32.mrf.mxu0  ;;  %7608 = vmatprep.mubr.bf16.mxu1 %v14935_v4  ;;  %17049 = vst [vmem:[#allocation424_spill] sm:$0xff] %v14950_v62 }
 0x39f   : > { %v14946_v30 = vadd.f32 %v10969_v52, %v7051_v34  ;;  %v10860_v28 = vadd.f32 %v10859_v63, %v10858_v9  ;;  %v10971_v43 = vpop.f32.mrf.mxu1  ;;  %17050 = vst [vmem:[#allocation425_spill] sm:$0xff] %v14953_v29  ;;  %17051 = vst [vmem:[#allocation426_spill] sm:$0xff] %v14955_v31  ;;  %v14957_v52 = vcombine.high %v672_v5, %v688_v37  ;;  %v703_v63 = vld [vmem:[%s11988_s25 + $0xd60] sm:$0xff] }
 0x3a0   : > { %v10972_v44 = vadd.f32 %v10971_v43, %v10970_v53  ;;  %v10861_v19 = vpop.f32.mrf.mxu0 }
 0x3a1   : > { %v7056_v45 = vadd.f32 %v10860_v28, %v14515_v18  ;;  %v10973_v57 = vpop.f32.mrf.mxu1  ;;  %17052 = vst [vmem:[#allocation427_spill] sm:$0xff] %v14957_v52  ;;  %v719_v28 = vld [vmem:[%s11988_s25 + $0xde0] sm:$0xff] }
 0x3a2   : > { %v10862_v4 = vpop.f32.mrf.mxu0 }
 0x3a3   : > { %v14959_v9 = vadd.f32 %v10972_v44, %v7056_v45  ;;  %v10863_v34 = vadd.f32 %v10862_v4, %v10861_v19  ;;  %v10974_v53 = vpop.f32.mrf.mxu1  ;;  %v704_v19 = vld [vmem:[%s11988_s25 + $0xd68] sm:$0xff] }
 0x3a4   : > { %v10975_v50 = vadd.f32 %v10974_v53, %v10973_v57  ;;  %v10864_v59 = vpop.f32.mrf.mxu0  ;;  %7448 = vmatmul.mubr.bf16.gmra.mxu0 %v14950_v62  ;;  %v720_v45 = vld [vmem:[%s11988_s25 + $0xde8] sm:$0xff]  ;;  %v14972_v62 = vcombine.low %v671_v8, %v687_v47 }
 0x3a5   : > { %v7059_v18 = vadd.f32 %v10863_v34, %v14524_v33  ;;  %v10976_v7 = vpop.f32.mrf.mxu1  ;;  %7609 = vmatmul.mubr.bf16.gmra.mxu1 %v14953_v29  ;;  %7455 = vmatprep.mubr.bf16.mxu0 %v14955_v31  ;;  %v14975_v29 = vcombine.low %v672_v5, %v688_v37  ;;  %v14977_v31 = vcombine.high %v703_v63, %v719_v28 }
 0x3a6   : > { %v10865_v55 = vpop.f32.mrf.mxu0  ;;  %7616 = vmatprep.mubr.bf16.mxu1 %v14957_v52  ;;  %17053 = vst [vmem:[#allocation428_spill] sm:$0xff] %v14972_v62 }
 0x3a7   : > { %v14968_v4 = vadd.f32 %v10975_v50, %v7059_v18  ;;  %v10866_v43 = vadd.f32 %v10865_v55, %v10864_v59  ;;  %v10977_v44 = vpop.f32.mrf.mxu1  ;;  %17054 = vst [vmem:[#allocation429_spill] sm:$0xff] %v14975_v29  ;;  %17055 = vst [vmem:[#allocation430_spill] sm:$0xff] %v14977_v31  ;;  %v14979_v50 = vcombine.high %v704_v19, %v720_v45  ;;  %v735_v55 = vld [vmem:[%s11988_s25 + $0xe60] sm:$0xff] }
 0x3a8   : > { %v10978_v57 = vadd.f32 %v10977_v44, %v10976_v7  ;;  %v10867_v53 = vpop.f32.mrf.mxu0 }
 0x3a9   : > { %v7064_v33 = vadd.f32 %v10866_v43, %v14537_v15  ;;  %v10979_v34 = vpop.f32.mrf.mxu1  ;;  %17056 = vst [vmem:[#allocation431_spill] sm:$0xff] %v14979_v50  ;;  %v751_v43 = vld [vmem:[%s11988_s25 + $0xee0] sm:$0xff] }
 0x3aa   : > { %v10868_v52 = vpop.f32.mrf.mxu0 }
 0x3ab   : > { %v14981_v59 = vadd.f32 %v10978_v57, %v7064_v33  ;;  %v10869_v18 = vadd.f32 %v10868_v52, %v10867_v53  ;;  %v10980_v7 = vpop.f32.mrf.mxu1  ;;  %v736_v53 = vld [vmem:[%s11988_s25 + $0xe68] sm:$0xff] }
 0x3ac   : > { %v10981_v8 = vadd.f32 %v10980_v7, %v10979_v34  ;;  %v10870_v47 = vpop.f32.mrf.mxu0  ;;  %7456 = vmatmul.mubr.bf16.gmra.mxu0 %v14972_v62  ;;  %v752_v33 = vld [vmem:[%s11988_s25 + $0xee8] sm:$0xff]  ;;  %v14994_v62 = vcombine.low %v703_v63, %v719_v28 }
 0x3ad   : > { %v7067_v15 = vadd.f32 %v10869_v18, %v14546_v11  ;;  %v10982_v5 = vpop.f32.mrf.mxu1  ;;  %7617 = vmatmul.mubr.bf16.gmra.mxu1 %v14975_v29  ;;  %7463 = vmatprep.mubr.bf16.mxu0 %v14977_v31  ;;  %v14997_v29 = vcombine.low %v704_v19, %v720_v45  ;;  %v14999_v31 = vcombine.high %v735_v55, %v751_v43 }
 0x3ae   : > { %v10871_v37 = vpop.f32.mrf.mxu0  ;;  %7624 = vmatprep.mubr.bf16.mxu1 %v14979_v50  ;;  %17057 = vst [vmem:[#allocation432_spill] sm:$0xff] %v14994_v62 }
 0x3af   : > { %v14990_v52 = vadd.f32 %v10981_v8, %v7067_v15  ;;  %v10872_v44 = vadd.f32 %v10871_v37, %v10870_v47  ;;  %v10983_v57 = vpop.f32.mrf.mxu1  ;;  %17058 = vst [vmem:[#allocation433_spill] sm:$0xff] %v14997_v29  ;;  %17059 = vst [vmem:[#allocation434_spill] sm:$0xff] %v14999_v31  ;;  %v15001_v8 = vcombine.high %v736_v53, %v752_v33  ;;  %v767_v37 = vld [vmem:[%s11988_s25 + $0xf60] sm:$0xff] }
 0x3b0   : > { %v10984_v34 = vadd.f32 %v10983_v57, %v10982_v5  ;;  %v10873_v7 = vpop.f32.mrf.mxu0 }
 0x3b1   : > { %v7072_v11 = vadd.f32 %v10872_v44, %v14559_v42  ;;  %v10985_v18 = vpop.f32.mrf.mxu1  ;;  %17060 = vst [vmem:[#allocation435_spill] sm:$0xff] %v15001_v8  ;;  %v783_v44 = vld [vmem:[%s11988_s25 + $0xfe0] sm:$0xff] }
 0x3b2   : > { %v10874_v50 = vpop.f32.mrf.mxu0 }
 0x3b3   : > { %v15003_v47 = vadd.f32 %v10984_v34, %v7072_v11  ;;  %v10875_v15 = vadd.f32 %v10874_v50, %v10873_v7  ;;  %v10986_v5 = vpop.f32.mrf.mxu1  ;;  %v768_v7 = vld [vmem:[%s11988_s25 + $0xf68] sm:$0xff] }
 0x3b4   : > { %v10987_v63 = vadd.f32 %v10986_v5, %v10985_v18  ;;  %v10876_v28 = vpop.f32.mrf.mxu0  ;;  %7464 = vmatmul.mubr.bf16.gmra.mxu0 %v14994_v62  ;;  %v784_v11 = vld [vmem:[%s11988_s25 + $0xfe8] sm:$0xff]  ;;  %v15016_v62 = vcombine.low %v735_v55, %v751_v43 }
 0x3b5   : > { %v7075_v42 = vadd.f32 %v10875_v15, %v14568_v10  ;;  %v10988_v19 = vpop.f32.mrf.mxu1  ;;  %7625 = vmatmul.mubr.bf16.gmra.mxu1 %v14997_v29  ;;  %7471 = vmatprep.mubr.bf16.mxu0 %v14999_v31  ;;  %v15019_v29 = vcombine.low %v736_v53, %v752_v33  ;;  %v15021_v31 = vcombine.high %v767_v37, %v783_v44 }
 0x3b6   : > { %v10877_v45 = vpop.f32.mrf.mxu0  ;;  %7632 = vmatprep.mubr.bf16.mxu1 %v15001_v8  ;;  %17061 = vst [vmem:[#allocation436_spill] sm:$0xff] %v15016_v62 }
 0x3b7   : > { %v15012_v50 = vadd.f32 %v10987_v63, %v7075_v42  ;;  %v10878_v57 = vadd.f32 %v10877_v45, %v10876_v28  ;;  %v10989_v34 = vpop.f32.mrf.mxu1  ;;  %17062 = vst [vmem:[#allocation437_spill] sm:$0xff] %v15019_v29  ;;  %17063 = vst [vmem:[#allocation438_spill] sm:$0xff] %v15021_v31  ;;  %v15023_v63 = vcombine.high %v768_v7, %v784_v11  ;;  %v289_v45 = vld [vmem:[%s11988_s25 + $0x70] sm:$0xff] }
 0x3b8   : > { %v10990_v18 = vadd.f32 %v10989_v34, %v10988_v19  ;;  %v10879_v5 = vpop.f32.mrf.mxu0 }
 0x3b9   : > { %v7080_v10 = vadd.f32 %v10878_v57, %v14581_v36  ;;  %v10991_v15 = vpop.f32.mrf.mxu1  ;;  %17064 = vst [vmem:[#allocation439_spill] sm:$0xff] %v15023_v63  ;;  %v305_v57 = vld [vmem:[%s11988_s25 + $0xf0] sm:$0xff] }
 0x3ba   : > { %v10880_v8 = vpop.f32.mrf.mxu0 }
 0x3bb   : > { %v15025_v28 = vadd.f32 %v10990_v18, %v7080_v10  ;;  %v10881_v42 = vadd.f32 %v10880_v8, %v10879_v5  ;;  %v10992_v19 = vpop.f32.mrf.mxu1  ;;  %v290_v5 = vld [vmem:[%s11988_s25 + $0x78] sm:$0xff] }
 0x3bc   : > { %v10993_v55 = vadd.f32 %v10992_v19, %v10991_v15  ;;  %v10882_v43 = vpop.f32.mrf.mxu0  ;;  %7472 = vmatmul.mubr.bf16.gmra.mxu0 %v15016_v62  ;;  %v306_v10 = vld [vmem:[%s11988_s25 + $0xf8] sm:$0xff]  ;;  %v15038_v62 = vcombine.low %v767_v37, %v783_v44 }
 0x3bd   : > { %v7083_v36 = vadd.f32 %v10881_v42, %v14590_v41  ;;  %v10994_v53 = vpop.f32.mrf.mxu1  ;;  %7633 = vmatmul.mubr.bf16.gmra.mxu1 %v15019_v29  ;;  %7479 = vmatprep.mubr.bf16.mxu0 %v15021_v31  ;;  %v15041_v29 = vcombine.low %v768_v7, %v784_v11  ;;  %v15043_v31 = vcombine.high %v289_v45, %v305_v57 }
 0x3be   : > { %v10883_v33 = vpop.f32.mrf.mxu0  ;;  %7640 = vmatprep.mubr.bf16.mxu1 %v15023_v63  ;;  %17065 = vst [vmem:[#allocation440_spill] sm:$0xff] %v15038_v62 }
 0x3bf   : > { %v15034_v8 = vadd.f32 %v10993_v55, %v7083_v36  ;;  %v10884_v34 = vadd.f32 %v10883_v33, %v10882_v43  ;;  %v10995_v18 = vpop.f32.mrf.mxu1  ;;  %17066 = vst [vmem:[#allocation441_spill] sm:$0xff] %v15041_v29  ;;  %17067 = vst [vmem:[#allocation442_spill] sm:$0xff] %v15043_v31  ;;  %v15045_v55 = vcombine.high %v290_v5, %v306_v10  ;;  %v321_v33 = vld [vmem:[%s11988_s25 + $0x170] sm:$0xff] }
 0x3c0   : > { %v10996_v15 = vadd.f32 %v10995_v18, %v10994_v53  ;;  %v10885_v19 = vpop.f32.mrf.mxu0 }
 0x3c1   : > { %v7088_v41 = vadd.f32 %v10884_v34, %v14603_v39  ;;  %v10997_v42 = vpop.f32.mrf.mxu1  ;;  %17068 = vst [vmem:[#allocation443_spill] sm:$0xff] %v15045_v55  ;;  %v337_v34 = vld [vmem:[%s11988_s25 + $0x1f0] sm:$0xff] }
 0x3c2   : > { %v10886_v63 = vpop.f32.mrf.mxu0 }
 0x3c3   : > { %v15047_v43 = vadd.f32 %v10996_v15, %v7088_v41  ;;  %v10887_v36 = vadd.f32 %v10886_v63, %v10885_v19  ;;  %v10998_v53 = vpop.f32.mrf.mxu1  ;;  %v322_v19 = vld [vmem:[%s11988_s25 + $0x178] sm:$0xff] }
 0x3c4   : > { %v10999_v37 = vadd.f32 %v10998_v53, %v10997_v42  ;;  %v10888_v44 = vpop.f32.mrf.mxu0  ;;  %7480 = vmatmul.mubr.bf16.gmra.mxu0 %v15038_v62  ;;  %v338_v41 = vld [vmem:[%s11988_s25 + $0x1f8] sm:$0xff]  ;;  %v15060_v62 = vcombine.low %v289_v45, %v305_v57 }
 0x3c5   : > { %v7091_v39 = vadd.f32 %v10887_v36, %v14610_v13  ;;  %v11000_v7 = vpop.f32.mrf.mxu1  ;;  %7641 = vmatmul.mubr.bf16.gmra.mxu1 %v15041_v29  ;;  %7681 = vmatprep.mubr.bf16.mxu0 %v15043_v31  ;;  %v15063_v29 = vcombine.low %v290_v5, %v306_v10  ;;  %v15065_v31 = vcombine.high %v321_v33, %v337_v34  ;;  %v353_v10 = vld [vmem:[%s11988_s25 + $0x270] sm:$0xff] }
 0x3c6   : > { %v10889_v11 = vpop.f32.mrf.mxu0  ;;  %7842 = vmatprep.mubr.bf16.mxu1 %v15045_v55  ;;  %17069 = vst [vmem:[#allocation444_spill] sm:$0xff] %v15060_v62 }
 0x3c7   : > { %v15056_v63 = vadd.f32 %v10999_v37, %v7091_v39  ;;  %v10890_v18 = vadd.f32 %v10889_v11, %v10888_v44  ;;  %v11001_v15 = vpop.f32.mrf.mxu1  ;;  %17070 = vst [vmem:[#allocation445_spill] sm:$0xff] %v15063_v29  ;;  %17071 = vst [vmem:[#allocation446_spill] sm:$0xff] %v15065_v31  ;;  %v15067_v37 = vcombine.high %v322_v19, %v338_v41 }
 0x3c8   : > { %v11002_v42 = vadd.f32 %v11001_v15, %v11000_v7  ;;  %v10891_v53 = vpop.f32.mrf.mxu0 }
 0x3c9   : > { %v7096_v13 = vadd.f32 %v10890_v18, %v14629_v6  ;;  %v11003_v36 = vpop.f32.mrf.mxu1  ;;  %17072 = vst [vmem:[#allocation447_spill] sm:$0xff] %v15067_v37  ;;  %v369_v18 = vld [vmem:[%s11988_s25 + $0x2f0] sm:$0xff] }
 0x3ca   : > { %v10892_v55 = vpop.f32.mrf.mxu0 }
 0x3cb   : > { %v15069_v44 = vadd.f32 %v11002_v42, %v7096_v13  ;;  %v10893_v39 = vadd.f32 %v10892_v55, %v10891_v53  ;;  %v11004_v11 = vpop.f32.mrf.mxu1  ;;  %v354_v53 = vld [vmem:[%s11988_s25 + $0x278] sm:$0xff] }
 0x3cc   : > { %v11005_v7 = vadd.f32 %v11004_v11, %v11003_v36  ;;  %v10894_v45 = vpop.f32.mrf.mxu0  ;;  %7682 = vmatmul.mubr.bf16.vlgmr.msra.gmra.mxu0 %v15060_v62  ;;  %v370_v13 = vld [vmem:[%s11988_s25 + $0x2f8] sm:$0xff]  ;;  %v15115_v62 = vcombine.low %v353_v10, %v369_v18 }
 0x3cd   : > { %v7099_v6 = vadd.f32 %v10893_v39, %v14654_v40  ;;  %v11006_v57 = vpop.f32.mrf.mxu1  ;;  %7843 = vmatmul.mubr.bf16.vlgmr.msra.gmra.mxu1 %v15063_v29  ;;  %7689 = vmatprep.mubr.bf16.mxu0 %v15065_v31  ;;  %v15085_v39 = vcombine.low %v321_v33, %v337_v34  ;;  %v17078_v34 = vld [vmem:[#allocation30_spill] sm:$0xff] }
 0x3ce   : > { %v10895_v5 = vpop.f32.mrf.mxu0  ;;  %7850 = vmatprep.mubr.bf16.mxu1 %v15067_v37  ;;  %8084 = vmatpush1.bf16.msra.mxu0 %v12315_v20  ;;  %v15089_v20 = vcombine.low %v322_v19, %v338_v41  ;;  %v17080_v41 = vld [vmem:[#allocation26_spill] sm:$0xff] }
 0x3cf   : > { %v15079_v55 = vadd.f32 %v11005_v7, %v7099_v6  ;;  %v10896_v15 = vadd.f32 %v10895_v5, %v10894_v45  ;;  %v11007_v42 = vpop.f32.mrf.mxu1  ;;  %8125 = vmatpush1.bf16.msra.mxu1 %v12317_v22  ;;  %8085 = vmatprep.subr.bf16.mxu0 %v12260_v49  ;;  %17073 = vst [vmem:[#allocation448_spill] sm:$0xff] %v15085_v39  ;;  %v17077_v5 = vld [vmem:[#allocation29_spill] sm:$0xff] }
 0x3d0   : > { %v11008_v40 = vadd.f32 %v11007_v42, %v11006_v57  ;;  %v10897_v36 = vpop.f32.mrf.mxu0  ;;  %8126 = vmatprep.subr.bf16.mxu1 %v12262_v51  ;;  %17074 = vst [vmem:[#allocation449_spill] sm:$0xff] %v15089_v20  ;;  %v15091_v7 = vcombine.high %v353_v10, %v369_v18  ;;  %v15093_v6 = vcombine.high %v354_v53, %v370_v13  ;;  %v17079_v51 = vld [vmem:[#allocation25_spill] sm:$0xff]  ;;  %17084 = vst [vmem:[#allocation29_spill] sm:$0xff] %v15115_v62 }
 0x3d1   : > { %v7104_v11 = vadd.f32 %v10896_v15, %v14674_v1  ;;  %v11009_v29 = vpop.f32.mrf.mxu1 }
 0x3d2   : > { %17075 = vst [vmem:[#allocation450_spill] sm:$0xff] %v15091_v7  ;;  %v10898_v45 = vpop.f32.mrf.mxu0  ;;  %17076 = vst [vmem:[#allocation451_spill] sm:$0xff] %v15093_v6  ;;  %8086 = vmatpush1.bf16.msra.mxu0 %v17077_v5 }
 0x3d3   : > { %v15096_v49 = vadd.f32 %v11008_v40, %v7104_v11  ;;  %v10899_v22 = vadd.f32 %v10898_v45, %v10897_v36  ;;  %v11010_v33 = vpop.f32.mrf.mxu1  ;;  %8127 = vmatpush1.bf16.msra.mxu1 %v17078_v34  ;;  %8087 = vmatprep.subr.bf16.mxu0 %v17079_v51  ;;  %v385_v40 = vld [vmem:[%s11988_s25 + $0x370] sm:$0xff]  ;;  %v402_v34 = vld [vmem:[%s11988_s25 + $0x3f8] sm:$0xff] }
 0x3d4   : > { %v11011_v1 = vadd.f32 %v11010_v33, %v11009_v29  ;;  %v10900_v19 = vpop.f32.mrf.mxu0  ;;  %7690 = vmatmul.mubr.bf16.gmra.mxu0 %v15085_v39  ;;  %8128 = vmatprep.subr.bf16.mxu1 %v17080_v41  ;;  %v401_v36 = vld [vmem:[%s11988_s25 + $0x3f0] sm:$0xff]  ;;  %v386_v33 = vld [vmem:[%s11988_s25 + $0x378] sm:$0xff] }
 0x3d5   : > { %v7107_v57 = vadd.f32 %v10899_v22, %v14696_v38  ;;  %v11012_v15 = vpop.f32.mrf.mxu1  ;;  %7851 = vmatmul.mubr.bf16.gmra.mxu1 %v15089_v20  ;;  %7697 = vmatprep.mubr.bf16.mxu0 %v15091_v7  ;;  %v17081_v29 = vld [vmem:[#allocation27_spill] sm:$0xff]  ;;  %v17082_v51 = vld [vmem:[#allocation28_spill] sm:$0xff]  ;;  %v17083_v38 = vld [vmem:[#allocation21_spill] sm:$0xff]  ;;  %v15145_v31 = vcombine.low %v385_v40, %v401_v36 }
 0x3d6   : > { %v10901_v42 = vpop.f32.mrf.mxu0  ;;  %7858 = vmatprep.mubr.bf16.mxu1 %v15093_v6  ;;  %8088 = vmatpush1.bf16.msra.mxu0 %v17081_v29  ;;  %v17085_v20 = vld [vmem:[#allocation22_spill] sm:$0xff]  ;;  %v15119_v29 = vcombine.low %v354_v53, %v370_v13 }
 0x3d7   : > { %v15109_v11 = vadd.f32 %v11011_v1, %v7107_v57  ;;  %v10902_v45 = vadd.f32 %v10901_v42, %v10900_v19  ;;  %v11013_v5 = vpop.f32.mrf.mxu1  ;;  %8129 = vmatpush1.bf16.msra.mxu1 %v17082_v51  ;;  %8089 = vmatprep.subr.bf16.mxu0 %v17083_v38  ;;  %v15121_v1 = vcombine.high %v385_v40, %v401_v36  ;;  %v17089_v42 = vld [vmem:[#allocation23_spill] sm:$0xff]  ;;  %v17092_v13 = vld [vmem:[#allocation18_spill] sm:$0xff] }
 0x3d8   : > { %v11014_v22 = vadd.f32 %v11013_v5, %v11012_v15  ;;  %v10903_v41 = vpop.f32.mrf.mxu0  ;;  %8130 = vmatprep.subr.bf16.mxu1 %v17085_v20  ;;  %17086 = vst [vmem:[#allocation30_spill] sm:$0xff] %v15119_v29  ;;  %v15123_v57 = vcombine.high %v386_v33, %v402_v34  ;;  %v17090_v15 = vld [vmem:[#allocation24_spill] sm:$0xff]  ;;  %v17091_v20 = vld [vmem:[#allocation17_spill] sm:$0xff]  ;;  %v417_v38 = vld [vmem:[%s11988_s25 + $0x470] sm:$0xff] }
 0x3d9   : > { %v7112_v39 = vadd.f32 %v10902_v45, %v14720_v26  ;;  %v11015_v37 = vpop.f32.mrf.mxu1  ;;  %17087 = vst [vmem:[#allocation25_spill] sm:$0xff] %v15121_v1  ;;  %17096 = vst [vmem:[#allocation27_spill] sm:$0xff] %v15145_v31 }
 0x3da   : > { %v10904_v19 = vpop.f32.mrf.mxu0  ;;  %17088 = vst [vmem:[#allocation26_spill] sm:$0xff] %v15123_v57  ;;  %8090 = vmatpush1.bf16.msra.mxu0 %v17089_v42 }
 0x3db   : > { %v15126_v51 = vadd.f32 %v11014_v22, %v7112_v39  ;;  %v10905_v10 = vadd.f32 %v10904_v19, %v10903_v41  ;;  %v11016_v18 = vpop.f32.mrf.mxu1  ;;  %8131 = vmatpush1.bf16.msra.mxu1 %v17090_v15  ;;  %8091 = vmatprep.subr.bf16.mxu0 %v17091_v20  ;;  %v433_v22 = vld [vmem:[%s11988_s25 + $0x4f0] sm:$0xff]  ;;  %v434_v15 = vld [vmem:[%s11988_s25 + $0x4f8] sm:$0xff] }
 0x3dc   : > { %v11017_v26 = vadd.f32 %v11016_v18, %v11015_v37  ;;  %v10906_v53 = vpop.f32.mrf.mxu0  ;;  %7698 = vmatmul.mubr.bf16.gmra.mxu0 %v15115_v62  ;;  %8132 = vmatprep.subr.bf16.mxu1 %v17092_v13  ;;  %v17093_v37 = vld [vmem:[#allocation19_spill] sm:$0xff]  ;;  %v418_v18 = vld [vmem:[%s11988_s25 + $0x478] sm:$0xff]  ;;  %v15175_v7 = vcombine.low %v417_v38, %v433_v22 }
 0x3dd   : > { %v7115_v45 = vadd.f32 %v10905_v10, %v14742_v60  ;;  %v11018_v5 = vpop.f32.mrf.mxu1  ;;  %7859 = vmatmul.mubr.bf16.gmra.mxu1 %v15119_v29  ;;  %7705 = vmatprep.mubr.bf16.mxu0 %v15121_v1  ;;  %v17094_v20 = vld [vmem:[#allocation20_spill] sm:$0xff]  ;;  %v17095_v60 = vld [vmem:[#allocation13_spill] sm:$0xff]  ;;  %v17097_v29 = vld [vmem:[#allocation14_spill] sm:$0xff] }
 0x3de   : > { %v10907_v39 = vpop.f32.mrf.mxu0  ;;  %7866 = vmatprep.mubr.bf16.mxu1 %v15123_v57  ;;  %8092 = vmatpush1.bf16.msra.mxu0 %v17093_v37  ;;  %v15149_v37 = vcombine.low %v386_v33, %v402_v34  ;;  %v17104_v34 = vld [vmem:[#allocation10_spill] sm:$0xff]  ;;  %17108 = vst [vmem:[#allocation23_spill] sm:$0xff] %v15175_v7 }
 0x3df   : > { %v15139_v41 = vadd.f32 %v11017_v26, %v7115_v45  ;;  %v10908_v19 = vadd.f32 %v10907_v39, %v10906_v53  ;;  %v11019_v42 = vpop.f32.mrf.mxu1  ;;  %8133 = vmatpush1.bf16.msra.mxu1 %v17094_v20  ;;  %8093 = vmatprep.subr.bf16.mxu0 %v17095_v60  ;;  %v15151_v26 = vcombine.high %v417_v38, %v433_v22  ;;  %v17101_v39 = vld [vmem:[#allocation15_spill] sm:$0xff] }
 0x3e0   : > { %v11020_v10 = vadd.f32 %v11019_v42, %v11018_v5  ;;  %v10909_v13 = vpop.f32.mrf.mxu0  ;;  %8134 = vmatprep.subr.bf16.mxu1 %v17097_v29  ;;  %17098 = vst [vmem:[#allocation28_spill] sm:$0xff] %v15149_v37  ;;  %v15153_v45 = vcombine.high %v418_v18, %v434_v15  ;;  %v17102_v5 = vld [vmem:[#allocation16_spill] sm:$0xff]  ;;  %v17103_v29 = vld [vmem:[#allocation9_spill] sm:$0xff]  ;;  %v449_v60 = vld [vmem:[%s11988_s25 + $0x570] sm:$0xff] }
 0x3e1   : > { %v7120_v62 = vadd.f32 %v10908_v19, %v14766_v3  ;;  %v11021_v6 = vpop.f32.mrf.mxu1  ;;  %17099 = vst [vmem:[#allocation21_spill] sm:$0xff] %v15151_v26 }
 0x3e2   : > { %v10910_v53 = vpop.f32.mrf.mxu0  ;;  %17100 = vst [vmem:[#allocation22_spill] sm:$0xff] %v15153_v45  ;;  %8094 = vmatpush1.bf16.msra.mxu0 %v17101_v39 }
 0x3e3   : > { %v15156_v20 = vadd.f32 %v11020_v10, %v7120_v62  ;;  %v10911_v40 = vadd.f32 %v10910_v53, %v10909_v13  ;;  %v11022_v36 = vpop.f32.mrf.mxu1  ;;  %8135 = vmatpush1.bf16.msra.mxu1 %v17102_v5  ;;  %8095 = vmatprep.subr.bf16.mxu0 %v17103_v29  ;;  %v465_v10 = vld [vmem:[%s11988_s25 + $0x5f0] sm:$0xff]  ;;  %v466_v5 = vld [vmem:[%s11988_s25 + $0x5f8] sm:$0xff] }
 0x3e4   : > { %v11023_v3 = vadd.f32 %v11022_v36, %v11021_v6  ;;  %v10912_v33 = vpop.f32.mrf.mxu0  ;;  %7706 = vmatmul.mubr.bf16.gmra.mxu0 %v15145_v31  ;;  %8136 = vmatprep.subr.bf16.mxu1 %v17104_v34  ;;  %v17105_v6 = vld [vmem:[#allocation11_spill] sm:$0xff]  ;;  %v450_v36 = vld [vmem:[%s11988_s25 + $0x578] sm:$0xff]  ;;  %v15205_v1 = vcombine.low %v449_v60, %v465_v10 }
 0x3e5   : > { %v7123_v19 = vadd.f32 %v10911_v40, %v14787_v23  ;;  %v11024_v42 = vpop.f32.mrf.mxu1  ;;  %7867 = vmatmul.mubr.bf16.gmra.mxu1 %v15149_v37  ;;  %7713 = vmatprep.mubr.bf16.mxu0 %v15151_v26  ;;  %v17106_v29 = vld [vmem:[#allocation12_spill] sm:$0xff]  ;;  %v17107_v23 = vld [vmem:[#allocation6_spill] sm:$0xff] }
 0x3e6   : > { %v10913_v62 = vpop.f32.mrf.mxu0  ;;  %7874 = vmatprep.mubr.bf16.mxu1 %v15153_v45  ;;  %8096 = vmatpush1.bf16.msra.mxu0 %v17105_v6  ;;  %v17109_v37 = vld [vmem:[#allocation8_spill] sm:$0xff]  ;;  %v15179_v6 = vcombine.low %v418_v18, %v434_v15  ;;  %17120 = vst [vmem:[#allocation19_spill] sm:$0xff] %v15205_v1 }
 0x3e7   : > { %v15169_v13 = vadd.f32 %v11023_v3, %v7123_v19  ;;  %v10914_v53 = vadd.f32 %v10913_v62, %v10912_v33  ;;  %v11025_v39 = vpop.f32.mrf.mxu1  ;;  %8137 = vmatpush1.bf16.msra.mxu1 %v17106_v29  ;;  %8097 = vmatprep.subr.bf16.mxu0 %v17107_v23  ;;  %v15181_v3 = vcombine.high %v449_v60, %v465_v10  ;;  %v17113_v62 = vld [vmem:[#allocation5_spill] sm:$0xff]  ;;  %v17116_v15 = vld [vmem:[#allocation60_spill] sm:$0xff]  ;;  %v481_v23 = vld [vmem:[%s11988_s25 + $0x670] sm:$0xff] }
 0x3e8   : > { %v11026_v40 = vadd.f32 %v11025_v39, %v11024_v42  ;;  %v10915_v34 = vpop.f32.mrf.mxu0  ;;  %8138 = vmatprep.subr.bf16.mxu1 %v17109_v37  ;;  %17110 = vst [vmem:[#allocation24_spill] sm:$0xff] %v15179_v6  ;;  %v15183_v19 = vcombine.high %v450_v36, %v466_v5  ;;  %v17114_v42 = vld [vmem:[#allocation7_spill] sm:$0xff] }
 0x3e9   : > { %v7128_v31 = vadd.f32 %v10914_v53, %v14803_v21  ;;  %v11027_v57 = vpop.f32.mrf.mxu1  ;;  %17111 = vst [vmem:[#allocation17_spill] sm:$0xff] %v15181_v3  ;;  %v17115_v37 = vld [vmem:[#allocation59_spill] sm:$0xff] }
 0x3ea   : > { %v10916_v33 = vpop.f32.mrf.mxu0  ;;  %17112 = vst [vmem:[#allocation18_spill] sm:$0xff] %v15183_v19  ;;  %8098 = vmatpush1.bf16.msra.mxu0 %v17113_v62 }
 0x3eb   : > { %v15186_v29 = vadd.f32 %v11026_v40, %v7128_v31  ;;  %v10917_v38 = vadd.f32 %v10916_v33, %v10915_v34  ;;  %v11028_v22 = vpop.f32.mrf.mxu1  ;;  %8139 = vmatpush1.bf16.msra.mxu1 %v17114_v42  ;;  %8099 = vmatprep.subr.bf16.mxu0 %v17115_v37  ;;  %v497_v40 = vld [vmem:[%s11988_s25 + $0x6f0] sm:$0xff]  ;;  %v498_v42 = vld [vmem:[%s11988_s25 + $0x6f8] sm:$0xff]  ;;  %v17118_v37 = vld [vmem:[#allocation62_spill] sm:$0xff] }
 0x3ec   : > { %v11029_v21 = vadd.f32 %v11028_v22, %v11027_v57  ;;  %v10918_v18 = vpop.f32.mrf.mxu0  ;;  %7714 = vmatmul.mubr.bf16.gmra.mxu0 %v15175_v7  ;;  %8140 = vmatprep.subr.bf16.mxu1 %v17116_v15  ;;  %v17117_v57 = vld [vmem:[#allocation61_spill] sm:$0xff]  ;;  %v482_v22 = vld [vmem:[%s11988_s25 + $0x678] sm:$0xff]  ;;  %v15235_v26 = vcombine.low %v481_v23, %v497_v40 }
 0x3ed   : > { %v7131_v53 = vadd.f32 %v10917_v38, %v14814_v14  ;;  %v11030_v39 = vpop.f32.mrf.mxu1  ;;  %7875 = vmatmul.mubr.bf16.gmra.mxu1 %v15179_v6  ;;  %7721 = vmatprep.mubr.bf16.mxu0 %v15181_v3  ;;  %v17119_v14 = vld [vmem:[#allocation55_spill] sm:$0xff]  ;;  %v17121_v6 = vld [vmem:[#allocation56_spill] sm:$0xff] }
 0x3ee   : > { %v10919_v31 = vpop.f32.mrf.mxu0  ;;  %7882 = vmatprep.mubr.bf16.mxu1 %v15183_v19  ;;  %8100 = vmatpush2.bf16.msra.mxu0 %v17117_v57  ;;  %v15209_v57 = vcombine.low %v450_v36, %v466_v5  ;;  %v17128_v5 = vld [vmem:[#allocation52_spill] sm:$0xff]  ;;  %17132 = vst [vmem:[#allocation15_spill] sm:$0xff] %v15235_v26 }
 0x3ef   : > { %v15199_v34 = vadd.f32 %v11029_v21, %v7131_v53  ;;  %v10920_v33 = vadd.f32 %v10919_v31, %v10918_v18  ;;  %v11031_v62 = vpop.f32.mrf.mxu1  ;;  %8141 = vmatpush2.bf16.msra.mxu1 %v17118_v37  ;;  %8101 = vmatprep.subr.bf16.mxu0 %v17119_v14  ;;  %v15211_v21 = vcombine.high %v481_v23, %v497_v40  ;;  %v17125_v31 = vld [vmem:[#allocation57_spill] sm:$0xff]  ;;  %v513_v14 = vld [vmem:[%s11988_s25 + $0x770] sm:$0xff] }
 0x3f0   : > { %v11032_v38 = vadd.f32 %v11031_v62, %v11030_v39  ;;  %v10921_v15 = vpop.f32.mrf.mxu0  ;;  %8142 = vmatprep.subr.bf16.mxu1 %v17121_v6  ;;  %17122 = vst [vmem:[#allocation20_spill] sm:$0xff] %v15209_v57  ;;  %v15213_v53 = vcombine.high %v482_v22, %v498_v42  ;;  %v17126_v39 = vld [vmem:[#allocation58_spill] sm:$0xff]  ;;  %v17127_v6 = vld [vmem:[#allocation51_spill] sm:$0xff] }
 0x3f1   : > { %v7136_v7 = vadd.f32 %v10920_v33, %v14827_v24  ;;  %v11033_v45 = vpop.f32.mrf.mxu1  ;;  %17123 = vst [vmem:[#allocation13_spill] sm:$0xff] %v15211_v21 }
 0x3f2   : > { %v10922_v18 = vpop.f32.mrf.mxu0  ;;  %17124 = vst [vmem:[#allocation14_spill] sm:$0xff] %v15213_v53  ;;  %8102 = vmatpush2.bf16.msra.mxu0 %v17125_v31 }
 0x3f3   : > { %v15216_v37 = vadd.f32 %v11032_v38, %v7136_v7  ;;  %v10923_v60 = vadd.f32 %v10922_v18, %v10921_v15  ;;  %v11034_v10 = vpop.f32.mrf.mxu1  ;;  %8143 = vmatpush2.bf16.msra.mxu1 %v17126_v39  ;;  %8103 = vmatprep.subr.bf16.mxu0 %v17127_v6  ;;  %v529_v38 = vld [vmem:[%s11988_s25 + $0x7f0] sm:$0xff]  ;;  %v530_v39 = vld [vmem:[%s11988_s25 + $0x7f8] sm:$0xff]  ;;  %v17130_v6 = vld [vmem:[#allocation54_spill] sm:$0xff] }
 0x3f4   : > { %v11035_v24 = vadd.f32 %v11034_v10, %v11033_v45  ;;  %v10924_v36 = vpop.f32.mrf.mxu0  ;;  %7722 = vmatmul.mubr.bf16.gmra.mxu0 %v15205_v1  ;;  %8144 = vmatprep.subr.bf16.mxu1 %v17128_v5  ;;  %v17129_v45 = vld [vmem:[#allocation53_spill] sm:$0xff]  ;;  %v514_v10 = vld [vmem:[%s11988_s25 + $0x778] sm:$0xff]  ;;  %v15265_v3 = vcombine.low %v513_v14, %v529_v38 }
 0x3f5   : > { %v7139_v33 = vadd.f32 %v10923_v60, %v14836_v2  ;;  %v11036_v62 = vpop.f32.mrf.mxu1  ;;  %7883 = vmatmul.mubr.bf16.gmra.mxu1 %v15209_v57  ;;  %7729 = vmatprep.mubr.bf16.mxu0 %v15211_v21  ;;  %v17131_v2 = vld [vmem:[#allocation47_spill] sm:$0xff]  ;;  %v17133_v57 = vld [vmem:[#allocation48_spill] sm:$0xff] }
 0x3f6   : > { %v10925_v7 = vpop.f32.mrf.mxu0  ;;  %7890 = vmatprep.mubr.bf16.mxu1 %v15213_v53  ;;  %8104 = vmatpush2.bf16.msra.mxu0 %v17129_v45  ;;  %v15239_v45 = vcombine.low %v482_v22, %v498_v42  ;;  %v17138_v42 = vld [vmem:[#allocation44_spill] sm:$0xff] }
 0x3f7   : > { %v15229_v15 = vadd.f32 %v11035_v24, %v7139_v33  ;;  %v10926_v18 = vadd.f32 %v10925_v7, %v10924_v36  ;;  %v11037_v31 = vpop.f32.mrf.mxu1  ;;  %8145 = vmatpush2.bf16.msra.mxu1 %v17130_v6  ;;  %8105 = vmatprep.subr.bf16.mxu0 %v17131_v2  ;;  %v15241_v24 = vcombine.high %v513_v14, %v529_v38  ;;  %v17135_v7 = vld [vmem:[#allocation49_spill] sm:$0xff]  ;;  %v545_v2 = vld [vmem:[%s11988_s25 + $0x870] sm:$0xff]  ;;  %v17154_v21 = vld [vmem:[#allocation32_spill] sm:$0xff] }
 0x3f8   : > { %v11038_v60 = vadd.f32 %v11037_v31, %v11036_v62  ;;  %v10927_v5 = vpop.f32.mrf.mxu0  ;;  %8146 = vmatprep.subr.bf16.mxu1 %v17133_v57  ;;  %17134 = vst [vmem:[#allocation16_spill] sm:$0xff] %v15239_v45  ;;  %v15243_v33 = vcombine.high %v514_v10, %v530_v39  ;;  %v17136_v62 = vld [vmem:[#allocation50_spill] sm:$0xff]  ;;  %v17137_v57 = vld [vmem:[#allocation43_spill] sm:$0xff] }
 0x3f9   : > { %v7144_v1 = vadd.f32 %v10926_v18, %v14849_v17  ;;  %v11039_v19 = vpop.f32.mrf.mxu1 }
 0x3fa   : > { %v10928_v36 = vpop.f32.mrf.mxu0  ;;  %8106 = vmatpush2.bf16.msra.mxu0 %v17135_v7 }
 0x3fb   : > { %v15246_v6 = vadd.f32 %v11038_v60, %v7144_v1  ;;  %v10929_v23 = vadd.f32 %v10928_v36, %v10927_v5  ;;  %v11040_v40 = vpop.f32.mrf.mxu1  ;;  %8147 = vmatpush2.bf16.msra.mxu1 %v17136_v62  ;;  %8107 = vmatprep.subr.bf16.mxu0 %v17137_v57  ;;  %v561_v60 = vld [vmem:[%s11988_s25 + $0x8f0] sm:$0xff]  ;;  %v562_v62 = vld [vmem:[%s11988_s25 + $0x8f8] sm:$0xff]  ;;  %v17140_v57 = vld [vmem:[#allocation46_spill] sm:$0xff] }
 0x3fc   : > { %v11041_v17 = vadd.f32 %v11040_v40, %v11039_v19  ;;  %v10930_v22 = vpop.f32.mrf.mxu0  ;;  %7730 = vmatmul.mubr.bf16.gmra.mxu0 %v15235_v26  ;;  %8148 = vmatprep.subr.bf16.mxu1 %v17138_v42  ;;  %v17139_v19 = vld [vmem:[#allocation45_spill] sm:$0xff]  ;;  %v546_v40 = vld [vmem:[%s11988_s25 + $0x878] sm:$0xff] }
 0x3fd   : > { %v7147_v18 = vadd.f32 %v10929_v23, %v14858_v58  ;;  %v11042_v31 = vpop.f32.mrf.mxu1  ;;  %7891 = vmatmul.mubr.bf16.gmra.mxu1 %v15239_v45  ;;  %7737 = vmatprep.mubr.bf16.mxu0 %v15241_v24  ;;  %v17141_v58 = vld [vmem:[#allocation39_spill] sm:$0xff]  ;;  %v17142_v45 = vld [vmem:[#allocation40_spill] sm:$0xff] }
 0x3fe   : > { %v10931_v1 = vpop.f32.mrf.mxu0  ;;  %7898 = vmatprep.mubr.bf16.mxu1 %v15243_v33  ;;  %8108 = vmatpush2.bf16.msra.mxu0 %v17139_v19  ;;  %v15269_v19 = vcombine.low %v514_v10, %v530_v39  ;;  %v17149_v39 = vld [vmem:[#allocation36_spill] sm:$0xff] }
 0x3ff   : > { %v15259_v5 = vadd.f32 %v11041_v17, %v7147_v18  ;;  %v10932_v36 = vadd.f32 %v10931_v1, %v10930_v22  ;;  %v11043_v7 = vpop.f32.mrf.mxu1  ;;  %8149 = vmatpush2.bf16.msra.mxu1 %v17140_v57  ;;  %8109 = vmatprep.subr.bf16.mxu0 %v17141_v58  ;;  %v15271_v17 = vcombine.high %v545_v2, %v561_v60  ;;  %v17146_v1 = vld [vmem:[#allocation41_spill] sm:$0xff]  ;;  %v577_v58 = vld [vmem:[%s11988_s25 + $0x970] sm:$0xff] }
 0x400   : > { %v11044_v23 = vadd.f32 %v11043_v7, %v11042_v31  ;;  %v10933_v42 = vpop.f32.mrf.mxu0  ;;  %8150 = vmatprep.subr.bf16.mxu1 %v17142_v45  ;;  %17143 = vst [vmem:[#allocation9_spill] sm:$0xff] %v15269_v19  ;;  %v15273_v18 = vcombine.high %v546_v40, %v562_v62  ;;  %v17147_v31 = vld [vmem:[#allocation42_spill] sm:$0xff]  ;;  %v17148_v45 = vld [vmem:[#allocation35_spill] sm:$0xff] }
 0x401   : > { %v7152_v26 = vadd.f32 %v10932_v36, %v14871_v35  ;;  %v11045_v53 = vpop.f32.mrf.mxu1  ;;  %17144 = vst [vmem:[#allocation10_spill] sm:$0xff] %v15271_v17 }
 0x402   : > { %v10934_v22 = vpop.f32.mrf.mxu0  ;;  %17145 = vst [vmem:[#allocation11_spill] sm:$0xff] %v15273_v18  ;;  %8110 = vmatpush2.bf16.msra.mxu0 %v17146_v1 }
 0x403   : > { %v15276_v57 = vadd.f32 %v11044_v23, %v7152_v26  ;;  %v10935_v14 = vadd.f32 %v10934_v22, %v10933_v42  ;;  %v11046_v38 = vpop.f32.mrf.mxu1  ;;  %8151 = vmatpush2.bf16.msra.mxu1 %v17147_v31  ;;  %8111 = vmatprep.subr.bf16.mxu0 %v17148_v45  ;;  %v593_v23 = vld [vmem:[%s11988_s25 + $0x9f0] sm:$0xff]  ;;  %v594_v31 = vld [vmem:[%s11988_s25 + $0x9f8] sm:$0xff]  ;;  %v17151_v45 = vld [vmem:[#allocation38_spill] sm:$0xff] }
 0x404   : > { %v11047_v35 = vadd.f32 %v11046_v38, %v11045_v53  ;;  %v10936_v10 = vpop.f32.mrf.mxu0  ;;  %7738 = vmatmul.mubr.bf16.gmra.mxu0 %v15265_v3  ;;  %8152 = vmatprep.subr.bf16.mxu1 %v17149_v39  ;;  %v17150_v53 = vld [vmem:[#allocation37_spill] sm:$0xff]  ;;  %v578_v38 = vld [vmem:[%s11988_s25 + $0x978] sm:$0xff] }
 0x405   : > { %v7155_v36 = vadd.f32 %v10935_v14, %v14880_v54  ;;  %v11048_v7 = vpop.f32.mrf.mxu1  ;;  %7899 = vmatmul.mubr.bf16.gmra.mxu1 %v15269_v19  ;;  %7745 = vmatprep.mubr.bf16.mxu0 %v15271_v17  ;;  %v17152_v54 = vld [vmem:[#allocation31_spill] sm:$0xff]  ;;  %v15295_v17 = vcombine.low %v545_v2, %v561_v60 }
 0x406   : > { %v10937_v26 = vpop.f32.mrf.mxu0  ;;  %7906 = vmatprep.mubr.bf16.mxu1 %v15273_v18  ;;  %8112 = vmatpush2.bf16.msra.mxu0 %v17150_v53  ;;  %v15299_v53 = vcombine.low %v546_v40, %v562_v62  ;;  %v17161_v62 = vld [vmem:[#allocation92_spill] sm:$0xff] }
 0x407   : > { %v15289_v42 = vadd.f32 %v11047_v35, %v7155_v36  ;;  %v10938_v22 = vadd.f32 %v10937_v26, %v10936_v10  ;;  %v11049_v1 = vpop.f32.mrf.mxu1  ;;  %8153 = vmatpush2.bf16.msra.mxu1 %v17151_v45  ;;  %8113 = vmatprep.subr.bf16.mxu0 %v17152_v54  ;;  %17153 = vst [vmem:[#allocation12_spill] sm:$0xff] %v15295_v17  ;;  %v17158_v26 = vld [vmem:[#allocation33_spill] sm:$0xff]  ;;  %v609_v54 = vld [vmem:[%s11988_s25 + $0xa70] sm:$0xff] }
 0x408   : > { %v11050_v14 = vadd.f32 %v11049_v1, %v11048_v7  ;;  %v10939_v39 = vpop.f32.mrf.mxu0  ;;  %8154 = vmatprep.subr.bf16.mxu1 %v17154_v21  ;;  %17155 = vst [vmem:[#allocation6_spill] sm:$0xff] %v15299_v53  ;;  %v15301_v35 = vcombine.high %v577_v58, %v593_v23  ;;  %v15303_v36 = vcombine.high %v578_v38, %v594_v31  ;;  %v17159_v7 = vld [vmem:[#allocation34_spill] sm:$0xff]  ;;  %v17160_v21 = vld [vmem:[#allocation91_spill] sm:$0xff] }
 0x409   : > { %v7160_v18 = vadd.f32 %v10938_v22, %v14893_v48  ;;  %v11051_v19 = vpop.f32.mrf.mxu1 }
 0x40a   : > { %17156 = vst [vmem:[#allocation8_spill] sm:$0xff] %v15301_v35  ;;  %v10940_v10 = vpop.f32.mrf.mxu0  ;;  %17157 = vst [vmem:[#allocation5_spill] sm:$0xff] %v15303_v36  ;;  %8114 = vmatpush2.bf16.msra.mxu0 %v17158_v26  ;;  %v610_v26 = vld [vmem:[%s11988_s25 + $0xa78] sm:$0xff] }
 0x40b   : > { %v15306_v45 = vadd.f32 %v11050_v14, %v7160_v18  ;;  %v10941_v2 = vadd.f32 %v10940_v10, %v10939_v39  ;;  %v11052_v60 = vpop.f32.mrf.mxu1  ;;  %8155 = vmatpush2.bf16.msra.mxu1 %v17159_v7  ;;  %8165 = vmatprep.subr.bf16.mxu0 %v17160_v21  ;;  %v625_v14 = vld [vmem:[%s11988_s25 + $0xaf0] sm:$0xff] }
 0x40c   : > { %v11053_v48 = vadd.f32 %v11052_v60, %v11051_v19  ;;  %v11070_v40 = vpop.f32.mrf.mxu0  ;;  %7746 = vmatmul.mubr.bf16.gmra.mxu0 %v15295_v17  ;;  %8206 = vmatprep.subr.bf16.mxu1 %v17161_v62  ;;  %v626_v60 = vld [vmem:[%s11988_s25 + $0xaf8] sm:$0xff]  ;;  %v15322_v62 = vcombine.low %v577_v58, %v593_v23  ;;  %v15327_v17 = vcombine.high %v609_v54, %v625_v14 }
 0x40d   : > { %v7163_v22 = vadd.f32 %v10941_v2, %v14902_v27  ;;  %v11182_v1 = vpop.f32.mrf.mxu1  ;;  %7907 = vmatmul.mubr.bf16.gmra.mxu1 %v15299_v53  ;;  %7753 = vmatprep.mubr.bf16.mxu0 %v15301_v35  ;;  %v15325_v53 = vcombine.low %v578_v38, %v594_v31 }
 0x40e   : > { %v11071_v18 = vpop.f32.mrf.mxu0  ;;  %7914 = vmatprep.mubr.bf16.mxu1 %v15303_v36  ;;  %17162 = vst [vmem:[#allocation7_spill] sm:$0xff] %v15322_v62  ;;  %17164 = vst [vmem:[#allocation60_spill] sm:$0xff] %v15327_v17 }
 0x40f   : > { %v15318_v39 = vadd.f32 %v11053_v48, %v7163_v22  ;;  %v11072_v19 = vadd.f32 %v11071_v18, %v11070_v40  ;;  %v11183_v10 = vpop.f32.mrf.mxu1  ;;  %17163 = vst [vmem:[#allocation59_spill] sm:$0xff] %v15325_v53  ;;  %v15329_v48 = vcombine.high %v610_v26, %v626_v60  ;;  %v641_v18 = vld [vmem:[%s11988_s25 + $0xb70] sm:$0xff] }
 0x410   : > { %v11184_v7 = vadd.f32 %v11183_v10, %v11182_v1  ;;  %v11073_v21 = vpop.f32.mrf.mxu0 }
 0x411   : > { %v7362_v27 = vadd.f32 %v11072_v19, %v14915_v25  ;;  %v11185_v2 = vpop.f32.mrf.mxu1  ;;  %17165 = vst [vmem:[#allocation61_spill] sm:$0xff] %v15329_v48  ;;  %v657_v19 = vld [vmem:[%s11988_s25 + $0xbf0] sm:$0xff] }
 0x412   : > { %v11074_v36 = vpop.f32.mrf.mxu0  ;;  %v15349_v35 = vcombine.high %v641_v18, %v657_v19 }
 0x413   : > { %v15331_v40 = vadd.f32 %v11184_v7, %v7362_v27  ;;  %v11075_v22 = vadd.f32 %v11074_v36, %v11073_v21  ;;  %v11186_v1 = vpop.f32.mrf.mxu1  ;;  %v642_v21 = vld [vmem:[%s11988_s25 + $0xb78] sm:$0xff] }
 0x414   : > { %v11187_v58 = vadd.f32 %v11186_v1, %v11185_v2  ;;  %v11076_v23 = vpop.f32.mrf.mxu0  ;;  %7754 = vmatmul.mubr.bf16.gmra.mxu0 %v15322_v62  ;;  %v658_v27 = vld [vmem:[%s11988_s25 + $0xbf8] sm:$0xff]  ;;  %v15344_v62 = vcombine.low %v609_v54, %v625_v14  ;;  %17168 = vst [vmem:[#allocation56_spill] sm:$0xff] %v15349_v35 }
 0x415   : > { %v7365_v25 = vadd.f32 %v11075_v22, %v14924_v46  ;;  %v11188_v38 = vpop.f32.mrf.mxu1  ;;  %7915 = vmatmul.mubr.bf16.gmra.mxu1 %v15325_v53  ;;  %7761 = vmatprep.mubr.bf16.mxu0 %v15327_v17  ;;  %v15347_v53 = vcombine.low %v610_v26, %v626_v60 }
 0x416   : > { %v11077_v31 = vpop.f32.mrf.mxu0  ;;  %7922 = vmatprep.mubr.bf16.mxu1 %v15329_v48  ;;  %17166 = vst [vmem:[#allocation62_spill] sm:$0xff] %v15344_v62 }
 0x417   : > { %v15340_v36 = vadd.f32 %v11187_v58, %v7365_v25  ;;  %v11078_v10 = vadd.f32 %v11077_v31, %v11076_v23  ;;  %v11189_v7 = vpop.f32.mrf.mxu1  ;;  %17167 = vst [vmem:[#allocation55_spill] sm:$0xff] %v15347_v53  ;;  %v15351_v58 = vcombine.high %v642_v21, %v658_v27  ;;  %v673_v31 = vld [vmem:[%s11988_s25 + $0xc70] sm:$0xff] }
 0x418   : > { %v11190_v2 = vadd.f32 %v11189_v7, %v11188_v38  ;;  %v11079_v1 = vpop.f32.mrf.mxu0 }
 0x419   : > { %v7370_v46 = vadd.f32 %v11078_v10, %v14937_v32  ;;  %v11191_v22 = vpop.f32.mrf.mxu1  ;;  %17169 = vst [vmem:[#allocation57_spill] sm:$0xff] %v15351_v58  ;;  %v689_v10 = vld [vmem:[%s11988_s25 + $0xcf0] sm:$0xff] }
 0x41a   : > { %v11080_v48 = vpop.f32.mrf.mxu0  ;;  %v15371_v17 = vcombine.high %v673_v31, %v689_v10 }
 0x41b   : > { %v15353_v23 = vadd.f32 %v11190_v2, %v7370_v46  ;;  %v11081_v25 = vadd.f32 %v11080_v48, %v11079_v1  ;;  %v11192_v38 = vpop.f32.mrf.mxu1  ;;  %v674_v1 = vld [vmem:[%s11988_s25 + $0xc78] sm:$0xff] }
 0x41c   : > { %v11193_v54 = vadd.f32 %v11192_v38, %v11191_v22  ;;  %v11082_v14 = vpop.f32.mrf.mxu0  ;;  %7762 = vmatmul.mubr.bf16.gmra.mxu0 %v15344_v62  ;;  %v690_v46 = vld [vmem:[%s11988_s25 + $0xcf8] sm:$0xff]  ;;  %v15366_v62 = vcombine.low %v641_v18, %v657_v19  ;;  %17172 = vst [vmem:[#allocation52_spill] sm:$0xff] %v15371_v17 }
 0x41d   : > { %v7373_v32 = vadd.f32 %v11081_v25, %v14946_v30  ;;  %v11194_v26 = vpop.f32.mrf.mxu1  ;;  %7923 = vmatmul.mubr.bf16.gmra.mxu1 %v15347_v53  ;;  %7769 = vmatprep.mubr.bf16.mxu0 %v15349_v35  ;;  %v15369_v53 = vcombine.low %v642_v21, %v658_v27 }
 0x41e   : > { %v11083_v60 = vpop.f32.mrf.mxu0  ;;  %7930 = vmatprep.mubr.bf16.mxu1 %v15351_v58  ;;  %17170 = vst [vmem:[#allocation58_spill] sm:$0xff] %v15366_v62 }
 0x41f   : > { %v15362_v48 = vadd.f32 %v11193_v54, %v7373_v32  ;;  %v11084_v7 = vadd.f32 %v11083_v60, %v11082_v14  ;;  %v11195_v2 = vpop.f32.mrf.mxu1  ;;  %17171 = vst [vmem:[#allocation51_spill] sm:$0xff] %v15369_v53  ;;  %v15373_v54 = vcombine.high %v674_v1, %v690_v46  ;;  %v705_v60 = vld [vmem:[%s11988_s25 + $0xd70] sm:$0xff] }
 0x420   : > { %v11196_v22 = vadd.f32 %v11195_v2, %v11194_v26  ;;  %v11085_v38 = vpop.f32.mrf.mxu0 }
 0x421   : > { %v7378_v30 = vadd.f32 %v11084_v7, %v14959_v9  ;;  %v11197_v25 = vpop.f32.mrf.mxu1  ;;  %17173 = vst [vmem:[#allocation53_spill] sm:$0xff] %v15373_v54  ;;  %v721_v7 = vld [vmem:[%s11988_s25 + $0xdf0] sm:$0xff] }
 0x422   : > { %v11086_v58 = vpop.f32.mrf.mxu0  ;;  %v15393_v35 = vcombine.high %v705_v60, %v721_v7 }
 0x423   : > { %v15375_v14 = vadd.f32 %v11196_v22, %v7378_v30  ;;  %v11087_v32 = vadd.f32 %v11086_v58, %v11085_v38  ;;  %v11198_v26 = vpop.f32.mrf.mxu1  ;;  %v706_v38 = vld [vmem:[%s11988_s25 + $0xd78] sm:$0xff] }
 0x424   : > { %v11199_v18 = vadd.f32 %v11198_v26, %v11197_v25  ;;  %v11088_v19 = vpop.f32.mrf.mxu0  ;;  %7770 = vmatmul.mubr.bf16.gmra.mxu0 %v15366_v62  ;;  %v722_v30 = vld [vmem:[%s11988_s25 + $0xdf8] sm:$0xff]  ;;  %v15388_v62 = vcombine.low %v673_v31, %v689_v10  ;;  %17176 = vst [vmem:[#allocation48_spill] sm:$0xff] %v15393_v35 }
 0x425   : > { %v7381_v9 = vadd.f32 %v11087_v32, %v14968_v4  ;;  %v11200_v21 = vpop.f32.mrf.mxu1  ;;  %7931 = vmatmul.mubr.bf16.gmra.mxu1 %v15369_v53  ;;  %7777 = vmatprep.mubr.bf16.mxu0 %v15371_v17  ;;  %v15391_v53 = vcombine.low %v674_v1, %v690_v46 }
 0x426   : > { %v11089_v27 = vpop.f32.mrf.mxu0  ;;  %7938 = vmatprep.mubr.bf16.mxu1 %v15373_v54  ;;  %17174 = vst [vmem:[#allocation54_spill] sm:$0xff] %v15388_v62 }
 0x427   : > { %v15384_v58 = vadd.f32 %v11199_v18, %v7381_v9  ;;  %v11090_v2 = vadd.f32 %v11089_v27, %v11088_v19  ;;  %v11201_v22 = vpop.f32.mrf.mxu1  ;;  %17175 = vst [vmem:[#allocation47_spill] sm:$0xff] %v15391_v53  ;;  %v15395_v18 = vcombine.high %v706_v38, %v722_v30  ;;  %v737_v27 = vld [vmem:[%s11988_s25 + $0xe70] sm:$0xff] }
 0x428   : > { %v11202_v25 = vadd.f32 %v11201_v22, %v11200_v21  ;;  %v11091_v26 = vpop.f32.mrf.mxu0 }
 0x429   : > { %v7386_v4 = vadd.f32 %v11090_v2, %v14981_v59  ;;  %v11203_v32 = vpop.f32.mrf.mxu1  ;;  %17177 = vst [vmem:[#allocation49_spill] sm:$0xff] %v15395_v18  ;;  %v753_v2 = vld [vmem:[%s11988_s25 + $0xef0] sm:$0xff] }
 0x42a   : > { %v11092_v54 = vpop.f32.mrf.mxu0  ;;  %v15415_v17 = vcombine.high %v737_v27, %v753_v2 }
 0x42b   : > { %v15397_v19 = vadd.f32 %v11202_v25, %v7386_v4  ;;  %v11093_v9 = vadd.f32 %v11092_v54, %v11091_v26  ;;  %v11204_v21 = vpop.f32.mrf.mxu1  ;;  %v738_v26 = vld [vmem:[%s11988_s25 + $0xe78] sm:$0xff] }
 0x42c   : > { %v11205_v31 = vadd.f32 %v11204_v21, %v11203_v32  ;;  %v11094_v10 = vpop.f32.mrf.mxu0  ;;  %7778 = vmatmul.mubr.bf16.gmra.mxu0 %v15388_v62  ;;  %v754_v4 = vld [vmem:[%s11988_s25 + $0xef8] sm:$0xff]  ;;  %v15410_v62 = vcombine.low %v705_v60, %v721_v7  ;;  %17180 = vst [vmem:[#allocation44_spill] sm:$0xff] %v15415_v17 }
 0x42d   : > { %v7389_v59 = vadd.f32 %v11093_v9, %v14990_v52  ;;  %v11206_v1 = vpop.f32.mrf.mxu1  ;;  %7939 = vmatmul.mubr.bf16.gmra.mxu1 %v15391_v53  ;;  %7785 = vmatprep.mubr.bf16.mxu0 %v15393_v35  ;;  %v15413_v53 = vcombine.low %v706_v38, %v722_v30 }
 0x42e   : > { %v11095_v46 = vpop.f32.mrf.mxu0  ;;  %7946 = vmatprep.mubr.bf16.mxu1 %v15395_v18  ;;  %17178 = vst [vmem:[#allocation50_spill] sm:$0xff] %v15410_v62 }
 0x42f   : > { %v15406_v54 = vadd.f32 %v11205_v31, %v7389_v59  ;;  %v11096_v22 = vadd.f32 %v11095_v46, %v11094_v10  ;;  %v11207_v25 = vpop.f32.mrf.mxu1  ;;  %17179 = vst [vmem:[#allocation43_spill] sm:$0xff] %v15413_v53  ;;  %v15417_v31 = vcombine.high %v738_v26, %v754_v4  ;;  %v769_v46 = vld [vmem:[%s11988_s25 + $0xf70] sm:$0xff] }
 0x430   : > { %v11208_v32 = vadd.f32 %v11207_v25, %v11206_v1  ;;  %v11097_v21 = vpop.f32.mrf.mxu0 }
 0x431   : > { %v7394_v52 = vadd.f32 %v11096_v22, %v15003_v47  ;;  %v11209_v9 = vpop.f32.mrf.mxu1  ;;  %17181 = vst [vmem:[#allocation45_spill] sm:$0xff] %v15417_v31  ;;  %v785_v22 = vld [vmem:[%s11988_s25 + $0xff0] sm:$0xff] }
 0x432   : > { %v11098_v18 = vpop.f32.mrf.mxu0 }
 0x433   : > { %v15419_v10 = vadd.f32 %v11208_v32, %v7394_v52  ;;  %v11099_v59 = vadd.f32 %v11098_v18, %v11097_v21  ;;  %v11210_v1 = vpop.f32.mrf.mxu1  ;;  %v770_v21 = vld [vmem:[%s11988_s25 + $0xf78] sm:$0xff] }
 0x434   : > { %v11100_v60 = vpop.f32.mrf.mxu0  ;;  %7786 = vmatmul.mubr.bf16.gmra.mxu0 %v15410_v62  ;;  %v11211_v7 = vadd.f32 %v11210_v1, %v11209_v9  ;;  %v786_v52 = vld [vmem:[%s11988_s25 + $0xff8] sm:$0xff]  ;;  %v15435_v1 = vcombine.low %v738_v26, %v754_v4  ;;  %s8933_s25 = sshll.u32 %s11886_s15, 5  ;;  %s17636_s15 = smov (!%p233_p8, %s11886_s15), 1 }
 0x435   : > { %v7397_v47 = vadd.f32 %v11099_v59, %v15012_v50  ;;  %v11212_v38 = vpop.f32.mrf.mxu1  ;;  %7947 = vmatmul.mubr.bf16.gmra.mxu1 %v15413_v53  ;;  %7793 = vmatprep.mubr.bf16.mxu0 %v15415_v17  ;;  %v15432_v50 = vcombine.low %v737_v27, %v753_v2  ;;  %v15437_v53 = vcombine.high %v769_v46, %v785_v22  ;;  %p225_p7 = scmp.lt.s32.totalorder %s8933_s25, 63  ;;  %s9709_s29 = sshll.u32 %s17636_s15, 8 }
 0x436   : > { %v11101_v30 = vpop.f32.mrf.mxu0  ;;  %7954 = vmatprep.mubr.bf16.mxu1 %v15417_v31  ;;  %17183 = vst [vmem:[#allocation39_spill] sm:$0xff] %v15435_v1  ;;  %v15439_v17 = vcombine.high %v770_v21, %v786_v52  ;;  %s15802_s5 = scalar_lea.vmem %s16128_s3, %s9709_s29 }
 0x437   : > { %v15428_v18 = vadd.f32 %v11211_v7, %v7397_v47  ;;  %v11102_v25 = vadd.f32 %v11101_v30, %v11100_v60  ;;  %v11213_v32 = vpop.f32.mrf.mxu1  ;;  %17182 = vst [vmem:[#allocation46_spill] sm:$0xff] %v15432_v50  ;;  %17184 = vst [vmem:[#allocation40_spill] sm:$0xff] %v15437_v53  ;;  %s17634_s25 = smov (!%p225_p7, %s8933_s25), 63 }
 0x438   : > { %v11214_v62 = vadd.f32 %v11213_v32, %v11212_v38  ;;  %v11103_v35 = vpop.f32.mrf.mxu0  ;;  %17185 = vst [vmem:[#allocation41_spill] sm:$0xff] %v15439_v17  ;;  %s8934_s22 = sshll.u32 %s17634_s25, 3 }
 0x439   : > { %v7402_v9 = vadd.f32 %v11102_v25, %v15025_v28  ;;  %v11215_v59 = vpop.f32.mrf.mxu1  ;;  %v15450_v25 = vcombine.low %v769_v46, %v785_v22  ;;  %s15521_s28 = scalar_lea.vmem %s16126_s1, %s8934_s22 }
 0x43a   : > { %v11104_v31 = vpop.f32.mrf.mxu0 }
 0x43b   : > { %v15441_v47 = vadd.f32 %v11214_v62, %v7402_v9  ;;  %v11105_v60 = vadd.f32 %v11104_v31, %v11103_v35  ;;  %v11216_v7 = vpop.f32.mrf.mxu1  ;;  %17186 = vst [vmem:[#allocation42_spill] sm:$0xff] %v15450_v25  ;;  %v15453_v9 = vcombine.low %v770_v21, %v786_v52 }
 0x43c   : > { %v11106_v30 = vpop.f32.mrf.mxu0  ;;  %7794 = vmatmul.mubr.bf16.gmra.mxu0 %v15432_v50  ;;  %v11217_v2 = vadd.f32 %v11216_v7, %v11215_v59 }
 0x43d   : > { %v7405_v27 = vadd.f32 %v11105_v60, %v15034_v8  ;;  %v11218_v38 = vpop.f32.mrf.mxu1  ;;  %7955 = vmatmul.mubr.bf16.gmra.mxu1 %v15435_v1  ;;  %7801 = vmatprep.mubr.bf16.mxu0 %v15437_v53  ;;  %17187 = vst [vmem:[#allocation35_spill] sm:$0xff] %v15453_v9 }
 0x43e   : > { %v11107_v28 = vpop.f32.mrf.mxu0  ;;  %7962 = vmatprep.mubr.bf16.mxu1 %v15439_v17 }
 0x43f   : > { %v15448_v26 = vadd.f32 %v11217_v2, %v7405_v27  ;;  %v11108_v62 = vadd.f32 %v11107_v28, %v11106_v30  ;;  %v11219_v4 = vpop.f32.mrf.mxu1 }
 0x440   : > { %v11220_v35 = vadd.f32 %v11219_v4, %v11218_v38  ;;  %v11109_v31 = vpop.f32.mrf.mxu0 }
 0x441   : > { %v7410_v32 = vadd.f32 %v11108_v62, %v15047_v43  ;;  %v11221_v8 = vpop.f32.mrf.mxu1 }
 0x442   : > { %v11110_v59 = vpop.f32.mrf.mxu0 }
 0x443   : > { %v15455_v60 = vadd.f32 %v11220_v35, %v7410_v32  ;;  %v11111_v7 = vadd.f32 %v11110_v59, %v11109_v31  ;;  %v11222_v1 = vpop.f32.mrf.mxu1 }
 0x444   : > { %v11112_v50 = vpop.f32.mrf.mxu0  ;;  %7802 = vmatmul.mubr.bf16.gmra.mxu0 %v15450_v25  ;;  %v11223_v27 = vadd.f32 %v11222_v1, %v11221_v8 }
 0x445   : > { %v7413_v30 = vadd.f32 %v11111_v7, %v15056_v63  ;;  %v11224_v2 = vpop.f32.mrf.mxu1  ;;  %7963 = vmatmul.mubr.bf16.gmra.mxu1 %v15453_v9 }
 0x446   : > { %v11113_v46 = vpop.f32.mrf.mxu0 }
 0x447   : > { %v15460_v22 = vadd.f32 %v11223_v27, %v7413_v30  ;;  %v11114_v43 = vadd.f32 %v11113_v46, %v11112_v50  ;;  %v11225_v21 = vpop.f32.mrf.mxu1 }
 0x448   : > { %v11226_v52 = vadd.f32 %v11225_v21, %v11224_v2  ;;  %v11115_v38 = vpop.f32.mrf.mxu0 }
 0x449   : > { %v7418_v28 = vadd.f32 %v11114_v43, %v15069_v44  ;;  %v11227_v62 = vpop.f32.mrf.mxu1 }
 0x44a   : > { %v11116_v4 = vpop.f32.mrf.mxu0 }
 0x44b   : > { %v15463_v35 = vadd.f32 %v11226_v52, %v7418_v28  ;;  %v11117_v31 = vadd.f32 %v11116_v4, %v11115_v38  ;;  %v11228_v32 = vpop.f32.mrf.mxu1 }
 0x44c   : > { %v11118_v63 = vpop.f32.mrf.mxu0  ;;  %v11229_v8 = vadd.f32 %v11228_v32, %v11227_v62 }
 0x44d   : > { %v7421_v1 = vadd.f32 %v11117_v31, %v15079_v55  ;;  %v11230_v59 = vpop.f32.mrf.mxu1 }
 0x44e   : > { %v11119_v7 = vpop.f32.mrf.mxu0 }
 0x44f   : > { %v15466_v30 = vadd.f32 %v11229_v8, %v7421_v1  ;;  %v11120_v50 = vadd.f32 %v11119_v7, %v11118_v63  ;;  %v11231_v27 = vpop.f32.mrf.mxu1 }
 0x450   : > { %v11232_v2 = vadd.f32 %v11231_v27, %v11230_v59  ;;  %v11121_v46 = vpop.f32.mrf.mxu0 }
 0x451   : > { %v7426_v44 = vadd.f32 %v11120_v50, %v15096_v49  ;;  %v11233_v43 = vpop.f32.mrf.mxu1 }
 0x452   : > { %v11122_v21 = vpop.f32.mrf.mxu0 }
 0x453   : > { %v15469_v52 = vadd.f32 %v11232_v2, %v7426_v44  ;;  %v11123_v38 = vadd.f32 %v11122_v21, %v11121_v46  ;;  %v11234_v28 = vpop.f32.mrf.mxu1 }
 0x454   : > { %v11124_v4 = vpop.f32.mrf.mxu0  ;;  %v11235_v62 = vadd.f32 %v11234_v28, %v11233_v43 }
 0x455   : > { %v7429_v55 = vadd.f32 %v11123_v38, %v15109_v11  ;;  %v11236_v31 = vpop.f32.mrf.mxu1 }
 0x456   : > { %v11125_v32 = vpop.f32.mrf.mxu0 }
 0x457   : > { %v15472_v1 = vadd.f32 %v11235_v62, %v7429_v55  ;;  %v11126_v63 = vadd.f32 %v11125_v32, %v11124_v4  ;;  %v11237_v8 = vpop.f32.mrf.mxu1 }
 0x458   : > { %v11238_v59 = vadd.f32 %v11237_v8, %v11236_v31  ;;  %v11127_v7 = vpop.f32.mrf.mxu0 }
 0x459   : > { %v7434_v49 = vadd.f32 %v11126_v63, %v15126_v51  ;;  %v11239_v50 = vpop.f32.mrf.mxu1 }
 0x45a   : > { %v11128_v27 = vpop.f32.mrf.mxu0 }
 0x45b   : > { %v15475_v2 = vadd.f32 %v11238_v59, %v7434_v49  ;;  %v11129_v46 = vadd.f32 %v11128_v27, %v11127_v7  ;;  %v11240_v44 = vpop.f32.mrf.mxu1 }
 0x45c   : > { %v11130_v21 = vpop.f32.mrf.mxu0  ;;  %v11241_v43 = vadd.f32 %v11240_v44, %v11239_v50 }
 0x45d   : > { %v7437_v11 = vadd.f32 %v11129_v46, %v15139_v41  ;;  %v11242_v38 = vpop.f32.mrf.mxu1 }
 0x45e   : > { %v11131_v28 = vpop.f32.mrf.mxu0 }
 0x45f   : > { %v15478_v55 = vadd.f32 %v11241_v43, %v7437_v11  ;;  %v11132_v4 = vadd.f32 %v11131_v28, %v11130_v21  ;;  %v11243_v62 = vpop.f32.mrf.mxu1 }
 0x460   : > { %v11244_v31 = vadd.f32 %v11243_v62, %v11242_v38  ;;  %v11133_v32 = vpop.f32.mrf.mxu0 }
 0x461   : > { %v7442_v51 = vadd.f32 %v11132_v4, %v15156_v20  ;;  %v11245_v63 = vpop.f32.mrf.mxu1 }
 0x462   : > { %v11134_v8 = vpop.f32.mrf.mxu0 }
 0x463   : > { %v15481_v59 = vadd.f32 %v11244_v31, %v7442_v51  ;;  %v11135_v7 = vadd.f32 %v11134_v8, %v11133_v32  ;;  %v11246_v49 = vpop.f32.mrf.mxu1 }
 0x464   : > { %v11136_v27 = vpop.f32.mrf.mxu0  ;;  %v11247_v50 = vadd.f32 %v11246_v49, %v11245_v63 }
 0x465   : > { %v7445_v41 = vadd.f32 %v11135_v7, %v15169_v13  ;;  %v11248_v46 = vpop.f32.mrf.mxu1 }
 0x466   : > { %v11137_v44 = vpop.f32.mrf.mxu0 }
 0x467   : > { %v15484_v11 = vadd.f32 %v11247_v50, %v7445_v41  ;;  %v11138_v21 = vadd.f32 %v11137_v44, %v11136_v27  ;;  %v11249_v43 = vpop.f32.mrf.mxu1 }
 0x468   : > { %v11250_v38 = vadd.f32 %v11249_v43, %v11248_v46  ;;  %v11139_v28 = vpop.f32.mrf.mxu0 }
 0x469   : > { %v7450_v20 = vadd.f32 %v11138_v21, %v15186_v29  ;;  %v11251_v4 = vpop.f32.mrf.mxu1 }
 0x46a   : > { %v11140_v62 = vpop.f32.mrf.mxu0 }
 0x46b   : > { %v15487_v31 = vadd.f32 %v11250_v38, %v7450_v20  ;;  %v11141_v32 = vadd.f32 %v11140_v62, %v11139_v28  ;;  %v11252_v51 = vpop.f32.mrf.mxu1 }
 0x46c   : > { %v11142_v8 = vpop.f32.mrf.mxu0  ;;  %v11253_v63 = vadd.f32 %v11252_v51, %v11251_v4 }
 0x46d   : > { %v7453_v13 = vadd.f32 %v11141_v32, %v15199_v34  ;;  %v11254_v7 = vpop.f32.mrf.mxu1 }
 0x46e   : > { %v11143_v49 = vpop.f32.mrf.mxu0 }
 0x46f   : > { %v15490_v41 = vadd.f32 %v11253_v63, %v7453_v13  ;;  %v11144_v27 = vadd.f32 %v11143_v49, %v11142_v8  ;;  %v11255_v50 = vpop.f32.mrf.mxu1 }
 0x470   : > { %v11256_v46 = vadd.f32 %v11255_v50, %v11254_v7  ;;  %v11145_v44 = vpop.f32.mrf.mxu0 }
 0x471   : > { %v7458_v29 = vadd.f32 %v11144_v27, %v15216_v37  ;;  %v11257_v21 = vpop.f32.mrf.mxu1 }
 0x472   : > { %v11146_v43 = vpop.f32.mrf.mxu0 }
 0x473   : > { %v15493_v38 = vadd.f32 %v11256_v46, %v7458_v29  ;;  %v11147_v28 = vadd.f32 %v11146_v43, %v11145_v44  ;;  %v11258_v20 = vpop.f32.mrf.mxu1 }
 0x474   : > { %v11259_v62 = vadd.f32 %v11258_v20, %v11257_v21  ;;  %v11148_v9 = vpop.f32.mrf.mxu0 }
 0x475   : > { %v7461_v34 = vadd.f32 %v11147_v28, %v15229_v15  ;;  %v11260_v4 = vpop.f32.mrf.mxu1 }
 0x476   : > { %v11149_v32 = vpop.f32.mrf.mxu0 }
 0x477   : > { %v15496_v51 = vadd.f32 %v11259_v62, %v7461_v34  ;;  %v11150_v8 = vadd.f32 %v11149_v32, %v11148_v9  ;;  %v11261_v13 = vpop.f32.mrf.mxu1 }
 0x478   : > { %v11262_v63 = vadd.f32 %v11261_v13, %v11260_v4  ;;  %v11151_v7 = vpop.f32.mrf.mxu0 }
 0x479   : > { %v7466_v37 = vadd.f32 %v11150_v8, %v15246_v6  ;;  %v11263_v49 = vpop.f32.mrf.mxu1 }
 0x47a   : > { %v11152_v27 = vpop.f32.mrf.mxu0 }
 0x47b   : > { %v15499_v50 = vadd.f32 %v11262_v63, %v7466_v37  ;;  %v11153_v46 = vadd.f32 %v11152_v27, %v11151_v7  ;;  %v11264_v44 = vpop.f32.mrf.mxu1 }
 0x47c   : > { %v11265_v29 = vadd.f32 %v11264_v44, %v11263_v49  ;;  %v11154_v21 = vpop.f32.mrf.mxu0 }
 0x47d   : > { %v7469_v15 = vadd.f32 %v11153_v46, %v15259_v5  ;;  %v11266_v43 = vpop.f32.mrf.mxu1 }
 0x47e   : > { %v11155_v28 = vpop.f32.mrf.mxu0 }
 0x47f   : > { %v15502_v20 = vadd.f32 %v11265_v29, %v7469_v15  ;;  %v11156_v9 = vadd.f32 %v11155_v28, %v11154_v21  ;;  %v11267_v62 = vpop.f32.mrf.mxu1 }
 0x480   : > { %v11268_v34 = vadd.f32 %v11267_v62, %v11266_v43  ;;  %v11157_v4 = vpop.f32.mrf.mxu0 }
 0x481   : > { %v7474_v6 = vadd.f32 %v11156_v9, %v15276_v57  ;;  %v11269_v32 = vpop.f32.mrf.mxu1 }
 0x482   : > { %v11158_v8 = vpop.f32.mrf.mxu0 }
 0x483   : > { %v15505_v13 = vadd.f32 %v11268_v34, %v7474_v6  ;;  %v11159_v63 = vadd.f32 %v11158_v8, %v11157_v4  ;;  %v11270_v7 = vpop.f32.mrf.mxu1 }
 0x484   : > { %v11271_v37 = vadd.f32 %v11270_v7, %v11269_v32  ;;  %v11160_v49 = vpop.f32.mrf.mxu0 }
 0x485   : > { %v7477_v5 = vadd.f32 %v11159_v63, %v15289_v42  ;;  %v11272_v27 = vpop.f32.mrf.mxu1 }
 0x486   : > { %v11161_v46 = vpop.f32.mrf.mxu0 }
 0x487   : > { %v15509_v44 = vadd.f32 %v11271_v37, %v7477_v5  ;;  %v11162_v29 = vadd.f32 %v11161_v46, %v11160_v49  ;;  %v11273_v21 = vpop.f32.mrf.mxu1 }
 0x488   : > { %v11274_v15 = vadd.f32 %v11273_v21, %v11272_v27  ;;  %v11163_v43 = vpop.f32.mrf.mxu0 }
 0x489   : > { %v7482_v57 = vadd.f32 %v11162_v29, %v15306_v45  ;;  %v11275_v28 = vpop.f32.mrf.mxu1 }
 0x48a   : > { %v11164_v9 = vpop.f32.mrf.mxu0 }
 0x48b   : > { %v15512_v62 = vadd.f32 %v11274_v15, %v7482_v57  ;;  %v11165_v34 = vadd.f32 %v11164_v9, %v11163_v43  ;;  %v11276_v4 = vpop.f32.mrf.mxu1 }
 0x48c   : > { %v11277_v6 = vadd.f32 %v11276_v4, %v11275_v28  ;;  %v11294_v42 = vpop.f32.mrf.mxu0  ;;  %v7972_v4 = vld [vmem:[%s15521_s28 + $0x8] sm:$0xff] }
 0x48d   : > { %v7485_v32 = vadd.f32 %v11165_v34, %v15318_v39  ;;  %v11406_v8 = vpop.f32.mrf.mxu1 }
 0x48e   : > { %v11295_v63 = vpop.f32.mrf.mxu0 }
 0x48f   : > { %v15515_v7 = vadd.f32 %v11277_v6, %v7485_v32  ;;  %v11296_v37 = vadd.f32 %v11295_v63, %v11294_v42  ;;  %v11407_v49 = vpop.f32.mrf.mxu1 }
 0x490   : > { %v11297_v5 = vpop.f32.mrf.mxu0  ;;  %v11408_v29 = vadd.f32 %v11407_v49, %v11406_v8 }
 0x491   : > { %v7684_v45 = vadd.f32 %v11296_v37, %v15331_v40  ;;  %v11409_v27 = vpop.f32.mrf.mxu1  ;;  %v7971_v40 = vld [vmem:[%s15521_s28] sm:$0xff] }
 0x492   : > { %v11298_v46 = vpop.f32.mrf.mxu0 }
 0x493   : > { %v11299_v21 = vadd.f32 %v11298_v46, %v11297_v5  ;;  %v11410_v15 = vpop.f32.mrf.mxu1  ;;  %v7845_v43 = vadd.f32 %v11408_v29, %v7684_v45 }
 0x494   : > { %v11300_v39 = vpop.f32.mrf.mxu0  ;;  %v11411_v28 = vadd.f32 %v11410_v15, %v11409_v27 }
 0x495   : > { %v7687_v57 = vadd.f32 %v11299_v21, %v15340_v36  ;;  %v11412_v9 = vpop.f32.mrf.mxu1  ;;  %v8003_v49 = vsub.f32 %v7845_v43, %v7971_v40 }
 0x496   : > { %v11301_v34 = vpop.f32.mrf.mxu0 }
 0x497   : > { %v7848_v6 = vadd.f32 %v11411_v28, %v7687_v57  ;;  %v11302_v42 = vadd.f32 %v11301_v34, %v11300_v39  ;;  %v11413_v32 = vpop.f32.mrf.mxu1  ;;  %v7973_v34 = vld [vmem:[%s15521_s28 + $0x10] sm:$0xff] }
 0x498   : > { %v11303_v8 = vpop.f32.mrf.mxu0  ;;  %v11414_v45 = vadd.f32 %v11413_v32, %v11412_v9 }
 0x499   : > { %v7692_v63 = vadd.f32 %v11302_v42, %v15353_v23  ;;  %v11415_v37 = vpop.f32.mrf.mxu1  ;;  %v8004_v5 = vsub.f32 %v7848_v6, %v7972_v4  ;;  %v7974_v23 = vld [vmem:[%s15521_s28 + $0x18] sm:$0xff] }
 0x49a   : > { %v11304_v46 = vpop.f32.mrf.mxu0 }
 0x49b   : > { %v11305_v29 = vadd.f32 %v11304_v46, %v11303_v8  ;;  %v11416_v36 = vpop.f32.mrf.mxu1  ;;  %v8035_v27 = vpack.c.bf16 %v8004_v5, %v8003_v49  ;;  %v7853_v15 = vadd.f32 %v11414_v45, %v7692_v63 }
 0x49c   : > { %v11306_v21 = vpop.f32.mrf.mxu0  ;;  %v11417_v57 = vadd.f32 %v11416_v36, %v11415_v37  ;;  %v7975_v36 = vld [vmem:[%s15521_s28 + $0x20] sm:$0xff] }
 0x49d   : > { %v7695_v25 = vadd.f32 %v11305_v29, %v15362_v48  ;;  %v11418_v39 = vpop.f32.mrf.mxu1  ;;  %8051 = vxpose.xlu1.c.b16.start [1/8] (narrow) %v8035_v27, 16  ;;  %v8005_v4 = vsub.f32 %v7853_v15, %v7973_v34 }
 0x49e   : > { %v11307_v28 = vpop.f32.mrf.mxu0 }
 0x49f   : > { %v7856_v42 = vadd.f32 %v11417_v57, %v7695_v25  ;;  %v11308_v17 = vadd.f32 %v11307_v28, %v11306_v21  ;;  %v11419_v53 = vpop.f32.mrf.mxu1 }
 0x4a0   : > { %v11309_v43 = vpop.f32.mrf.mxu0  ;;  %v11420_v8 = vadd.f32 %v11419_v53, %v11418_v39 }
 0x4a1   : > { %v7700_v40 = vadd.f32 %v11308_v17, %v15375_v14  ;;  %v11421_v9 = vpop.f32.mrf.mxu1  ;;  %v8006_v6 = vsub.f32 %v7856_v42, %v7974_v23  ;;  %v7976_v17 = vld [vmem:[%s15521_s28 + $0x28] sm:$0xff] }
 0x4a2   : > { %v11310_v32 = vpop.f32.mrf.mxu0 }
 0x4a3   : > { %v11311_v48 = vadd.f32 %v11310_v32, %v11309_v43  ;;  %v11422_v63 = vpop.f32.mrf.mxu1  ;;  %v8036_v37 = vpack.c.bf16 %v8006_v6, %v8005_v4  ;;  %v7861_v5 = vadd.f32 %v11420_v8, %v7700_v40 }
 0x4a4   : > { %v11312_v49 = vpop.f32.mrf.mxu0  ;;  %v11423_v25 = vadd.f32 %v11422_v63, %v11421_v9 }
 0x4a5   : > { %v7703_v46 = vadd.f32 %v11311_v48, %v15384_v58  ;;  %v11424_v45 = vpop.f32.mrf.mxu1  ;;  %8052 = vxpose.xlu1.c.b16.cont [2/8] (narrow) %v8036_v37, 16  ;;  %v8007_v39 = vsub.f32 %v7861_v5, %v7975_v36  ;;  %v7977_v48 = vld [vmem:[%s15521_s28 + $0x30] sm:$0xff] }
 0x4a6   : > { %v11313_v29 = vpop.f32.mrf.mxu0 }
 0x4a7   : > { %v7864_v14 = vadd.f32 %v11423_v25, %v7703_v46  ;;  %v11314_v27 = vadd.f32 %v11313_v29, %v11312_v49  ;;  %v11425_v21 = vpop.f32.mrf.mxu1 }
 0x4a8   : > { %v11315_v15 = vpop.f32.mrf.mxu0  ;;  %v11426_v23 = vadd.f32 %v11425_v21, %v11424_v45 }
 0x4a9   : > { %v7708_v57 = vadd.f32 %v11314_v27, %v15397_v19  ;;  %v11427_v53 = vpop.f32.mrf.mxu1  ;;  %v8008_v28 = vsub.f32 %v7864_v14, %v7976_v17  ;;  %v7978_v19 = vld [vmem:[%s15521_s28 + $0x38] sm:$0xff] }
 0x4aa   : > { %v11316_v34 = vpop.f32.mrf.mxu0 }
 0x4ab   : > { %v11317_v58 = vadd.f32 %v11316_v34, %v11315_v15  ;;  %v11428_v42 = vpop.f32.mrf.mxu1  ;;  %v8037_v43 = vpack.c.bf16 %v8008_v28, %v8007_v39  ;;  %v7869_v9 = vadd.f32 %v11426_v23, %v7708_v57  ;;  %v7979_v34 = vld [vmem:[%s15521_s28 + $0x40] sm:$0xff] }
 0x4ac   : > { %v11318_v40 = vpop.f32.mrf.mxu0  ;;  %v11429_v6 = vadd.f32 %v11428_v42, %v11427_v53 }
 0x4ad   : > { %v7711_v4 = vadd.f32 %v11317_v58, %v15406_v54  ;;  %v11430_v32 = vpop.f32.mrf.mxu1  ;;  %8053 = vxpose.xlu1.c.b16.cont [3/8] (narrow) %v8037_v43, 16  ;;  %v8009_v45 = vsub.f32 %v7869_v9, %v7977_v48 }
 0x4ae   : > { %v11319_v8 = vpop.f32.mrf.mxu0 }
 0x4af   : > { %v7872_v63 = vadd.f32 %v11429_v6, %v7711_v4  ;;  %v11320_v37 = vadd.f32 %v11319_v8, %v11318_v40  ;;  %v11431_v49 = vpop.f32.mrf.mxu1 }
 0x4b0   : > { %v11321_v5 = vpop.f32.mrf.mxu0  ;;  %v11432_v17 = vadd.f32 %v11431_v49, %v11430_v32 }
 0x4b1   : > { %v7716_v46 = vadd.f32 %v11320_v37, %v15419_v10  ;;  %v11433_v25 = vpop.f32.mrf.mxu1  ;;  %v8010_v29 = vsub.f32 %v7872_v63, %v7978_v19  ;;  %v7980_v10 = vld [vmem:[%s15521_s28 + $0x48] sm:$0xff] }
 0x4b2   : > { %v11322_v36 = vpop.f32.mrf.mxu0 }
 0x4b3   : > { %v11323_v54 = vadd.f32 %v11322_v36, %v11321_v5  ;;  %v11434_v14 = vpop.f32.mrf.mxu1  ;;  %v8038_v27 = vpack.c.bf16 %v8010_v29, %v8009_v45  ;;  %v7877_v15 = vadd.f32 %v11432_v17, %v7716_v46  ;;  %v7981_v45 = vld [vmem:[%s15521_s28 + $0x50] sm:$0xff] }
 0x4b4   : > { %v11324_v21 = vpop.f32.mrf.mxu0  ;;  %v11435_v53 = vadd.f32 %v11434_v14, %v11433_v25 }
 0x4b5   : > { %v7719_v57 = vadd.f32 %v11323_v54, %v15428_v18  ;;  %v11436_v39 = vpop.f32.mrf.mxu1  ;;  %8054 = vxpose.xlu1.c.b16.cont [4/8] (narrow) %v8038_v27, 16  ;;  %v8011_v4 = vsub.f32 %v7877_v15, %v7979_v34 }
 0x4b6   : > { %v11325_v28 = vpop.f32.mrf.mxu0 }
 0x4b7   : > { %v7880_v23 = vadd.f32 %v11435_v53, %v7719_v57  ;;  %v11326_v58 = vadd.f32 %v11325_v28, %v11324_v21  ;;  %v11437_v42 = vpop.f32.mrf.mxu1 }
 0x4b8   : > { %v11327_v43 = vpop.f32.mrf.mxu0  ;;  %v11438_v8 = vadd.f32 %v11437_v42, %v11436_v39 }
 0x4b9   : > { %v7724_v40 = vadd.f32 %v11326_v58, %v15441_v47  ;;  %v11439_v9 = vpop.f32.mrf.mxu1  ;;  %v8012_v6 = vsub.f32 %v7880_v23, %v7980_v10  ;;  %v7982_v47 = vld [vmem:[%s15521_s28 + $0x58] sm:$0xff] }
 0x4ba   : > { %v11328_v32 = vpop.f32.mrf.mxu0 }
 0x4bb   : > { %v11329_v18 = vadd.f32 %v11328_v32, %v11327_v43  ;;  %v11440_v48 = vpop.f32.mrf.mxu1  ;;  %v8039_v19 = vpack.c.bf16 %v8012_v6, %v8011_v4  ;;  %v7885_v37 = vadd.f32 %v11438_v8, %v7724_v40  ;;  %v7983_v40 = vld [vmem:[%s15521_s28 + $0x60] sm:$0xff] }
 0x4bc   : > { %v11330_v63 = vpop.f32.mrf.mxu0  ;;  %v11441_v5 = vadd.f32 %v11440_v48, %v11439_v9 }
 0x4bd   : > { %v7727_v49 = vadd.f32 %v11329_v18, %v15448_v26  ;;  %v11442_v46 = vpop.f32.mrf.mxu1  ;;  %8055 = vxpose.xlu1.c.b16.cont [5/8] (narrow) %v8039_v19, 16  ;;  %v8013_v21 = vsub.f32 %v7885_v37, %v7981_v45 }
 0x4be   : > { %v11331_v25 = vpop.f32.mrf.mxu0 }
 0x4bf   : > { %v7888_v29 = vadd.f32 %v11441_v5, %v7727_v49  ;;  %v11332_v36 = vadd.f32 %v11331_v25, %v11330_v63  ;;  %v11443_v17 = vpop.f32.mrf.mxu1 }
 0x4c0   : > { %v11333_v54 = vpop.f32.mrf.mxu0  ;;  %v11444_v53 = vadd.f32 %v11443_v17, %v11442_v46  ;;  %v7985_v17 = vld [vmem:[%s15521_s28 + $0x70] sm:$0xff] }
 0x4c1   : > { %v7732_v14 = vadd.f32 %v11332_v36, %v15455_v60  ;;  %v11445_v27 = vpop.f32.mrf.mxu1  ;;  %v8014_v15 = vsub.f32 %v7888_v29, %v7982_v47  ;;  %v7984_v60 = vld [vmem:[%s15521_s28 + $0x68] sm:$0xff] }
 0x4c2   : > { %v11334_v57 = vpop.f32.mrf.mxu0 }
 0x4c3   : > { %v11335_v26 = vadd.f32 %v11334_v57, %v11333_v54  ;;  %v11446_v39 = vpop.f32.mrf.mxu1  ;;  %v8040_v28 = vpack.c.bf16 %v8014_v15, %v8013_v21  ;;  %v7893_v10 = vadd.f32 %v11444_v53, %v7732_v14 }
 0x4c4   : > { %v11336_v34 = vpop.f32.mrf.mxu0  ;;  %v11447_v58 = vadd.f32 %v11446_v39, %v11445_v27 }
 0x4c5   : > { %v7735_v23 = vadd.f32 %v11335_v26, %v15460_v22  ;;  %v11448_v42 = vpop.f32.mrf.mxu1  ;;  %8056 = vxpose.xlu1.c.b16.cont [6/8] (narrow) %v8040_v28, 16  ;;  %v8015_v48 = vsub.f32 %v7893_v10, %v7983_v40 }
 0x4c6   : > { %v11337_v43 = vpop.f32.mrf.mxu0 }
 0x4c7   : > { %v7896_v9 = vadd.f32 %v11447_v58, %v7735_v23  ;;  %v11338_v4 = vadd.f32 %v11337_v43, %v11336_v34  ;;  %v11449_v6 = vpop.f32.mrf.mxu1 }
 0x4c8   : > { %v11339_v32 = vpop.f32.mrf.mxu0  ;;  %v11450_v37 = vadd.f32 %v11449_v6, %v11448_v42 }
 0x4c9   : > { %v7740_v8 = vadd.f32 %v11338_v4, %v15463_v35  ;;  %v11451_v18 = vpop.f32.mrf.mxu1  ;;  %v8016_v19 = vsub.f32 %v7896_v9, %v7984_v60  ;;  %v7986_v35 = vld [vmem:[%s15521_s28 + $0x78] sm:$0xff]  ;;  %v7987_v9 = vld [vmem:[%s15521_s28 + $0x80] sm:$0xff] }
 0x4ca   : > { %v11340_v63 = vpop.f32.mrf.mxu0 }
 0x4cb   : > { %v11341_v22 = vadd.f32 %v11340_v63, %v11339_v32  ;;  %v11452_v49 = vpop.f32.mrf.mxu1  ;;  %v8041_v5 = vpack.c.bf16 %v8016_v19, %v8015_v48  ;;  %v7901_v25 = vadd.f32 %v11450_v37, %v7740_v8 }
 0x4cc   : > { %v11342_v46 = vpop.f32.mrf.mxu0  ;;  %v11453_v47 = vadd.f32 %v11452_v49, %v11451_v18 }
 0x4cd   : > { %v7743_v45 = vadd.f32 %v11341_v22, %v15466_v30  ;;  %v11454_v29 = vpop.f32.mrf.mxu1  ;;  %8057 = vxpose.xlu1.c.b16.cont [7/8] (narrow) %v8041_v5, 16  ;;  %v8017_v53 = vsub.f32 %v7901_v25, %v7985_v17  ;;  %v7989_v17 = vld [vmem:[%s15521_s28 + $0x90] sm:$0xff] }
 0x4ce   : > { %v11343_v36 = vpop.f32.mrf.mxu0 }
 0x4cf   : > { %v7904_v54 = vadd.f32 %v11453_v47, %v7743_v45  ;;  %v11344_v14 = vadd.f32 %v11343_v36, %v11342_v46  ;;  %v11455_v27 = vpop.f32.mrf.mxu1 }
 0x4d0   : > { %v11345_v21 = vpop.f32.mrf.mxu0  ;;  %v11456_v28 = vadd.f32 %v11455_v27, %v11454_v29 }
 0x4d1   : > { %v7748_v15 = vadd.f32 %v11344_v14, %v15469_v52  ;;  %v11457_v57 = vpop.f32.mrf.mxu1  ;;  %v8018_v26 = vsub.f32 %v7904_v54, %v7986_v35  ;;  %v7988_v52 = vld [vmem:[%s15521_s28 + $0x88] sm:$0xff] }
 0x4d2   : > { %v11346_v39 = vpop.f32.mrf.mxu0 }
 0x4d3   : > { %v11347_v30 = vadd.f32 %v11346_v39, %v11345_v21  ;;  %v11458_v34 = vpop.f32.mrf.mxu1  ;;  %v8042_v10 = vpack.c.bf16 %v8018_v26, %v8017_v53  ;;  %v7909_v58 = vadd.f32 %v11456_v28, %v7748_v15 }
 0x4d4   : > { %v11348_v23 = vpop.f32.mrf.mxu0  ;;  %v11459_v43 = vadd.f32 %v11458_v34, %v11457_v57 }
 0x4d5   : > { %v7751_v42 = vadd.f32 %v11347_v30, %v15472_v1  ;;  %v11460_v40 = vpop.f32.mrf.mxu1  ;;  %8058 = vxpose.xlu1.c.b16.end [8/8] (narrow) %v8042_v10, 16  ;;  %v8019_v19 = vsub.f32 %v7909_v58, %v7987_v9 }
 0x4d6   : > { %v11349_v60 = vpop.f32.mrf.mxu0 }
 0x4d7   : > { %v7912_v4 = vadd.f32 %v11459_v43, %v7751_v42  ;;  %v11350_v6 = vadd.f32 %v11349_v60, %v11348_v23  ;;  %v11461_v32 = vpop.f32.mrf.mxu1 }
 0x4d8   : > { %v11351_v8 = vpop.f32.mrf.mxu0  ;;  %v11462_v22 = vadd.f32 %v11461_v32, %v11460_v40  ;;  %v7991_v40 = vld [vmem:[%s15521_s28 + $0xa0] sm:$0xff] }
 0x4d9   : > { %v7756_v18 = vadd.f32 %v11350_v6, %v15475_v2  ;;  %v11463_v48 = vpop.f32.mrf.mxu1  ;;  %v8020_v63 = vsub.f32 %v7912_v4, %v7988_v52  ;;  %v7990_v2 = vld [vmem:[%s15521_s28 + $0x98] sm:$0xff] }
 0x4da   : > { %v11352_v37 = vpop.f32.mrf.mxu0 }
 0x4db   : > { %v11353_v1 = vadd.f32 %v11352_v37, %v11351_v8  ;;  %v11464_v49 = vpop.f32.mrf.mxu1  ;;  %v8043_v5 = vpack.c.bf16 %v8020_v63, %v8019_v19  ;;  %v7917_v25 = vadd.f32 %v11462_v22, %v7756_v18 }
 0x4dc   : > { %v11354_v46 = vpop.f32.mrf.mxu0  ;;  %v11465_v47 = vadd.f32 %v11464_v49, %v11463_v48 }
 0x4dd   : > { %v7759_v45 = vadd.f32 %v11353_v1, %v15478_v55  ;;  %v11466_v29 = vpop.f32.mrf.mxu1  ;;  %8067 = vxpose.xlu0.c.b16.start [1/8] (narrow) %v8043_v5, 16  ;;  %v8021_v57 = vsub.f32 %v7917_v25, %v7989_v17 }
 0x4de   : > { %v11355_v36 = vpop.f32.mrf.mxu0 }
 0x4df   : > { %v7920_v35 = vadd.f32 %v11465_v47, %v7759_v45  ;;  %v11356_v54 = vadd.f32 %v11355_v36, %v11354_v46  ;;  %v11467_v14 = vpop.f32.mrf.mxu1  ;;  %v7993_v45 = vld [vmem:[%s15521_s28 + $0xb0] sm:$0xff] }
 0x4e0   : > { %v11357_v27 = vpop.f32.mrf.mxu0  ;;  %v11468_v39 = vadd.f32 %v11467_v14, %v11466_v29 }
 0x4e1   : > { %v7764_v21 = vadd.f32 %v11356_v54, %v15481_v59  ;;  %v11469_v15 = vpop.f32.mrf.mxu1  ;;  %v8022_v53 = vsub.f32 %v7920_v35, %v7990_v2  ;;  %v7992_v59 = vld [vmem:[%s15521_s28 + $0xa8] sm:$0xff] }
 0x4e2   : > { %v11358_v26 = vpop.f32.mrf.mxu0 }
 0x4e3   : > { %v11359_v55 = vadd.f32 %v11358_v26, %v11357_v27  ;;  %v11470_v28 = vpop.f32.mrf.mxu1  ;;  %v8044_v30 = vpack.c.bf16 %v8022_v53, %v8021_v57  ;;  %v7925_v10 = vadd.f32 %v11468_v39, %v7764_v21 }
 0x4e4   : > { %v11360_v34 = vpop.f32.mrf.mxu0  ;;  %v11471_v58 = vadd.f32 %v11470_v28, %v11469_v15 }
 0x4e5   : > { %v7767_v23 = vadd.f32 %v11359_v55, %v15484_v11  ;;  %v11472_v42 = vpop.f32.mrf.mxu1  ;;  %8068 = vxpose.xlu0.c.b16.cont [2/8] (narrow) %v8044_v30, 16  ;;  %v8023_v8 = vsub.f32 %v7925_v10, %v7991_v40 }
 0x4e6   : > { %v11361_v43 = vpop.f32.mrf.mxu0 }
 0x4e7   : > { %v7928_v60 = vadd.f32 %v11471_v58, %v7767_v23  ;;  %v11362_v9 = vadd.f32 %v11361_v43, %v11360_v34  ;;  %v11473_v52 = vpop.f32.mrf.mxu1  ;;  %v7995_v34 = vld [vmem:[%s15521_s28 + $0xc0] sm:$0xff] }
 0x4e8   : > { %v11363_v4 = vpop.f32.mrf.mxu0  ;;  %v11474_v19 = vadd.f32 %v11473_v52, %v11472_v42 }
 0x4e9   : > { %v7772_v6 = vadd.f32 %v11362_v9, %v15487_v31  ;;  %v11475_v32 = vpop.f32.mrf.mxu1  ;;  %v8024_v18 = vsub.f32 %v7928_v60, %v7992_v59  ;;  %v7994_v31 = vld [vmem:[%s15521_s28 + $0xb8] sm:$0xff] }
 0x4ea   : > { %v11364_v48 = vpop.f32.mrf.mxu0 }
 0x4eb   : > { %v11365_v11 = vadd.f32 %v11364_v48, %v11363_v4  ;;  %v11476_v63 = vpop.f32.mrf.mxu1  ;;  %v8045_v37 = vpack.c.bf16 %v8024_v18, %v8023_v8  ;;  %v7933_v1 = vadd.f32 %v11474_v19, %v7772_v6 }
 0x4ec   : > { %v11366_v22 = vpop.f32.mrf.mxu0  ;;  %v11477_v5 = vadd.f32 %v11476_v63, %v11475_v32  ;;  %v7997_v63 = vld [vmem:[%s15521_s28 + $0xd0] sm:$0xff] }
 0x4ed   : > { %v7775_v49 = vadd.f32 %v11365_v11, %v15490_v41  ;;  %v11478_v46 = vpop.f32.mrf.mxu1  ;;  %8069 = vxpose.xlu0.c.b16.cont [3/8] (narrow) %v8045_v37, 16  ;;  %v8025_v54 = vsub.f32 %v7933_v1, %v7993_v45 }
 0x4ee   : > { %v11367_v25 = vpop.f32.mrf.mxu0 }
 0x4ef   : > { %v7936_v47 = vadd.f32 %v11477_v5, %v7775_v49  ;;  %v11368_v29 = vadd.f32 %v11367_v25, %v11366_v22  ;;  %v11479_v36 = vpop.f32.mrf.mxu1 }
 0x4f0   : > { %v11369_v17 = vpop.f32.mrf.mxu0  ;;  %v11480_v21 = vadd.f32 %v11479_v36, %v11478_v46 }
 0x4f1   : > { %v7780_v2 = vadd.f32 %v11368_v29, %v15493_v38  ;;  %v11481_v35 = vpop.f32.mrf.mxu1  ;;  %v8026_v14 = vsub.f32 %v7936_v47, %v7994_v31  ;;  %v7996_v38 = vld [vmem:[%s15521_s28 + $0xc8] sm:$0xff] }
 0x4f2   : > { %v11370_v27 = vpop.f32.mrf.mxu0 }
 0x4f3   : > { %v11371_v41 = vadd.f32 %v11370_v27, %v11369_v17  ;;  %v11482_v15 = vpop.f32.mrf.mxu1  ;;  %v8046_v57 = vpack.c.bf16 %v8026_v14, %v8025_v54  ;;  %v7941_v26 = vadd.f32 %v11480_v21, %v7780_v2  ;;  %v7999_v21 = vld [vmem:[%s15521_s28 + $0xe0] sm:$0xff] }
 0x4f4   : > { %v11372_v53 = vpop.f32.mrf.mxu0  ;;  %v11483_v55 = vadd.f32 %v11482_v15, %v11481_v35 }
 0x4f5   : > { %v7783_v39 = vadd.f32 %v11371_v41, %v15496_v51  ;;  %v11484_v28 = vpop.f32.mrf.mxu1  ;;  %8070 = vxpose.xlu0.c.b16.cont [4/8] (narrow) %v8046_v57, 16  ;;  %v8027_v59 = vsub.f32 %v7941_v26, %v7995_v34 }
 0x4f6   : > { %v11373_v30 = vpop.f32.mrf.mxu0 }
 0x4f7   : > { %v7944_v10 = vadd.f32 %v11483_v55, %v7783_v39  ;;  %v11374_v23 = vadd.f32 %v11373_v30, %v11372_v53  ;;  %v11485_v58 = vpop.f32.mrf.mxu1 }
 0x4f8   : > { %v11375_v42 = vpop.f32.mrf.mxu0  ;;  %v11486_v52 = vadd.f32 %v11485_v58, %v11484_v28 }
 0x4f9   : > { %v7788_v43 = vadd.f32 %v11374_v23, %v15499_v50  ;;  %v11487_v40 = vpop.f32.mrf.mxu1  ;;  %v8028_v60 = vsub.f32 %v7944_v10, %v7996_v38  ;;  %v7998_v50 = vld [vmem:[%s15521_s28 + $0xd8] sm:$0xff] }
 0x4fa   : > { %v11376_v9 = vpop.f32.mrf.mxu0 }
 0x4fb   : > { %v11377_v51 = vadd.f32 %v11376_v9, %v11375_v42  ;;  %v11488_v4 = vpop.f32.mrf.mxu1  ;;  %v8047_v6 = vpack.c.bf16 %v8028_v60, %v8027_v59  ;;  %v7949_v8 = vadd.f32 %v11486_v52, %v7788_v43  ;;  %v8001_v43 = vld [vmem:[%s15521_s28 + $0xf0] sm:$0xff] }
 0x4fc   : > { %v11378_v32 = vpop.f32.mrf.mxu0  ;;  %v11489_v48 = vadd.f32 %v11488_v4, %v11487_v40  ;;  %v8002_v40 = vld [vmem:[%s15521_s28 + $0xf8] sm:$0xff]  ;;  %v17189_v4 = vld [vmem:[#allocation94_spill] sm:$0xff] }
 0x4fd   : > { %v7791_v18 = vadd.f32 %v11377_v51, %v15502_v20  ;;  %v11490_v19 = vpop.f32.mrf.mxu1  ;;  %8071 = vxpose.xlu0.c.b16.cont [5/8] (narrow) %v8047_v6, 16  ;;  %v8029_v25 = vsub.f32 %v7949_v8, %v7997_v63  ;;  %v17190_v6 = vld [vmem:[#allocation87_spill] sm:$0xff]  ;;  %v17192_v8 = vld [vmem:[#allocation89_spill] sm:$0xff]  ;;  %v17197_v63 = vld [vmem:[#allocation86_spill] sm:$0xff] }
 0x4fe   : > { %v11379_v11 = vpop.f32.mrf.mxu0 }
 0x4ff   : > { %v7952_v37 = vadd.f32 %v11489_v48, %v7791_v18  ;;  %v11380_v22 = vadd.f32 %v11379_v11, %v11378_v32  ;;  %v11491_v1 = vpop.f32.mrf.mxu1  ;;  %v17191_v32 = vld [vmem:[#allocation88_spill] sm:$0xff]  ;;  %v17193_v18 = vld [vmem:[#allocation90_spill] sm:$0xff]  ;;  %v17194_v48 = vld [vmem:[#allocation83_spill] sm:$0xff] }
 0x500   : > { %v11381_v49 = vpop.f32.mrf.mxu0  ;;  %v11492_v47 = vadd.f32 %v11491_v1, %v11490_v19  ;;  %v17195_v19 = vld [vmem:[#allocation84_spill] sm:$0xff]  ;;  %v17196_v11 = vld [vmem:[#allocation85_spill] sm:$0xff]  ;;  %v17201_v1 = vld [vmem:[#allocation82_spill] sm:$0xff] }
 0x501   : > { %v7796_v5 = vadd.f32 %v11380_v22, %v15505_v13  ;;  %v11493_v46 = vpop.f32.mrf.mxu1  ;;  %v8030_v45 = vsub.f32 %v7952_v37, %v7998_v50  ;;  %v8000_v13 = vld [vmem:[%s15521_s28 + $0xe8] sm:$0xff]  ;;  %v17198_v50 = vld [vmem:[#allocation79_spill] sm:$0xff]  ;;  %v17199_v37 = vld [vmem:[#allocation80_spill] sm:$0xff] }
 0x502   : > { %v11382_v31 = vpop.f32.mrf.mxu0  ;;  %v17200_v22 = vld [vmem:[#allocation81_spill] sm:$0xff] }
 0x503   : > { %v11383_v20 = vadd.f32 %v11382_v31, %v11381_v49  ;;  %v11494_v29 = vpop.f32.mrf.mxu1  ;;  %v8048_v36 = vpack.c.bf16 %v8030_v45, %v8029_v25  ;;  %v7957_v2 = vadd.f32 %v11492_v47, %v7796_v5  ;;  %v17202_v49 = vld [vmem:[#allocation75_spill] sm:$0xff]  ;;  %v17203_v5 = vld [vmem:[#allocation76_spill] sm:$0xff]  ;;  %v17205_v25 = vld [vmem:[#allocation78_spill] sm:$0xff] }
 0x504   : > { %v11384_v17 = vpop.f32.mrf.mxu0  ;;  %v11495_v54 = vadd.f32 %v11494_v29, %v11493_v46  ;;  %v17204_v46 = vld [vmem:[#allocation77_spill] sm:$0xff]  ;;  %v17206_v45 = vld [vmem:[#allocation71_spill] sm:$0xff]  ;;  %v17207_v31 = vld [vmem:[#allocation72_spill] sm:$0xff] }
 0x505   : > { %v7799_v35 = vadd.f32 %v11383_v20, %v15509_v44  ;;  %v11496_v14 = vpop.f32.mrf.mxu1  ;;  %8072 = vxpose.xlu0.c.b16.cont [6/8] (narrow) %v8048_v36, 16  ;;  %v8031_v55 = vsub.f32 %v7957_v2, %v7999_v21  ;;  %v17208_v47 = vld [vmem:[#allocation73_spill] sm:$0xff]  ;;  %v17209_v20 = vld [vmem:[#allocation74_spill] sm:$0xff]  ;;  %v17210_v29 = vld [vmem:[#allocation67_spill] sm:$0xff] }
 0x506   : > { %v11385_v27 = vpop.f32.mrf.mxu0  ;;  %v17211_v36 = vld [vmem:[#allocation68_spill] sm:$0xff]  ;;  %v17213_v2 = vld [vmem:[#allocation70_spill] sm:$0xff]  ;;  %v17218_v21 = vld [vmem:[#allocation123_spill] sm:$0xff] }
 0x507   : > { %v7960_v41 = vadd.f32 %v11495_v54, %v7799_v35  ;;  %v11386_v15 = vadd.f32 %v11385_v27, %v11384_v17  ;;  %v11497_v57 = vpop.f32.mrf.mxu1  ;;  %v17212_v17 = vld [vmem:[#allocation69_spill] sm:$0xff]  ;;  %v17214_v35 = vld [vmem:[#allocation63_spill] sm:$0xff]  ;;  %v17215_v54 = vld [vmem:[#allocation64_spill] sm:$0xff] }
 0x508   : > { %v11387_v53 = vpop.f32.mrf.mxu0  ;;  %v11498_v34 = vadd.f32 %v11497_v57, %v11496_v14  ;;  %v17216_v14 = vld [vmem:[#allocation65_spill] sm:$0xff]  ;;  %v17217_v27 = vld [vmem:[#allocation66_spill] sm:$0xff]  ;;  %v17222_v57 = vld [vmem:[#allocation119_spill] sm:$0xff] }
 0x509   : > { %v7804_v26 = vadd.f32 %v11386_v15, %v15512_v62  ;;  %v11499_v39 = vpop.f32.mrf.mxu1  ;;  %v8032_v28 = vsub.f32 %v7960_v41, %v8000_v13  ;;  %v17219_v13 = vld [vmem:[#allocation124_spill] sm:$0xff]  ;;  %v17220_v41 = vld [vmem:[#allocation125_spill] sm:$0xff]  ;;  %v17221_v15 = vld [vmem:[#allocation126_spill] sm:$0xff] }
 0x50a   : > { %v11388_v30 = vpop.f32.mrf.mxu0 }
 0x50b   : > { %v11389_v44 = vadd.f32 %v11388_v30, %v11387_v53  ;;  %v11500_v38 = vpop.f32.mrf.mxu1  ;;  %v8049_v10 = vpack.c.bf16 %v8032_v28, %v8031_v55  ;;  %v7965_v23 = vadd.f32 %v11498_v34, %v7804_v26  ;;  %v17223_v53 = vld [vmem:[#allocation120_spill] sm:$0xff]  ;;  %v17224_v26 = vld [vmem:[#allocation121_spill] sm:$0xff]  ;;  %v17226_v55 = vld [vmem:[#allocation115_spill] sm:$0xff] }
 0x50c   : > { %v11501_v42 = vadd.f32 %v11500_v38, %v11499_v39  ;;  %v17225_v39 = vld [vmem:[#allocation122_spill] sm:$0xff]  ;;  %v17227_v28 = vld [vmem:[#allocation116_spill] sm:$0xff]  ;;  %v17228_v30 = vld [vmem:[#allocation117_spill] sm:$0xff] }
 0x50d   : > { %v7807_v58 = vadd.f32 %v11389_v44, %v15515_v7  ;;  %8073 = vxpose.xlu0.c.b16.cont [7/8] (narrow) %v8049_v10, 16  ;;  %v8033_v60 = vsub.f32 %v7965_v23, %v8001_v43  ;;  %v17188_v7 = vld [vmem:[#allocation93_spill] sm:$0xff]  ;;  %v17229_v34 = vld [vmem:[#allocation118_spill] sm:$0xff]  ;;  %v17230_v44 = vld [vmem:[#allocation111_spill] sm:$0xff] }
 0x50e   : > { %v17231_v38 = vld [vmem:[#allocation112_spill] sm:$0xff]  ;;  %v17232_v10 = vld [vmem:[#allocation113_spill] sm:$0xff]  ;;  %v17233_v23 = vld [vmem:[#allocation114_spill] sm:$0xff] }
 0x50f   : > { %v7968_v59 = vadd.f32 %v11501_v42, %v7807_v58  ;;  %v17234_v58 = vld [vmem:[#allocation107_spill] sm:$0xff]  ;;  %v17235_v42 = vld [vmem:[#allocation108_spill] sm:$0xff]  ;;  %v17236_v43 = vld [vmem:[#allocation109_spill] sm:$0xff] }
 0x511   : > { %v8034_v9 = vsub.f32 %v7968_v59, %v8002_v40  ;;  %v17237_v40 = vld [vmem:[#allocation110_spill] sm:$0xff]  ;;  %v17238_v59 = vld [vmem:[#allocation103_spill] sm:$0xff] }
 0x513   : > { %v8050_v52 = vpack.c.bf16 %v8034_v9, %v8033_v60  ;;  %v17239_v60 = vld [vmem:[#allocation104_spill] sm:$0xff]  ;;  %v17240_v9 = vld [vmem:[#allocation105_spill] sm:$0xff] }
 0x515   : > { %8074 = vxpose.xlu0.c.b16.end [8/8] (narrow) %v8050_v52, 16  ;;  %v17241_v52 = vld [vmem:[#allocation106_spill] sm:$0xff] }
 0x51b   : > { %v15586_v62 = vpop.trf.xlu1 }
 0x55b   : > { %v15588_v51 = vpop.trf.xlu0 }
 0x55c   : > { %8115 = vmatprep.mubr.bf16.mxu0 %v15588_v51  ;;  %8156 = vmatprep.mubr.bf16.mxu1 %v15588_v51 }
 0x55d   : > { %8116 = vmatmul.mubr.bf16.vlgmr.msra.gmra.mxu0 %v15586_v62  ;;  %8157 = vmatmul.mubr.bf16.vlgmr.msra.gmra.mxu1 %v15586_v62 }
 0x55e   : > { %8166 = vmatpush1.bf16.msra.mxu0 %v17188_v7  ;;  %8207 = vmatpush1.bf16.msra.mxu1 %v17189_v4  ;;  %v17242_v7 = vld [vmem:[#allocation99_spill] sm:$0xff]  ;;  %v17243_v4 = vld [vmem:[#allocation100_spill] sm:$0xff] }
 0x55f   : > { %8197 = vmatprep.mubr.bf16.mxu0 %v15588_v51  ;;  %8238 = vmatprep.mubr.bf16.mxu1 %v15588_v51 }
 0x560   : > { %8167 = vmatprep.subr.bf16.mxu0 %v17190_v6  ;;  %8208 = vmatprep.subr.bf16.mxu1 %v17191_v32  ;;  %v17244_v6 = vld [vmem:[#allocation101_spill] sm:$0xff]  ;;  %v17245_v32 = vld [vmem:[#allocation102_spill] sm:$0xff] }
 0x562   : > { %8168 = vmatpush1.bf16.msra.mxu0 %v17192_v8  ;;  %8209 = vmatpush1.bf16.msra.mxu1 %v17193_v18  ;;  %v17246_v8 = vld [vmem:[#allocation95_spill] sm:$0xff]  ;;  %v17247_v18 = vld [vmem:[#allocation96_spill] sm:$0xff] }
 0x563   : > { %8169 = vmatprep.subr.bf16.mxu0 %v17194_v48  ;;  %8210 = vmatprep.subr.bf16.mxu1 %v17195_v19  ;;  %v17248_v48 = vld [vmem:[#allocation97_spill] sm:$0xff]  ;;  %v17249_v19 = vld [vmem:[#allocation98_spill] sm:$0xff] }
 0x566   : > { %8170 = vmatpush1.bf16.msra.mxu0 %v17196_v11  ;;  %8211 = vmatpush1.bf16.msra.mxu1 %v17197_v63  ;;  %v17250_v11 = vld [vmem:[#allocation155_spill] sm:$0xff]  ;;  %v17251_v63 = vld [vmem:[#allocation156_spill] sm:$0xff] }
 0x567   : > { %8171 = vmatprep.subr.bf16.mxu0 %v17198_v50  ;;  %8212 = vmatprep.subr.bf16.mxu1 %v17199_v37  ;;  %v17252_v50 = vld [vmem:[#allocation157_spill] sm:$0xff]  ;;  %v17253_v37 = vld [vmem:[#allocation158_spill] sm:$0xff] }
 0x56a   : > { %8172 = vmatpush1.bf16.msra.mxu0 %v17200_v22  ;;  %8213 = vmatpush1.bf16.msra.mxu1 %v17201_v1  ;;  %v17254_v22 = vld [vmem:[#allocation151_spill] sm:$0xff]  ;;  %v17255_v1 = vld [vmem:[#allocation152_spill] sm:$0xff] }
 0x56b   : > { %8173 = vmatprep.subr.bf16.mxu0 %v17202_v49  ;;  %8214 = vmatprep.subr.bf16.mxu1 %v17203_v5  ;;  %v17256_v49 = vld [vmem:[#allocation153_spill] sm:$0xff]  ;;  %v17257_v5 = vld [vmem:[#allocation154_spill] sm:$0xff] }
 0x56e   : > { %8174 = vmatpush1.bf16.msra.mxu0 %v17204_v46  ;;  %8215 = vmatpush1.bf16.msra.mxu1 %v17205_v25  ;;  %v17258_v46 = vld [vmem:[#allocation147_spill] sm:$0xff]  ;;  %v17259_v25 = vld [vmem:[#allocation148_spill] sm:$0xff] }
 0x56f   : > { %8175 = vmatprep.subr.bf16.mxu0 %v17206_v45  ;;  %8216 = vmatprep.subr.bf16.mxu1 %v17207_v31  ;;  %v17260_v45 = vld [vmem:[#allocation149_spill] sm:$0xff]  ;;  %v17261_v31 = vld [vmem:[#allocation150_spill] sm:$0xff] }
 0x572   : > { %8176 = vmatpush1.bf16.msra.mxu0 %v17208_v47  ;;  %8217 = vmatpush1.bf16.msra.mxu1 %v17209_v20  ;;  %v17262_v47 = vld [vmem:[#allocation143_spill] sm:$0xff]  ;;  %v17263_v20 = vld [vmem:[#allocation144_spill] sm:$0xff] }
 0x573   : > { %8177 = vmatprep.subr.bf16.mxu0 %v17210_v29  ;;  %8218 = vmatprep.subr.bf16.mxu1 %v17211_v36  ;;  %v17264_v29 = vld [vmem:[#allocation145_spill] sm:$0xff]  ;;  %v17265_v36 = vld [vmem:[#allocation146_spill] sm:$0xff] }
 0x576   : > { %8178 = vmatpush1.bf16.msra.mxu0 %v17212_v17  ;;  %8219 = vmatpush1.bf16.msra.mxu1 %v17213_v2  ;;  %v17266_v17 = vld [vmem:[#allocation139_spill] sm:$0xff]  ;;  %v17267_v2 = vld [vmem:[#allocation140_spill] sm:$0xff] }
 0x577   : > { %8179 = vmatprep.subr.bf16.mxu0 %v17214_v35  ;;  %8220 = vmatprep.subr.bf16.mxu1 %v17215_v54  ;;  %v17268_v35 = vld [vmem:[#allocation141_spill] sm:$0xff]  ;;  %v17269_v54 = vld [vmem:[#allocation142_spill] sm:$0xff] }
 0x57a   : > { %8180 = vmatpush1.bf16.msra.mxu0 %v17216_v14  ;;  %8221 = vmatpush1.bf16.msra.mxu1 %v17217_v27  ;;  %v17270_v14 = vld [vmem:[#allocation135_spill] sm:$0xff]  ;;  %v17271_v27 = vld [vmem:[#allocation136_spill] sm:$0xff] }
 0x57b   : > { %8181 = vmatprep.subr.bf16.mxu0 %v17218_v21  ;;  %8222 = vmatprep.subr.bf16.mxu1 %v17219_v13  ;;  %v17272_v21 = vld [vmem:[#allocation137_spill] sm:$0xff]  ;;  %v17273_v13 = vld [vmem:[#allocation138_spill] sm:$0xff] }
 0x57e   : > { %8182 = vmatpush2.bf16.msra.mxu0 %v17220_v41  ;;  %8223 = vmatpush2.bf16.msra.mxu1 %v17221_v15  ;;  %v17274_v41 = vld [vmem:[#allocation131_spill] sm:$0xff]  ;;  %v17275_v15 = vld [vmem:[#allocation132_spill] sm:$0xff] }
 0x57f   : > { %8183 = vmatprep.subr.bf16.mxu0 %v17222_v57  ;;  %8224 = vmatprep.subr.bf16.mxu1 %v17223_v53  ;;  %v17276_v57 = vld [vmem:[#allocation133_spill] sm:$0xff]  ;;  %v17277_v53 = vld [vmem:[#allocation134_spill] sm:$0xff] }
 0x582   : > { %8184 = vmatpush2.bf16.msra.mxu0 %v17224_v26  ;;  %8225 = vmatpush2.bf16.msra.mxu1 %v17225_v39  ;;  %v17278_v26 = vld [vmem:[#allocation127_spill] sm:$0xff]  ;;  %v17279_v39 = vld [vmem:[#allocation128_spill] sm:$0xff] }
 0x583   : > { %8185 = vmatprep.subr.bf16.mxu0 %v17226_v55  ;;  %8226 = vmatprep.subr.bf16.mxu1 %v17227_v28  ;;  %v17280_v55 = vld [vmem:[#allocation129_spill] sm:$0xff]  ;;  %v17281_v28 = vld [vmem:[#allocation130_spill] sm:$0xff] }
 0x586   : > { %8186 = vmatpush2.bf16.msra.mxu0 %v17228_v30  ;;  %8227 = vmatpush2.bf16.msra.mxu1 %v17229_v34  ;;  %v17282_v30 = vld [vmem:[#allocation187_spill] sm:$0xff]  ;;  %v17283_v34 = vld [vmem:[#allocation188_spill] sm:$0xff] }
 0x587   : > { %8187 = vmatprep.subr.bf16.mxu0 %v17230_v44  ;;  %8228 = vmatprep.subr.bf16.mxu1 %v17231_v38  ;;  %v17284_v44 = vld [vmem:[#allocation189_spill] sm:$0xff]  ;;  %v17285_v38 = vld [vmem:[#allocation190_spill] sm:$0xff] }
 0x58a   : > { %8188 = vmatpush2.bf16.msra.mxu0 %v17232_v10  ;;  %8229 = vmatpush2.bf16.msra.mxu1 %v17233_v23  ;;  %v17286_v10 = vld [vmem:[#allocation183_spill] sm:$0xff]  ;;  %v17287_v23 = vld [vmem:[#allocation184_spill] sm:$0xff] }
 0x58b   : > { %8189 = vmatprep.subr.bf16.mxu0 %v17234_v58  ;;  %8230 = vmatprep.subr.bf16.mxu1 %v17235_v42  ;;  %v17288_v58 = vld [vmem:[#allocation185_spill] sm:$0xff]  ;;  %v17289_v42 = vld [vmem:[#allocation186_spill] sm:$0xff] }
 0x58e   : > { %8190 = vmatpush2.bf16.msra.mxu0 %v17236_v43  ;;  %8231 = vmatpush2.bf16.msra.mxu1 %v17237_v40  ;;  %v17290_v43 = vld [vmem:[#allocation179_spill] sm:$0xff]  ;;  %v17291_v40 = vld [vmem:[#allocation180_spill] sm:$0xff] }
 0x58f   : > { %8191 = vmatprep.subr.bf16.mxu0 %v17238_v59  ;;  %8232 = vmatprep.subr.bf16.mxu1 %v17239_v60  ;;  %v17292_v59 = vld [vmem:[#allocation181_spill] sm:$0xff]  ;;  %v17293_v60 = vld [vmem:[#allocation182_spill] sm:$0xff] }
 0x592   : > { %8192 = vmatpush2.bf16.msra.mxu0 %v17240_v9  ;;  %8233 = vmatpush2.bf16.msra.mxu1 %v17241_v52  ;;  %v17294_v9 = vld [vmem:[#allocation175_spill] sm:$0xff]  ;;  %v17295_v52 = vld [vmem:[#allocation176_spill] sm:$0xff] }
 0x593   : > { %8193 = vmatprep.subr.bf16.mxu0 %v17242_v7  ;;  %8234 = vmatprep.subr.bf16.mxu1 %v17243_v4  ;;  %v17296_v7 = vld [vmem:[#allocation177_spill] sm:$0xff]  ;;  %v17297_v4 = vld [vmem:[#allocation178_spill] sm:$0xff] }
 0x596   : > { %8194 = vmatpush2.bf16.msra.mxu0 %v17244_v6  ;;  %8235 = vmatpush2.bf16.msra.mxu1 %v17245_v32  ;;  %v17298_v6 = vld [vmem:[#allocation171_spill] sm:$0xff]  ;;  %v17299_v32 = vld [vmem:[#allocation172_spill] sm:$0xff] }
 0x597   : > { %8195 = vmatprep.subr.bf16.mxu0 %v17246_v8  ;;  %8236 = vmatprep.subr.bf16.mxu1 %v17247_v18  ;;  %v17300_v8 = vld [vmem:[#allocation173_spill] sm:$0xff]  ;;  %v17301_v18 = vld [vmem:[#allocation174_spill] sm:$0xff] }
 0x59a   : > { %8196 = vmatpush2.bf16.msra.mxu0 %v17248_v48  ;;  %8237 = vmatpush2.bf16.msra.mxu1 %v17249_v19  ;;  %v17302_v48 = vld [vmem:[#allocation167_spill] sm:$0xff]  ;;  %v17303_v19 = vld [vmem:[#allocation168_spill] sm:$0xff] }
 0x59b   : > { %8247 = vmatprep.subr.bf16.mxu0 %v17250_v11  ;;  %8288 = vmatprep.subr.bf16.mxu1 %v17251_v63  ;;  %v17304_v11 = vld [vmem:[#allocation169_spill] sm:$0xff]  ;;  %v17305_v63 = vld [vmem:[#allocation170_spill] sm:$0xff] }
 0x59d   : > { %8198 = vmatmul.mubr.bf16.vlgmr.msra.gmra.mxu0 %v15586_v62  ;;  %8239 = vmatmul.mubr.bf16.vlgmr.msra.gmra.mxu1 %v15586_v62 }
 0x59e   : > { %8248 = vmatpush1.bf16.msra.mxu0 %v17252_v50  ;;  %8279 = vmatprep.mubr.bf16.mxu0 %v15588_v51  ;;  %v17306_v50 = vld [vmem:[#allocation163_spill] sm:$0xff] }
 0x59f   : > { %8289 = vmatpush1.bf16.msra.mxu1 %v17253_v37  ;;  %8320 = vmatprep.mubr.bf16.mxu1 %v15588_v51  ;;  %v17307_v37 = vld [vmem:[#allocation164_spill] sm:$0xff] }
 0x5a0   : > { %8249 = vmatprep.subr.bf16.mxu0 %v17254_v22  ;;  %8290 = vmatprep.subr.bf16.mxu1 %v17255_v1  ;;  %v17308_v22 = vld [vmem:[#allocation165_spill] sm:$0xff]  ;;  %v17309_v1 = vld [vmem:[#allocation166_spill] sm:$0xff] }
 0x5a2   : > { %8250 = vmatpush1.bf16.msra.mxu0 %v17256_v49  ;;  %v17310_v49 = vld [vmem:[#allocation159_spill] sm:$0xff] }
 0x5a3   : > { %8291 = vmatpush1.bf16.msra.mxu1 %v17257_v5  ;;  %8251 = vmatprep.subr.bf16.mxu0 %v17258_v46  ;;  %v17311_v5 = vld [vmem:[#allocation160_spill] sm:$0xff]  ;;  %v17312_v46 = vld [vmem:[#allocation161_spill] sm:$0xff] }
 0x5a4   : > { %8292 = vmatprep.subr.bf16.mxu1 %v17259_v25  ;;  %v17313_v25 = vld [vmem:[#allocation162_spill] sm:$0xff] }
 0x5a6   : > { %8252 = vmatpush1.bf16.msra.mxu0 %v17260_v45  ;;  %v17314_v45 = vld [vmem:[#allocation219_spill] sm:$0xff] }
 0x5a7   : > { %8293 = vmatpush1.bf16.msra.mxu1 %v17261_v31  ;;  %8253 = vmatprep.subr.bf16.mxu0 %v17262_v47  ;;  %v17315_v31 = vld [vmem:[#allocation220_spill] sm:$0xff]  ;;  %v17316_v47 = vld [vmem:[#allocation221_spill] sm:$0xff] }
 0x5a8   : > { %8294 = vmatprep.subr.bf16.mxu1 %v17263_v20  ;;  %v17317_v20 = vld [vmem:[#allocation222_spill] sm:$0xff] }
 0x5aa   : > { %8254 = vmatpush1.bf16.msra.mxu0 %v17264_v29  ;;  %v17318_v29 = vld [vmem:[#allocation215_spill] sm:$0xff] }
 0x5ab   : > { %8295 = vmatpush1.bf16.msra.mxu1 %v17265_v36  ;;  %8255 = vmatprep.subr.bf16.mxu0 %v17266_v17  ;;  %v17319_v36 = vld [vmem:[#allocation216_spill] sm:$0xff]  ;;  %v17320_v17 = vld [vmem:[#allocation217_spill] sm:$0xff] }
 0x5ac   : > { %8296 = vmatprep.subr.bf16.mxu1 %v17267_v2  ;;  %v17321_v2 = vld [vmem:[#allocation218_spill] sm:$0xff] }
 0x5ae   : > { %8256 = vmatpush1.bf16.msra.mxu0 %v17268_v35  ;;  %v17322_v35 = vld [vmem:[#allocation211_spill] sm:$0xff] }
 0x5af   : > { %8297 = vmatpush1.bf16.msra.mxu1 %v17269_v54  ;;  %8257 = vmatprep.subr.bf16.mxu0 %v17270_v14  ;;  %v17323_v54 = vld [vmem:[#allocation212_spill] sm:$0xff]  ;;  %v17324_v14 = vld [vmem:[#allocation213_spill] sm:$0xff] }
 0x5b0   : > { %8298 = vmatprep.subr.bf16.mxu1 %v17271_v27  ;;  %v17325_v27 = vld [vmem:[#allocation214_spill] sm:$0xff] }
 0x5b2   : > { %8258 = vmatpush1.bf16.msra.mxu0 %v17272_v21  ;;  %v17326_v21 = vld [vmem:[#allocation207_spill] sm:$0xff] }
 0x5b3   : > { %8299 = vmatpush1.bf16.msra.mxu1 %v17273_v13  ;;  %8259 = vmatprep.subr.bf16.mxu0 %v17274_v41  ;;  %v17327_v13 = vld [vmem:[#allocation208_spill] sm:$0xff]  ;;  %v17328_v41 = vld [vmem:[#allocation209_spill] sm:$0xff] }
 0x5b4   : > { %8300 = vmatprep.subr.bf16.mxu1 %v17275_v15  ;;  %v17329_v15 = vld [vmem:[#allocation210_spill] sm:$0xff] }
 0x5b6   : > { %8260 = vmatpush1.bf16.msra.mxu0 %v17276_v57  ;;  %v17330_v57 = vld [vmem:[#allocation203_spill] sm:$0xff] }
 0x5b7   : > { %8301 = vmatpush1.bf16.msra.mxu1 %v17277_v53  ;;  %8261 = vmatprep.subr.bf16.mxu0 %v17278_v26  ;;  %v17331_v53 = vld [vmem:[#allocation204_spill] sm:$0xff]  ;;  %v17332_v26 = vld [vmem:[#allocation205_spill] sm:$0xff] }
 0x5b8   : > { %8302 = vmatprep.subr.bf16.mxu1 %v17279_v39  ;;  %v17333_v39 = vld [vmem:[#allocation206_spill] sm:$0xff] }
 0x5ba   : > { %8262 = vmatpush1.bf16.msra.mxu0 %v17280_v55  ;;  %v17334_v55 = vld [vmem:[#allocation199_spill] sm:$0xff] }
 0x5bb   : > { %8303 = vmatpush1.bf16.msra.mxu1 %v17281_v28  ;;  %8263 = vmatprep.subr.bf16.mxu0 %v17282_v30  ;;  %v17335_v28 = vld [vmem:[#allocation200_spill] sm:$0xff]  ;;  %v17336_v30 = vld [vmem:[#allocation201_spill] sm:$0xff] }
 0x5bc   : > { %8304 = vmatprep.subr.bf16.mxu1 %v17283_v34  ;;  %v17337_v34 = vld [vmem:[#allocation202_spill] sm:$0xff] }
 0x5be   : > { %8264 = vmatpush2.bf16.msra.mxu0 %v17284_v44  ;;  %v17338_v44 = vld [vmem:[#allocation195_spill] sm:$0xff] }
 0x5bf   : > { %8305 = vmatpush2.bf16.msra.mxu1 %v17285_v38  ;;  %8265 = vmatprep.subr.bf16.mxu0 %v17286_v10  ;;  %v17339_v38 = vld [vmem:[#allocation196_spill] sm:$0xff]  ;;  %v17340_v10 = vld [vmem:[#allocation197_spill] sm:$0xff] }
 0x5c0   : > { %8306 = vmatprep.subr.bf16.mxu1 %v17287_v23  ;;  %v17341_v23 = vld [vmem:[#allocation198_spill] sm:$0xff] }
 0x5c2   : > { %8266 = vmatpush2.bf16.msra.mxu0 %v17288_v58  ;;  %v17342_v58 = vld [vmem:[#allocation191_spill] sm:$0xff] }
 0x5c3   : > { %8307 = vmatpush2.bf16.msra.mxu1 %v17289_v42  ;;  %8267 = vmatprep.subr.bf16.mxu0 %v17290_v43  ;;  %v17343_v42 = vld [vmem:[#allocation192_spill] sm:$0xff]  ;;  %v17344_v43 = vld [vmem:[#allocation193_spill] sm:$0xff] }
 0x5c4   : > { %8308 = vmatprep.subr.bf16.mxu1 %v17291_v40  ;;  %v17345_v40 = vld [vmem:[#allocation194_spill] sm:$0xff] }
 0x5c6   : > { %8268 = vmatpush2.bf16.msra.mxu0 %v17292_v59  ;;  %v17346_v59 = vld [vmem:[#allocation251_spill] sm:$0xff] }
 0x5c7   : > { %8309 = vmatpush2.bf16.msra.mxu1 %v17293_v60  ;;  %8269 = vmatprep.subr.bf16.mxu0 %v17294_v9  ;;  %v17347_v60 = vld [vmem:[#allocation252_spill] sm:$0xff]  ;;  %v17348_v9 = vld [vmem:[#allocation253_spill] sm:$0xff] }
 0x5c8   : > { %8310 = vmatprep.subr.bf16.mxu1 %v17295_v52  ;;  %v17349_v52 = vld [vmem:[#allocation254_spill] sm:$0xff] }
 0x5ca   : > { %8270 = vmatpush2.bf16.msra.mxu0 %v17296_v7  ;;  %v17350_v7 = vld [vmem:[#allocation247_spill] sm:$0xff] }
 0x5cb   : > { %8311 = vmatpush2.bf16.msra.mxu1 %v17297_v4  ;;  %8271 = vmatprep.subr.bf16.mxu0 %v17298_v6  ;;  %v17351_v4 = vld [vmem:[#allocation248_spill] sm:$0xff]  ;;  %v17352_v6 = vld [vmem:[#allocation249_spill] sm:$0xff] }
 0x5cc   : > { %8312 = vmatprep.subr.bf16.mxu1 %v17299_v32  ;;  %v17353_v32 = vld [vmem:[#allocation250_spill] sm:$0xff] }
 0x5ce   : > { %8272 = vmatpush2.bf16.msra.mxu0 %v17300_v8  ;;  %v17354_v8 = vld [vmem:[#allocation243_spill] sm:$0xff] }
 0x5cf   : > { %8313 = vmatpush2.bf16.msra.mxu1 %v17301_v18  ;;  %8273 = vmatprep.subr.bf16.mxu0 %v17302_v48  ;;  %v17355_v18 = vld [vmem:[#allocation244_spill] sm:$0xff]  ;;  %v17356_v48 = vld [vmem:[#allocation245_spill] sm:$0xff] }
 0x5d0   : > { %8314 = vmatprep.subr.bf16.mxu1 %v17303_v19  ;;  %v17357_v19 = vld [vmem:[#allocation246_spill] sm:$0xff] }
 0x5d2   : > { %8274 = vmatpush2.bf16.msra.mxu0 %v17304_v11  ;;  %v17358_v11 = vld [vmem:[#allocation239_spill] sm:$0xff] }
 0x5d3   : > { %8315 = vmatpush2.bf16.msra.mxu1 %v17305_v63  ;;  %8275 = vmatprep.subr.bf16.mxu0 %v17306_v50  ;;  %v17359_v63 = vld [vmem:[#allocation240_spill] sm:$0xff]  ;;  %v17360_v50 = vld [vmem:[#allocation241_spill] sm:$0xff] }
 0x5d4   : > { %8316 = vmatprep.subr.bf16.mxu1 %v17307_v37  ;;  %v17361_v37 = vld [vmem:[#allocation242_spill] sm:$0xff] }
 0x5d6   : > { %8276 = vmatpush2.bf16.msra.mxu0 %v17308_v22  ;;  %v17362_v22 = vld [vmem:[#allocation235_spill] sm:$0xff] }
 0x5d7   : > { %8317 = vmatpush2.bf16.msra.mxu1 %v17309_v1  ;;  %8277 = vmatprep.subr.bf16.mxu0 %v17310_v49  ;;  %v17363_v1 = vld [vmem:[#allocation236_spill] sm:$0xff]  ;;  %v17364_v49 = vld [vmem:[#allocation237_spill] sm:$0xff] }
 0x5d8   : > { %8318 = vmatprep.subr.bf16.mxu1 %v17311_v5  ;;  %v17365_v5 = vld [vmem:[#allocation238_spill] sm:$0xff] }
 0x5da   : > { %8278 = vmatpush2.bf16.msra.mxu0 %v17312_v46  ;;  %v17366_v46 = vld [vmem:[#allocation231_spill] sm:$0xff] }
 0x5db   : > { %8319 = vmatpush2.bf16.msra.mxu1 %v17313_v25  ;;  %8329 = vmatprep.subr.bf16.mxu0 %v17314_v45  ;;  %v17367_v25 = vld [vmem:[#allocation232_spill] sm:$0xff]  ;;  %v17368_v45 = vld [vmem:[#allocation233_spill] sm:$0xff] }
 0x5dc   : > { %8370 = vmatprep.subr.bf16.mxu1 %v17315_v31  ;;  %v17369_v31 = vld [vmem:[#allocation234_spill] sm:$0xff] }
 0x5dd   : > { %8280 = vmatmul.mubr.bf16.vlgmr.msra.gmra.mxu0 %v15586_v62 }
 0x5de   : > { %8321 = vmatmul.mubr.bf16.vlgmr.msra.gmra.mxu1 %v15586_v62  ;;  %8330 = vmatpush1.bf16.msra.mxu0 %v17316_v47  ;;  %v17370_v47 = vld [vmem:[#allocation227_spill] sm:$0xff] }
 0x5df   : > { %8361 = vmatprep.mubr.bf16.mxu0 %v15588_v51  ;;  %8371 = vmatpush1.bf16.msra.mxu1 %v17317_v20  ;;  %v17371_v20 = vld [vmem:[#allocation228_spill] sm:$0xff] }
 0x5e0   : > { %8402 = vmatprep.mubr.bf16.mxu1 %v15588_v51  ;;  %8331 = vmatprep.subr.bf16.mxu0 %v17318_v29  ;;  %v17372_v29 = vld [vmem:[#allocation229_spill] sm:$0xff] }
 0x5e1   : > { %8372 = vmatprep.subr.bf16.mxu1 %v17319_v36  ;;  %v17373_v36 = vld [vmem:[#allocation230_spill] sm:$0xff] }
 0x5e2   : > { %8332 = vmatpush1.bf16.msra.mxu0 %v17320_v17  ;;  %v17374_v17 = vld [vmem:[#allocation223_spill] sm:$0xff] }
 0x5e3   : > { %8373 = vmatpush1.bf16.msra.mxu1 %v17321_v2  ;;  %8333 = vmatprep.subr.bf16.mxu0 %v17322_v35  ;;  %v17375_v2 = vld [vmem:[#allocation224_spill] sm:$0xff]  ;;  %v17376_v35 = vld [vmem:[#allocation225_spill] sm:$0xff] }
 0x5e4   : > { %8374 = vmatprep.subr.bf16.mxu1 %v17323_v54  ;;  %v17377_v54 = vld [vmem:[#allocation226_spill] sm:$0xff] }
 0x5e6   : > { %8334 = vmatpush1.bf16.msra.mxu0 %v17324_v14  ;;  %v17378_v14 = vld [vmem:[#allocation283_spill] sm:$0xff] }
 0x5e7   : > { %8375 = vmatpush1.bf16.msra.mxu1 %v17325_v27  ;;  %8335 = vmatprep.subr.bf16.mxu0 %v17326_v21  ;;  %v17379_v27 = vld [vmem:[#allocation284_spill] sm:$0xff] }
 0x5e8   : > { %8376 = vmatprep.subr.bf16.mxu1 %v17327_v13 }
 0x5ea   : > { %8336 = vmatpush1.bf16.msra.mxu0 %v17328_v41  ;;  %v17380_v41 = vld [vmem:[#allocation285_spill] sm:$0xff] }
 0x5eb   : > { %8377 = vmatpush1.bf16.msra.mxu1 %v17329_v15  ;;  %8337 = vmatprep.subr.bf16.mxu0 %v17330_v57  ;;  %v17381_v15 = vld [vmem:[#allocation286_spill] sm:$0xff] }
 0x5ec   : > { %8378 = vmatprep.subr.bf16.mxu1 %v17331_v53 }
 0x5ee   : > { %8338 = vmatpush1.bf16.msra.mxu0 %v17332_v26  ;;  %v17382_v26 = vld [vmem:[#allocation279_spill] sm:$0xff] }
 0x5ef   : > { %8379 = vmatpush1.bf16.msra.mxu1 %v17333_v39  ;;  %8339 = vmatprep.subr.bf16.mxu0 %v17334_v55  ;;  %v17383_v39 = vld [vmem:[#allocation280_spill] sm:$0xff] }
 0x5f0   : > { %8380 = vmatprep.subr.bf16.mxu1 %v17335_v28 }
 0x5f2   : > { %8340 = vmatpush1.bf16.msra.mxu0 %v17336_v30  ;;  %v17384_v30 = vld [vmem:[#allocation281_spill] sm:$0xff] }
 0x5f3   : > { %8381 = vmatpush1.bf16.msra.mxu1 %v17337_v34  ;;  %8341 = vmatprep.subr.bf16.mxu0 %v17338_v44  ;;  %v17385_v34 = vld [vmem:[#allocation282_spill] sm:$0xff] }
 0x5f4   : > { %8382 = vmatprep.subr.bf16.mxu1 %v17339_v38 }
 0x5f6   : > { %8342 = vmatpush1.bf16.msra.mxu0 %v17340_v10  ;;  %v17386_v10 = vld [vmem:[#allocation275_spill] sm:$0xff] }
 0x5f7   : > { %8383 = vmatpush1.bf16.msra.mxu1 %v17341_v23  ;;  %8343 = vmatprep.subr.bf16.mxu0 %v17342_v58  ;;  %v17387_v23 = vld [vmem:[#allocation276_spill] sm:$0xff]  ;;  %v17388_v58 = vld [vmem:[#allocation277_spill] sm:$0xff] }
 0x5f8   : > { %8384 = vmatprep.subr.bf16.mxu1 %v17343_v42  ;;  %v17389_v42 = vld [vmem:[#allocation278_spill] sm:$0xff] }
 0x5fa   : > { %8344 = vmatpush1.bf16.msra.mxu0 %v17344_v43  ;;  %v17390_v43 = vld [vmem:[#allocation271_spill] sm:$0xff] }
 0x5fb   : > { %8385 = vmatpush1.bf16.msra.mxu1 %v17345_v40  ;;  %8345 = vmatprep.subr.bf16.mxu0 %v17346_v59  ;;  %v17391_v40 = vld [vmem:[#allocation272_spill] sm:$0xff]  ;;  %v17392_v59 = vld [vmem:[#allocation273_spill] sm:$0xff] }
 0x5fc   : > { %8386 = vmatprep.subr.bf16.mxu1 %v17347_v60  ;;  %v17393_v60 = vld [vmem:[#allocation274_spill] sm:$0xff] }
 0x5fe   : > { %8346 = vmatpush2.bf16.msra.mxu0 %v17348_v9  ;;  %v17394_v9 = vld [vmem:[#allocation267_spill] sm:$0xff] }
 0x5ff   : > { %8387 = vmatpush2.bf16.msra.mxu1 %v17349_v52  ;;  %8347 = vmatprep.subr.bf16.mxu0 %v17350_v7  ;;  %v17395_v52 = vld [vmem:[#allocation268_spill] sm:$0xff]  ;;  %v17396_v7 = vld [vmem:[#allocation269_spill] sm:$0xff] }
 0x600   : > { %8388 = vmatprep.subr.bf16.mxu1 %v17351_v4  ;;  %v17397_v4 = vld [vmem:[#allocation270_spill] sm:$0xff] }
 0x602   : > { %8348 = vmatpush2.bf16.msra.mxu0 %v17352_v6  ;;  %v17398_v6 = vld [vmem:[#allocation263_spill] sm:$0xff] }
 0x603   : > { %8389 = vmatpush2.bf16.msra.mxu1 %v17353_v32  ;;  %8349 = vmatprep.subr.bf16.mxu0 %v17354_v8  ;;  %v17399_v32 = vld [vmem:[#allocation264_spill] sm:$0xff]  ;;  %v17400_v8 = vld [vmem:[#allocation265_spill] sm:$0xff] }
 0x604   : > { %8390 = vmatprep.subr.bf16.mxu1 %v17355_v18  ;;  %v17401_v18 = vld [vmem:[#allocation266_spill] sm:$0xff] }
 0x606   : > { %8350 = vmatpush2.bf16.msra.mxu0 %v17356_v48  ;;  %v17402_v48 = vld [vmem:[#allocation259_spill] sm:$0xff] }
 0x607   : > { %8391 = vmatpush2.bf16.msra.mxu1 %v17357_v19  ;;  %8351 = vmatprep.subr.bf16.mxu0 %v17358_v11  ;;  %v17403_v19 = vld [vmem:[#allocation260_spill] sm:$0xff]  ;;  %v17404_v11 = vld [vmem:[#allocation261_spill] sm:$0xff] }
 0x608   : > { %8392 = vmatprep.subr.bf16.mxu1 %v17359_v63  ;;  %v17405_v63 = vld [vmem:[#allocation262_spill] sm:$0xff] }
 0x60a   : > { %8352 = vmatpush2.bf16.msra.mxu0 %v17360_v50  ;;  %v17406_v50 = vld [vmem:[#allocation255_spill] sm:$0xff] }
 0x60b   : > { %8393 = vmatpush2.bf16.msra.mxu1 %v17361_v37  ;;  %8353 = vmatprep.subr.bf16.mxu0 %v17362_v22  ;;  %v17407_v37 = vld [vmem:[#allocation256_spill] sm:$0xff]  ;;  %v17408_v22 = vld [vmem:[#allocation257_spill] sm:$0xff] }
 0x60c   : > { %8394 = vmatprep.subr.bf16.mxu1 %v17363_v1  ;;  %v17409_v1 = vld [vmem:[#allocation258_spill] sm:$0xff] }
 0x60e   : > { %8354 = vmatpush2.bf16.msra.mxu0 %v17364_v49  ;;  %v17410_v49 = vld [vmem:[#allocation315_spill] sm:$0xff] }
 0x60f   : > { %8395 = vmatpush2.bf16.msra.mxu1 %v17365_v5  ;;  %8355 = vmatprep.subr.bf16.mxu0 %v17366_v46  ;;  %v17411_v5 = vld [vmem:[#allocation316_spill] sm:$0xff]  ;;  %v17412_v46 = vld [vmem:[#allocation317_spill] sm:$0xff] }
 0x610   : > { %8396 = vmatprep.subr.bf16.mxu1 %v17367_v25  ;;  %v17413_v25 = vld [vmem:[#allocation318_spill] sm:$0xff] }
 0x612   : > { %8356 = vmatpush2.bf16.msra.mxu0 %v17368_v45  ;;  %v17414_v45 = vld [vmem:[#allocation311_spill] sm:$0xff] }
 0x613   : > { %8397 = vmatpush2.bf16.msra.mxu1 %v17369_v31  ;;  %8357 = vmatprep.subr.bf16.mxu0 %v17370_v47  ;;  %v17415_v31 = vld [vmem:[#allocation312_spill] sm:$0xff]  ;;  %v17416_v47 = vld [vmem:[#allocation313_spill] sm:$0xff] }
 0x614   : > { %8398 = vmatprep.subr.bf16.mxu1 %v17371_v20  ;;  %v17417_v20 = vld [vmem:[#allocation314_spill] sm:$0xff] }
 0x616   : > { %8358 = vmatpush2.bf16.msra.mxu0 %v17372_v29  ;;  %v17418_v29 = vld [vmem:[#allocation307_spill] sm:$0xff] }
 0x617   : > { %8399 = vmatpush2.bf16.msra.mxu1 %v17373_v36  ;;  %8359 = vmatprep.subr.bf16.mxu0 %v17374_v17  ;;  %v17419_v36 = vld [vmem:[#allocation308_spill] sm:$0xff]  ;;  %v17420_v17 = vld [vmem:[#allocation309_spill] sm:$0xff] }
 0x618   : > { %8400 = vmatprep.subr.bf16.mxu1 %v17375_v2  ;;  %v17421_v2 = vld [vmem:[#allocation310_spill] sm:$0xff] }
 0x61a   : > { %8360 = vmatpush2.bf16.msra.mxu0 %v17376_v35  ;;  %v17422_v35 = vld [vmem:[#allocation303_spill] sm:$0xff] }
 0x61b   : > { %8401 = vmatpush2.bf16.msra.mxu1 %v17377_v54  ;;  %8411 = vmatprep.subr.bf16.mxu0 %v17378_v14  ;;  %v17423_v54 = vld [vmem:[#allocation304_spill] sm:$0xff]  ;;  %v17424_v14 = vld [vmem:[#allocation305_spill] sm:$0xff] }
 0x61c   : > { %8452 = vmatprep.subr.bf16.mxu1 %v17379_v27  ;;  %v17425_v27 = vld [vmem:[#allocation306_spill] sm:$0xff] }
 0x61d   : > { %8362 = vmatmul.mubr.bf16.vlgmr.msra.gmra.mxu0 %v15586_v62  ;;  %v8117_v21 = vpop.f32.mrf.mxu0  ;;  %v8158_v13 = vpop.f32.mrf.mxu1 }
 0x61e   : > { %8403 = vmatmul.mubr.bf16.vlgmr.msra.gmra.mxu1 %v15586_v62  ;;  %8412 = vmatpush1.bf16.msra.mxu0 %v17380_v41  ;;  %8803 = vst [vmem:[%s15802_s5] sm:$0xff] %v8117_v21  ;;  %8805 = vst [vmem:[%s15802_s5 + $0x10] sm:$0xff] %v8158_v13  ;;  %v17426_v21 = vld [vmem:[#allocation299_spill] sm:$0xff]  ;;  %v17427_v13 = vld [vmem:[#allocation300_spill] sm:$0xff] }
 0x61f   : > { %8443 = vmatprep.mubr.bf16.mxu0 %v15588_v51  ;;  %8453 = vmatpush1.bf16.msra.mxu1 %v17381_v15  ;;  %v8119_v57 = vpop.f32.mrf.mxu0  ;;  %v8160_v53 = vpop.f32.mrf.mxu1  ;;  %v17428_v41 = vld [vmem:[#allocation301_spill] sm:$0xff]  ;;  %v17429_v15 = vld [vmem:[#allocation302_spill] sm:$0xff] }
 0x620   : > { %8484 = vmatprep.mubr.bf16.mxu1 %v15588_v51  ;;  %8413 = vmatprep.subr.bf16.mxu0 %v17382_v26  ;;  %8804 = vst [vmem:[%s15802_s5 + $0x8] sm:$0xff] %v8119_v57  ;;  %8806 = vst [vmem:[%s15802_s5 + $0x18] sm:$0xff] %v8160_v53  ;;  %v17430_v57 = vld [vmem:[#allocation295_spill] sm:$0xff]  ;;  %v17431_v53 = vld [vmem:[#allocation296_spill] sm:$0xff] }
 0x621   : > { %8454 = vmatprep.subr.bf16.mxu1 %v17383_v39  ;;  %v8121_v55 = vpop.f32.mrf.mxu0  ;;  %v8162_v28 = vpop.f32.mrf.mxu1  ;;  %v17432_v26 = vld [vmem:[#allocation297_spill] sm:$0xff]  ;;  %v17433_v39 = vld [vmem:[#allocation298_spill] sm:$0xff] }
 0x622   : > { %8414 = vmatpush1.bf16.msra.mxu0 %v17384_v30  ;;  %v17434_v55 = vld [vmem:[#allocation291_spill] sm:$0xff]  ;;  %v17435_v28 = vld [vmem:[#allocation292_spill] sm:$0xff]  ;;  %v17436_v30 = vld [vmem:[#allocation293_spill] sm:$0xff] }
 0x623   : > { %8455 = vmatpush1.bf16.msra.mxu1 %v17385_v34  ;;  %v8122_v44 = vpop.f32.mrf.mxu0  ;;  %v8163_v38 = vpop.f32.mrf.mxu1  ;;  %8415 = vmatprep.subr.bf16.mxu0 %v17386_v10  ;;  %v17437_v34 = vld [vmem:[#allocation294_spill] sm:$0xff]  ;;  %v17440_v10 = vld [vmem:[#allocation289_spill] sm:$0xff] }
 0x624   : > { %8456 = vmatprep.subr.bf16.mxu1 %v17387_v23  ;;  %v17438_v44 = vld [vmem:[#allocation287_spill] sm:$0xff]  ;;  %v17439_v38 = vld [vmem:[#allocation288_spill] sm:$0xff]  ;;  %v17441_v23 = vld [vmem:[#allocation290_spill] sm:$0xff] }
 0x626   : > { %8416 = vmatpush1.bf16.msra.mxu0 %v17388_v58  ;;  %v17442_v58 = vld [vmem:[#allocation347_spill] sm:$0xff] }
 0x627   : > { %8457 = vmatpush1.bf16.msra.mxu1 %v17389_v42  ;;  %8417 = vmatprep.subr.bf16.mxu0 %v17390_v43  ;;  %v17443_v42 = vld [vmem:[#allocation348_spill] sm:$0xff] }
 0x628   : > { %8458 = vmatprep.subr.bf16.mxu1 %v17391_v40 }
 0x62a   : > { %8418 = vmatpush1.bf16.msra.mxu0 %v17392_v59  ;;  %v17444_v59 = vld [vmem:[#allocation349_spill] sm:$0xff] }
 0x62b   : > { %8459 = vmatpush1.bf16.msra.mxu1 %v17393_v60  ;;  %8419 = vmatprep.subr.bf16.mxu0 %v17394_v9  ;;  %v17445_v60 = vld [vmem:[#allocation350_spill] sm:$0xff] }
 0x62c   : > { %8460 = vmatprep.subr.bf16.mxu1 %v17395_v52 }
 0x62e   : > { %8420 = vmatpush1.bf16.msra.mxu0 %v17396_v7  ;;  %v17446_v7 = vld [vmem:[#allocation343_spill] sm:$0xff] }
 0x62f   : > { %8461 = vmatpush1.bf16.msra.mxu1 %v17397_v4  ;;  %8421 = vmatprep.subr.bf16.mxu0 %v17398_v6 }
 0x630   : > { %8462 = vmatprep.subr.bf16.mxu1 %v17399_v32  ;;  %v17447_v32 = vld [vmem:[#allocation344_spill] sm:$0xff] }
 0x632   : > { %8422 = vmatpush1.bf16.msra.mxu0 %v17400_v8  ;;  %v17448_v8 = vld [vmem:[#allocation345_spill] sm:$0xff] }
 0x633   : > { %8463 = vmatpush1.bf16.msra.mxu1 %v17401_v18  ;;  %8423 = vmatprep.subr.bf16.mxu0 %v17402_v48  ;;  %v17449_v18 = vld [vmem:[#allocation346_spill] sm:$0xff] }
 0x634   : > { %8464 = vmatprep.subr.bf16.mxu1 %v17403_v19 }
 0x636   : > { %8424 = vmatpush1.bf16.msra.mxu0 %v17404_v11  ;;  %v17450_v11 = vld [vmem:[#allocation339_spill] sm:$0xff] }
 0x637   : > { %8465 = vmatpush1.bf16.msra.mxu1 %v17405_v63  ;;  %8425 = vmatprep.subr.bf16.mxu0 %v17406_v50  ;;  %v17451_v63 = vld [vmem:[#allocation340_spill] sm:$0xff]  ;;  %v17452_v50 = vld [vmem:[#allocation341_spill] sm:$0xff] }
 0x638   : > { %8466 = vmatprep.subr.bf16.mxu1 %v17407_v37  ;;  %v17453_v37 = vld [vmem:[#allocation342_spill] sm:$0xff] }
 0x63a   : > { %8426 = vmatpush1.bf16.msra.mxu0 %v17408_v22  ;;  %v17454_v22 = vld [vmem:[#allocation335_spill] sm:$0xff] }
 0x63b   : > { %8467 = vmatpush1.bf16.msra.mxu1 %v17409_v1  ;;  %8427 = vmatprep.subr.bf16.mxu0 %v17410_v49  ;;  %v17455_v1 = vld [vmem:[#allocation336_spill] sm:$0xff]  ;;  %v17456_v49 = vld [vmem:[#allocation337_spill] sm:$0xff] }
 0x63c   : > { %8468 = vmatprep.subr.bf16.mxu1 %v17411_v5  ;;  %v17457_v5 = vld [vmem:[#allocation338_spill] sm:$0xff] }
 0x63e   : > { %8428 = vmatpush2.bf16.msra.mxu0 %v17412_v46  ;;  %v17458_v46 = vld [vmem:[#allocation331_spill] sm:$0xff] }
 0x63f   : > { %8469 = vmatpush2.bf16.msra.mxu1 %v17413_v25  ;;  %8429 = vmatprep.subr.bf16.mxu0 %v17414_v45  ;;  %v17459_v25 = vld [vmem:[#allocation332_spill] sm:$0xff]  ;;  %v17460_v45 = vld [vmem:[#allocation333_spill] sm:$0xff] }
 0x640   : > { %8470 = vmatprep.subr.bf16.mxu1 %v17415_v31  ;;  %v17461_v31 = vld [vmem:[#allocation334_spill] sm:$0xff] }
 0x642   : > { %8430 = vmatpush2.bf16.msra.mxu0 %v17416_v47  ;;  %v17462_v47 = vld [vmem:[#allocation327_spill] sm:$0xff] }
 0x643   : > { %8471 = vmatpush2.bf16.msra.mxu1 %v17417_v20  ;;  %8431 = vmatprep.subr.bf16.mxu0 %v17418_v29  ;;  %v17463_v20 = vld [vmem:[#allocation328_spill] sm:$0xff]  ;;  %v17464_v29 = vld [vmem:[#allocation329_spill] sm:$0xff] }
 0x644   : > { %8472 = vmatprep.subr.bf16.mxu1 %v17419_v36  ;;  %v17465_v36 = vld [vmem:[#allocation330_spill] sm:$0xff] }
 0x646   : > { %8432 = vmatpush2.bf16.msra.mxu0 %v17420_v17  ;;  %v17466_v17 = vld [vmem:[#allocation323_spill] sm:$0xff] }
 0x647   : > { %8473 = vmatpush2.bf16.msra.mxu1 %v17421_v2  ;;  %8433 = vmatprep.subr.bf16.mxu0 %v17422_v35  ;;  %v17467_v2 = vld [vmem:[#allocation324_spill] sm:$0xff]  ;;  %v17468_v35 = vld [vmem:[#allocation325_spill] sm:$0xff] }
 0x648   : > { %8474 = vmatprep.subr.bf16.mxu1 %v17423_v54  ;;  %v17469_v54 = vld [vmem:[#allocation326_spill] sm:$0xff] }
 0x64a   : > { %8434 = vmatpush2.bf16.msra.mxu0 %v17424_v14  ;;  %v17470_v14 = vld [vmem:[#allocation319_spill] sm:$0xff] }
 0x64b   : > { %8475 = vmatpush2.bf16.msra.mxu1 %v17425_v27  ;;  %8435 = vmatprep.subr.bf16.mxu0 %v17426_v21  ;;  %v17471_v27 = vld [vmem:[#allocation320_spill] sm:$0xff]  ;;  %v17472_v21 = vld [vmem:[#allocation321_spill] sm:$0xff] }
 0x64c   : > { %8476 = vmatprep.subr.bf16.mxu1 %v17427_v13  ;;  %v17473_v13 = vld [vmem:[#allocation322_spill] sm:$0xff] }
 0x64e   : > { %8436 = vmatpush2.bf16.msra.mxu0 %v17428_v41  ;;  %v17474_v41 = vld [vmem:[#allocation379_spill] sm:$0xff] }
 0x64f   : > { %8477 = vmatpush2.bf16.msra.mxu1 %v17429_v15  ;;  %8437 = vmatprep.subr.bf16.mxu0 %v17430_v57  ;;  %v17475_v15 = vld [vmem:[#allocation380_spill] sm:$0xff]  ;;  %v17476_v57 = vld [vmem:[#allocation381_spill] sm:$0xff] }
 0x650   : > { %8478 = vmatprep.subr.bf16.mxu1 %v17431_v53  ;;  %v17477_v53 = vld [vmem:[#allocation382_spill] sm:$0xff] }
 0x652   : > { %8438 = vmatpush2.bf16.msra.mxu0 %v17432_v26  ;;  %v17478_v26 = vld [vmem:[#allocation375_spill] sm:$0xff] }
 0x653   : > { %8479 = vmatpush2.bf16.msra.mxu1 %v17433_v39  ;;  %8439 = vmatprep.subr.bf16.mxu0 %v17434_v55  ;;  %v17479_v39 = vld [vmem:[#allocation376_spill] sm:$0xff]  ;;  %v17480_v55 = vld [vmem:[#allocation377_spill] sm:$0xff] }
 0x654   : > { %8480 = vmatprep.subr.bf16.mxu1 %v17435_v28  ;;  %v17481_v28 = vld [vmem:[#allocation378_spill] sm:$0xff] }
 0x656   : > { %8440 = vmatpush2.bf16.msra.mxu0 %v17436_v30  ;;  %v17482_v30 = vld [vmem:[#allocation371_spill] sm:$0xff] }
 0x657   : > { %8481 = vmatpush2.bf16.msra.mxu1 %v17437_v34  ;;  %8441 = vmatprep.subr.bf16.mxu0 %v17438_v44  ;;  %v17483_v34 = vld [vmem:[#allocation372_spill] sm:$0xff]  ;;  %v17484_v44 = vld [vmem:[#allocation373_spill] sm:$0xff] }
 0x658   : > { %8482 = vmatprep.subr.bf16.mxu1 %v17439_v38  ;;  %v17485_v38 = vld [vmem:[#allocation374_spill] sm:$0xff] }
 0x65a   : > { %8442 = vmatpush2.bf16.msra.mxu0 %v17440_v10  ;;  %v17486_v10 = vld [vmem:[#allocation367_spill] sm:$0xff] }
 0x65b   : > { %8483 = vmatpush2.bf16.msra.mxu1 %v17441_v23  ;;  %8493 = vmatprep.subr.bf16.mxu0 %v17442_v58  ;;  %v17487_v23 = vld [vmem:[#allocation368_spill] sm:$0xff]  ;;  %v17488_v58 = vld [vmem:[#allocation369_spill] sm:$0xff] }
 0x65c   : > { %8534 = vmatprep.subr.bf16.mxu1 %v17443_v42  ;;  %v17489_v42 = vld [vmem:[#allocation370_spill] sm:$0xff] }
 0x65d   : > { %v8199_v43 = vpop.f32.mrf.mxu0  ;;  %v8240_v40 = vpop.f32.mrf.mxu1  ;;  %8444 = vmatmul.mubr.bf16.vlgmr.msra.gmra.mxu0 %v15586_v62 }
 0x65e   : > { %8485 = vmatmul.mubr.bf16.vlgmr.msra.gmra.mxu1 %v15586_v62  ;;  %8494 = vmatpush1.bf16.msra.mxu0 %v17444_v59  ;;  %8807 = vst [vmem:[%s15802_s5 + $0x20] sm:$0xff] %v8199_v43  ;;  %8809 = vst [vmem:[%s15802_s5 + $0x30] sm:$0xff] %v8240_v40  ;;  %v17490_v43 = vld [vmem:[#allocation363_spill] sm:$0xff]  ;;  %v17491_v40 = vld [vmem:[#allocation364_spill] sm:$0xff] }
 0x65f   : > { %8525 = vmatprep.mubr.bf16.mxu0 %v15588_v51  ;;  %8535 = vmatpush1.bf16.msra.mxu1 %v17445_v60  ;;  %v8201_v9 = vpop.f32.mrf.mxu0  ;;  %v8242_v52 = vpop.f32.mrf.mxu1  ;;  %v17492_v59 = vld [vmem:[#allocation365_spill] sm:$0xff]  ;;  %v17493_v60 = vld [vmem:[#allocation366_spill] sm:$0xff] }
 0x660   : > { %8566 = vmatprep.mubr.bf16.mxu1 %v15588_v51  ;;  %8495 = vmatprep.subr.bf16.mxu0 %v17446_v7  ;;  %8808 = vst [vmem:[%s15802_s5 + $0x28] sm:$0xff] %v8201_v9  ;;  %8810 = vst [vmem:[%s15802_s5 + $0x38] sm:$0xff] %v8242_v52  ;;  %v17494_v9 = vld [vmem:[#allocation359_spill] sm:$0xff]  ;;  %v17495_v52 = vld [vmem:[#allocation360_spill] sm:$0xff] }
 0x661   : > { %v8203_v4 = vpop.f32.mrf.mxu0  ;;  %v8244_v6 = vpop.f32.mrf.mxu1  ;;  %8536 = vmatprep.subr.bf16.mxu1 %v17447_v32  ;;  %v17496_v7 = vld [vmem:[#allocation361_spill] sm:$0xff]  ;;  %v17499_v32 = vld [vmem:[#allocation356_spill] sm:$0xff] }
 0x662   : > { %8496 = vmatpush1.bf16.msra.mxu0 %v17448_v8  ;;  %v17497_v4 = vld [vmem:[#allocation362_spill] sm:$0xff]  ;;  %v17498_v6 = vld [vmem:[#allocation355_spill] sm:$0xff]  ;;  %v17500_v8 = vld [vmem:[#allocation357_spill] sm:$0xff] }
 0x663   : > { %8537 = vmatpush1.bf16.msra.mxu1 %v17449_v18  ;;  %v8204_v48 = vpop.f32.mrf.mxu0  ;;  %v8245_v19 = vpop.f32.mrf.mxu1  ;;  %8497 = vmatprep.subr.bf16.mxu0 %v17450_v11  ;;  %v17501_v18 = vld [vmem:[#allocation358_spill] sm:$0xff]  ;;  %v17504_v11 = vld [vmem:[#allocation353_spill] sm:$0xff] }
 0x664   : > { %8538 = vmatprep.subr.bf16.mxu1 %v17451_v63  ;;  %v17502_v48 = vld [vmem:[#allocation351_spill] sm:$0xff]  ;;  %v17503_v19 = vld [vmem:[#allocation352_spill] sm:$0xff]  ;;  %v17505_v63 = vld [vmem:[#allocation354_spill] sm:$0xff] }
 0x666   : > { %8498 = vmatpush1.bf16.msra.mxu0 %v17452_v50 }
 0x667   : > { %8539 = vmatpush1.bf16.msra.mxu1 %v17453_v37  ;;  %8499 = vmatprep.subr.bf16.mxu0 %v17454_v22 }
 0x668   : > { %8540 = vmatprep.subr.bf16.mxu1 %v17455_v1  ;;  %v17506_v1 = vld [vmem:[#allocation407_spill] sm:$0xff] }
 0x66a   : > { %8500 = vmatpush1.bf16.msra.mxu0 %v17456_v49 }
 0x66b   : > { %8541 = vmatpush1.bf16.msra.mxu1 %v17457_v5  ;;  %8501 = vmatprep.subr.bf16.mxu0 %v17458_v46  ;;  %v17507_v5 = vld [vmem:[#allocation408_spill] sm:$0xff] }
 0x66c   : > { %8542 = vmatprep.subr.bf16.mxu1 %v17459_v25 }
 0x66e   : > { %8502 = vmatpush1.bf16.msra.mxu0 %v17460_v45  ;;  %v17510_v45 = vld [vmem:[#allocation404_spill] sm:$0xff] }
 0x66f   : > { %8543 = vmatpush1.bf16.msra.mxu1 %v17461_v31  ;;  %8503 = vmatprep.subr.bf16.mxu0 %v17462_v47  ;;  %v17511_v31 = vld [vmem:[#allocation405_spill] sm:$0xff]  ;;  %v17513_v47 = vld [vmem:[#allocation399_spill] sm:$0xff] }
 0x670   : > { %8544 = vmatprep.subr.bf16.mxu1 %v17463_v20  ;;  %v17514_v20 = vld [vmem:[#allocation400_spill] sm:$0xff] }
 0x672   : > { %8504 = vmatpush1.bf16.msra.mxu0 %v17464_v29  ;;  %v17515_v29 = vld [vmem:[#allocation401_spill] sm:$0xff] }
 0x673   : > { %8545 = vmatpush1.bf16.msra.mxu1 %v17465_v36  ;;  %8505 = vmatprep.subr.bf16.mxu0 %v17466_v17  ;;  %v17516_v36 = vld [vmem:[#allocation402_spill] sm:$0xff]  ;;  %v17517_v17 = vld [vmem:[#allocation395_spill] sm:$0xff] }
 0x674   : > { %8546 = vmatprep.subr.bf16.mxu1 %v17467_v2  ;;  %v17518_v2 = vld [vmem:[#allocation396_spill] sm:$0xff] }
 0x676   : > { %8506 = vmatpush1.bf16.msra.mxu0 %v17468_v35  ;;  %v17519_v35 = vld [vmem:[#allocation397_spill] sm:$0xff] }
 0x677   : > { %8547 = vmatpush1.bf16.msra.mxu1 %v17469_v54  ;;  %8507 = vmatprep.subr.bf16.mxu0 %v17470_v14  ;;  %v17520_v54 = vld [vmem:[#allocation398_spill] sm:$0xff]  ;;  %v17521_v14 = vld [vmem:[#allocation391_spill] sm:$0xff] }
 0x678   : > { %8548 = vmatprep.subr.bf16.mxu1 %v17471_v27  ;;  %v17522_v27 = vld [vmem:[#allocation392_spill] sm:$0xff] }
 0x67a   : > { %8508 = vmatpush1.bf16.msra.mxu0 %v17472_v21  ;;  %v17523_v21 = vld [vmem:[#allocation393_spill] sm:$0xff] }
 0x67b   : > { %8549 = vmatpush1.bf16.msra.mxu1 %v17473_v13  ;;  %8509 = vmatprep.subr.bf16.mxu0 %v17474_v41  ;;  %v17524_v13 = vld [vmem:[#allocation394_spill] sm:$0xff]  ;;  %v17525_v41 = vld [vmem:[#allocation387_spill] sm:$0xff] }
 0x67c   : > { %8550 = vmatprep.subr.bf16.mxu1 %v17475_v15  ;;  %v17526_v15 = vld [vmem:[#allocation388_spill] sm:$0xff] }
 0x67e   : > { %8510 = vmatpush2.bf16.msra.mxu0 %v17476_v57  ;;  %v17527_v57 = vld [vmem:[#allocation389_spill] sm:$0xff] }
 0x67f   : > { %8551 = vmatpush2.bf16.msra.mxu1 %v17477_v53  ;;  %8511 = vmatprep.subr.bf16.mxu0 %v17478_v26  ;;  %v17528_v53 = vld [vmem:[#allocation390_spill] sm:$0xff]  ;;  %v17529_v26 = vld [vmem:[#allocation383_spill] sm:$0xff] }
 0x680   : > { %8552 = vmatprep.subr.bf16.mxu1 %v17479_v39  ;;  %v17530_v39 = vld [vmem:[#allocation384_spill] sm:$0xff] }
 0x682   : > { %8512 = vmatpush2.bf16.msra.mxu0 %v17480_v55  ;;  %v17531_v55 = vld [vmem:[#allocation385_spill] sm:$0xff] }
 0x683   : > { %8553 = vmatpush2.bf16.msra.mxu1 %v17481_v28  ;;  %8513 = vmatprep.subr.bf16.mxu0 %v17482_v30  ;;  %v17532_v28 = vld [vmem:[#allocation386_spill] sm:$0xff] }
 0x684   : > { %8554 = vmatprep.subr.bf16.mxu1 %v17483_v34  ;;  %v17533_v30 = vld [vmem:[#allocation438_spill] sm:$0xff]  ;;  %v17534_v34 = vld [vmem:[#allocation439_spill] sm:$0xff] }
 0x686   : > { %8514 = vmatpush2.bf16.msra.mxu0 %v17484_v44  ;;  %v17535_v44 = vld [vmem:[#allocation440_spill] sm:$0xff] }
 0x687   : > { %8555 = vmatpush2.bf16.msra.mxu1 %v17485_v38  ;;  %8515 = vmatprep.subr.bf16.mxu0 %v17486_v10  ;;  %v17536_v38 = vld [vmem:[#allocation441_spill] sm:$0xff]  ;;  %v17537_v10 = vld [vmem:[#allocation434_spill] sm:$0xff] }
 0x688   : > { %8556 = vmatprep.subr.bf16.mxu1 %v17487_v23  ;;  %v17538_v23 = vld [vmem:[#allocation435_spill] sm:$0xff] }
 0x68a   : > { %8516 = vmatpush2.bf16.msra.mxu0 %v17488_v58  ;;  %v17539_v58 = vld [vmem:[#allocation436_spill] sm:$0xff] }
 0x68b   : > { %8557 = vmatpush2.bf16.msra.mxu1 %v17489_v42  ;;  %8517 = vmatprep.subr.bf16.mxu0 %v17490_v43  ;;  %v17540_v42 = vld [vmem:[#allocation437_spill] sm:$0xff]  ;;  %v17541_v43 = vld [vmem:[#allocation430_spill] sm:$0xff] }
 0x68c   : > { %8558 = vmatprep.subr.bf16.mxu1 %v17491_v40  ;;  %v17542_v40 = vld [vmem:[#allocation431_spill] sm:$0xff] }
 0x68e   : > { %8518 = vmatpush2.bf16.msra.mxu0 %v17492_v59  ;;  %v17543_v59 = vld [vmem:[#allocation432_spill] sm:$0xff] }
 0x68f   : > { %8559 = vmatpush2.bf16.msra.mxu1 %v17493_v60  ;;  %8519 = vmatprep.subr.bf16.mxu0 %v17494_v9  ;;  %v17544_v60 = vld [vmem:[#allocation433_spill] sm:$0xff]  ;;  %v17545_v9 = vld [vmem:[#allocation426_spill] sm:$0xff] }
 0x690   : > { %8560 = vmatprep.subr.bf16.mxu1 %v17495_v52  ;;  %v17546_v52 = vld [vmem:[#allocation427_spill] sm:$0xff] }
 0x692   : > { %8520 = vmatpush2.bf16.msra.mxu0 %v17496_v7  ;;  %v17547_v7 = vld [vmem:[#allocation428_spill] sm:$0xff] }
 0x693   : > { %8561 = vmatpush2.bf16.msra.mxu1 %v17497_v4  ;;  %8521 = vmatprep.subr.bf16.mxu0 %v17498_v6  ;;  %v17548_v4 = vld [vmem:[#allocation429_spill] sm:$0xff]  ;;  %v17549_v6 = vld [vmem:[#allocation422_spill] sm:$0xff] }
 0x694   : > { %8562 = vmatprep.subr.bf16.mxu1 %v17499_v32  ;;  %v17550_v32 = vld [vmem:[#allocation423_spill] sm:$0xff] }
 0x696   : > { %8522 = vmatpush2.bf16.msra.mxu0 %v17500_v8  ;;  %v17551_v8 = vld [vmem:[#allocation424_spill] sm:$0xff] }
 0x697   : > { %8563 = vmatpush2.bf16.msra.mxu1 %v17501_v18  ;;  %8523 = vmatprep.subr.bf16.mxu0 %v17502_v48  ;;  %v17552_v18 = vld [vmem:[#allocation425_spill] sm:$0xff]  ;;  %v17553_v48 = vld [vmem:[#allocation418_spill] sm:$0xff] }
 0x698   : > { %8564 = vmatprep.subr.bf16.mxu1 %v17503_v19  ;;  %v17554_v19 = vld [vmem:[#allocation419_spill] sm:$0xff] }
 0x69a   : > { %8524 = vmatpush2.bf16.msra.mxu0 %v17504_v11  ;;  %v17555_v11 = vld [vmem:[#allocation420_spill] sm:$0xff] }
 0x69b   : > { %8565 = vmatpush2.bf16.msra.mxu1 %v17505_v63  ;;  %8575 = vmatprep.subr.bf16.mxu0 %v14845_v0  ;;  %v17556_v63 = vld [vmem:[#allocation421_spill] sm:$0xff] }
 0x69c   : > { %8616 = vmatprep.subr.bf16.mxu1 %v14847_v16 }
 0x69d   : > { %v8281_v50 = vpop.f32.mrf.mxu0  ;;  %8526 = vmatmul.mubr.bf16.vlgmr.msra.gmra.mxu0 %v15586_v62 }
 0x69e   : > { %v8322_v37 = vpop.f32.mrf.mxu1  ;;  %8567 = vmatmul.mubr.bf16.vlgmr.msra.gmra.mxu1 %v15586_v62  ;;  %8576 = vmatpush1.bf16.msra.mxu0 %v14862_v56  ;;  %8811 = vst [vmem:[%s15802_s5 + $0x40] sm:$0xff] %v8281_v50  ;;  %v17508_v56 = vld [vmem:[#allocation409_spill] sm:$0xff]  ;;  %v17557_v50 = vld [vmem:[#allocation414_spill] sm:$0xff] }
 0x69f   : > { %8607 = vmatprep.mubr.bf16.mxu0 %v15588_v51  ;;  %8617 = vmatpush1.bf16.msra.mxu1 %v14865_v12  ;;  %v8283_v22 = vpop.f32.mrf.mxu0  ;;  %8813 = vst [vmem:[%s15802_s5 + $0x50] sm:$0xff] %v8322_v37  ;;  %v17509_v12 = vld [vmem:[#allocation403_spill] sm:$0xff] }
 0x6a0   : > { %8648 = vmatprep.mubr.bf16.mxu1 %v15588_v51  ;;  %v8324_v0 = vpop.f32.mrf.mxu1  ;;  %8577 = vmatprep.subr.bf16.mxu0 %v14823_v61  ;;  %8812 = vst [vmem:[%s15802_s5 + $0x48] sm:$0xff] %v8283_v22  ;;  %v17512_v61 = vld [vmem:[#allocation406_spill] sm:$0xff]  ;;  %v17558_v37 = vld [vmem:[#allocation415_spill] sm:$0xff]  ;;  %v17559_v22 = vld [vmem:[#allocation416_spill] sm:$0xff] }
 0x6a1   : > { %v8285_v16 = vpop.f32.mrf.mxu0  ;;  %8618 = vmatprep.subr.bf16.mxu1 %v17506_v1  ;;  %8814 = vst [vmem:[%s15802_s5 + $0x58] sm:$0xff] %v8324_v0  ;;  %v17560_v0 = vld [vmem:[#allocation417_spill] sm:$0xff]  ;;  %v17562_v1 = vld [vmem:[#allocation411_spill] sm:$0xff] }
 0x6a2   : > { %v8326_v49 = vpop.f32.mrf.mxu1  ;;  %8578 = vmatpush1.bf16.msra.mxu0 %v17507_v5  ;;  %v17561_v16 = vld [vmem:[#allocation410_spill] sm:$0xff]  ;;  %v17564_v5 = vld [vmem:[#allocation413_spill] sm:$0xff] }
 0x6a3   : > { %8619 = vmatpush1.bf16.msra.mxu1 %v17508_v56  ;;  %v8286_v46 = vpop.f32.mrf.mxu0  ;;  %8579 = vmatprep.subr.bf16.mxu0 %v17509_v12  ;;  %v17563_v49 = vld [vmem:[#allocation412_spill] sm:$0xff]  ;;  %v17565_v12 = vld [vmem:[#allocation9_spill] sm:$0xff] }
 0x6a4   : > { %v8327_v25 = vpop.f32.mrf.mxu1  ;;  %8620 = vmatprep.subr.bf16.mxu1 %v17510_v45 }
 0x6a6   : > { %8580 = vmatpush1.bf16.msra.mxu0 %v17511_v31  ;;  %v17567_v31 = vld [vmem:[#allocation14_spill] sm:$0xff] }
 0x6a7   : > { %8621 = vmatpush1.bf16.msra.mxu1 %v17512_v61  ;;  %8581 = vmatprep.subr.bf16.mxu0 %v17513_v47  ;;  %v17568_v47 = vld [vmem:[#allocation15_spill] sm:$0xff] }
 0x6a8   : > { %8622 = vmatprep.subr.bf16.mxu1 %v17514_v20 }
 0x6aa   : > { %8582 = vmatpush1.bf16.msra.mxu0 %v17515_v29  ;;  %v17570_v29 = vld [vmem:[#allocation17_spill] sm:$0xff] }
 0x6ab   : > { %8623 = vmatpush1.bf16.msra.mxu1 %v17516_v36  ;;  %8583 = vmatprep.subr.bf16.mxu0 %v17517_v17  ;;  %v17571_v17 = vld [vmem:[#allocation18_spill] sm:$0xff] }
 0x6ac   : > { %8624 = vmatprep.subr.bf16.mxu1 %v17518_v2  ;;  %v17573_v2 = vld [vmem:[#allocation20_spill] sm:$0xff] }
 0x6ae   : > { %8584 = vmatpush1.bf16.msra.mxu0 %v17519_v35  ;;  %v17574_v35 = vld [vmem:[#allocation21_spill] sm:$0xff] }
 0x6af   : > { %8625 = vmatpush1.bf16.msra.mxu1 %v17520_v54  ;;  %8585 = vmatprep.subr.bf16.mxu0 %v17521_v14  ;;  %v17575_v54 = vld [vmem:[#allocation22_spill] sm:$0xff]  ;;  %v17576_v14 = vld [vmem:[#allocation23_spill] sm:$0xff] }
 0x6b0   : > { %8626 = vmatprep.subr.bf16.mxu1 %v17522_v27  ;;  %v17577_v27 = vld [vmem:[#allocation24_spill] sm:$0xff] }
 0x6b2   : > { %8586 = vmatpush1.bf16.msra.mxu0 %v17523_v21  ;;  %v17578_v21 = vld [vmem:[#allocation25_spill] sm:$0xff] }
 0x6b3   : > { %8627 = vmatpush1.bf16.msra.mxu1 %v17524_v13  ;;  %8587 = vmatprep.subr.bf16.mxu0 %v17525_v41  ;;  %v17579_v13 = vld [vmem:[#allocation26_spill] sm:$0xff]  ;;  %v17580_v41 = vld [vmem:[#allocation27_spill] sm:$0xff] }
 0x6b4   : > { %8628 = vmatprep.subr.bf16.mxu1 %v17526_v15  ;;  %v17581_v15 = vld [vmem:[#allocation28_spill] sm:$0xff] }
 0x6b6   : > { %8588 = vmatpush1.bf16.msra.mxu0 %v17527_v57  ;;  %v17582_v57 = vld [vmem:[#allocation450_spill] sm:$0xff] }
 0x6b7   : > { %8629 = vmatpush1.bf16.msra.mxu1 %v17528_v53  ;;  %8589 = vmatprep.subr.bf16.mxu0 %v17529_v26  ;;  %v17583_v53 = vld [vmem:[#allocation451_spill] sm:$0xff]  ;;  %v17584_v26 = vld [vmem:[#allocation29_spill] sm:$0xff] }
 0x6b8   : > { %8630 = vmatprep.subr.bf16.mxu1 %v17530_v39  ;;  %v17585_v39 = vld [vmem:[#allocation30_spill] sm:$0xff] }
 0x6ba   : > { %8590 = vmatpush1.bf16.msra.mxu0 %v17531_v55  ;;  %v17586_v55 = vld [vmem:[#allocation446_spill] sm:$0xff] }
 0x6bb   : > { %8631 = vmatpush1.bf16.msra.mxu1 %v17532_v28  ;;  %8591 = vmatprep.subr.bf16.mxu0 %v17533_v30  ;;  %v17587_v28 = vld [vmem:[#allocation447_spill] sm:$0xff]  ;;  %v17588_v30 = vld [vmem:[#allocation448_spill] sm:$0xff] }
 0x6bc   : > { %8632 = vmatprep.subr.bf16.mxu1 %v17534_v34  ;;  %v17589_v34 = vld [vmem:[#allocation449_spill] sm:$0xff] }
 0x6be   : > { %8592 = vmatpush2.bf16.msra.mxu0 %v17535_v44  ;;  %v17590_v44 = vld [vmem:[#allocation442_spill] sm:$0xff] }
 0x6bf   : > { %8633 = vmatpush2.bf16.msra.mxu1 %v17536_v38  ;;  %8593 = vmatprep.subr.bf16.mxu0 %v17537_v10  ;;  %v17591_v38 = vld [vmem:[#allocation443_spill] sm:$0xff]  ;;  %v17592_v10 = vld [vmem:[#allocation444_spill] sm:$0xff] }
 0x6c0   : > { %8634 = vmatprep.subr.bf16.mxu1 %v17538_v23  ;;  %v17593_v23 = vld [vmem:[#allocation445_spill] sm:$0xff] }
 0x6c2   : > { %8594 = vmatpush2.bf16.msra.mxu0 %v17539_v58  ;;  %v17594_v58 = vld [vmem:[#allocation40_spill] sm:$0xff] }
 0x6c3   : > { %8635 = vmatpush2.bf16.msra.mxu1 %v17540_v42  ;;  %8595 = vmatprep.subr.bf16.mxu0 %v17541_v43  ;;  %v17595_v42 = vld [vmem:[#allocation41_spill] sm:$0xff]  ;;  %v17596_v43 = vld [vmem:[#allocation42_spill] sm:$0xff] }
 0x6c4   : > { %8636 = vmatprep.subr.bf16.mxu1 %v17542_v40  ;;  %v17597_v40 = vld [vmem:[#allocation35_spill] sm:$0xff] }
 0x6c6   : > { %8596 = vmatpush2.bf16.msra.mxu0 %v17543_v59  ;;  %v17598_v59 = vld [vmem:[#allocation44_spill] sm:$0xff] }
 0x6c7   : > { %8637 = vmatpush2.bf16.msra.mxu1 %v17544_v60  ;;  %8597 = vmatprep.subr.bf16.mxu0 %v17545_v9  ;;  %v17599_v60 = vld [vmem:[#allocation45_spill] sm:$0xff]  ;;  %v17600_v9 = vld [vmem:[#allocation46_spill] sm:$0xff] }
 0x6c8   : > { %8638 = vmatprep.subr.bf16.mxu1 %v17546_v52  ;;  %v17601_v52 = vld [vmem:[#allocation39_spill] sm:$0xff] }
 0x6ca   : > { %8598 = vmatpush2.bf16.msra.mxu0 %v17547_v7  ;;  %v17602_v7 = vld [vmem:[#allocation48_spill] sm:$0xff] }
 0x6cb   : > { %8639 = vmatpush2.bf16.msra.mxu1 %v17548_v4  ;;  %8599 = vmatprep.subr.bf16.mxu0 %v17549_v6  ;;  %v17603_v4 = vld [vmem:[#allocation49_spill] sm:$0xff]  ;;  %v17604_v6 = vld [vmem:[#allocation50_spill] sm:$0xff] }
 0x6cc   : > { %8640 = vmatprep.subr.bf16.mxu1 %v17550_v32  ;;  %v17605_v32 = vld [vmem:[#allocation43_spill] sm:$0xff] }
 0x6ce   : > { %8600 = vmatpush2.bf16.msra.mxu0 %v17551_v8  ;;  %v17606_v8 = vld [vmem:[#allocation52_spill] sm:$0xff] }
 0x6cf   : > { %8641 = vmatpush2.bf16.msra.mxu1 %v17552_v18  ;;  %8601 = vmatprep.subr.bf16.mxu0 %v17553_v48  ;;  %v17607_v18 = vld [vmem:[#allocation53_spill] sm:$0xff]  ;;  %v17608_v48 = vld [vmem:[#allocation54_spill] sm:$0xff] }
 0x6d0   : > { %8642 = vmatprep.subr.bf16.mxu1 %v17554_v19  ;;  %v17609_v19 = vld [vmem:[#allocation47_spill] sm:$0xff] }
 0x6d2   : > { %8602 = vmatpush2.bf16.msra.mxu0 %v17555_v11  ;;  %v17610_v11 = vld [vmem:[#allocation56_spill] sm:$0xff] }
 0x6d3   : > { %8643 = vmatpush2.bf16.msra.mxu1 %v17556_v63  ;;  %8603 = vmatprep.subr.bf16.mxu0 %v17557_v50  ;;  %v17611_v63 = vld [vmem:[#allocation57_spill] sm:$0xff]  ;;  %v17612_v50 = vld [vmem:[#allocation58_spill] sm:$0xff] }
 0x6d4   : > { %8644 = vmatprep.subr.bf16.mxu1 %v17558_v37  ;;  %v17613_v37 = vld [vmem:[#allocation51_spill] sm:$0xff] }
 0x6d6   : > { %8604 = vmatpush2.bf16.msra.mxu0 %v17559_v22  ;;  %v17614_v22 = vld [vmem:[#allocation60_spill] sm:$0xff] }
 0x6d7   : > { %8645 = vmatpush2.bf16.msra.mxu1 %v17560_v0  ;;  %8605 = vmatprep.subr.bf16.mxu0 %v17561_v16  ;;  %v17615_v0 = vld [vmem:[#allocation61_spill] sm:$0xff]  ;;  %v17616_v16 = vld [vmem:[#allocation62_spill] sm:$0xff] }
 0x6d8   : > { %8646 = vmatprep.subr.bf16.mxu1 %v17562_v1  ;;  %v17617_v1 = vld [vmem:[#allocation55_spill] sm:$0xff] }
 0x6da   : > { %8606 = vmatpush2.bf16.msra.mxu0 %v17563_v49  ;;  %v17618_v49 = vld [vmem:[#allocation8_spill] sm:$0xff] }
 0x6db   : > { %8647 = vmatpush2.bf16.msra.mxu1 %v17564_v5  ;;  %8657 = vmatprep.subr.bf16.mxu0 %v15241_v24  ;;  %v17619_v5 = vld [vmem:[#allocation5_spill] sm:$0xff] }
 0x6dc   : > { %8698 = vmatprep.subr.bf16.mxu1 %v15243_v33  ;;  %v17566_v33 = vld [vmem:[#allocation13_spill] sm:$0xff] }
 0x6dd   : > { %v8363_v56 = vpop.f32.mrf.mxu0  ;;  %8608 = vmatmul.mubr.bf16.vlgmr.msra.gmra.mxu0 %v15586_v62 }
 0x6de   : > { %v8404_v46 = vpop.f32.mrf.mxu1  ;;  %8649 = vmatmul.mubr.bf16.vlgmr.msra.gmra.mxu1 %v15586_v62  ;;  %8658 = vmatpush1.bf16.msra.mxu0 %v15265_v3  ;;  %8815 = vst [vmem:[%s15802_s5 + $0x60] sm:$0xff] %v8363_v56  ;;  %v17569_v3 = vld [vmem:[#allocation16_spill] sm:$0xff]  ;;  %v17620_v56 = vld [vmem:[#allocation7_spill] sm:$0xff] }
 0x6df   : > { %8689 = vmatprep.mubr.bf16.mxu0 %v15588_v51  ;;  %8699 = vmatpush1.bf16.msra.mxu1 %v17565_v12  ;;  %v8365_v25 = vpop.f32.mrf.mxu0  ;;  %8817 = vst [vmem:[%s15802_s5 + $0x70] sm:$0xff] %v8404_v46  ;;  %v17621_v46 = vld [vmem:[#allocation59_spill] sm:$0xff]  ;;  %v17622_v12 = vld [vmem:[#allocation10_spill] sm:$0xff] }
 0x6e0   : > { %8730 = vmatprep.mubr.bf16.mxu1 %v15588_v51  ;;  %v8406_v24 = vpop.f32.mrf.mxu1  ;;  %8659 = vmatprep.subr.bf16.mxu0 %v17566_v33  ;;  %8816 = vst [vmem:[%s15802_s5 + $0x68] sm:$0xff] %v8365_v25  ;;  %v17572_v51 = vld [vmem:[#allocation19_spill] sm:$0xff]  ;;  %v17625_v33 = vld [vmem:[#allocation6_spill] sm:$0xff] }
 0x6e1   : > { %v8367_v45 = vpop.f32.mrf.mxu0  ;;  %8700 = vmatprep.subr.bf16.mxu1 %v17567_v31  ;;  %8818 = vst [vmem:[%s15802_s5 + $0x78] sm:$0xff] %v8406_v24  ;;  %v17623_v25 = vld [vmem:[#allocation11_spill] sm:$0xff]  ;;  %v17624_v24 = vld [vmem:[#allocation12_spill] sm:$0xff] }
 0x6e2   : > { %v8408_v61 = vpop.f32.mrf.mxu1  ;;  %8660 = vmatpush1.bf16.msra.mxu0 %v17568_v47 }
 0x6e3   : > { %8701 = vmatpush1.bf16.msra.mxu1 %v17569_v3  ;;  %v8368_v20 = vpop.f32.mrf.mxu0  ;;  %8661 = vmatprep.subr.bf16.mxu0 %v17570_v29 }
 0x6e4   : > { %v8409_v36 = vpop.f32.mrf.mxu1  ;;  %8702 = vmatprep.subr.bf16.mxu1 %v17571_v17 }
 0x6e6   : > { %8662 = vmatpush1.bf16.msra.mxu0 %v17572_v51 }
 0x6e7   : > { %8703 = vmatpush1.bf16.msra.mxu1 %v17573_v2  ;;  %8663 = vmatprep.subr.bf16.mxu0 %v17574_v35 }
 0x6e8   : > { %8704 = vmatprep.subr.bf16.mxu1 %v17575_v54 }
 0x6ea   : > { %8664 = vmatpush1.bf16.msra.mxu0 %v17576_v14 }
 0x6eb   : > { %8705 = vmatpush1.bf16.msra.mxu1 %v17577_v27  ;;  %8665 = vmatprep.subr.bf16.mxu0 %v17578_v21 }
 0x6ec   : > { %8706 = vmatprep.subr.bf16.mxu1 %v17579_v13 }
 0x6ee   : > { %8666 = vmatpush1.bf16.msra.mxu0 %v17580_v41 }
 0x6ef   : > { %8707 = vmatpush1.bf16.msra.mxu1 %v17581_v15  ;;  %8667 = vmatprep.subr.bf16.mxu0 %v17582_v57 }
 0x6f0   : > { %8708 = vmatprep.subr.bf16.mxu1 %v17583_v53 }
 0x6f2   : > { %8668 = vmatpush1.bf16.msra.mxu0 %v17584_v26 }
 0x6f3   : > { %8709 = vmatpush1.bf16.msra.mxu1 %v17585_v39  ;;  %8669 = vmatprep.subr.bf16.mxu0 %v17586_v55 }
 0x6f4   : > { %8710 = vmatprep.subr.bf16.mxu1 %v17587_v28 }
 0x6f6   : > { %8670 = vmatpush1.bf16.msra.mxu0 %v17588_v30 }
 0x6f7   : > { %8711 = vmatpush1.bf16.msra.mxu1 %v17589_v34  ;;  %8671 = vmatprep.subr.bf16.mxu0 %v17590_v44 }
 0x6f8   : > { %8712 = vmatprep.subr.bf16.mxu1 %v17591_v38 }
 0x6fa   : > { %8672 = vmatpush1.bf16.msra.mxu0 %v17592_v10 }
 0x6fb   : > { %8713 = vmatpush1.bf16.msra.mxu1 %v17593_v23  ;;  %8673 = vmatprep.subr.bf16.mxu0 %v17594_v58 }
 0x6fc   : > { %8714 = vmatprep.subr.bf16.mxu1 %v17595_v42 }
 0x6fe   : > { %8674 = vmatpush2.bf16.msra.mxu0 %v17596_v43 }
 0x6ff   : > { %8715 = vmatpush2.bf16.msra.mxu1 %v17597_v40  ;;  %8675 = vmatprep.subr.bf16.mxu0 %v17598_v59 }
 0x700   : > { %8716 = vmatprep.subr.bf16.mxu1 %v17599_v60 }
 0x702   : > { %8676 = vmatpush2.bf16.msra.mxu0 %v17600_v9 }
 0x703   : > { %8717 = vmatpush2.bf16.msra.mxu1 %v17601_v52  ;;  %8677 = vmatprep.subr.bf16.mxu0 %v17602_v7 }
 0x704   : > { %8718 = vmatprep.subr.bf16.mxu1 %v17603_v4 }
 0x706   : > { %8678 = vmatpush2.bf16.msra.mxu0 %v17604_v6 }
 0x707   : > { %8719 = vmatpush2.bf16.msra.mxu1 %v17605_v32  ;;  %8679 = vmatprep.subr.bf16.mxu0 %v17606_v8 }
 0x708   : > { %8720 = vmatprep.subr.bf16.mxu1 %v17607_v18 }
 0x70a   : > { %8680 = vmatpush2.bf16.msra.mxu0 %v17608_v48 }
 0x70b   : > { %8721 = vmatpush2.bf16.msra.mxu1 %v17609_v19  ;;  %8681 = vmatprep.subr.bf16.mxu0 %v17610_v11 }
 0x70c   : > { %8722 = vmatprep.subr.bf16.mxu1 %v17611_v63 }
 0x70e   : > { %8682 = vmatpush2.bf16.msra.mxu0 %v17612_v50 }
 0x70f   : > { %8723 = vmatpush2.bf16.msra.mxu1 %v17613_v37  ;;  %8683 = vmatprep.subr.bf16.mxu0 %v17614_v22 }
 0x710   : > { %8724 = vmatprep.subr.bf16.mxu1 %v17615_v0 }
 0x712   : > { %8684 = vmatpush2.bf16.msra.mxu0 %v17616_v16 }
 0x713   : > { %8725 = vmatpush2.bf16.msra.mxu1 %v17617_v1  ;;  %8685 = vmatprep.subr.bf16.mxu0 %v17618_v49 }
 0x714   : > { %8726 = vmatprep.subr.bf16.mxu1 %v17619_v5 }
 0x716   : > { %8686 = vmatpush2.bf16.msra.mxu0 %v17620_v56 }
 0x717   : > { %8727 = vmatpush2.bf16.msra.mxu1 %v17621_v46  ;;  %8687 = vmatprep.subr.bf16.mxu0 %v17622_v12 }
 0x718   : > { %8728 = vmatprep.subr.bf16.mxu1 %v17623_v25 }
 0x71a   : > { %8688 = vmatpush2.bf16.msra.mxu0 %v17624_v24 }
 0x71b   : > { %8729 = vmatpush2.bf16.msra.mxu1 %v17625_v33 }
 0x71d   : > { %v8445_v45 = vpop.f32.mrf.mxu0  ;;  %8690 = vmatmul.mubr.bf16.vlgmr.msra.gmra.mxu0 %v15586_v62 }
 0x71e   : > { %v8486_v31 = vpop.f32.mrf.mxu1  ;;  %8731 = vmatmul.mubr.bf16.vlgmr.msra.gmra.mxu1 %v15586_v62  ;;  %8819 = vst [vmem:[%s15802_s5 + $0x80] sm:$0xff] %v8445_v45 }
 0x71f   : > { %v8447_v61 = vpop.f32.mrf.mxu0  ;;  %8821 = vst [vmem:[%s15802_s5 + $0x90] sm:$0xff] %v8486_v31 }
 0x720   : > { %v8488_v47 = vpop.f32.mrf.mxu1  ;;  %8820 = vst [vmem:[%s15802_s5 + $0x88] sm:$0xff] %v8447_v61 }
 0x721   : > { %v8449_v3 = vpop.f32.mrf.mxu0  ;;  %8822 = vst [vmem:[%s15802_s5 + $0x98] sm:$0xff] %v8488_v47 }
 0x722   : > { %v8490_v20 = vpop.f32.mrf.mxu1 }
 0x723   : > { %v8450_v29 = vpop.f32.mrf.mxu0 }
 0x724   : > { %v8491_v36 = vpop.f32.mrf.mxu1 }
 0x75d   : > { %v8527_v17 = vpop.f32.mrf.mxu0 }
 0x75e   : > { %v8568_v51 = vpop.f32.mrf.mxu1  ;;  %8823 = vst [vmem:[%s15802_s5 + $0xa0] sm:$0xff] %v8527_v17 }
 0x75f   : > { %v8529_v2 = vpop.f32.mrf.mxu0  ;;  %8825 = vst [vmem:[%s15802_s5 + $0xb0] sm:$0xff] %v8568_v51 }
 0x760   : > { %v8570_v62 = vpop.f32.mrf.mxu1  ;;  %8824 = vst [vmem:[%s15802_s5 + $0xa8] sm:$0xff] %v8529_v2 }
 0x761   : > { %v8531_v35 = vpop.f32.mrf.mxu0  ;;  %8826 = vst [vmem:[%s15802_s5 + $0xb8] sm:$0xff] %v8570_v62 }
 0x762   : > { %v8572_v54 = vpop.f32.mrf.mxu1 }
 0x763   : > { %v8532_v14 = vpop.f32.mrf.mxu0 }
 0x764   : > { %v8573_v27 = vpop.f32.mrf.mxu1 }
 0x79d   : > { %v8609_v21 = vpop.f32.mrf.mxu0 }
 0x79e   : > { %v8650_v13 = vpop.f32.mrf.mxu1  ;;  %8827 = vst [vmem:[%s15802_s5 + $0xc0] sm:$0xff] %v8609_v21 }
 0x79f   : > { %v8611_v41 = vpop.f32.mrf.mxu0  ;;  %8829 = vst [vmem:[%s15802_s5 + $0xd0] sm:$0xff] %v8650_v13 }
 0x7a0   : > { %v8652_v15 = vpop.f32.mrf.mxu1  ;;  %8828 = vst [vmem:[%s15802_s5 + $0xc8] sm:$0xff] %v8611_v41 }
 0x7a1   : > { %v8613_v57 = vpop.f32.mrf.mxu0  ;;  %8830 = vst [vmem:[%s15802_s5 + $0xd8] sm:$0xff] %v8652_v15 }
 0x7a2   : > { %v8654_v53 = vpop.f32.mrf.mxu1 }
 0x7a3   : > { %v8614_v26 = vpop.f32.mrf.mxu0 }
 0x7a4   : > { %v8655_v39 = vpop.f32.mrf.mxu1 }
 0x7dd   : > { %v8691_v55 = vpop.f32.mrf.mxu0 }
 0x7de   : > { %v8732_v28 = vpop.f32.mrf.mxu1  ;;  %8831 = vst [vmem:[%s15802_s5 + $0xe0] sm:$0xff] %v8691_v55 }
 0x7df   : > { %v8693_v30 = vpop.f32.mrf.mxu0  ;;  %8833 = vst [vmem:[%s15802_s5 + $0xf0] sm:$0xff] %v8732_v28 }
 0x7e0   : > { %v8734_v34 = vpop.f32.mrf.mxu1  ;;  %8832 = vst [vmem:[%s15802_s5 + $0xe8] sm:$0xff] %v8693_v30 }
 0x7e1   : > { %v8695_v44 = vpop.f32.mrf.mxu0  ;;  %8834 = vst [vmem:[%s15802_s5 + $0xf8] sm:$0xff] %v8734_v34 }
 0x7e2   : > { %v8736_v38 = vpop.f32.mrf.mxu1 }
 0x7e3   : > { %v8696_v10 = vpop.f32.mrf.mxu0 }
 0x7e4   : > { %v8737_v23 = vpop.f32.mrf.mxu1 }
 0x7e5 PF: > { %s16_s17 = sadd.s32 1, %s11894_s17   ;;  %s17626_s12 = smov %s11878_s13 }
 0x7e6   : > { %p13_p9 = scmp.ge.s32.totalorder %s16_s17, 4   ;;  %s17627_s13 = smov %s11882_s14 }
 0x7e7   : > { %s17628_s14 = smov %s11968_s24  ;;  %s17629_s15 = smov %s11890_s16 }
 0x7e8   : > { %s17630_s16 = smov %s17632_s19  ;;  %15 = sbr.rel (!%p13_p9) target bundleno = 4 (0x4), region = 79 }
 0x7ed   :  { %8856 = vsyncpa [#allocation3], 1 }
 0x7ee   :  { %8858 = vsyncpa [#allocation3 + $0x1], 1 }

</bundles_post_ra>
